<compile_context>
chip_gen: v7x
topology: tpu7x:2x2x1
jax: 0.10.0
libtpu: 0.0.40
codegen_flags: <defaults>
</compile_context>

<pallas_src>
import functools

import jax
import jax.numpy as jnp
from jax import lax
from jax.experimental import pallas as pl
from jax.experimental.pallas import tpu as pltpu


# ----------------------------------------------------------------------------
# Pallas kernel: one full multi-head cross attention per grid step.
#   step 0: (q=text, kv=img, weights=mha_txt)
#   step 1: (q=img,  kv=text, weights=mha_img)
# ----------------------------------------------------------------------------
def fused_cross_mha_kernel(q_ref, kv_ref, wq_ref, wkv_ref, wo_ref,
                           bq_ref, bkv_ref, bo_ref, o_ref, *, num_heads):
    L, E = q_ref.shape
    D = E // num_heads

    # Activations cast to bf16 so every MXU matmul is native bf16 x bf16 with
    # f32 accumulation (weights already stored as bf16 in HBM).
    x_q = q_ref[...].astype(jnp.bfloat16)     # (L, E)
    x_kv = kv_ref[...].astype(jnp.bfloat16)   # (L, E)

    # Full-width projections; every minor dim is a multiple of 128.
    # 1/sqrt(D) is already folded into wq / bq.
    q = jnp.dot(x_q, wq_ref[...], preferred_element_type=jnp.float32) + bq_ref[...]
    kv = jnp.dot(x_kv, wkv_ref[...], preferred_element_type=jnp.float32) + bkv_ref[...]
    k = kv[:, :E]
    v = kv[:, E:]

    q_b = q.astype(jnp.bfloat16)
    k_b = k.astype(jnp.bfloat16)
    v_b = v.astype(jnp.bfloat16)

    # Static per-head loop (num_heads = 8); slices act on tiny (L, E) tensors.
    ctx_heads = []
    for h in range(num_heads):
        sl = slice(h * D, (h + 1) * D)
        s = lax.dot_general(q_b[:, sl], k_b[:, sl], (((1,), (1,)), ((), ())),
                            preferred_element_type=jnp.float32)        # (L, L)
        s = s - jnp.max(s, axis=-1, keepdims=True)
        p = jnp.exp(s)
        p = p / jnp.sum(p, axis=-1, keepdims=True)
        ctx_heads.append(jnp.dot(p.astype(jnp.bfloat16), v_b[:, sl],
                                 preferred_element_type=jnp.float32))  # (L, D)

    ctx = jnp.concatenate(ctx_heads, axis=-1).astype(jnp.bfloat16)     # (L, E)

    # Single full-width output projection + bias.
    out = jnp.dot(ctx, wo_ref[...], preferred_element_type=jnp.float32) + bo_ref[...]
    o_ref[...] = out.astype(o_ref.dtype)


def fused_cross_mha(q_stack, kv_stack, wq, wkv, wo, bq, bkv, bo, *, num_heads):
    n, L, E = q_stack.shape

    def mat_spec(r, c):
        return pl.BlockSpec((None, r, c), lambda i: (i, 0, 0))

    seq_spec = mat_spec(L, E)

    return pl.pallas_call(
        functools.partial(fused_cross_mha_kernel, num_heads=num_heads),
        out_shape=jax.ShapeDtypeStruct((n, L, E), jnp.float32),
        grid=(n,),
        in_specs=[
            seq_spec, seq_spec,                        # q, kv           (n,L,E)   f32
            mat_spec(E, E),                            # Wq              (n,E,E)   bf16
            mat_spec(E, 2 * E),                        # Wkv = [Wk|Wv]   (n,E,2E)  bf16
            mat_spec(E, E),                            # Wo              (n,E,E)   bf16
            mat_spec(1, E),                            # bq (scaled)     (n,1,E)   f32
            mat_spec(1, 2 * E),                        # bkv = [bk|bv]   (n,1,2E)  f32
            mat_spec(1, E),                            # bo              (n,1,E)   f32
        ],
        out_specs=pl.BlockSpec((None, L, E), lambda i: (i, 0, 0)),
        compiler_params=pltpu.CompilerParams(
            dimension_semantics=("parallel",),   # one MHA per TC on v7x; harmless on v5e/v6e
            vmem_limit_bytes=20 * 1024 * 1024),
    )(q_stack, kv_stack, wq, wkv, wo, bq, bkv, bo)


# ----------------------------------------------------------------------------
# One-time, host-side weight repack (parameter-construction time, NOT per call).
# PyTorch layouts in, kernel-ready bf16 matrices out.
# ----------------------------------------------------------------------------
def pack_mha_params(in_w, in_b, out_w, out_b, num_heads, weight_dtype=jnp.bfloat16):
    E = in_w.shape[1]
    D = E // num_heads
    scale = 1.0 / (D ** 0.5)

    # PyTorch in_proj is (3E, E) acting as y = x @ W.T; rows [0:E]=Q, [E:2E]=K, [2E:3E]=V.
    wq = (in_w[:E].T * scale).astype(weight_dtype)                               # (E, E)
    bq = (in_b[:E] * scale).reshape(1, E)                                        # (1, E) f32
    wkv = jnp.concatenate([in_w[E:2 * E].T, in_w[2 * E:].T], axis=1).astype(weight_dtype)  # (E, 2E)
    bkv = jnp.concatenate([in_b[E:2 * E], in_b[2 * E:]]).reshape(1, 2 * E)       # (1, 2E) f32
    wo = out_w.T.astype(weight_dtype)                                            # (E, E)
    bo = out_b.reshape(1, E)                                                     # (1, E) f32
    return wq, wkv, wo, bq, bkv, bo


# ----------------------------------------------------------------------------
# Encoder stand-ins (plain JAX glue, deterministic synthetic parameters).
# ----------------------------------------------------------------------------
def text_encoder_stub(input_ids, attention_mask, embed_table):
    # TODO(synk): pretrained bert-base-multilingual-cased is not reproduced;
    # stand-in is a deterministic embedding lookup + masked mean pool -> (B, 768).
    emb = embed_table[input_ids]                                   # (B, Ltok, E)
    m = attention_mask[..., None].astype(jnp.float32)
    return jnp.sum(emb * m, axis=1) / jnp.maximum(jnp.sum(m, axis=1), 1.0)


def image_encoder_stub(img, w_patch, b_patch):
    # TODO(synk): pretrained timm vit_base_patch16_224 is not reproduced;
    # stand-in flattens the NCHW image and applies one linear projection -> (B, 768).
    B = img.shape[0]
    return img.reshape(B, -1) @ w_patch + b_patch


# ----------------------------------------------------------------------------
# References.
#  * mha_ref_f32: pure-f32 PyTorch nn.MultiheadAttention math (loose check).
#  * mha_ref_bf16: same math with the kernel's bf16 rounding points mirrored
#    exactly (tight check; accounts for bf16 weight streaming).
# ----------------------------------------------------------------------------
def mha_ref_f32(q, kv, in_w, in_b, out_w, out_b, num_heads):
    L, E = q.shape
    D = E // num_heads
    Q = q @ in_w[:E].T + in_b[:E]
    K = kv @ in_w[E:2 * E].T + in_b[E:2 * E]
    V = kv @ in_w[2 * E:].T + in_b[2 * E:]
    Qh = Q.reshape(L, num_heads, D).transpose(1, 0, 2)
    Kh = K.reshape(L, num_heads, D).transpose(1, 0, 2)
    Vh = V.reshape(L, num_heads, D).transpose(1, 0, 2)
    s = jnp.einsum('hqd,hkd->hqk', Qh, Kh) / (D ** 0.5)
    p = jax.nn.softmax(s, axis=-1)
    ctx = jnp.einsum('hqk,hkd->hqd', p, Vh).transpose(1, 0, 2).reshape(L, E)
    return ctx @ out_w.T + out_b


def mha_ref_bf16(q, kv, in_w, in_b, out_w, out_b, num_heads):
    E = q.shape[-1]
    D = E // num_heads
    scale = 1.0 / (D ** 0.5)
    bf = lambda a: a.astype(jnp.bfloat16).astype(jnp.float32)

    wq = bf(in_w[:E].T * scale)
    bq = in_b[:E] * scale
    wk = bf(in_w[E:2 * E].T)
    bk = in_b[E:2 * E]
    wv = bf(in_w[2 * E:].T)
    bv = in_b[2 * E:]
    wo = bf(out_w.T)
    bo = out_b

    xq, xkv = bf(q), bf(kv)
    Q = xq @ wq + bq
    K = xkv @ wk + bk
    V = xkv @ wv + bv
    Qb, Kb, Vb = bf(Q), bf(K), bf(V)

    ctx_heads = []
    for h in range(num_heads):
        sl = slice(h * D, (h + 1) * D)
        s = Qb[:, sl] @ Kb[:, sl].T
        p = jax.nn.softmax(s, axis=-1)
        ctx_heads.append(bf(p) @ Vb[:, sl])
    ctx = bf(jnp.concatenate(ctx_heads, axis=-1))
    return ctx @ wo + bo


# ----------------------------------------------------------------------------
def cross_it_forward(input_ids, attention_mask, img, params):
    H = params["H"]
    text_output = text_encoder_stub(input_ids, attention_mask, params["embed_table"])
    img_output = image_encoder_stub(img, params["w_patch"], params["b_patch"])

    # Both cross-attentions in ONE pallas_call (grid step 0: text<-img, 1: img<-text).
    q_stack = jnp.stack([text_output, img_output])    # (2, L, E)
    kv_stack = jnp.stack([img_output, text_output])   # (2, L, E)
    upd = fused_cross_mha(q_stack, kv_stack, *params["mha_packed"], num_heads=H)

    # In PyTorch, .squeeze(1) on (B, 768) is a no-op; cat along dim=1 -> (B, 1536)
    return jnp.concatenate([upd[0], upd[1]], axis=1), (text_output, img_output)


if __name__ == "__main__":
    B, Ltok, E, H = 8, 8, 768, 8
    VOCAB = 1000

    key = jax.random.PRNGKey(0)
    ks = jax.random.split(key, 12)

    # Inputs (PyTorch conventions: img is NCHW).
    input_ids = jax.random.randint(ks[0], (B, Ltok), 0, VOCAB, dtype=jnp.int32)
    attention_mask = jnp.ones((B, Ltok), jnp.int32)
    img = jax.random.normal(ks[1], (B, 3, 16, 16), jnp.float32)   # 3*16*16 = 768

    # Deterministic synthetic parameters (PyTorch layouts), packed once.
    def make_raw_mha_params(k):
        k0, k1, k2, k3 = jax.random.split(k, 4)
        in_w = jax.random.normal(k0, (3 * E, E), jnp.float32) * 0.02   # (out, in)
        in_b = jax.random.normal(k1, (3 * E,), jnp.float32) * 0.02
        out_w = jax.random.normal(k2, (E, E), jnp.float32) * 0.02
        out_b = jax.random.normal(k3, (E,), jnp.float32) * 0.02
        return in_w, in_b, out_w, out_b

    raw_txt = make_raw_mha_params(ks[5])
    raw_img = make_raw_mha_params(ks[6])

    # One-time repack (f32 -> bf16 weight stream) + stack the two MHA weight
    # sets along a leading axis of 2 (grid step selects the set).
    mha_packed = tuple(
        jnp.stack([a, b]) for a, b in zip(pack_mha_params(*raw_txt, num_heads=H),
                                          pack_mha_params(*raw_img, num_heads=H)))

    params = {
        "E": E, "H": H,
        "embed_table": jax.random.normal(ks[2], (VOCAB, E), jnp.float32) * 0.02,
        "w_patch": jax.random.normal(ks[3], (3 * 16 * 16, E), jnp.float32) * 0.02,
        "b_patch": jax.random.normal(ks[4], (E,), jnp.float32) * 0.02,
        "mha_packed": mha_packed,
    }

    out, (text_output, img_output) = cross_it_forward(input_ids, attention_mask, img, params)
    out = jax.block_until_ready(out)
    assert out.shape == (B, 2 * E), out.shape

    # Tight check: JAX reference that mirrors the kernel's bf16 rounding points.
    ref_bf16 = jnp.concatenate(
        [mha_ref_bf16(text_output, img_output, *raw_txt, num_heads=H),
         mha_ref_bf16(img_output, text_output, *raw_img, num_heads=H)],
        axis=1)
    assert jnp.allclose(out, ref_bf16, atol=2e-4, rtol=2e-4), \
        float(jnp.max(jnp.abs(out - ref_bf16)))

    # Loose check: pure-f32 PyTorch-math reference (bounds the bf16 streaming error).
    ref_f32 = jnp.concatenate(
        [mha_ref_f32(text_output, img_output, *raw_txt, num_heads=H),
         mha_ref_f32(img_output, text_output, *raw_img, num_heads=H)],
        axis=1)
    assert jnp.allclose(out, ref_f32, atol=1e-3, rtol=1e-2), \
        float(jnp.max(jnp.abs(out - ref_f32)))

    print("KERNEL_OK")
</pallas_src>

<mosaic_0001>
module attributes {stable_mosaic.version = 11 : i64} {
  func.func @fused_cross_mha_kernel(%arg0: i32, %arg1: memref<1x8x768xf32, #tpu.memory_space<vmem>>, %arg2: memref<1x8x768xf32, #tpu.memory_space<vmem>>, %arg3: memref<1x768x768xbf16, #tpu.memory_space<vmem>>, %arg4: memref<1x768x1536xbf16, #tpu.memory_space<vmem>>, %arg5: memref<1x768x768xbf16, #tpu.memory_space<vmem>>, %arg6: memref<1x1x768xf32, #tpu.memory_space<vmem>>, %arg7: memref<1x1x1536xf32, #tpu.memory_space<vmem>>, %arg8: memref<1x1x768xf32, #tpu.memory_space<vmem>>, %arg9: memref<1x8x768xf32, #tpu.memory_space<vmem>>) attributes {dimension_semantics = [#tpu.dimension_semantics<parallel>], iteration_bounds = array<i64: 2>, scalar_prefetch = 0 : i64, scratch_operands = 0 : i64, tpu.core_type = #tpu.core_type<tc>, window_params = [{transform_indices = @transform_0, window_bounds = array<i64: 1, 8, 768>}, {transform_indices = @transform_1, window_bounds = array<i64: 1, 8, 768>}, {transform_indices = @transform_2, window_bounds = array<i64: 1, 768, 768>}, {transform_indices = @transform_3, window_bounds = array<i64: 1, 768, 1536>}, {transform_indices = @transform_4, window_bounds = array<i64: 1, 768, 768>}, {transform_indices = @transform_5, window_bounds = array<i64: 1, 1, 768>}, {transform_indices = @transform_6, window_bounds = array<i64: 1, 1, 1536>}, {transform_indices = @transform_7, window_bounds = array<i64: 1, 1, 768>}, {transform_indices = @transform_8, window_bounds = array<i64: 1, 8, 768>}]} {
    %c0 = arith.constant 0 : index
    %c0_0 = arith.constant 0 : index
    %c0_1 = arith.constant 0 : index
    %0 = vector.load %arg1[%c0, %c0_0, %c0_1] : memref<1x8x768xf32, #tpu.memory_space<vmem>>, vector<1x8x768xf32>
    %1 = vector.shape_cast %0 : vector<1x8x768xf32> to vector<8x768xf32>
    %2 = arith.truncf %1 : vector<8x768xf32> to vector<8x768xbf16>
    %c0_2 = arith.constant 0 : index
    %c0_3 = arith.constant 0 : index
    %c0_4 = arith.constant 0 : index
    %3 = vector.load %arg2[%c0_2, %c0_3, %c0_4] : memref<1x8x768xf32, #tpu.memory_space<vmem>>, vector<1x8x768xf32>
    %4 = vector.shape_cast %3 : vector<1x8x768xf32> to vector<8x768xf32>
    %5 = arith.truncf %4 : vector<8x768xf32> to vector<8x768xbf16>
    %c0_5 = arith.constant 0 : index
    %c0_6 = arith.constant 0 : index
    %c0_7 = arith.constant 0 : index
    %6 = vector.load %arg3[%c0_5, %c0_6, %c0_7] : memref<1x768x768xbf16, #tpu.memory_space<vmem>>, vector<1x768x768xbf16>
    %7 = vector.shape_cast %6 : vector<1x768x768xbf16> to vector<768x768xbf16>
    %cst = arith.constant dense<0.000000e+00> : vector<8x768xf32>
    %8 = tpu.matmul %2, %7, %cst {dimension_numbers = #tpu.dot_dimension_numbers<[1], [0], [0], [1], [0, 0, 1, 1], [], []>} : vector<8x768xbf16>, vector<768x768xbf16>, vector<8x768xf32> -> vector<8x768xf32>
    %c0_8 = arith.constant 0 : index
    %c0_9 = arith.constant 0 : index
    %c0_10 = arith.constant 0 : index
    %9 = vector.load %arg6[%c0_8, %c0_9, %c0_10] : memref<1x1x768xf32, #tpu.memory_space<vmem>>, vector<1x1x768xf32>
    %10 = vector.shape_cast %9 : vector<1x1x768xf32> to vector<1x768xf32>
    %11 = vector.broadcast %10 : vector<1x768xf32> to vector<8x768xf32>
    %12 = arith.addf %8, %11 : vector<8x768xf32>
    %c0_11 = arith.constant 0 : index
    %c0_12 = arith.constant 0 : index
    %c0_13 = arith.constant 0 : index
    %13 = vector.load %arg4[%c0_11, %c0_12, %c0_13] : memref<1x768x1536xbf16, #tpu.memory_space<vmem>>, vector<1x768x1536xbf16>
    %14 = vector.shape_cast %13 : vector<1x768x1536xbf16> to vector<768x1536xbf16>
    %cst_14 = arith.constant dense<0.000000e+00> : vector<8x1536xf32>
    %15 = tpu.matmul %5, %14, %cst_14 {dimension_numbers = #tpu.dot_dimension_numbers<[1], [0], [0], [1], [0, 0, 1, 1], [], []>} : vector<8x768xbf16>, vector<768x1536xbf16>, vector<8x1536xf32> -> vector<8x1536xf32>
    %c0_15 = arith.constant 0 : index
    %c0_16 = arith.constant 0 : index
    %c0_17 = arith.constant 0 : index
    %16 = vector.load %arg7[%c0_15, %c0_16, %c0_17] : memref<1x1x1536xf32, #tpu.memory_space<vmem>>, vector<1x1x1536xf32>
    %17 = vector.shape_cast %16 : vector<1x1x1536xf32> to vector<1x1536xf32>
    %18 = vector.broadcast %17 : vector<1x1536xf32> to vector<8x1536xf32>
    %19 = arith.addf %15, %18 : vector<8x1536xf32>
    %20 = vector.extract_strided_slice %19 {offsets = [0, 0], sizes = [8, 768], strides = [1, 1]} : vector<8x1536xf32> to vector<8x768xf32>
    %21 = vector.extract_strided_slice %19 {offsets = [0, 768], sizes = [8, 768], strides = [1, 1]} : vector<8x1536xf32> to vector<8x768xf32>
    %22 = arith.truncf %12 : vector<8x768xf32> to vector<8x768xbf16>
    %23 = arith.truncf %20 : vector<8x768xf32> to vector<8x768xbf16>
    %24 = arith.truncf %21 : vector<8x768xf32> to vector<8x768xbf16>
    %25 = vector.extract_strided_slice %22 {offsets = [0, 0], sizes = [8, 96], strides = [1, 1]} : vector<8x768xbf16> to vector<8x96xbf16>
    %26 = vector.extract_strided_slice %23 {offsets = [0, 0], sizes = [8, 96], strides = [1, 1]} : vector<8x768xbf16> to vector<8x96xbf16>
    %cst_18 = arith.constant dense<0.000000e+00> : vector<8x8xf32>
    %27 = tpu.matmul %25, %26, %cst_18 {dimension_numbers = #tpu.dot_dimension_numbers<[1], [1], [0], [0], [0, 0, 1, 0], [], []>} : vector<8x96xbf16>, vector<8x96xbf16>, vector<8x8xf32> -> vector<8x8xf32>
    %cst_19 = arith.constant dense<0xFF800000> : vector<8xf32>
    %28 = vector.multi_reduction <maximumf>, %27, %cst_19 [1] : vector<8x8xf32> to vector<8xf32>
    %29 = vector.shape_cast %28 : vector<8xf32> to vector<8x1xf32>
    %30 = vector.broadcast %29 : vector<8x1xf32> to vector<8x8xf32>
    %31 = arith.subf %27, %30 : vector<8x8xf32>
    %32 = math.exp %31 : vector<8x8xf32>
    %cst_20 = arith.constant dense<0.000000e+00> : vector<8xf32>
    %33 = vector.multi_reduction <add>, %32, %cst_20 [1] : vector<8x8xf32> to vector<8xf32>
    %34 = vector.shape_cast %33 : vector<8xf32> to vector<8x1xf32>
    %35 = vector.broadcast %34 : vector<8x1xf32> to vector<8x8xf32>
    %36 = arith.divf %32, %35 : vector<8x8xf32>
    %37 = arith.truncf %36 : vector<8x8xf32> to vector<8x8xbf16>
    %38 = vector.extract_strided_slice %24 {offsets = [0, 0], sizes = [8, 96], strides = [1, 1]} : vector<8x768xbf16> to vector<8x96xbf16>
    %cst_21 = arith.constant dense<0.000000e+00> : vector<8x96xf32>
    %39 = tpu.matmul %37, %38, %cst_21 {dimension_numbers = #tpu.dot_dimension_numbers<[1], [0], [0], [1], [0, 0, 1, 1], [], []>} : vector<8x8xbf16>, vector<8x96xbf16>, vector<8x96xf32> -> vector<8x96xf32>
    %40 = vector.extract_strided_slice %22 {offsets = [0, 96], sizes = [8, 96], strides = [1, 1]} : vector<8x768xbf16> to vector<8x96xbf16>
    %41 = vector.extract_strided_slice %23 {offsets = [0, 96], sizes = [8, 96], strides = [1, 1]} : vector<8x768xbf16> to vector<8x96xbf16>
    %cst_22 = arith.constant dense<0.000000e+00> : vector<8x8xf32>
    %42 = tpu.matmul %40, %41, %cst_22 {dimension_numbers = #tpu.dot_dimension_numbers<[1], [1], [0], [0], [0, 0, 1, 0], [], []>} : vector<8x96xbf16>, vector<8x96xbf16>, vector<8x8xf32> -> vector<8x8xf32>
    %cst_23 = arith.constant dense<0xFF800000> : vector<8xf32>
    %43 = vector.multi_reduction <maximumf>, %42, %cst_23 [1] : vector<8x8xf32> to vector<8xf32>
    %44 = vector.shape_cast %43 : vector<8xf32> to vector<8x1xf32>
    %45 = vector.broadcast %44 : vector<8x1xf32> to vector<8x8xf32>
    %46 = arith.subf %42, %45 : vector<8x8xf32>
    %47 = math.exp %46 : vector<8x8xf32>
    %cst_24 = arith.constant dense<0.000000e+00> : vector<8xf32>
    %48 = vector.multi_reduction <add>, %47, %cst_24 [1] : vector<8x8xf32> to vector<8xf32>
    %49 = vector.shape_cast %48 : vector<8xf32> to vector<8x1xf32>
    %50 = vector.broadcast %49 : vector<8x1xf32> to vector<8x8xf32>
    %51 = arith.divf %47, %50 : vector<8x8xf32>
    %52 = arith.truncf %51 : vector<8x8xf32> to vector<8x8xbf16>
    %53 = vector.extract_strided_slice %24 {offsets = [0, 96], sizes = [8, 96], strides = [1, 1]} : vector<8x768xbf16> to vector<8x96xbf16>
    %cst_25 = arith.constant dense<0.000000e+00> : vector<8x96xf32>
    %54 = tpu.matmul %52, %53, %cst_25 {dimension_numbers = #tpu.dot_dimension_numbers<[1], [0], [0], [1], [0, 0, 1, 1], [], []>} : vector<8x8xbf16>, vector<8x96xbf16>, vector<8x96xf32> -> vector<8x96xf32>
    %55 = vector.extract_strided_slice %22 {offsets = [0, 192], sizes = [8, 96], strides = [1, 1]} : vector<8x768xbf16> to vector<8x96xbf16>
    %56 = vector.extract_strided_slice %23 {offsets = [0, 192], sizes = [8, 96], strides = [1, 1]} : vector<8x768xbf16> to vector<8x96xbf16>
    %cst_26 = arith.constant dense<0.000000e+00> : vector<8x8xf32>
    %57 = tpu.matmul %55, %56, %cst_26 {dimension_numbers = #tpu.dot_dimension_numbers<[1], [1], [0], [0], [0, 0, 1, 0], [], []>} : vector<8x96xbf16>, vector<8x96xbf16>, vector<8x8xf32> -> vector<8x8xf32>
    %cst_27 = arith.constant dense<0xFF800000> : vector<8xf32>
    %58 = vector.multi_reduction <maximumf>, %57, %cst_27 [1] : vector<8x8xf32> to vector<8xf32>
    %59 = vector.shape_cast %58 : vector<8xf32> to vector<8x1xf32>
    %60 = vector.broadcast %59 : vector<8x1xf32> to vector<8x8xf32>
    %61 = arith.subf %57, %60 : vector<8x8xf32>
    %62 = math.exp %61 : vector<8x8xf32>
    %cst_28 = arith.constant dense<0.000000e+00> : vector<8xf32>
    %63 = vector.multi_reduction <add>, %62, %cst_28 [1] : vector<8x8xf32> to vector<8xf32>
    %64 = vector.shape_cast %63 : vector<8xf32> to vector<8x1xf32>
    %65 = vector.broadcast %64 : vector<8x1xf32> to vector<8x8xf32>
    %66 = arith.divf %62, %65 : vector<8x8xf32>
    %67 = arith.truncf %66 : vector<8x8xf32> to vector<8x8xbf16>
    %68 = vector.extract_strided_slice %24 {offsets = [0, 192], sizes = [8, 96], strides = [1, 1]} : vector<8x768xbf16> to vector<8x96xbf16>
    %cst_29 = arith.constant dense<0.000000e+00> : vector<8x96xf32>
    %69 = tpu.matmul %67, %68, %cst_29 {dimension_numbers = #tpu.dot_dimension_numbers<[1], [0], [0], [1], [0, 0, 1, 1], [], []>} : vector<8x8xbf16>, vector<8x96xbf16>, vector<8x96xf32> -> vector<8x96xf32>
    %70 = vector.extract_strided_slice %22 {offsets = [0, 288], sizes = [8, 96], strides = [1, 1]} : vector<8x768xbf16> to vector<8x96xbf16>
    %71 = vector.extract_strided_slice %23 {offsets = [0, 288], sizes = [8, 96], strides = [1, 1]} : vector<8x768xbf16> to vector<8x96xbf16>
    %cst_30 = arith.constant dense<0.000000e+00> : vector<8x8xf32>
    %72 = tpu.matmul %70, %71, %cst_30 {dimension_numbers = #tpu.dot_dimension_numbers<[1], [1], [0], [0], [0, 0, 1, 0], [], []>} : vector<8x96xbf16>, vector<8x96xbf16>, vector<8x8xf32> -> vector<8x8xf32>
    %cst_31 = arith.constant dense<0xFF800000> : vector<8xf32>
    %73 = vector.multi_reduction <maximumf>, %72, %cst_31 [1] : vector<8x8xf32> to vector<8xf32>
    %74 = vector.shape_cast %73 : vector<8xf32> to vector<8x1xf32>
    %75 = vector.broadcast %74 : vector<8x1xf32> to vector<8x8xf32>
    %76 = arith.subf %72, %75 : vector<8x8xf32>
    %77 = math.exp %76 : vector<8x8xf32>
    %cst_32 = arith.constant dense<0.000000e+00> : vector<8xf32>
    %78 = vector.multi_reduction <add>, %77, %cst_32 [1] : vector<8x8xf32> to vector<8xf32>
    %79 = vector.shape_cast %78 : vector<8xf32> to vector<8x1xf32>
    %80 = vector.broadcast %79 : vector<8x1xf32> to vector<8x8xf32>
    %81 = arith.divf %77, %80 : vector<8x8xf32>
    %82 = arith.truncf %81 : vector<8x8xf32> to vector<8x8xbf16>
    %83 = vector.extract_strided_slice %24 {offsets = [0, 288], sizes = [8, 96], strides = [1, 1]} : vector<8x768xbf16> to vector<8x96xbf16>
    %cst_33 = arith.constant dense<0.000000e+00> : vector<8x96xf32>
    %84 = tpu.matmul %82, %83, %cst_33 {dimension_numbers = #tpu.dot_dimension_numbers<[1], [0], [0], [1], [0, 0, 1, 1], [], []>} : vector<8x8xbf16>, vector<8x96xbf16>, vector<8x96xf32> -> vector<8x96xf32>
    %85 = vector.extract_strided_slice %22 {offsets = [0, 384], sizes = [8, 96], strides = [1, 1]} : vector<8x768xbf16> to vector<8x96xbf16>
    %86 = vector.extract_strided_slice %23 {offsets = [0, 384], sizes = [8, 96], strides = [1, 1]} : vector<8x768xbf16> to vector<8x96xbf16>
    %cst_34 = arith.constant dense<0.000000e+00> : vector<8x8xf32>
    %87 = tpu.matmul %85, %86, %cst_34 {dimension_numbers = #tpu.dot_dimension_numbers<[1], [1], [0], [0], [0, 0, 1, 0], [], []>} : vector<8x96xbf16>, vector<8x96xbf16>, vector<8x8xf32> -> vector<8x8xf32>
    %cst_35 = arith.constant dense<0xFF800000> : vector<8xf32>
    %88 = vector.multi_reduction <maximumf>, %87, %cst_35 [1] : vector<8x8xf32> to vector<8xf32>
    %89 = vector.shape_cast %88 : vector<8xf32> to vector<8x1xf32>
    %90 = vector.broadcast %89 : vector<8x1xf32> to vector<8x8xf32>
    %91 = arith.subf %87, %90 : vector<8x8xf32>
    %92 = math.exp %91 : vector<8x8xf32>
    %cst_36 = arith.constant dense<0.000000e+00> : vector<8xf32>
    %93 = vector.multi_reduction <add>, %92, %cst_36 [1] : vector<8x8xf32> to vector<8xf32>
    %94 = vector.shape_cast %93 : vector<8xf32> to vector<8x1xf32>
    %95 = vector.broadcast %94 : vector<8x1xf32> to vector<8x8xf32>
    %96 = arith.divf %92, %95 : vector<8x8xf32>
    %97 = arith.truncf %96 : vector<8x8xf32> to vector<8x8xbf16>
    %98 = vector.extract_strided_slice %24 {offsets = [0, 384], sizes = [8, 96], strides = [1, 1]} : vector<8x768xbf16> to vector<8x96xbf16>
    %cst_37 = arith.constant dense<0.000000e+00> : vector<8x96xf32>
    %99 = tpu.matmul %97, %98, %cst_37 {dimension_numbers = #tpu.dot_dimension_numbers<[1], [0], [0], [1], [0, 0, 1, 1], [], []>} : vector<8x8xbf16>, vector<8x96xbf16>, vector<8x96xf32> -> vector<8x96xf32>
    %100 = vector.extract_strided_slice %22 {offsets = [0, 480], sizes = [8, 96], strides = [1, 1]} : vector<8x768xbf16> to vector<8x96xbf16>
    %101 = vector.extract_strided_slice %23 {offsets = [0, 480], sizes = [8, 96], strides = [1, 1]} : vector<8x768xbf16> to vector<8x96xbf16>
    %cst_38 = arith.constant dense<0.000000e+00> : vector<8x8xf32>
    %102 = tpu.matmul %100, %101, %cst_38 {dimension_numbers = #tpu.dot_dimension_numbers<[1], [1], [0], [0], [0, 0, 1, 0], [], []>} : vector<8x96xbf16>, vector<8x96xbf16>, vector<8x8xf32> -> vector<8x8xf32>
    %cst_39 = arith.constant dense<0xFF800000> : vector<8xf32>
    %103 = vector.multi_reduction <maximumf>, %102, %cst_39 [1] : vector<8x8xf32> to vector<8xf32>
    %104 = vector.shape_cast %103 : vector<8xf32> to vector<8x1xf32>
    %105 = vector.broadcast %104 : vector<8x1xf32> to vector<8x8xf32>
    %106 = arith.subf %102, %105 : vector<8x8xf32>
    %107 = math.exp %106 : vector<8x8xf32>
    %cst_40 = arith.constant dense<0.000000e+00> : vector<8xf32>
    %108 = vector.multi_reduction <add>, %107, %cst_40 [1] : vector<8x8xf32> to vector<8xf32>
    %109 = vector.shape_cast %108 : vector<8xf32> to vector<8x1xf32>
    %110 = vector.broadcast %109 : vector<8x1xf32> to vector<8x8xf32>
    %111 = arith.divf %107, %110 : vector<8x8xf32>
    %112 = arith.truncf %111 : vector<8x8xf32> to vector<8x8xbf16>
    %113 = vector.extract_strided_slice %24 {offsets = [0, 480], sizes = [8, 96], strides = [1, 1]} : vector<8x768xbf16> to vector<8x96xbf16>
    %cst_41 = arith.constant dense<0.000000e+00> : vector<8x96xf32>
    %114 = tpu.matmul %112, %113, %cst_41 {dimension_numbers = #tpu.dot_dimension_numbers<[1], [0], [0], [1], [0, 0, 1, 1], [], []>} : vector<8x8xbf16>, vector<8x96xbf16>, vector<8x96xf32> -> vector<8x96xf32>
    %115 = vector.extract_strided_slice %22 {offsets = [0, 576], sizes = [8, 96], strides = [1, 1]} : vector<8x768xbf16> to vector<8x96xbf16>
    %116 = vector.extract_strided_slice %23 {offsets = [0, 576], sizes = [8, 96], strides = [1, 1]} : vector<8x768xbf16> to vector<8x96xbf16>
    %cst_42 = arith.constant dense<0.000000e+00> : vector<8x8xf32>
    %117 = tpu.matmul %115, %116, %cst_42 {dimension_numbers = #tpu.dot_dimension_numbers<[1], [1], [0], [0], [0, 0, 1, 0], [], []>} : vector<8x96xbf16>, vector<8x96xbf16>, vector<8x8xf32> -> vector<8x8xf32>
    %cst_43 = arith.constant dense<0xFF800000> : vector<8xf32>
    %118 = vector.multi_reduction <maximumf>, %117, %cst_43 [1] : vector<8x8xf32> to vector<8xf32>
    %119 = vector.shape_cast %118 : vector<8xf32> to vector<8x1xf32>
    %120 = vector.broadcast %119 : vector<8x1xf32> to vector<8x8xf32>
    %121 = arith.subf %117, %120 : vector<8x8xf32>
    %122 = math.exp %121 : vector<8x8xf32>
    %cst_44 = arith.constant dense<0.000000e+00> : vector<8xf32>
    %123 = vector.multi_reduction <add>, %122, %cst_44 [1] : vector<8x8xf32> to vector<8xf32>
    %124 = vector.shape_cast %123 : vector<8xf32> to vector<8x1xf32>
    %125 = vector.broadcast %124 : vector<8x1xf32> to vector<8x8xf32>
    %126 = arith.divf %122, %125 : vector<8x8xf32>
    %127 = arith.truncf %126 : vector<8x8xf32> to vector<8x8xbf16>
    %128 = vector.extract_strided_slice %24 {offsets = [0, 576], sizes = [8, 96], strides = [1, 1]} : vector<8x768xbf16> to vector<8x96xbf16>
    %cst_45 = arith.constant dense<0.000000e+00> : vector<8x96xf32>
    %129 = tpu.matmul %127, %128, %cst_45 {dimension_numbers = #tpu.dot_dimension_numbers<[1], [0], [0], [1], [0, 0, 1, 1], [], []>} : vector<8x8xbf16>, vector<8x96xbf16>, vector<8x96xf32> -> vector<8x96xf32>
    %130 = vector.extract_strided_slice %22 {offsets = [0, 672], sizes = [8, 96], strides = [1, 1]} : vector<8x768xbf16> to vector<8x96xbf16>
    %131 = vector.extract_strided_slice %23 {offsets = [0, 672], sizes = [8, 96], strides = [1, 1]} : vector<8x768xbf16> to vector<8x96xbf16>
    %cst_46 = arith.constant dense<0.000000e+00> : vector<8x8xf32>
    %132 = tpu.matmul %130, %131, %cst_46 {dimension_numbers = #tpu.dot_dimension_numbers<[1], [1], [0], [0], [0, 0, 1, 0], [], []>} : vector<8x96xbf16>, vector<8x96xbf16>, vector<8x8xf32> -> vector<8x8xf32>
    %cst_47 = arith.constant dense<0xFF800000> : vector<8xf32>
    %133 = vector.multi_reduction <maximumf>, %132, %cst_47 [1] : vector<8x8xf32> to vector<8xf32>
    %134 = vector.shape_cast %133 : vector<8xf32> to vector<8x1xf32>
    %135 = vector.broadcast %134 : vector<8x1xf32> to vector<8x8xf32>
    %136 = arith.subf %132, %135 : vector<8x8xf32>
    %137 = math.exp %136 : vector<8x8xf32>
    %cst_48 = arith.constant dense<0.000000e+00> : vector<8xf32>
    %138 = vector.multi_reduction <add>, %137, %cst_48 [1] : vector<8x8xf32> to vector<8xf32>
    %139 = vector.shape_cast %138 : vector<8xf32> to vector<8x1xf32>
    %140 = vector.broadcast %139 : vector<8x1xf32> to vector<8x8xf32>
    %141 = arith.divf %137, %140 : vector<8x8xf32>
    %142 = arith.truncf %141 : vector<8x8xf32> to vector<8x8xbf16>
    %143 = vector.extract_strided_slice %24 {offsets = [0, 672], sizes = [8, 96], strides = [1, 1]} : vector<8x768xbf16> to vector<8x96xbf16>
    %cst_49 = arith.constant dense<0.000000e+00> : vector<8x96xf32>
    %144 = tpu.matmul %142, %143, %cst_49 {dimension_numbers = #tpu.dot_dimension_numbers<[1], [0], [0], [1], [0, 0, 1, 1], [], []>} : vector<8x8xbf16>, vector<8x96xbf16>, vector<8x96xf32> -> vector<8x96xf32>
    %145 = tpu.concatenate %39, %54, %69, %84, %99, %114, %129, %144 in 1 : vector<8x96xf32>, vector<8x96xf32>, vector<8x96xf32>, vector<8x96xf32>, vector<8x96xf32>, vector<8x96xf32>, vector<8x96xf32>, vector<8x96xf32> -> vector<8x768xf32>
    %146 = arith.truncf %145 : vector<8x768xf32> to vector<8x768xbf16>
    %c0_50 = arith.constant 0 : index
    %c0_51 = arith.constant 0 : index
    %c0_52 = arith.constant 0 : index
    %147 = vector.load %arg5[%c0_50, %c0_51, %c0_52] : memref<1x768x768xbf16, #tpu.memory_space<vmem>>, vector<1x768x768xbf16>
    %148 = vector.shape_cast %147 : vector<1x768x768xbf16> to vector<768x768xbf16>
    %cst_53 = arith.constant dense<0.000000e+00> : vector<8x768xf32>
    %149 = tpu.matmul %146, %148, %cst_53 {dimension_numbers = #tpu.dot_dimension_numbers<[1], [0], [0], [1], [0, 0, 1, 1], [], []>} : vector<8x768xbf16>, vector<768x768xbf16>, vector<8x768xf32> -> vector<8x768xf32>
    %c0_54 = arith.constant 0 : index
    %c0_55 = arith.constant 0 : index
    %c0_56 = arith.constant 0 : index
    %150 = vector.load %arg8[%c0_54, %c0_55, %c0_56] : memref<1x1x768xf32, #tpu.memory_space<vmem>>, vector<1x1x768xf32>
    %151 = vector.shape_cast %150 : vector<1x1x768xf32> to vector<1x768xf32>
    %152 = vector.broadcast %151 : vector<1x768xf32> to vector<8x768xf32>
    %153 = arith.addf %149, %152 : vector<8x768xf32>
    %c0_57 = arith.constant 0 : index
    %c0_58 = arith.constant 0 : index
    %c0_59 = arith.constant 0 : index
    %154 = vector.load %arg9[%c0_57, %c0_58, %c0_59] : memref<1x8x768xf32, #tpu.memory_space<vmem>>, vector<1x8x768xf32>
    %155 = vector.shape_cast %154 : vector<1x8x768xf32> to vector<8x768xf32>
    %156 = vector.shape_cast %153 : vector<8x768xf32> to vector<1x8x768xf32>
    tpu.vector_store %arg9[%c0_57, %c0_58, %c0_59], %156 {strides = array<i32>} : memref<1x8x768xf32, #tpu.memory_space<vmem>>, vector<1x8x768xf32>,
    return
  }
  func.func @transform_0(%arg0: i32) -> (i32, i32, i32) {
    %c0_i32 = arith.constant 0 : i32
    %c0_i32_0 = arith.constant 0 : i32
    %c0_i32_1 = arith.constant 0 : i32
    return %arg0, %c0_i32, %c0_i32_0 : i32, i32, i32
  }
  func.func @transform_1(%arg0: i32) -> (i32, i32, i32) {
    %c0_i32 = arith.constant 0 : i32
    %c0_i32_0 = arith.constant 0 : i32
    %c0_i32_1 = arith.constant 0 : i32
    return %arg0, %c0_i32, %c0_i32_0 : i32, i32, i32
  }
  func.func @transform_2(%arg0: i32) -> (i32, i32, i32) {
    %c0_i32 = arith.constant 0 : i32
    %c0_i32_0 = arith.constant 0 : i32
    %c0_i32_1 = arith.constant 0 : i32
    return %arg0, %c0_i32, %c0_i32_0 : i32, i32, i32
  }
  func.func @transform_3(%arg0: i32) -> (i32, i32, i32) {
    %c0_i32 = arith.constant 0 : i32
    %c0_i32_0 = arith.constant 0 : i32
    %c0_i32_1 = arith.constant 0 : i32
    return %arg0, %c0_i32, %c0_i32_0 : i32, i32, i32
  }
  func.func @transform_4(%arg0: i32) -> (i32, i32, i32) {
    %c0_i32 = arith.constant 0 : i32
    %c0_i32_0 = arith.constant 0 : i32
    %c0_i32_1 = arith.constant 0 : i32
    return %arg0, %c0_i32, %c0_i32_0 : i32, i32, i32
  }
  func.func @transform_5(%arg0: i32) -> (i32, i32, i32) {
    %c0_i32 = arith.constant 0 : i32
    %c0_i32_0 = arith.constant 0 : i32
    %c0_i32_1 = arith.constant 0 : i32
    return %arg0, %c0_i32, %c0_i32_0 : i32, i32, i32
  }
  func.func @transform_6(%arg0: i32) -> (i32, i32, i32) {
    %c0_i32 = arith.constant 0 : i32
    %c0_i32_0 = arith.constant 0 : i32
    %c0_i32_1 = arith.constant 0 : i32
    return %arg0, %c0_i32, %c0_i32_0 : i32, i32, i32
  }
  func.func @transform_7(%arg0: i32) -> (i32, i32, i32) {
    %c0_i32 = arith.constant 0 : i32
    %c0_i32_0 = arith.constant 0 : i32
    %c0_i32_1 = arith.constant 0 : i32
    return %arg0, %c0_i32, %c0_i32_0 : i32, i32, i32
  }
  func.func @transform_8(%arg0: i32) -> (i32, i32, i32) {
    %c0_i32 = arith.constant 0 : i32
    %c0_i32_0 = arith.constant 0 : i32
    %c0_i32_1 = arith.constant 0 : i32
    return %arg0, %c0_i32, %c0_i32_0 : i32, i32, i32
  }
}

</mosaic_0001>

<bundles_post_ra>
// kernel: tpu_custom_call.1
= control target key start
LH: loop header
LB: loop body
LE: loop exit
PB: predicated region body
PF: predicated region fallthrough
CT: control target
= control target key end

     0   :  { %s16121_s0 = inlined_call_operand.hbm [shape: f32[2,8,768], index: 0, kind: input, shape index: {}]   ;;  %s16122_s1 = inlined_call_operand.hbm [shape: f32[2,8,768], index: 1, kind: input, shape index: {}]   ;;  %s16123_s2 = inlined_call_operand.hbm [shape: bf16[2,768,768], index: 2, kind: input, shape index: {}]   ;;  %s16124_s3 = inlined_call_operand.hbm [shape: bf16[2,768,1536], index: 3, kind: input, shape index: {}]   ;;  %s16125_s4 = inlined_call_operand.hbm [shape: bf16[2,768,768], index: 4, kind: input, shape index: {}]   ;;  %s16126_s5 = inlined_call_operand.hbm [shape: f32[2,1,768], index: 5, kind: input, shape index: {}]   ;;  %s16127_s6 = inlined_call_operand.hbm [shape: f32[2,1,1536], index: 6, kind: input, shape index: {}]   ;;  %s16128_s7 = inlined_call_operand.hbm [shape: f32[2,1,768], index: 7, kind: input, shape index: {}]   ;;  %s16129_s8 = inlined_call_operand.hbm [shape: f32[2,8,768], index: 8, kind: output, shape index: {}]  }
   0x1   :  { %16145 = sst [smem:[#allocation28_spill]] %s16121_s0 }
   0x2   :  { %16146 = sst [smem:[#allocation29_spill]] %s16122_s1 }
   0x3   :  { %16147 = sst [smem:[#allocation30_spill]] %s16123_s2 }
   0x4   :  { %16148 = sst [smem:[#allocation31_spill]] %s16124_s3 }
   0x5   :  { %16149 = sst [smem:[#allocation32_spill]] %s16125_s4 }
   0x6   :  { %13 = vsyncpa [#allocation3], 0 }
   0x7   :  { %15 = vsyncpa [#allocation3 + $0x1], 0 }
   0x8   :  { %16 = vsyncpa [#allocation6], 0 }
   0x9   :  { %18 = vsyncpa [#allocation6 + $0x1], 0 }
   0xa   :  { %19 = vsyncpa [#allocation9], 0 }
   0xb   :  { %21 = vsyncpa [#allocation9 + $0x1], 0 }
   0xc   :  { %22 = vsyncpa [#allocation12], 0 }
   0xd   :  { %24 = vsyncpa [#allocation12 + $0x1], 0 }
   0xe   :  { %25 = vsyncpa [#allocation15], 0 }
   0xf   :  { %27 = vsyncpa [#allocation15 + $0x1], 0 }
  0x10   :  { %28 = vsyncpa [#allocation4], 0 }
  0x11   :  { %30 = vsyncpa [#allocation4 + $0x1], 0  ;;  %s14043_s27 = smov 0   ;;  %s14045_s28 = smov 0  }
  0x12   :  { %s14047_s29 = smov 0   ;;  %s14049_s30 = smov 0  }
  0x13 LB: > { %16150 = sst [smem:[#allocation23_spill]] %s13966_s27  ;;  %s14064_s9 = sadd.s32 4294967295, %s13978_s30   ;;  %s13978_s30 = sphi %s14049_s30, %s16185_s30   ;;  %s13974_s29 = sphi %s14047_s29, %s16187_s29   ;;  %s13970_s28 = sphi %s14045_s28, %s16189_s28   ;;  %s13966_s27 = sphi %s14043_s27, %s16188_s27  }
  0x14   : > { %16151 = sst [smem:[#allocation24_spill]] %s13974_s29  ;;  %s10352_s10 = sadd.s32 4294967294, %s13978_s30  }
  0x15   : > { %s14068_s11 = sadd.s32 1, %s13978_s30   ;;  %s43_s12 = sadd.s32 1, %s13974_s29 }
  0x16   : > { %16152 = sst [smem:[#allocation25_spill]] %s14068_s11  ;;  %s40_s13 = ssub.s32 %s13978_s30, %s14068_s11 }
  0x17   : > { %p50_p0 = scmp.ne.s32.totalorder %s13974_s29, %s13970_s28  ;;  %p41_p1 = scmp.eq.s32.totalorder %s40_s13, 0 }
  0x18   : > { %p51_p2 = scmp.eq.s32.totalorder %s13978_s30, 0  ;;  %p56_p3 = scmp.ne.s32.totalorder %s13970_s28, %s13966_s27 }
  0x19   : > { %p57_p4 = scmp.eq.s32.totalorder %s14064_s9, 0  ;;  %p262_p7 = scmp.eq.s32.totalorder %s14064_s9, 1 }
  0x1a   : > { %s14080_s14 = scalar_select %p41_p1, %s13974_s29, %s43_s12  }
  0x1b   : > { %p52_p5 = por %p51_p2, %p50_p0  ;;  %p14082_p6 = por %p57_p4, %p56_p3 }
  0x1c   : > { %16153 = sst [smem:[#allocation26_spill]] %s14080_s14  ;;  %p268_p8 = scmp.eq.s32.totalorder %s10352_s10, 1 }
  0x1d   : > { %s16154_s15 = scalar_select %p14082_p6, 1, 0 }
  0x1e   : > { %p11850_p10 = scmp.lt.s32.totalorder %s13978_s30, 2  ;;  %p14089_p11 = por %p262_p7, %p50_p0 }
  0x1f   : > { %p14093_p12 = por %p268_p8, %p56_p3  ;;  %s14098_s18 = sand.u32 1, %s13974_s29  }
  0x20   : > { %s16155_s16 = scalar_select %p14089_p11, 1, 0 }
  0x21   : > { %s16156_s17 = scalar_select %p14093_p12, 1, 0 }
  0x22   : > { %s16130_s19 = smul.u32 768, %s13978_s30  ;;  %p14102_p13 = pnand %p11850_p10, %p52_p5 }
  0x23   : > { %16157 = sst [smem:[#allocation27_spill]] %s16156_s17  ;;  %s16131_s20 = smul.u32 48, %s14098_s18 }
  0x24   : > { %s16158_s21 = scalar_select %p14102_p13, 1, 0 }
  0x25   : > { %s14107_s22 = sand.u32 1, %s13978_s30   ;;  %s16159_s1 = sld [smem:[#allocation29_spill]] }
  0x26   : > { %s311_s26 = scalar_lea.vmem [#allocation5], %s16131_s20  ;;  %p14127_p3 = pneg %p14102_p13 }
  0x27   : > { %s319_s10 = sshll.u32 %s311_s26, 4  ;;  %s14119_s10 = int_to_ptr.vmem [resolvable:$true] %s319_s10 }
  0x2b   : > { %s14114_s25 = scalar_lea.hbm %s16159_s1, %s16130_s19  ;;  %s13661_s26 = scalar_lea.hbm %s16159_s1, 1536 }
  0x2c   : > { %s13656_s13 = scalar_lea.hbm %s14114_s25, 768  ;;  %p13662_p7 = scmp.lt.u32.totalorder %s14114_s25, %s16159_s1 }
  0x2d   : > { %p13657_p2 = scmp.ne.s32.totalorder %s14114_s25, %s13656_s13  ;;  %p13663_p8 = scmp.lt.u32.totalorder %s13661_s26, %s13656_s13 }
  0x2e   : > { %p13665_p9 = scmp.lt.u32.totalorder %s13656_s13, %s14114_s25 }
  0x2f   : > { %p13659_p4 = pnand %p14127_p3, %p13657_p2  ;;  %p13664_p10 = por %p13663_p8, %p13662_p7 }
  0x31   : > { %p13660_p5 = pneg %p13659_p4  ;;  %p13666_p0 = por %p13665_p9, %p13664_p10 }
  0x33   : > { %p13667_p1 = pnand %p13666_p0, %p13660_p5 }
  0x35   : > { %13670 = shalt.err (!%p13667_p1)
}
  0x36   : > { %s13671_s12 = scalar_lea.vmem %s14119_s10, 768  ;;  %s13980_s19 = smov [#allocation5]  }
  0x37   : > { %p13672_p2 = scmp.ne.s32.totalorder %s14119_s10, %s13671_s12  ;;  %s13676_s24 = sshll.u32 %s13980_s19, 4  ;;  %s13677_s24 = int_to_ptr.vmem [resolvable:$false] %s13676_s24 }
  0x38   : > { %s13678_s14 = scalar_lea.vmem %s13677_s24, 1536  ;;  %p13679_p11 = scmp.lt.s32.totalorder %s14119_s10, %s13677_s24 }
  0x39   : > { %p13674_p4 = pnand %p13672_p2, %p14127_p3  ;;  %p13680_p6 = scmp.lt.s32.totalorder %s13678_s14, %s13671_s12 }
  0x3b   : > { %p13675_p12 = pneg %p13674_p4  ;;  %p13681_p7 = por %p13680_p6, %p13679_p11 }
  0x3d   : > { %p13682_p8 = pnand %p13681_p7, %p13675_p12 }
  0x3f   : > { %13685 = shalt.err (!%p13682_p8)
}
  0x40   : > { %s16161_s20 = scalar_lea.sflag [#allocation6], %s14107_s22  ;;  %p16162_p9 = scmp.lt.s32.totalorder %s13978_s30, 3 }
  0x41   : > { %11827 = dma.hbm_to_vmem [thread:$0]  (!%p14102_p13), %s14114_s25, 768, %s14119_s10, %s16161_s20  }
  0x42   : > { %p16163_p0 = scmp.ge.s32.totalorder %s13978_s30, 1  ;;  %s11787_s13 = smul.u32 4608, %s14098_s18 }
  0x43   : > { %s11788_s26 = smul.u32 73728, %s13978_s30  ;;  %s16165_s3 = sld [smem:[#allocation31_spill]] }
  0x44   : > { %p14156_p1 = pnand %p16163_p0, %p16162_p9  ;;  %s351_s1 = scalar_lea.vmem [#allocation8], %s11787_s13 }
  0x45   : > { %s358_s29 = sshll.u32 %s351_s1, 4  ;;  %s16140_s25 = scalar_lea.sflag [#allocation9], %s14107_s22  ;;  %s14167_s29 = int_to_ptr.vmem [resolvable:$true] %s358_s29 }
  0x46   : > { %s16164_s12 = scalar_select %p14156_p1, 1, 0 }
  0x49   : > { %s14165_s14 = scalar_lea.hbm %s16165_s3, %s11788_s26  ;;  %s13691_s19 = scalar_lea.hbm %s16165_s3, 147456 }
  0x4a   : > { %s13686_s10 = scalar_lea.hbm %s14165_s14, 73728  ;;  %p13692_p5 = scmp.lt.u32.totalorder %s14165_s14, %s16165_s3 }
  0x4b   : > { %p13687_p6 = scmp.ne.s32.totalorder %s14165_s14, %s13686_s10  ;;  %p13693_p10 = scmp.lt.u32.totalorder %s13691_s19, %s13686_s10 }
  0x4c   : > { %p13695_p4 = scmp.lt.u32.totalorder %s13686_s10, %s14165_s14 }
  0x4d   : > { %p13689_p11 = pnand %p13687_p6, %p14127_p3  ;;  %p13694_p2 = por %p13693_p10, %p13692_p5 }
  0x4f   : > { %p13690_p12 = pneg %p13689_p11  ;;  %p13696_p7 = por %p13695_p4, %p13694_p2 }
  0x51   : > { %p13697_p8 = pnand %p13696_p7, %p13690_p12 }
  0x53   : > { %13700 = shalt.err (!%p13697_p8)
}
  0x54   : > { %s13701_s1 = scalar_lea.vmem %s14167_s29, 73728  ;;  %s13981_s11 = smov [#allocation8]  }
  0x55   : > { %p13702_p9 = scmp.ne.s32.totalorder %s14167_s29, %s13701_s1  ;;  %s13706_s13 = sshll.u32 %s13981_s11, 4  ;;  %s13707_s13 = int_to_ptr.vmem [resolvable:$false] %s13706_s13 }
  0x56   : > { %s13708_s20 = scalar_lea.vmem %s13707_s13, 147456  ;;  %p13709_p11 = scmp.lt.s32.totalorder %s14167_s29, %s13707_s13 }
  0x57   : > { %p13704_p0 = pnand %p13702_p9, %p14127_p3  ;;  %p13710_p1 = scmp.lt.s32.totalorder %s13708_s20, %s13701_s1 }
  0x59   : > { %p13705_p6 = pneg %p13704_p0  ;;  %p13711_p5 = por %p13710_p1, %p13709_p11 }
  0x5b   : > { %p13712_p10 = pnand %p13711_p5, %p13705_p6 }
  0x5d   : > { %13715 = shalt.err (!%p13712_p10)
}
  0x5e   : > { %s13982_s10 = smov 768   ;;  %s13983_s19 = smov 48  }
  0x5f   : > { %11833 = dma.hbm_to_vmem [thread:$0]  (!%p14102_p13), %s14165_s14, 73728, %s14167_s29, %s16140_s25, %s13982_s10, %s13982_s10, %s13983_s19  }
  0x60   : > { %s16141_s26 = smul.u32 6, %s14098_s18  ;;  %s16167_s0 = sld [smem:[#allocation28_spill]] }
  0x61   : > { %s16139_s24 = smul.u32 96, %s13978_s30  ;;  %s16142_s11 = scalar_lea.sflag [#allocation12], %s14107_s22 }
  0x62   : > { %s16166_s1 = smul.u32 768, %s13978_s30  ;;  %s393_s29 = scalar_lea.vmem [#allocation11], %s16141_s26 }
  0x63   : > { %s14207_s27 = scalar_lea.hbm %s16126_s5, %s16139_s24  ;;  %s401_s14 = sshll.u32 %s393_s29, 4  ;;  %s14211_s14 = int_to_ptr.vmem [resolvable:$true] %s401_s14 }
  0x64   : > { %s16168_s10 = smul.u32 48, %s14098_s18  ;;  %s13716_s13 = scalar_lea.hbm %s14207_s27, 96 }
  0x65   : > { %p13717_p1 = scmp.ne.s32.totalorder %s14207_s27, %s13716_s13  ;;  %s13721_s24 = scalar_lea.hbm %s16126_s5, 192 }
  0x66   : > { %s14200_s20 = scalar_lea.hbm %s16167_s0, %s16166_s1  ;;  %s14215_s19 = scalar_lea.vmem [#allocation2], %s16168_s10 }
  0x67   : > { %s300_s1 = sshll.u32 %s14215_s19, 4  ;;  %p13719_p12 = pnand %p13717_p1, %p14127_p3  ;;  %s14244_s1 = int_to_ptr.vmem [resolvable:$true] %s300_s1 }
  0x68   : > { %p13722_p4 = scmp.lt.u32.totalorder %s14207_s27, %s16126_s5  ;;  %p13723_p7 = scmp.lt.u32.totalorder %s13721_s24, %s13716_s13 }
  0x69   : > { %p13720_p2 = pneg %p13719_p12  ;;  %p13725_p9 = scmp.lt.u32.totalorder %s13716_s13, %s14207_s27 }
  0x6a   : > { %p13724_p8 = por %p13723_p7, %p13722_p4 }
  0x6c   : > { %p13726_p0 = por %p13725_p9, %p13724_p8 }
  0x6e   : > { %p13727_p6 = pnand %p13726_p0, %p13720_p2 }
  0x70   : > { %13730 = shalt.err (!%p13727_p6)
}
  0x71   : > { %s13731_s29 = scalar_lea.vmem %s14211_s14, 96  ;;  %s13984_s10 = smov [#allocation11]  }
  0x72   : > { %p13732_p11 = scmp.ne.s32.totalorder %s14211_s14, %s13731_s29  ;;  %s13736_s3 = sshll.u32 %s13984_s10, 4  ;;  %s13737_s3 = int_to_ptr.vmem [resolvable:$false] %s13736_s3 }
  0x73   : > { %s13738_s25 = scalar_lea.vmem %s13737_s3, 192  ;;  %p13739_p1 = scmp.lt.s32.totalorder %s14211_s14, %s13737_s3 }
  0x74   : > { %p13734_p5 = pnand %p13732_p11, %p14127_p3  ;;  %p13740_p12 = scmp.lt.s32.totalorder %s13738_s25, %s13731_s29 }
  0x76   : > { %p13735_p10 = pneg %p13734_p5  ;;  %p13741_p4 = por %p13740_p12, %p13739_p1 }
  0x78   : > { %p13742_p7 = pnand %p13741_p4, %p13735_p10 }
  0x7a   : > { %13745 = shalt.err (!%p13742_p7)
}
  0x7b   : > { %11839 = dma.hbm_to_vmem [thread:$0]  (!%p14102_p13), %s14207_s27, 96, %s14211_s14, %s16142_s11  }
  0x7c   : > { %s11785_s26 = smul.u32 2304, %s14098_s18  ;;  %s289_s24 = scalar_lea.sflag [#allocation3], %s14098_s18 }
  0x7d   : > { %s13746_s13 = scalar_lea.hbm %s14200_s20, 768  ;;  %s13751_s10 = scalar_lea.hbm %s16167_s0, 1536 }
  0x7e   : > { %p13747_p2 = scmp.ne.s32.totalorder %s14200_s20, %s13746_s13  ;;  %p13752_p0 = scmp.lt.u32.totalorder %s14200_s20, %s16167_s0 }
  0x7f   : > { %p13753_p6 = scmp.lt.u32.totalorder %s13751_s10, %s13746_s13  ;;  %p13755_p5 = scmp.lt.u32.totalorder %s13746_s13, %s14200_s20 }
  0x80   : > { %p13749_p8 = pnand %p13747_p2, %p14127_p3 }
  0x81   : > { %p13754_p11 = por %p13753_p6, %p13752_p0 }
  0x82   : > { %p13750_p9 = pneg %p13749_p8 }
  0x83   : > { %p13756_p10 = por %p13755_p5, %p13754_p11 }
  0x85   : > { %p13757_p1 = pnand %p13756_p10, %p13750_p9 }
  0x87   : > { %13760 = shalt.err (!%p13757_p1)
}
  0x88   : > { %s13761_s27 = scalar_lea.vmem %s14244_s1, 768  ;;  %s13985_s14 = smov [#allocation2]  }
  0x89   : > { %p13762_p12 = scmp.ne.s32.totalorder %s14244_s1, %s13761_s27  ;;  %s13766_s19 = sshll.u32 %s13985_s14, 4  ;;  %s13767_s19 = int_to_ptr.vmem [resolvable:$false] %s13766_s19 }
  0x8a   : > { %s13768_s17 = scalar_lea.vmem %s13767_s19, 1536  ;;  %p13769_p2 = scmp.lt.s32.totalorder %s14244_s1, %s13767_s19 }
  0x8b   : > { %p13764_p4 = pnand %p13762_p12, %p14127_p3  ;;  %p13770_p8 = scmp.lt.s32.totalorder %s13768_s17, %s13761_s27 }
  0x8d   : > { %p13765_p7 = pneg %p13764_p4  ;;  %p13771_p0 = por %p13770_p8, %p13769_p2 }
  0x8f   : > { %p13772_p6 = pnand %p13771_p0, %p13765_p7 }
  0x91   : > { %13775 = shalt.err (!%p13772_p6)
}
  0x92   : > { %11824 = dma.hbm_to_vmem [thread:$0]  (!%p14102_p13), %s14200_s20, 768, %s14244_s1, %s289_s24  }
  0x93   : > { %s11786_s13 = smul.u32 36864, %s13978_s30  ;;  %s330_s29 = scalar_lea.vmem [#allocation7], %s11785_s26 }
  0x94   : > { %s337_s10 = sshll.u32 %s330_s29, 4  ;;  %s16169_s2 = sld [smem:[#allocation30_spill]]  ;;  %s14279_s10 = int_to_ptr.vmem [resolvable:$true] %s337_s10 }
  0x9a   : > { %s14277_s27 = scalar_lea.hbm %s16169_s2, %s11786_s13  ;;  %s13781_s24 = scalar_lea.hbm %s16169_s2, 73728 }
  0x9b   : > { %s13776_s14 = scalar_lea.hbm %s14277_s27, 36864  ;;  %p13782_p10 = scmp.lt.u32.totalorder %s14277_s27, %s16169_s2 }
  0x9c   : > { %p13777_p9 = scmp.ne.s32.totalorder %s14277_s27, %s13776_s14  ;;  %p13783_p1 = scmp.lt.u32.totalorder %s13781_s24, %s13776_s14 }
  0x9d   : > { %p13785_p4 = scmp.lt.u32.totalorder %s13776_s14, %s14277_s27 }
  0x9e   : > { %p13779_p11 = pnand %p13777_p9, %p14127_p3  ;;  %p13784_p12 = por %p13783_p1, %p13782_p10 }
  0xa0   : > { %p13780_p5 = pneg %p13779_p11  ;;  %p13786_p7 = por %p13785_p4, %p13784_p12 }
  0xa2   : > { %p13787_p2 = pnand %p13786_p7, %p13780_p5 }
  0xa4   : > { %13790 = shalt.err (!%p13787_p2)
}
  0xa5   : > { %s13791_s29 = scalar_lea.vmem %s14279_s10, 36864  ;;  %s13986_s3 = smov [#allocation7]  }
  0xa6   : > { %p13792_p8 = scmp.ne.s32.totalorder %s14279_s10, %s13791_s29  ;;  %s13796_s25 = sshll.u32 %s13986_s3, 4  ;;  %s13797_s25 = int_to_ptr.vmem [resolvable:$false] %s13796_s25 }
  0xa7   : > { %s13798_s20 = scalar_lea.vmem %s13797_s25, 73728  ;;  %p13799_p9 = scmp.lt.s32.totalorder %s14279_s10, %s13797_s25 }
  0xa8   : > { %p13794_p0 = pnand %p13792_p8, %p14127_p3  ;;  %p13800_p11 = scmp.lt.s32.totalorder %s13798_s20, %s13791_s29 }
  0xaa   : > { %p13795_p6 = pneg %p13794_p0  ;;  %p13801_p10 = por %p13800_p11, %p13799_p9 }
  0xac   : > { %p13802_p1 = pnand %p13801_p10, %p13795_p6 }
  0xae   : > { %13805 = shalt.err (!%p13802_p1)
}
  0xaf   : > { %s13987_s14 = smov 384   ;;  %s13988_s1 = smov 24  }
  0xb0   : > { %s16170_s24 = scalar_lea.sflag [#allocation6], %s14107_s22  ;;  %s16171_s4 = sld [smem:[#allocation32_spill]] }
  0xb1   : > { %11830 = dma.hbm_to_vmem [thread:$0]  (!%p14102_p13), %s14277_s27, 36864, %s14279_s10, %s16170_s24, %s13987_s14, %s13987_s14, %s13988_s1  }
  0xb2   : > { %s372_s3 = scalar_lea.vmem [#allocation10], %s11785_s26  ;;  %s11793_s20 = smul.u32 12, %s14098_s18 }
  0xb3   : > { %s379_s25 = sshll.u32 %s372_s3, 4  ;;  %s14316_s25 = int_to_ptr.vmem [resolvable:$true] %s379_s25 }
  0xb6   : > { %s14312_s29 = scalar_lea.hbm %s16171_s4, %s11786_s13  ;;  %s13811_s13 = scalar_lea.hbm %s16171_s4, 73728 }
  0xb7   : > { %s13806_s11 = scalar_lea.hbm %s14312_s29, 36864  ;;  %p13812_p7 = scmp.lt.u32.totalorder %s14312_s29, %s16171_s4 }
  0xb8   : > { %p13807_p5 = scmp.ne.s32.totalorder %s14312_s29, %s13806_s11  ;;  %p13813_p2 = scmp.lt.u32.totalorder %s13811_s13, %s13806_s11 }
  0xb9   : > { %p13815_p0 = scmp.lt.u32.totalorder %s13806_s11, %s14312_s29 }
  0xba   : > { %p13809_p12 = pnand %p13807_p5, %p14127_p3  ;;  %p13814_p8 = por %p13813_p2, %p13812_p7 }
  0xbc   : > { %p13810_p4 = pneg %p13809_p12  ;;  %p13816_p6 = por %p13815_p0, %p13814_p8 }
  0xbe   : > { %p13817_p9 = pnand %p13816_p6, %p13810_p4 }
  0xc0   : > { %13820 = shalt.err (!%p13817_p9)
}
  0xc1   : > { %s13821_s26 = scalar_lea.vmem %s14316_s25, 36864  ;;  %s13989_s17 = smov [#allocation10]  }
  0xc2   : > { %p13822_p11 = scmp.ne.s32.totalorder %s14316_s25, %s13821_s26  ;;  %s13826_s3 = sshll.u32 %s13989_s17, 4  ;;  %s13827_s3 = int_to_ptr.vmem [resolvable:$false] %s13826_s3 }
  0xc3   : > { %s13828_s10 = scalar_lea.vmem %s13827_s3, 73728  ;;  %p13829_p5 = scmp.lt.s32.totalorder %s14316_s25, %s13827_s3 }
  0xc4   : > { %p13824_p10 = pnand %p13822_p11, %p14127_p3  ;;  %p13830_p12 = scmp.lt.s32.totalorder %s13828_s10, %s13821_s26 }
  0xc6   : > { %p13825_p1 = pneg %p13824_p10  ;;  %p13831_p7 = por %p13830_p12, %p13829_p5 }
  0xc8   : > { %p13832_p2 = pnand %p13831_p7, %p13825_p1 }
  0xca   : > { %13835 = shalt.err (!%p13832_p2)
}
  0xcb   : > { %s16172_s11 = scalar_lea.sflag [#allocation9], %s14107_s22  ;;  %s11794_s27 = smul.u32 192, %s13978_s30 }
  0xcc   : > { %11836 = dma.hbm_to_vmem [thread:$0]  (!%p14102_p13), %s14312_s29, 36864, %s14316_s25, %s16172_s11, %s13987_s14, %s13987_s14, %s13988_s1  }
  0xcd   : > { %s412_s13 = scalar_lea.vmem [#allocation13], %s11793_s20  ;;  %s418_s17 = scalar_lea.hbm %s16127_s6, %s11794_s27 }
  0xce   : > { %s420_s24 = sshll.u32 %s412_s13, 4  ;;  %s13836_s3 = scalar_lea.hbm %s418_s17, 192  ;;  %s421_s24 = int_to_ptr.vmem [resolvable:$true] %s420_s24 }
  0xcf   : > { %p13837_p4 = scmp.ne.s32.totalorder %s418_s17, %s13836_s3  ;;  %s13841_s2 = scalar_lea.hbm %s16127_s6, 384 }
  0xd0   : > { %p13842_p6 = scmp.lt.u32.totalorder %s418_s17, %s16127_s6  ;;  %p13843_p9 = scmp.lt.u32.totalorder %s13841_s2, %s13836_s3 }
  0xd1   : > { %p13839_p8 = pnand %p13837_p4, %p14127_p3  ;;  %p13845_p10 = scmp.lt.u32.totalorder %s13836_s3, %s418_s17 }
  0xd2   : > { %p13844_p11 = por %p13843_p9, %p13842_p6 }
  0xd3   : > { %p13840_p0 = pneg %p13839_p8 }
  0xd4   : > { %p13846_p1 = por %p13845_p10, %p13844_p11 }
  0xd6   : > { %p13847_p5 = pnand %p13846_p1, %p13840_p0 }
  0xd8   : > { %13850 = shalt.err (!%p13847_p5)
}
  0xd9   : > { %s13851_s1 = scalar_lea.vmem %s421_s24, 192  ;;  %s13990_s29 = smov [#allocation13]  }
  0xda   : > { %p13852_p12 = scmp.ne.s32.totalorder %s421_s24, %s13851_s1  ;;  %s13856_s25 = sshll.u32 %s13990_s29, 4  ;;  %s13857_s25 = int_to_ptr.vmem [resolvable:$false] %s13856_s25 }
  0xdb   : > { %s13858_s0 = scalar_lea.vmem %s13857_s25, 384  ;;  %p13859_p4 = scmp.lt.s32.totalorder %s421_s24, %s13857_s25 }
  0xdc   : > { %p13854_p7 = pnand %p13852_p12, %p14127_p3  ;;  %p13860_p8 = scmp.lt.s32.totalorder %s13858_s0, %s13851_s1 }
  0xde   : > { %p13855_p2 = pneg %p13854_p7  ;;  %p13861_p13 = por %p13860_p8, %p13859_p4 }
  0xe0   : > { %p13862_p6 = pnand %p13861_p13, %p13855_p2 }
  0xe2   : > { %13865 = shalt.err (!%p13862_p6)
}
  0xe3   : > { %p16173_p9 = scmp.ne.s32.totalorder %s16158_s21, 0  ;;  %s16174_s2 = scalar_lea.sflag [#allocation12], %s14107_s22 }
  0xe4   : > { %s16175_s4 = smul.u32 96, %s13978_s30  ;;  %s428_s22 = scalar_lea.sflag [#allocation15], %s14098_s18 }
  0xe5   : > { %11842 = dma.hbm_to_vmem [thread:$0]  (!%p16173_p9), %s418_s17, 192, %s421_s24, %s16174_s2  }
  0xe6   : > { %s14370_s27 = scalar_lea.hbm %s16128_s7, %s16175_s4  ;;  %s16176_s13 = smul.u32 6, %s14098_s18 }
  0xe7   : > { %s13866_s3 = scalar_lea.hbm %s14370_s27, 96  ;;  %s13871_s10 = scalar_lea.hbm %s16128_s7, 192 }
  0xe8   : > { %s431_s19 = scalar_lea.vmem [#allocation14], %s16176_s13  ;;  %p13867_p13 = scmp.ne.s32.totalorder %s14370_s27, %s13866_s3 }
  0xe9   : > { %s439_s26 = sshll.u32 %s431_s19, 4  ;;  %p13872_p10 = scmp.lt.u32.totalorder %s14370_s27, %s16128_s7  ;;  %s440_s26 = int_to_ptr.vmem [resolvable:$true] %s439_s26 }
  0xea   : > { %p13869_p0 = pnand %p13867_p13, %p14127_p3  ;;  %p13873_p1 = scmp.lt.u32.totalorder %s13871_s10, %s13866_s3 }
  0xeb   : > { %p13875_p12 = scmp.lt.u32.totalorder %s13866_s3, %s14370_s27 }
  0xec   : > { %p13870_p11 = pneg %p13869_p0  ;;  %p13874_p5 = por %p13873_p1, %p13872_p10 }
  0xee   : > { %p13876_p7 = por %p13875_p12, %p13874_p5 }
  0xf0   : > { %p13877_p2 = pnand %p13876_p7, %p13870_p11 }
  0xf2   : > { %13880 = shalt.err (!%p13877_p2)
}
  0xf3   : > { %s13881_s18 = scalar_lea.vmem %s440_s26, 96  ;;  %s13991_s29 = smov [#allocation14]  }
  0xf4   : > { %p13882_p4 = scmp.ne.s32.totalorder %s440_s26, %s13881_s18  ;;  %s13886_s25 = sshll.u32 %s13991_s29, 4  ;;  %s13887_s25 = int_to_ptr.vmem [resolvable:$false] %s13886_s25 }
  0xf5   : > { %s13888_s0 = scalar_lea.vmem %s13887_s25, 192  ;;  %p13889_p13 = scmp.lt.s32.totalorder %s440_s26, %s13887_s25 }
  0xf6   : > { %p13884_p8 = pnand %p13882_p4, %p14127_p3  ;;  %p13890_p0 = scmp.lt.s32.totalorder %s13888_s0, %s13881_s18 }
  0xf8   : > { %p13885_p6 = pneg %p13884_p8  ;;  %p13891_p9 = por %p13890_p0, %p13889_p13 }
  0xfa   : > { %p13892_p1 = pnand %p13891_p9, %p13885_p6 }
  0xfc   : > { %13895 = shalt.err (!%p13892_p1)
}
  0xfd   : > { %p16177_p10 = scmp.ne.s32.totalorder %s16158_s21, 0  ;;  %p16178_p11 = scmp.ne.s32.totalorder %s16164_s12, 0 }
  0xfe   : > { %s14395_s23 = sand.u32 (!%p16178_p11), 1, %s13970_s28   ;;  %p16179_p3 = scmp.ne.s32.totalorder (!%p16178_p11), %s16154_s15, 0 }
  0xff   : > { %11845 = dma.hbm_to_vmem [thread:$0]  (!%p16177_p10), %s14370_s27, 96, %s440_s26, %s428_s22  }
 0x100   : > { %448 = sbr.rel (%p16178_p11) target bundleno = 6031 (0x178f), region = 52  ;;  %s451_s4 = scalar_lea.sflag (!%p16178_p11), [#allocation3], %s14395_s23 }
 0x101   : > { %s14398_s2 = smul.u32 (!%p16178_p11), 48, %s14395_s23 }
 0x103   : > { %s14402_s20 = scalar_lea.vmem (!%p16178_p11), [#allocation2], %s14398_s2 }
 0x107   : > { %13941 = dma.done.wait (%p16179_p3), %s451_s4, 768  }
 0x108   : > { %13943 = vsyncadd (%p16179_p3), %s451_s4, 4294966528  ;;  %s459_s21 = sand.u32 1, %s14064_s9   ;;  %s14410_s11 = scalar_lea.vmem [#allocation5], %s14398_s2 }
 0x109   : > { %s460_s12 = scalar_lea.sflag [#allocation6], %s459_s21 }
 0x10a   : > { %13945 = dma.done.wait (%p16179_p3), %s460_s12, 37632  }
 0x10b   : > { %13947 = vsyncadd (%p16179_p3), %s460_s12, 4294929664  ;;  %s11798_s27 = smul.u32 2304, %s14395_s23  ;;  %s478_s26 = scalar_lea.sflag [#allocation9], %s459_s21 }
 0x10c   : > { %s11799_s13 = smul.u32 4608, %s14395_s23 }
 0x10d   : > { %s14418_s19 = scalar_lea.vmem [#allocation7], %s11798_s27 }
 0x10e   : > { %s14420_s22 = scalar_lea.vmem [#allocation8], %s11799_s13 }
 0x10f   : > { %13949 = dma.done.wait (%p16179_p3), %s478_s26, 110592  }
 0x110   : > { %13951 = vsyncadd (%p16179_p3), %s478_s26, 4294856704  ;;  %s11800_s3 = smul.u32 6, %s14395_s23  ;;  %s14427_s24 = scalar_lea.vmem [#allocation10], %s11798_s27 }
 0x111   : > { %s496_s17 = scalar_lea.sflag [#allocation12], %s459_s21 }
 0x112   : > { %s14429_s10 = scalar_lea.vmem [#allocation11], %s11800_s3 }
 0x113   : > { %13953 = dma.done.wait (%p16179_p3), %s496_s17, 288  }
 0x114   : > { %13955 = vsyncadd (%p16179_p3), %s496_s17, 4294967008  ;;  %s11801_s14 = smul.u32 12, %s14395_s23  ;;  %s514_s18 = scalar_lea.sflag [#allocation15], %s14395_s23 }
 0x115   : > { %s14439_s29 = scalar_lea.vmem [#allocation14], %s11800_s3 }
 0x116   : > { %s14436_s1 = scalar_lea.vmem [#allocation13], %s11801_s14 }
 0x117   : > { %13957 = dma.done.wait (%p16179_p3), %s514_s18, 96  }
 0x118   : > { %13959 = vsyncadd (%p16179_p3), %s514_s18, 4294967200  ;;  %v11893_v0 = vld [vmem:[%s14418_s19 + $0x4] ss:$24 sps:$4 sm:$0xff]   ;;  %v11897_v2 = vld [vmem:[%s14418_s19] ss:$24 sps:$4 sm:$0xff]   ;;  %s13992_s15 = smov 32  }
 0x119   : > { %v11895_v1 = vld [vmem:[%s14418_s19 + $0x30c] ss:$24 sps:$4 sm:$0xff]   ;;  %2370 = vmatprep.subr.bf16.mxu0 %v11893_v0  ;;  %v11898_v3 = vld [vmem:[%s14418_s19 + $0x308] ss:$24 sps:$4 sm:$0xff]   ;;  %v11901_v5 = vld [vmem:[%s14418_s19 + $0x33c] ss:$24 sps:$4 sm:$0xff]  }
 0x11a   : > { %2534 = vmatprep.subr.bf16.mxu1 %v11895_v1  ;;  %v11899_v4 = vld [vmem:[%s14418_s19 + $0x34] ss:$24 sps:$4 sm:$0xff]   ;;  %2371 = vmatpush1.bf16.msra.mxu0 %v11897_v2  ;;  %v11903_v6 = vld [vmem:[%s14418_s19 + $0x30] ss:$24 sps:$4 sm:$0xff]   ;;  %v11905_v8 = vld [vmem:[%s14418_s19 + $0x64] ss:$24 sps:$4 sm:$0xff]  }
 0x11b   : > { %2535 = vmatpush1.bf16.msra.mxu1 %v11898_v3  ;;  %2372 = vmatprep.subr.bf16.mxu0 %v11899_v4  ;;  %v11904_v7 = vld [vmem:[%s14418_s19 + $0x338] ss:$24 sps:$4 sm:$0xff]   ;;  %v11907_v9 = vld [vmem:[%s14418_s19 + $0x36c] ss:$24 sps:$4 sm:$0xff]   ;;  %v11910_v11 = vld [vmem:[%s14418_s19 + $0x368] ss:$24 sps:$4 sm:$0xff]  }
 0x11c   : > { %2536 = vmatprep.subr.bf16.mxu1 %v11901_v5  ;;  %v11909_v10 = vld [vmem:[%s14418_s19 + $0x60] ss:$24 sps:$4 sm:$0xff]   ;;  %v11911_v12 = vld [vmem:[%s14418_s19 + $0x94] ss:$24 sps:$4 sm:$0xff]   ;;  %v11915_v14 = vld [vmem:[%s14418_s19 + $0x90] ss:$24 sps:$4 sm:$0xff]  }
 0x11d   : > { %v11913_v13 = vld [vmem:[%s14418_s19 + $0x39c] ss:$24 sps:$4 sm:$0xff]   ;;  %v11916_v15 = vld [vmem:[%s14418_s19 + $0x398] ss:$24 sps:$4 sm:$0xff]   ;;  %v11919_v17 = vld [vmem:[%s14418_s19 + $0x3cc] ss:$24 sps:$4 sm:$0xff]  }
 0x11e   : > { %2373 = vmatpush1.bf16.msra.mxu0 %v11903_v6  ;;  %v11917_v16 = vld [vmem:[%s14418_s19 + $0xc4] ss:$24 sps:$4 sm:$0xff]   ;;  %v11921_v18 = vld [vmem:[%s14418_s19 + $0xc0] ss:$24 sps:$4 sm:$0xff]   ;;  %v11923_v20 = vld [vmem:[%s14418_s19 + $0xf4] ss:$24 sps:$4 sm:$0xff]  }
 0x11f   : > { %2537 = vmatpush1.bf16.msra.mxu1 %v11904_v7  ;;  %2374 = vmatprep.subr.bf16.mxu0 %v11905_v8  ;;  %v11922_v19 = vld [vmem:[%s14418_s19 + $0x3c8] ss:$24 sps:$4 sm:$0xff]   ;;  %v11925_v21 = vld [vmem:[%s14418_s19 + $0x3fc] ss:$24 sps:$4 sm:$0xff]   ;;  %v11928_v23 = vld [vmem:[%s14418_s19 + $0x3f8] ss:$24 sps:$4 sm:$0xff]  }
 0x120   : > { %2538 = vmatprep.subr.bf16.mxu1 %v11907_v9  ;;  %v11927_v22 = vld [vmem:[%s14418_s19 + $0xf0] ss:$24 sps:$4 sm:$0xff]   ;;  %v11929_v24 = vld [vmem:[%s14418_s19 + $0x124] ss:$24 sps:$4 sm:$0xff]   ;;  %v11933_v26 = vld [vmem:[%s14418_s19 + $0x120] ss:$24 sps:$4 sm:$0xff]  }
 0x121   : > { %v11931_v25 = vld [vmem:[%s14418_s19 + $0x42c] ss:$24 sps:$4 sm:$0xff]   ;;  %v11934_v27 = vld [vmem:[%s14418_s19 + $0x428] ss:$24 sps:$4 sm:$0xff]   ;;  %v11937_v29 = vld [vmem:[%s14418_s19 + $0x45c] ss:$24 sps:$4 sm:$0xff]  }
 0x122   : > { %2375 = vmatpush1.bf16.msra.mxu0 %v11909_v10  ;;  %v11935_v28 = vld [vmem:[%s14418_s19 + $0x154] ss:$24 sps:$4 sm:$0xff]   ;;  %v11939_v30 = vld [vmem:[%s14418_s19 + $0x150] ss:$24 sps:$4 sm:$0xff]   ;;  %v11941_v32 = vld [vmem:[%s14418_s19 + $0x184] ss:$24 sps:$4 sm:$0xff]  }
 0x123   : > { %2539 = vmatpush1.bf16.msra.mxu1 %v11910_v11  ;;  %2376 = vmatprep.subr.bf16.mxu0 %v11911_v12  ;;  %v11940_v31 = vld [vmem:[%s14418_s19 + $0x458] ss:$24 sps:$4 sm:$0xff]   ;;  %v11943_v33 = vld [vmem:[%s14418_s19 + $0x48c] ss:$24 sps:$4 sm:$0xff]   ;;  %v11946_v35 = vld [vmem:[%s14418_s19 + $0x488] ss:$24 sps:$4 sm:$0xff]  }
 0x124   : > { %2540 = vmatprep.subr.bf16.mxu1 %v11913_v13  ;;  %v11945_v34 = vld [vmem:[%s14418_s19 + $0x180] ss:$24 sps:$4 sm:$0xff]   ;;  %v11947_v36 = vld [vmem:[%s14418_s19 + $0x1b4] ss:$24 sps:$4 sm:$0xff]   ;;  %v11951_v38 = vld [vmem:[%s14418_s19 + $0x1b0] ss:$24 sps:$4 sm:$0xff]  }
 0x125   : > { %v11949_v37 = vld [vmem:[%s14418_s19 + $0x4bc] ss:$24 sps:$4 sm:$0xff]   ;;  %v11952_v39 = vld [vmem:[%s14418_s19 + $0x4b8] ss:$24 sps:$4 sm:$0xff]   ;;  %v11955_v41 = vld [vmem:[%s14418_s19 + $0x4ec] ss:$24 sps:$4 sm:$0xff]  }
 0x126   : > { %2377 = vmatpush1.bf16.msra.mxu0 %v11915_v14  ;;  %v11953_v40 = vld [vmem:[%s14418_s19 + $0x1e4] ss:$24 sps:$4 sm:$0xff]   ;;  %v11957_v42 = vld [vmem:[%s14418_s19 + $0x1e0] ss:$24 sps:$4 sm:$0xff]   ;;  %v11959_v44 = vld [vmem:[%s14418_s19 + $0x214] ss:$24 sps:$4 sm:$0xff]  }
 0x127   : > { %2541 = vmatpush1.bf16.msra.mxu1 %v11916_v15  ;;  %2378 = vmatprep.subr.bf16.mxu0 %v11917_v16  ;;  %v11958_v43 = vld [vmem:[%s14418_s19 + $0x4e8] ss:$24 sps:$4 sm:$0xff]   ;;  %v11961_v45 = vld [vmem:[%s14418_s19 + $0x51c] ss:$24 sps:$4 sm:$0xff]   ;;  %v11964_v49 = vld [vmem:[%s14418_s19 + $0x518] ss:$24 sps:$4 sm:$0xff]  }
 0x128   : > { %2542 = vmatprep.subr.bf16.mxu1 %v11919_v17  ;;  %v587_v46 = vld [vmem:[%s14402_s20 + $0x8] sm:$0xff]  ;;  %v589_v50 = vld [vmem:[%s14402_s20 + $0x18] sm:$0xff]  ;;  %v586_v5 = vld [vmem:[%s14402_s20] sm:$0xff]  ;;  %vm13994_vm0 = vmmov 0   ;;  %vm7015_vm1 = vcmask 785408   ;;  %vm7062_vm2 = vcmask 64512  }
 0x129   : > { %v11963_v47 = vld [vmem:[%s14418_s19 + $0x210] ss:$24 sps:$4 sm:$0xff]   ;;  %v14493_v48 = vpack.c.bf16 %v587_v46, %v587_v46  ;;  %v11965_v51 = vld [vmem:[%s14418_s19 + $0x244] ss:$24 sps:$4 sm:$0xff]   ;;  %v14499_v53 = vpack.c.bf16 %v589_v50, %v589_v50  ;;  %v11969_v54 = vld [vmem:[%s14418_s19 + $0x240] ss:$24 sps:$4 sm:$0xff]   ;;  %v14523_v10 = vpack.c.bf16 %v586_v5, %v586_v5 }
 0x12a   : > { %2379 = vmatpush1.bf16.msra.mxu0 %v11921_v18  ;;  %v11967_v52 = vld [vmem:[%s14418_s19 + $0x54c] ss:$24 sps:$4 sm:$0xff]   ;;  %v11970_v55 = vld [vmem:[%s14418_s19 + $0x548] ss:$24 sps:$4 sm:$0xff]   ;;  %v11973_v57 = vld [vmem:[%s14418_s19 + $0x57c] ss:$24 sps:$4 sm:$0xff]  }
 0x12b   : > { %2543 = vmatpush1.bf16.msra.mxu1 %v11922_v19  ;;  %2380 = vmatprep.subr.bf16.mxu0 %v11923_v20  ;;  %v11971_v56 = vld [vmem:[%s14418_s19 + $0x274] ss:$24 sps:$4 sm:$0xff]   ;;  %v11975_v58 = vld [vmem:[%s14418_s19 + $0x270] ss:$24 sps:$4 sm:$0xff]   ;;  %v11977_v60 = vld [vmem:[%s14418_s19 + $0x2a4] ss:$24 sps:$4 sm:$0xff]  }
 0x12c   : > { %2544 = vmatprep.subr.bf16.mxu1 %v11925_v21  ;;  %2402 = vmatprep.mubr.bf16.mxu0 %v14493_v48  ;;  %v11976_v59 = vld [vmem:[%s14418_s19 + $0x578] ss:$24 sps:$4 sm:$0xff]   ;;  %v11979_v61 = vld [vmem:[%s14418_s19 + $0x5ac] ss:$24 sps:$4 sm:$0xff]   ;;  %v11982_v63 = vld [vmem:[%s14418_s19 + $0x5a8] ss:$24 sps:$4 sm:$0xff]  }
 0x12d   : > { %2566 = vmatprep.mubr.bf16.mxu1 %v14499_v53  ;;  %v11981_v62 = vld [vmem:[%s14418_s19 + $0x2a0] ss:$24 sps:$4 sm:$0xff]   ;;  %v11983_v0 = vld [vmem:[%s14418_s19 + $0x2d4] ss:$24 sps:$4 sm:$0xff]   ;;  %v11987_v2 = vld [vmem:[%s14418_s19 + $0x2d0] ss:$24 sps:$4 sm:$0xff]  }
 0x12e   : > { %2381 = vmatpush1.bf16.msra.mxu0 %v11927_v22  ;;  %v11985_v1 = vld [vmem:[%s14418_s19 + $0x5dc] ss:$24 sps:$4 sm:$0xff]   ;;  %v11988_v3 = vld [vmem:[%s14418_s19 + $0x5d8] ss:$24 sps:$4 sm:$0xff]   ;;  %v11994_v7 = vld [vmem:[%s14418_s19 + $0x60c] ss:$24 sps:$4 sm:$0xff]  }
 0x12f   : > { %2545 = vmatpush1.bf16.msra.mxu1 %v11928_v23  ;;  %2382 = vmatprep.subr.bf16.mxu0 %v11929_v24  ;;  %v11991_v4 = vld [vmem:[%s14418_s19 + $0x304] ss:$24 sps:$4 sm:$0xff]   ;;  %v11989_v8 = vld [vmem:[%s14418_s19 + $0x300] ss:$24 sps:$4 sm:$0xff]   ;;  %v11997_v12 = vld [vmem:[%s14418_s19 + $0x334] ss:$24 sps:$4 sm:$0xff]  }
 0x130   : > { %2546 = vmatprep.subr.bf16.mxu1 %v11931_v25  ;;  %v588_v6 = vld [vmem:[%s14402_s20 + $0x10] sm:$0xff]  ;;  %vm7078_vm3 = vcmask 1043456   ;;  %vm7128_vm4 = vcmask 261120   ;;  %s13995_s25 = smov 64   ;;  %vm7253_vm5 = vcmask 523264   ;;  %s13996_s0 = smov 96  }
 0x131   : > { %v11992_v9 = vld [vmem:[%s14418_s19 + $0x608] ss:$24 sps:$4 sm:$0xff]   ;;  %v14525_v11 = vpack.c.bf16 %v588_v6, %v588_v6  ;;  %v12000_v13 = vld [vmem:[%s14418_s19 + $0x63c] ss:$24 sps:$4 sm:$0xff]   ;;  %v11998_v15 = vld [vmem:[%s14418_s19 + $0x638] ss:$24 sps:$4 sm:$0xff]  }
 0x132   : > { %2383 = vmatpush1.bf16.msra.mxu0 %v11933_v26  ;;  %v11995_v14 = vld [vmem:[%s14418_s19 + $0x330] ss:$24 sps:$4 sm:$0xff]   ;;  %v12003_v16 = vld [vmem:[%s14418_s19 + $0x364] ss:$24 sps:$4 sm:$0xff]   ;;  %v12001_v18 = vld [vmem:[%s14418_s19 + $0x360] ss:$24 sps:$4 sm:$0xff]  }
 0x133   : > { %2547 = vmatpush1.bf16.msra.mxu1 %v11934_v27  ;;  %2384 = vmatprep.subr.bf16.mxu0 %v11935_v28  ;;  %v12006_v17 = vld [vmem:[%s14418_s19 + $0x66c] ss:$24 sps:$4 sm:$0xff]   ;;  %v12004_v19 = vld [vmem:[%s14418_s19 + $0x668] ss:$24 sps:$4 sm:$0xff]   ;;  %v12012_v21 = vld [vmem:[%s14418_s19 + $0x69c] ss:$24 sps:$4 sm:$0xff]  }
 0x134   : > { %2548 = vmatprep.subr.bf16.mxu1 %v11937_v29  ;;  %v12009_v20 = vld [vmem:[%s14418_s19 + $0x394] ss:$24 sps:$4 sm:$0xff]   ;;  %v12007_v22 = vld [vmem:[%s14418_s19 + $0x390] ss:$24 sps:$4 sm:$0xff]   ;;  %v12015_v24 = vld [vmem:[%s14418_s19 + $0x3c4] ss:$24 sps:$4 sm:$0xff]  }
 0x135   : > { %v12010_v23 = vld [vmem:[%s14418_s19 + $0x698] ss:$24 sps:$4 sm:$0xff]   ;;  %v12018_v25 = vld [vmem:[%s14418_s19 + $0x6cc] ss:$24 sps:$4 sm:$0xff]   ;;  %v12016_v27 = vld [vmem:[%s14418_s19 + $0x6c8] ss:$24 sps:$4 sm:$0xff]  }
 0x136   : > { %2385 = vmatpush1.bf16.msra.mxu0 %v11939_v30  ;;  %v12013_v26 = vld [vmem:[%s14418_s19 + $0x3c0] ss:$24 sps:$4 sm:$0xff]   ;;  %v12021_v28 = vld [vmem:[%s14418_s19 + $0x3f4] ss:$24 sps:$4 sm:$0xff]   ;;  %v12019_v30 = vld [vmem:[%s14418_s19 + $0x3f0] ss:$24 sps:$4 sm:$0xff]  }
 0x137   : > { %2549 = vmatpush1.bf16.msra.mxu1 %v11940_v31  ;;  %2386 = vmatprep.subr.bf16.mxu0 %v11941_v32  ;;  %v12024_v29 = vld [vmem:[%s14418_s19 + $0x6fc] ss:$24 sps:$4 sm:$0xff]   ;;  %v12022_v31 = vld [vmem:[%s14418_s19 + $0x6f8] ss:$24 sps:$4 sm:$0xff]   ;;  %v12078_v5 = vld [vmem:[%s14418_s19 + $0x8ac] ss:$24 sps:$4 sm:$0xff]  }
 0x138   : > { %2550 = vmatprep.subr.bf16.mxu1 %v11943_v33  ;;  %v12027_v32 = vld [vmem:[%s14418_s19 + $0x424] ss:$24 sps:$4 sm:$0xff]   ;;  %v12045_v46 = vld [vmem:[%s14418_s19 + $0x4b4] ss:$24 sps:$4 sm:$0xff]   ;;  %v12046_v50 = vld [vmem:[%s14418_s19 + $0x7b8] ss:$24 sps:$4 sm:$0xff]  }
 0x139   : > { %v12030_v33 = vld [vmem:[%s14418_s19 + $0x72c] ss:$24 sps:$4 sm:$0xff]   ;;  %v12073_v6 = vld [vmem:[%s14418_s19 + $0x5a0] ss:$24 sps:$4 sm:$0xff]   ;;  %s584_s4 = scalar_lea.vmem [#allocation16], %s14398_s2  ;;  %p16180_p5 = scmp.ne.s32.totalorder %s16155_s16, 0 }
 0x13a   : > { %2387 = vmatpush1.bf16.msra.mxu0 %v11945_v34  ;;  %v591_v34 = vld [vmem:[%s14402_s20 + $0x28] sm:$0xff]  ;;  %s10130_s21 = sshll.u32 %s584_s4, 4  ;;  %s13997_s13 = smov [#allocation16]   ;;  %s16079_s21 = int_to_ptr.vmem [resolvable:$true] %s10130_s21 }
 0x13b   : > { %2551 = vmatpush1.bf16.msra.mxu1 %v11946_v35  ;;  %2388 = vmatprep.subr.bf16.mxu0 %v11947_v36  ;;  %v14553_v35 = vpack.c.bf16 %v591_v34, %v591_v34  ;;  %v12025_v36 = vld [vmem:[%s14418_s19 + $0x420] ss:$24 sps:$4 sm:$0xff]   ;;  %v12111_v34 = vld [vmem:[%s14418_s19 + $0x6c4] ss:$24 sps:$4 sm:$0xff]   ;;  %s13896_s27 = scalar_lea.vmem %s16079_s21, 768 }
 0x13c   : > { %2552 = vmatprep.subr.bf16.mxu1 %v11949_v37  ;;  %v12028_v37 = vld [vmem:[%s14418_s19 + $0x728] ss:$24 sps:$4 sm:$0xff]   ;;  %p13897_p9 = scmp.ne.s32.totalorder %s16079_s21, %s13896_s27 }
 0x13e   : > { %2389 = vmatpush1.bf16.msra.mxu0 %v11951_v38  ;;  %v12033_v38 = vld [vmem:[%s14418_s19 + $0x454] ss:$24 sps:$4 sm:$0xff]   ;;  %p13898_p12 = pnand %p13897_p9, %p16180_p5 }
 0x13f   : > { %2553 = vmatpush1.bf16.msra.mxu1 %v11952_v39  ;;  %2390 = vmatprep.subr.bf16.mxu0 %v11953_v40  ;;  %v12036_v39 = vld [vmem:[%s14418_s19 + $0x75c] ss:$24 sps:$4 sm:$0xff]   ;;  %v12031_v40 = vld [vmem:[%s14418_s19 + $0x450] ss:$24 sps:$4 sm:$0xff]  }
 0x140   : > { %2554 = vmatprep.subr.bf16.mxu1 %v11955_v41  ;;  %v12034_v41 = vld [vmem:[%s14418_s19 + $0x758] ss:$24 sps:$4 sm:$0xff]   ;;  %p13899_p7 = pneg %p13898_p12 }
 0x142   : > { %2391 = vmatpush1.bf16.msra.mxu0 %v11957_v42  ;;  %v12039_v42 = vld [vmem:[%s14418_s19 + $0x484] ss:$24 sps:$4 sm:$0xff]  }
 0x143   : > { %2555 = vmatpush1.bf16.msra.mxu1 %v11958_v43  ;;  %2392 = vmatprep.subr.bf16.mxu0 %v11959_v44  ;;  %v12042_v43 = vld [vmem:[%s14418_s19 + $0x78c] ss:$24 sps:$4 sm:$0xff]   ;;  %v12037_v44 = vld [vmem:[%s14418_s19 + $0x480] ss:$24 sps:$4 sm:$0xff]  }
 0x144   : > { %2556 = vmatprep.subr.bf16.mxu1 %v11961_v45  ;;  %v12040_v45 = vld [vmem:[%s14418_s19 + $0x788] ss:$24 sps:$4 sm:$0xff]  }
 0x146   : > { %2393 = vmatpush1.bf16.msra.mxu0 %v11963_v47  ;;  %v12048_v47 = vld [vmem:[%s14418_s19 + $0x7bc] ss:$24 sps:$4 sm:$0xff]  }
 0x147   : > { %2557 = vmatpush1.bf16.msra.mxu1 %v11964_v49  ;;  %2394 = vmatprep.subr.bf16.mxu0 %v11965_v51  ;;  %v12043_v49 = vld [vmem:[%s14418_s19 + $0x4b0] ss:$24 sps:$4 sm:$0xff]   ;;  %v12051_v51 = vld [vmem:[%s14418_s19 + $0x4e4] ss:$24 sps:$4 sm:$0xff]  }
 0x148   : > { %2558 = vmatprep.subr.bf16.mxu1 %v11967_v52  ;;  %v12054_v52 = vld [vmem:[%s14418_s19 + $0x7ec] ss:$24 sps:$4 sm:$0xff]  }
 0x14a   : > { %2395 = vmatpush1.bf16.msra.mxu0 %v11969_v54  ;;  %v12049_v54 = vld [vmem:[%s14418_s19 + $0x4e0] ss:$24 sps:$4 sm:$0xff]  }
 0x14b   : > { %2559 = vmatpush1.bf16.msra.mxu1 %v11970_v55  ;;  %2396 = vmatprep.subr.bf16.mxu0 %v11971_v56  ;;  %v12052_v55 = vld [vmem:[%s14418_s19 + $0x7e8] ss:$24 sps:$4 sm:$0xff]   ;;  %v12057_v56 = vld [vmem:[%s14418_s19 + $0x514] ss:$24 sps:$4 sm:$0xff]  }
 0x14c   : > { %2560 = vmatprep.subr.bf16.mxu1 %v11973_v57  ;;  %v12060_v57 = vld [vmem:[%s14418_s19 + $0x81c] ss:$24 sps:$4 sm:$0xff]  }
 0x14e   : > { %2397 = vmatpush1.bf16.msra.mxu0 %v11975_v58  ;;  %v12055_v58 = vld [vmem:[%s14418_s19 + $0x510] ss:$24 sps:$4 sm:$0xff]  }
 0x14f   : > { %2561 = vmatpush1.bf16.msra.mxu1 %v11976_v59  ;;  %2398 = vmatprep.subr.bf16.mxu0 %v11977_v60  ;;  %v12058_v59 = vld [vmem:[%s14418_s19 + $0x818] ss:$24 sps:$4 sm:$0xff]   ;;  %v12063_v60 = vld [vmem:[%s14418_s19 + $0x544] ss:$24 sps:$4 sm:$0xff]  }
 0x150   : > { %2562 = vmatprep.subr.bf16.mxu1 %v11979_v61  ;;  %v12066_v61 = vld [vmem:[%s14418_s19 + $0x84c] ss:$24 sps:$4 sm:$0xff]  }
 0x152   : > { %2399 = vmatpush1.bf16.msra.mxu0 %v11981_v62  ;;  %v12061_v62 = vld [vmem:[%s14418_s19 + $0x540] ss:$24 sps:$4 sm:$0xff]  }
 0x153   : > { %2563 = vmatpush1.bf16.msra.mxu1 %v11982_v63  ;;  %2400 = vmatprep.subr.bf16.mxu0 %v11983_v0  ;;  %v12064_v63 = vld [vmem:[%s14418_s19 + $0x848] ss:$24 sps:$4 sm:$0xff]   ;;  %v12069_v0 = vld [vmem:[%s14418_s19 + $0x574] ss:$24 sps:$4 sm:$0xff]  }
 0x154   : > { %2564 = vmatprep.subr.bf16.mxu1 %v11985_v1  ;;  %v12072_v1 = vld [vmem:[%s14418_s19 + $0x87c] ss:$24 sps:$4 sm:$0xff]  }
 0x156   : > { %2401 = vmatpush1.bf16.msra.mxu0 %v11987_v2  ;;  %v12067_v2 = vld [vmem:[%s14418_s19 + $0x570] ss:$24 sps:$4 sm:$0xff]  }
 0x157   : > { %2565 = vmatpush1.bf16.msra.mxu1 %v11988_v3  ;;  %2411 = vmatprep.subr.bf16.mxu0 %v11991_v4  ;;  %v12070_v3 = vld [vmem:[%s14418_s19 + $0x878] ss:$24 sps:$4 sm:$0xff]   ;;  %v12075_v4 = vld [vmem:[%s14418_s19 + $0x5a4] ss:$24 sps:$4 sm:$0xff]  }
 0x158   : > { %2575 = vmatprep.subr.bf16.mxu1 %v11994_v7  ;;  %v12076_v7 = vld [vmem:[%s14418_s19 + $0x8a8] ss:$24 sps:$4 sm:$0xff]  }
 0x159   : > { %2403 = vmatmul.mubr.bf16.vlgmr.msra.gmra.mrb[0].mxu0 %v14523_v10 }
 0x15a   : > { %2567 = vmatmul.mubr.bf16.vlgmr.msra.gmra.mrb[0].mxu1 %v14525_v11  ;;  %2412 = vmatpush1.bf16.msra.mxu0 %v11989_v8  ;;  %v12081_v8 = vld [vmem:[%s14418_s19 + $0x5d4] ss:$24 sps:$4 sm:$0xff]  }
 0x15b   : > { %2576 = vmatpush1.bf16.msra.mxu1 %v11992_v9  ;;  %2413 = vmatprep.subr.bf16.mxu0 %v11997_v12  ;;  %v12084_v9 = vld [vmem:[%s14418_s19 + $0x8dc] ss:$24 sps:$4 sm:$0xff]   ;;  %v12079_v12 = vld [vmem:[%s14418_s19 + $0x5d0] ss:$24 sps:$4 sm:$0xff]  }
 0x15c   : > { %2577 = vmatprep.subr.bf16.mxu1 %v12000_v13  ;;  %2443 = vmatprep.mubr.bf16.mxu0 %v14499_v53  ;;  %v12082_v13 = vld [vmem:[%s14418_s19 + $0x8d8] ss:$24 sps:$4 sm:$0xff]  }
 0x15d   : > { %2607 = vmatprep.mubr.bf16.mxu1 %v14553_v35 }
 0x15e   : > { %2414 = vmatpush1.bf16.msra.mxu0 %v11995_v14  ;;  %v590_v14 = vld [vmem:[%s14402_s20 + $0x20] sm:$0xff]  ;;  %s11802_s20 = smul.u32 768, %s14064_s9  ;;  %s10116_s9 = scalar_lea.sflag [#allocation4], %s14395_s23 }
 0x15f   : > { %2578 = vmatpush1.bf16.msra.mxu1 %v11998_v15  ;;  %2415 = vmatprep.subr.bf16.mxu0 %v12003_v16  ;;  %v12087_v15 = vld [vmem:[%s14418_s19 + $0x604] ss:$24 sps:$4 sm:$0xff]  }
 0x160   : > { %2579 = vmatprep.subr.bf16.mxu1 %v12006_v17  ;;  %v12090_v16 = vld [vmem:[%s14420_s22 + $0x4] ss:$48 sps:$4 sm:$0xff]   ;;  %v14597_v17 = vpack.c.bf16 %v590_v14, %v590_v14  ;;  %v12166_v14 = vld [vmem:[%s14420_s22 + $0x4e0] ss:$48 sps:$4 sm:$0xff]  }
 0x162   : > { %2416 = vmatpush1.bf16.msra.mxu0 %v12001_v18  ;;  %v12085_v18 = vld [vmem:[%s14418_s19 + $0x600] ss:$24 sps:$4 sm:$0xff]  }
 0x163   : > { %2580 = vmatpush1.bf16.msra.mxu1 %v12004_v19  ;;  %2417 = vmatprep.subr.bf16.mxu0 %v12009_v20  ;;  %v12088_v19 = vld [vmem:[%s14420_s22] ss:$48 sps:$4 sm:$0xff]   ;;  %v12093_v20 = vld [vmem:[%s14418_s19 + $0x634] ss:$24 sps:$4 sm:$0xff]  }
 0x164   : > { %2581 = vmatprep.subr.bf16.mxu1 %v12012_v21  ;;  %v12096_v21 = vld [vmem:[%s14420_s22 + $0x64] ss:$48 sps:$4 sm:$0xff]  }
 0x166   : > { %2418 = vmatpush1.bf16.msra.mxu0 %v12007_v22  ;;  %v12091_v22 = vld [vmem:[%s14418_s19 + $0x630] ss:$24 sps:$4 sm:$0xff]  }
 0x167   : > { %2582 = vmatpush1.bf16.msra.mxu1 %v12010_v23  ;;  %2419 = vmatprep.subr.bf16.mxu0 %v12015_v24  ;;  %v599_v23 = vld [vmem:[%s14410_s11 + $0x8] sm:$0xff]  ;;  %v12094_v24 = vld [vmem:[%s14420_s22 + $0x60] ss:$48 sps:$4 sm:$0xff]  }
 0x168   : > { %2583 = vmatprep.subr.bf16.mxu1 %v12018_v25  ;;  %v12099_v25 = vld [vmem:[%s14418_s19 + $0x664] ss:$24 sps:$4 sm:$0xff]  }
 0x16a   : > { %2420 = vmatpush1.bf16.msra.mxu0 %v12013_v26  ;;  %v14609_v26 = vpack.c.bf16 %v599_v23, %v599_v23  ;;  %v12178_v23 = vld [vmem:[%s14420_s22 + $0x5a0] ss:$48 sps:$4 sm:$0xff]  }
 0x16b   : > { %2584 = vmatpush1.bf16.msra.mxu1 %v12016_v27  ;;  %2421 = vmatprep.subr.bf16.mxu0 %v12021_v28  ;;  %v12102_v27 = vld [vmem:[%s14420_s22 + $0xc4] ss:$48 sps:$4 sm:$0xff]   ;;  %v12097_v28 = vld [vmem:[%s14418_s19 + $0x660] ss:$24 sps:$4 sm:$0xff]  }
 0x16c   : > { %2585 = vmatprep.subr.bf16.mxu1 %v12024_v29  ;;  %v12100_v29 = vld [vmem:[%s14420_s22 + $0xc0] ss:$48 sps:$4 sm:$0xff]  }
 0x16e   : > { %2422 = vmatpush1.bf16.msra.mxu0 %v12019_v30  ;;  %v12105_v30 = vld [vmem:[%s14418_s19 + $0x694] ss:$24 sps:$4 sm:$0xff]  }
 0x16f   : > { %2586 = vmatpush1.bf16.msra.mxu1 %v12022_v31  ;;  %2423 = vmatprep.subr.bf16.mxu0 %v12027_v32  ;;  %v12108_v31 = vld [vmem:[%s14420_s22 + $0x124] ss:$48 sps:$4 sm:$0xff]   ;;  %v12103_v32 = vld [vmem:[%s14418_s19 + $0x690] ss:$24 sps:$4 sm:$0xff]  }
 0x170   : > { %2587 = vmatprep.subr.bf16.mxu1 %v12030_v33  ;;  %v12106_v33 = vld [vmem:[%s14420_s22 + $0x120] ss:$48 sps:$4 sm:$0xff]  }
 0x172   : > { %2424 = vmatpush1.bf16.msra.mxu0 %v12025_v36  ;;  %v12114_v36 = vld [vmem:[%s14420_s22 + $0x184] ss:$48 sps:$4 sm:$0xff]  }
 0x173   : > { %2588 = vmatpush1.bf16.msra.mxu1 %v12028_v37  ;;  %2425 = vmatprep.subr.bf16.mxu0 %v12033_v38  ;;  %v12109_v37 = vld [vmem:[%s14418_s19 + $0x6c0] ss:$24 sps:$4 sm:$0xff]  }
 0x174   : > { %2589 = vmatprep.subr.bf16.mxu1 %v12036_v39  ;;  %v12112_v38 = vld [vmem:[%s14420_s22 + $0x180] ss:$48 sps:$4 sm:$0xff]   ;;  %v12117_v39 = vld [vmem:[%s14418_s19 + $0x6f4] ss:$24 sps:$4 sm:$0xff]  }
 0x176   : > { %2426 = vmatpush1.bf16.msra.mxu0 %v12031_v40  ;;  %v12120_v40 = vld [vmem:[%s14420_s22 + $0x1e4] ss:$48 sps:$4 sm:$0xff]  }
 0x177   : > { %2590 = vmatpush1.bf16.msra.mxu1 %v12034_v41  ;;  %2427 = vmatprep.subr.bf16.mxu0 %v12039_v42  ;;  %v12115_v41 = vld [vmem:[%s14418_s19 + $0x6f0] ss:$24 sps:$4 sm:$0xff]  }
 0x178   : > { %2591 = vmatprep.subr.bf16.mxu1 %v12042_v43  ;;  %v12118_v42 = vld [vmem:[%s14420_s22 + $0x1e0] ss:$48 sps:$4 sm:$0xff]   ;;  %v12123_v43 = vld [vmem:[%s14418_s19 + $0x724] ss:$24 sps:$4 sm:$0xff]  }
 0x17a   : > { %2428 = vmatpush1.bf16.msra.mxu0 %v12037_v44  ;;  %v12126_v44 = vld [vmem:[%s14420_s22 + $0x244] ss:$48 sps:$4 sm:$0xff]  }
 0x17b   : > { %2592 = vmatpush1.bf16.msra.mxu1 %v12040_v45  ;;  %2429 = vmatprep.subr.bf16.mxu0 %v12045_v46  ;;  %v12121_v45 = vld [vmem:[%s14418_s19 + $0x720] ss:$24 sps:$4 sm:$0xff]  }
 0x17c   : > { %2593 = vmatprep.subr.bf16.mxu1 %v12048_v47  ;;  %v12124_v46 = vld [vmem:[%s14420_s22 + $0x240] ss:$48 sps:$4 sm:$0xff]   ;;  %v12129_v47 = vld [vmem:[%s14418_s19 + $0x754] ss:$24 sps:$4 sm:$0xff]  }
 0x17e   : > { %2430 = vmatpush1.bf16.msra.mxu0 %v12043_v49  ;;  %v12132_v49 = vld [vmem:[%s14420_s22 + $0x2a4] ss:$48 sps:$4 sm:$0xff]  }
 0x17f   : > { %2594 = vmatpush1.bf16.msra.mxu1 %v12046_v50  ;;  %2431 = vmatprep.subr.bf16.mxu0 %v12051_v51  ;;  %v12127_v50 = vld [vmem:[%s14418_s19 + $0x750] ss:$24 sps:$4 sm:$0xff]  }
 0x180   : > { %2595 = vmatprep.subr.bf16.mxu1 %v12054_v52  ;;  %v12130_v51 = vld [vmem:[%s14420_s22 + $0x2a0] ss:$48 sps:$4 sm:$0xff]   ;;  %v12135_v52 = vld [vmem:[%s14418_s19 + $0x784] ss:$24 sps:$4 sm:$0xff]  }
 0x182   : > { %2432 = vmatpush1.bf16.msra.mxu0 %v12049_v54  ;;  %v12138_v54 = vld [vmem:[%s14420_s22 + $0x304] ss:$48 sps:$4 sm:$0xff]  }
 0x183   : > { %2596 = vmatpush1.bf16.msra.mxu1 %v12052_v55  ;;  %2433 = vmatprep.subr.bf16.mxu0 %v12057_v56  ;;  %v12133_v55 = vld [vmem:[%s14418_s19 + $0x780] ss:$24 sps:$4 sm:$0xff]  }
 0x184   : > { %2597 = vmatprep.subr.bf16.mxu1 %v12060_v57  ;;  %v12136_v56 = vld [vmem:[%s14420_s22 + $0x300] ss:$48 sps:$4 sm:$0xff]   ;;  %v12141_v57 = vld [vmem:[%s14418_s19 + $0x7b4] ss:$24 sps:$4 sm:$0xff]  }
 0x186   : > { %2434 = vmatpush1.bf16.msra.mxu0 %v12055_v58  ;;  %v12144_v58 = vld [vmem:[%s14420_s22 + $0x364] ss:$48 sps:$4 sm:$0xff]  }
 0x187   : > { %2598 = vmatpush1.bf16.msra.mxu1 %v12058_v59  ;;  %2435 = vmatprep.subr.bf16.mxu0 %v12063_v60  ;;  %v12139_v59 = vld [vmem:[%s14418_s19 + $0x7b0] ss:$24 sps:$4 sm:$0xff]  }
 0x188   : > { %2599 = vmatprep.subr.bf16.mxu1 %v12066_v61  ;;  %v12142_v60 = vld [vmem:[%s14420_s22 + $0x360] ss:$48 sps:$4 sm:$0xff]   ;;  %v12147_v61 = vld [vmem:[%s14418_s19 + $0x7e4] ss:$24 sps:$4 sm:$0xff]  }
 0x18a   : > { %2436 = vmatpush1.bf16.msra.mxu0 %v12061_v62  ;;  %v12150_v62 = vld [vmem:[%s14420_s22 + $0x3c4] ss:$48 sps:$4 sm:$0xff]  }
 0x18b   : > { %2600 = vmatpush1.bf16.msra.mxu1 %v12064_v63  ;;  %2437 = vmatprep.subr.bf16.mxu0 %v12069_v0  ;;  %v12145_v63 = vld [vmem:[%s14418_s19 + $0x7e0] ss:$24 sps:$4 sm:$0xff]  }
 0x18c   : > { %2601 = vmatprep.subr.bf16.mxu1 %v12072_v1  ;;  %v12148_v0 = vld [vmem:[%s14420_s22 + $0x3c0] ss:$48 sps:$4 sm:$0xff]   ;;  %v12153_v1 = vld [vmem:[%s14418_s19 + $0x814] ss:$24 sps:$4 sm:$0xff]  }
 0x18e   : > { %2438 = vmatpush1.bf16.msra.mxu0 %v12067_v2  ;;  %v12156_v2 = vld [vmem:[%s14420_s22 + $0x424] ss:$48 sps:$4 sm:$0xff]  }
 0x18f   : > { %2602 = vmatpush1.bf16.msra.mxu1 %v12070_v3  ;;  %2439 = vmatprep.subr.bf16.mxu0 %v12075_v4  ;;  %v12151_v3 = vld [vmem:[%s14418_s19 + $0x810] ss:$24 sps:$4 sm:$0xff]  }
 0x190   : > { %2603 = vmatprep.subr.bf16.mxu1 %v12078_v5  ;;  %v12154_v4 = vld [vmem:[%s14420_s22 + $0x420] ss:$48 sps:$4 sm:$0xff]   ;;  %v12159_v5 = vld [vmem:[%s14418_s19 + $0x844] ss:$24 sps:$4 sm:$0xff]  }
 0x192   : > { %2440 = vmatpush1.bf16.msra.mxu0 %v12073_v6  ;;  %v12162_v6 = vld [vmem:[%s14420_s22 + $0x484] ss:$48 sps:$4 sm:$0xff]  }
 0x193   : > { %2604 = vmatpush1.bf16.msra.mxu1 %v12076_v7  ;;  %2441 = vmatprep.subr.bf16.mxu0 %v12081_v8  ;;  %v12157_v7 = vld [vmem:[%s14418_s19 + $0x840] ss:$24 sps:$4 sm:$0xff]  }
 0x194   : > { %2605 = vmatprep.subr.bf16.mxu1 %v12084_v9  ;;  %v12160_v8 = vld [vmem:[%s14420_s22 + $0x480] ss:$48 sps:$4 sm:$0xff]   ;;  %v12165_v9 = vld [vmem:[%s14418_s19 + $0x874] ss:$24 sps:$4 sm:$0xff]  }
 0x196   : > { %2442 = vmatpush1.bf16.msra.mxu0 %v12079_v12  ;;  %v12168_v12 = vld [vmem:[%s14420_s22 + $0x4e4] ss:$48 sps:$4 sm:$0xff]  }
 0x197   : > { %2606 = vmatpush1.bf16.msra.mxu1 %v12082_v13  ;;  %2452 = vmatprep.subr.bf16.mxu0 %v12087_v15  ;;  %v12163_v13 = vld [vmem:[%s14418_s19 + $0x870] ss:$24 sps:$4 sm:$0xff]   ;;  %v12171_v15 = vld [vmem:[%s14418_s19 + $0x8a4] ss:$24 sps:$4 sm:$0xff]  }
 0x198   : > { %6259 = vmatprep.subr.bf16.mxu1 %v12090_v16  ;;  %v12174_v16 = vld [vmem:[%s14420_s22 + $0x544] ss:$48 sps:$4 sm:$0xff]  }
 0x199   : > { %2444 = vmatmul.mubr.bf16.vlgmr.msra.gmra.mrb[0].mxu0 %v14525_v11 }
 0x19a   : > { %2608 = vmatmul.mubr.bf16.vlgmr.msra.gmra.mrb[0].mxu1 %v14597_v17  ;;  %2453 = vmatpush1.bf16.msra.mxu0 %v12085_v18  ;;  %v12169_v18 = vld [vmem:[%s14418_s19 + $0x8a0] ss:$24 sps:$4 sm:$0xff]  }
 0x19b   : > { %6260 = vmatpush1.bf16.msra.mxu1 %v12088_v19  ;;  %2454 = vmatprep.subr.bf16.mxu0 %v12093_v20  ;;  %v12172_v19 = vld [vmem:[%s14420_s22 + $0x540] ss:$48 sps:$4 sm:$0xff]   ;;  %v12177_v20 = vld [vmem:[%s14418_s19 + $0x8d4] ss:$24 sps:$4 sm:$0xff]  }
 0x19c   : > { %6261 = vmatprep.subr.bf16.mxu1 %v12096_v21  ;;  %2484 = vmatprep.mubr.bf16.mxu0 %v14553_v35  ;;  %v12180_v21 = vld [vmem:[%s14420_s22 + $0x5a4] ss:$48 sps:$4 sm:$0xff]  }
 0x19d   : > { %6291 = vmatprep.mubr.bf16.mxu1 %v14609_v26 }
 0x19e   : > { %2455 = vmatpush1.bf16.msra.mxu0 %v12091_v22  ;;  %v12175_v22 = vld [vmem:[%s14418_s19 + $0x8d0] ss:$24 sps:$4 sm:$0xff]  }
 0x19f   : > { %6262 = vmatpush1.bf16.msra.mxu1 %v12094_v24  ;;  %2456 = vmatprep.subr.bf16.mxu0 %v12099_v25  ;;  %v598_v24 = vld [vmem:[%s14410_s11] sm:$0xff] }
 0x1a0   : > { %6263 = vmatprep.subr.bf16.mxu1 %v12102_v27  ;;  %v12183_v25 = vld [vmem:[%s14418_s19 + $0xc] ss:$24 sps:$4 sm:$0xff]  }
 0x1a1   : > { %v12186_v27 = vld [vmem:[%s14420_s22 + $0x604] ss:$48 sps:$4 sm:$0xff]  }
 0x1a2   : > { %2457 = vmatpush1.bf16.msra.mxu0 %v12097_v28  ;;  %v14671_v28 = vpack.c.bf16 %v598_v24, %v598_v24  ;;  %v12264_v24 = vld [vmem:[%s14420_s22 + $0xae4] ss:$48 sps:$4 sm:$0xff]  }
 0x1a3   : > { %6264 = vmatpush1.bf16.msra.mxu1 %v12100_v29  ;;  %2458 = vmatprep.subr.bf16.mxu0 %v12105_v30  ;;  %v601_v29 = vld [vmem:[%s14410_s11 + $0x18] sm:$0xff] }
 0x1a4   : > { %6265 = vmatprep.subr.bf16.mxu1 %v12108_v31  ;;  %v12181_v30 = vld [vmem:[%s14418_s19 + $0x8] ss:$24 sps:$4 sm:$0xff]  }
 0x1a5   : > { %v12184_v31 = vld [vmem:[%s14420_s22 + $0x600] ss:$48 sps:$4 sm:$0xff]  }
 0x1a6   : > { %2459 = vmatpush1.bf16.msra.mxu0 %v12103_v32  ;;  %v12189_v32 = vld [vmem:[%s14418_s19 + $0x3c] ss:$24 sps:$4 sm:$0xff]  }
 0x1a7   : > { %6266 = vmatpush1.bf16.msra.mxu1 %v12106_v33  ;;  %2460 = vmatprep.subr.bf16.mxu0 %v12111_v34  ;;  %v12192_v33 = vld [vmem:[%s14420_s22 + $0x664] ss:$48 sps:$4 sm:$0xff]   ;;  %v14678_v34 = vpack.c.bf16 %v601_v29, %v601_v29 }
 0x1a8   : > { %6267 = vmatprep.subr.bf16.mxu1 %v12114_v36  ;;  %v12187_v36 = vld [vmem:[%s14418_s19 + $0x38] ss:$24 sps:$4 sm:$0xff]   ;;  %v12267_v29 = vld [vmem:[%s14418_s19 + $0x2ac] ss:$24 sps:$4 sm:$0xff]  }
 0x1aa   : > { %2461 = vmatpush1.bf16.msra.mxu0 %v12109_v37  ;;  %v12190_v37 = vld [vmem:[%s14420_s22 + $0x660] ss:$48 sps:$4 sm:$0xff]  }
 0x1ab   : > { %6268 = vmatpush1.bf16.msra.mxu1 %v12112_v38  ;;  %2462 = vmatprep.subr.bf16.mxu0 %v12117_v39  ;;  %v12195_v38 = vld [vmem:[%s14418_s19 + $0x6c] ss:$24 sps:$4 sm:$0xff]  }
 0x1ac   : > { %6269 = vmatprep.subr.bf16.mxu1 %v12120_v40  ;;  %v12198_v39 = vld [vmem:[%s14420_s22 + $0x6c4] ss:$48 sps:$4 sm:$0xff]   ;;  %v12193_v40 = vld [vmem:[%s14418_s19 + $0x68] ss:$24 sps:$4 sm:$0xff]  }
 0x1ae   : > { %2463 = vmatpush1.bf16.msra.mxu0 %v12115_v41  ;;  %v12196_v41 = vld [vmem:[%s14420_s22 + $0x6c0] ss:$48 sps:$4 sm:$0xff]  }
 0x1af   : > { %6270 = vmatpush1.bf16.msra.mxu1 %v12118_v42  ;;  %2464 = vmatprep.subr.bf16.mxu0 %v12123_v43  ;;  %v12201_v42 = vld [vmem:[%s14418_s19 + $0x9c] ss:$24 sps:$4 sm:$0xff]  }
 0x1b0   : > { %6271 = vmatprep.subr.bf16.mxu1 %v12126_v44  ;;  %v12204_v43 = vld [vmem:[%s14420_s22 + $0x724] ss:$48 sps:$4 sm:$0xff]   ;;  %v12199_v44 = vld [vmem:[%s14418_s19 + $0x98] ss:$24 sps:$4 sm:$0xff]  }
 0x1b2   : > { %2465 = vmatpush1.bf16.msra.mxu0 %v12121_v45  ;;  %v12202_v45 = vld [vmem:[%s14420_s22 + $0x720] ss:$48 sps:$4 sm:$0xff]  }
 0x1b3   : > { %6272 = vmatpush1.bf16.msra.mxu1 %v12124_v46  ;;  %2466 = vmatprep.subr.bf16.mxu0 %v12129_v47  ;;  %v12207_v46 = vld [vmem:[%s14418_s19 + $0xcc] ss:$24 sps:$4 sm:$0xff]  }
 0x1b4   : > { %6273 = vmatprep.subr.bf16.mxu1 %v12132_v49  ;;  %v12210_v47 = vld [vmem:[%s14420_s22 + $0x784] ss:$48 sps:$4 sm:$0xff]   ;;  %v12205_v49 = vld [vmem:[%s14418_s19 + $0xc8] ss:$24 sps:$4 sm:$0xff]  }
 0x1b6   : > { %2467 = vmatpush1.bf16.msra.mxu0 %v12127_v50  ;;  %v12208_v50 = vld [vmem:[%s14420_s22 + $0x780] ss:$48 sps:$4 sm:$0xff]  }
 0x1b7   : > { %6274 = vmatpush1.bf16.msra.mxu1 %v12130_v51  ;;  %2468 = vmatprep.subr.bf16.mxu0 %v12135_v52  ;;  %v12213_v51 = vld [vmem:[%s14418_s19 + $0xfc] ss:$24 sps:$4 sm:$0xff]  }
 0x1b8   : > { %6275 = vmatprep.subr.bf16.mxu1 %v12138_v54  ;;  %v12216_v52 = vld [vmem:[%s14420_s22 + $0x7e4] ss:$48 sps:$4 sm:$0xff]   ;;  %v12211_v54 = vld [vmem:[%s14418_s19 + $0xf8] ss:$24 sps:$4 sm:$0xff]  }
 0x1ba   : > { %2469 = vmatpush1.bf16.msra.mxu0 %v12133_v55  ;;  %v12214_v55 = vld [vmem:[%s14420_s22 + $0x7e0] ss:$48 sps:$4 sm:$0xff]  }
 0x1bb   : > { %6276 = vmatpush1.bf16.msra.mxu1 %v12136_v56  ;;  %2470 = vmatprep.subr.bf16.mxu0 %v12141_v57  ;;  %v12219_v56 = vld [vmem:[%s14418_s19 + $0x12c] ss:$24 sps:$4 sm:$0xff]  }
 0x1bc   : > { %6277 = vmatprep.subr.bf16.mxu1 %v12144_v58  ;;  %v12222_v57 = vld [vmem:[%s14420_s22 + $0x844] ss:$48 sps:$4 sm:$0xff]   ;;  %v12217_v58 = vld [vmem:[%s14418_s19 + $0x128] ss:$24 sps:$4 sm:$0xff]  }
 0x1be   : > { %2471 = vmatpush1.bf16.msra.mxu0 %v12139_v59  ;;  %v12220_v59 = vld [vmem:[%s14420_s22 + $0x840] ss:$48 sps:$4 sm:$0xff]  }
 0x1bf   : > { %6278 = vmatpush1.bf16.msra.mxu1 %v12142_v60  ;;  %2472 = vmatprep.subr.bf16.mxu0 %v12147_v61  ;;  %v12225_v60 = vld [vmem:[%s14418_s19 + $0x15c] ss:$24 sps:$4 sm:$0xff]  }
 0x1c0   : > { %6279 = vmatprep.subr.bf16.mxu1 %v12150_v62  ;;  %v12228_v61 = vld [vmem:[%s14420_s22 + $0x8a4] ss:$48 sps:$4 sm:$0xff]   ;;  %v12223_v62 = vld [vmem:[%s14418_s19 + $0x158] ss:$24 sps:$4 sm:$0xff]  }
 0x1c2   : > { %2473 = vmatpush1.bf16.msra.mxu0 %v12145_v63  ;;  %v12226_v63 = vld [vmem:[%s14420_s22 + $0x8a0] ss:$48 sps:$4 sm:$0xff]  }
 0x1c3   : > { %6280 = vmatpush1.bf16.msra.mxu1 %v12148_v0  ;;  %2474 = vmatprep.subr.bf16.mxu0 %v12153_v1  ;;  %v12231_v0 = vld [vmem:[%s14418_s19 + $0x18c] ss:$24 sps:$4 sm:$0xff]  }
 0x1c4   : > { %6281 = vmatprep.subr.bf16.mxu1 %v12156_v2  ;;  %v12234_v1 = vld [vmem:[%s14420_s22 + $0x904] ss:$48 sps:$4 sm:$0xff]   ;;  %v12229_v2 = vld [vmem:[%s14418_s19 + $0x188] ss:$24 sps:$4 sm:$0xff]  }
 0x1c6   : > { %2475 = vmatpush1.bf16.msra.mxu0 %v12151_v3  ;;  %v12232_v3 = vld [vmem:[%s14420_s22 + $0x900] ss:$48 sps:$4 sm:$0xff]  }
 0x1c7   : > { %6282 = vmatpush1.bf16.msra.mxu1 %v12154_v4  ;;  %2476 = vmatprep.subr.bf16.mxu0 %v12159_v5  ;;  %v12237_v4 = vld [vmem:[%s14418_s19 + $0x1bc] ss:$24 sps:$4 sm:$0xff]  }
 0x1c8   : > { %6283 = vmatprep.subr.bf16.mxu1 %v12162_v6  ;;  %v12240_v5 = vld [vmem:[%s14420_s22 + $0x964] ss:$48 sps:$4 sm:$0xff]   ;;  %v12235_v6 = vld [vmem:[%s14418_s19 + $0x1b8] ss:$24 sps:$4 sm:$0xff]  }
 0x1ca   : > { %2477 = vmatpush1.bf16.msra.mxu0 %v12157_v7  ;;  %v12238_v7 = vld [vmem:[%s14420_s22 + $0x960] ss:$48 sps:$4 sm:$0xff]  }
 0x1cb   : > { %6284 = vmatpush1.bf16.msra.mxu1 %v12160_v8  ;;  %2478 = vmatprep.subr.bf16.mxu0 %v12165_v9  ;;  %v12243_v8 = vld [vmem:[%s14418_s19 + $0x1ec] ss:$24 sps:$4 sm:$0xff]  }
 0x1cc   : > { %6285 = vmatprep.subr.bf16.mxu1 %v12168_v12  ;;  %v12246_v9 = vld [vmem:[%s14420_s22 + $0x9c4] ss:$48 sps:$4 sm:$0xff]   ;;  %v12241_v12 = vld [vmem:[%s14418_s19 + $0x1e8] ss:$24 sps:$4 sm:$0xff]  }
 0x1ce   : > { %2479 = vmatpush1.bf16.msra.mxu0 %v12163_v13  ;;  %v12244_v13 = vld [vmem:[%s14420_s22 + $0x9c0] ss:$48 sps:$4 sm:$0xff]  }
 0x1cf   : > { %6286 = vmatpush1.bf16.msra.mxu1 %v12166_v14  ;;  %2480 = vmatprep.subr.bf16.mxu0 %v12171_v15  ;;  %v12249_v14 = vld [vmem:[%s14418_s19 + $0x21c] ss:$24 sps:$4 sm:$0xff]  }
 0x1d0   : > { %6287 = vmatprep.subr.bf16.mxu1 %v12174_v16  ;;  %v12252_v15 = vld [vmem:[%s14420_s22 + $0xa24] ss:$48 sps:$4 sm:$0xff]   ;;  %v12247_v16 = vld [vmem:[%s14418_s19 + $0x218] ss:$24 sps:$4 sm:$0xff]  }
 0x1d2   : > { %2481 = vmatpush1.bf16.msra.mxu0 %v12169_v18  ;;  %v12250_v18 = vld [vmem:[%s14420_s22 + $0xa20] ss:$48 sps:$4 sm:$0xff]  }
 0x1d3   : > { %6288 = vmatpush1.bf16.msra.mxu1 %v12172_v19  ;;  %2482 = vmatprep.subr.bf16.mxu0 %v12177_v20  ;;  %v12255_v19 = vld [vmem:[%s14418_s19 + $0x24c] ss:$24 sps:$4 sm:$0xff]  }
 0x1d4   : > { %6289 = vmatprep.subr.bf16.mxu1 %v12180_v21  ;;  %v12258_v20 = vld [vmem:[%s14420_s22 + $0xa84] ss:$48 sps:$4 sm:$0xff]   ;;  %v12253_v21 = vld [vmem:[%s14418_s19 + $0x248] ss:$24 sps:$4 sm:$0xff]  }
 0x1d6   : > { %2483 = vmatpush1.bf16.msra.mxu0 %v12175_v22  ;;  %v12256_v22 = vld [vmem:[%s14420_s22 + $0xa80] ss:$48 sps:$4 sm:$0xff]  }
 0x1d7   : > { %6290 = vmatpush1.bf16.msra.mxu1 %v12178_v23  ;;  %2493 = vmatprep.subr.bf16.mxu0 %v12183_v25  ;;  %v12261_v23 = vld [vmem:[%s14418_s19 + $0x27c] ss:$24 sps:$4 sm:$0xff]   ;;  %v12259_v25 = vld [vmem:[%s14418_s19 + $0x278] ss:$24 sps:$4 sm:$0xff]  }
 0x1d8   : > { %6300 = vmatprep.subr.bf16.mxu1 %v12186_v27  ;;  %v12262_v27 = vld [vmem:[%s14420_s22 + $0xae0] ss:$48 sps:$4 sm:$0xff]  }
 0x1d9   : > { %2485 = vmatmul.mubr.bf16.vlgmr.msra.gmra.mrb[0].mxu0 %v14597_v17 }
 0x1da   : > { %6292 = vmatmul.mubr.bf16.vlgmr.msra.gmra.mrb[4].mxu1 %v14671_v28  ;;  %2494 = vmatpush1.bf16.msra.mxu0 %v12181_v30  ;;  %v12270_v30 = vld [vmem:[%s14420_s22 + $0xb44] ss:$48 sps:$4 sm:$0xff]  }
 0x1db   : > { %6301 = vmatpush1.bf16.msra.mxu1 %v12184_v31  ;;  %2495 = vmatprep.subr.bf16.mxu0 %v12189_v32  ;;  %v12265_v31 = vld [vmem:[%s14418_s19 + $0x2a8] ss:$24 sps:$4 sm:$0xff]  }
 0x1dc   : > { %6302 = vmatprep.subr.bf16.mxu1 %v12192_v33  ;;  %2525 = vmatprep.mubr.bf16.mxu0 %v14493_v48  ;;  %v12268_v32 = vld [vmem:[%s14420_s22 + $0xb40] ss:$48 sps:$4 sm:$0xff]   ;;  %v12273_v33 = vld [vmem:[%s14418_s19 + $0x2dc] ss:$24 sps:$4 sm:$0xff]  }
 0x1dd   : > { %6332 = vmatprep.mubr.bf16.mxu1 %v14678_v34 }
 0x1de   : > { %2496 = vmatpush1.bf16.msra.mxu0 %v12187_v36  ;;  %v12276_v36 = vld [vmem:[%s14420_s22 + $0xba4] ss:$48 sps:$4 sm:$0xff]  }
 0x1df   : > { %6303 = vmatpush1.bf16.msra.mxu1 %v12190_v37  ;;  %2497 = vmatprep.subr.bf16.mxu0 %v12195_v38  ;;  %v12271_v37 = vld [vmem:[%s14418_s19 + $0x2d8] ss:$24 sps:$4 sm:$0xff]  }
 0x1e0   : > { %6304 = vmatprep.subr.bf16.mxu1 %v12198_v39  ;;  %v12274_v38 = vld [vmem:[%s14420_s22 + $0xba0] ss:$48 sps:$4 sm:$0xff]   ;;  %v12279_v39 = vld [vmem:[%s14420_s22 + $0xc04] ss:$48 sps:$4 sm:$0xff]  }
 0x1e2   : > { %2498 = vmatpush1.bf16.msra.mxu0 %v12193_v40  ;;  %v600_v40 = vld [vmem:[%s14410_s11 + $0x10] sm:$0xff] }
 0x1e3   : > { %6305 = vmatpush1.bf16.msra.mxu1 %v12196_v41  ;;  %2499 = vmatprep.subr.bf16.mxu0 %v12201_v42  ;;  %v12324_v41 = vld [vmem:[%s14418_s19 + $0x14] ss:$24 sps:$4 sm:$0xff]   ;;  %v12277_v42 = vld [vmem:[%s14420_s22 + $0xc00] ss:$48 sps:$4 sm:$0xff]  }
 0x1e4   : > { %6306 = vmatprep.subr.bf16.mxu1 %v12204_v43  ;;  %v14746_v43 = vpack.c.bf16 %v600_v40, %v600_v40  ;;  %v12402_v40 = vld [vmem:[%s14418_s19 + $0x284] ss:$24 sps:$4 sm:$0xff]  }
 0x1e6   : > { %2500 = vmatpush1.bf16.msra.mxu0 %v12199_v44  ;;  %v603_v44 = vld [vmem:[%s14410_s11 + $0x28] sm:$0xff] }
 0x1e7   : > { %6307 = vmatpush1.bf16.msra.mxu1 %v12202_v45  ;;  %2501 = vmatprep.subr.bf16.mxu0 %v12207_v46  ;;  %v12282_v45 = vld [vmem:[%s14420_s22 + $0xc64] ss:$48 sps:$4 sm:$0xff]   ;;  %v12322_v46 = vld [vmem:[%s14418_s19 + $0x10] ss:$24 sps:$4 sm:$0xff]  }
 0x1e8   : > { %6308 = vmatprep.subr.bf16.mxu1 %v12210_v47  ;;  %v12330_v47 = vld [vmem:[%s14418_s19 + $0x44] ss:$24 sps:$4 sm:$0xff]  }
 0x1ea   : > { %2502 = vmatpush1.bf16.msra.mxu0 %v12205_v49  ;;  %v14752_v49 = vpack.c.bf16 %v603_v44, %v603_v44  ;;  %v12400_v44 = vld [vmem:[%s14418_s19 + $0x280] ss:$24 sps:$4 sm:$0xff]  }
 0x1eb   : > { %6309 = vmatpush1.bf16.msra.mxu1 %v12208_v50  ;;  %2503 = vmatprep.subr.bf16.mxu0 %v12213_v51  ;;  %v12280_v50 = vld [vmem:[%s14420_s22 + $0xc60] ss:$48 sps:$4 sm:$0xff]   ;;  %v12285_v51 = vld [vmem:[%s14420_s22 + $0xcc4] ss:$48 sps:$4 sm:$0xff]  }
 0x1ec   : > { %6310 = vmatprep.subr.bf16.mxu1 %v12216_v52  ;;  %v12328_v52 = vld [vmem:[%s14418_s19 + $0x40] ss:$24 sps:$4 sm:$0xff]  }
 0x1ee   : > { %2504 = vmatpush1.bf16.msra.mxu0 %v12211_v54  ;;  %v12336_v54 = vld [vmem:[%s14418_s19 + $0x74] ss:$24 sps:$4 sm:$0xff]  }
 0x1ef   : > { %6311 = vmatpush1.bf16.msra.mxu1 %v12214_v55  ;;  %2505 = vmatprep.subr.bf16.mxu0 %v12219_v56  ;;  %v12283_v55 = vld [vmem:[%s14420_s22 + $0xcc0] ss:$48 sps:$4 sm:$0xff]   ;;  %v12288_v56 = vld [vmem:[%s14420_s22 + $0xd24] ss:$48 sps:$4 sm:$0xff]  }
 0x1f0   : > { %6312 = vmatprep.subr.bf16.mxu1 %v12222_v57  ;;  %v12334_v57 = vld [vmem:[%s14418_s19 + $0x70] ss:$24 sps:$4 sm:$0xff]  }
 0x1f2   : > { %2506 = vmatpush1.bf16.msra.mxu0 %v12217_v58  ;;  %v12342_v58 = vld [vmem:[%s14418_s19 + $0xa4] ss:$24 sps:$4 sm:$0xff]  }
 0x1f3   : > { %6313 = vmatpush1.bf16.msra.mxu1 %v12220_v59  ;;  %2507 = vmatprep.subr.bf16.mxu0 %v12225_v60  ;;  %v12286_v59 = vld [vmem:[%s14420_s22 + $0xd20] ss:$48 sps:$4 sm:$0xff]   ;;  %v12291_v60 = vld [vmem:[%s14420_s22 + $0xd84] ss:$48 sps:$4 sm:$0xff]  }
 0x1f4   : > { %6314 = vmatprep.subr.bf16.mxu1 %v12228_v61  ;;  %v12340_v61 = vld [vmem:[%s14418_s19 + $0xa0] ss:$24 sps:$4 sm:$0xff]  }
 0x1f6   : > { %2508 = vmatpush1.bf16.msra.mxu0 %v12223_v62  ;;  %v12289_v62 = vld [vmem:[%s14420_s22 + $0xd80] ss:$48 sps:$4 sm:$0xff]  }
 0x1f7   : > { %6315 = vmatpush1.bf16.msra.mxu1 %v12226_v63  ;;  %2509 = vmatprep.subr.bf16.mxu0 %v12231_v0  ;;  %v12294_v63 = vld [vmem:[%s14420_s22 + $0xde4] ss:$48 sps:$4 sm:$0xff]   ;;  %v12346_v0 = vld [vmem:[%s14418_s19 + $0xd0] ss:$24 sps:$4 sm:$0xff]  }
 0x1f8   : > { %6316 = vmatprep.subr.bf16.mxu1 %v12234_v1  ;;  %v12354_v1 = vld [vmem:[%s14418_s19 + $0x104] ss:$24 sps:$4 sm:$0xff]  }
 0x1fa   : > { %2510 = vmatpush1.bf16.msra.mxu0 %v12229_v2  ;;  %v12292_v2 = vld [vmem:[%s14420_s22 + $0xde0] ss:$48 sps:$4 sm:$0xff]  }
 0x1fb   : > { %6317 = vmatpush1.bf16.msra.mxu1 %v12232_v3  ;;  %2511 = vmatprep.subr.bf16.mxu0 %v12237_v4  ;;  %v12297_v3 = vld [vmem:[%s14420_s22 + $0xe44] ss:$48 sps:$4 sm:$0xff]   ;;  %v12352_v4 = vld [vmem:[%s14418_s19 + $0x100] ss:$24 sps:$4 sm:$0xff]  }
 0x1fc   : > { %6318 = vmatprep.subr.bf16.mxu1 %v12240_v5  ;;  %v12360_v5 = vld [vmem:[%s14418_s19 + $0x134] ss:$24 sps:$4 sm:$0xff]  }
 0x1fe   : > { %2512 = vmatpush1.bf16.msra.mxu0 %v12235_v6  ;;  %v12295_v6 = vld [vmem:[%s14420_s22 + $0xe40] ss:$48 sps:$4 sm:$0xff]  }
 0x1ff   : > { %6319 = vmatpush1.bf16.msra.mxu1 %v12238_v7  ;;  %2513 = vmatprep.subr.bf16.mxu0 %v12243_v8  ;;  %v12300_v7 = vld [vmem:[%s14420_s22 + $0xea4] ss:$48 sps:$4 sm:$0xff]   ;;  %v12358_v8 = vld [vmem:[%s14418_s19 + $0x130] ss:$24 sps:$4 sm:$0xff]  }
 0x200   : > { %6320 = vmatprep.subr.bf16.mxu1 %v12246_v9  ;;  %v12366_v9 = vld [vmem:[%s14418_s19 + $0x164] ss:$24 sps:$4 sm:$0xff]  }
 0x202   : > { %2514 = vmatpush1.bf16.msra.mxu0 %v12241_v12  ;;  %v12298_v12 = vld [vmem:[%s14420_s22 + $0xea0] ss:$48 sps:$4 sm:$0xff]  }
 0x203   : > { %6321 = vmatpush1.bf16.msra.mxu1 %v12244_v13  ;;  %2515 = vmatprep.subr.bf16.mxu0 %v12249_v14  ;;  %v12303_v13 = vld [vmem:[%s14420_s22 + $0xf04] ss:$48 sps:$4 sm:$0xff]   ;;  %v12364_v14 = vld [vmem:[%s14418_s19 + $0x160] ss:$24 sps:$4 sm:$0xff]  }
 0x204   : > { %6322 = vmatprep.subr.bf16.mxu1 %v12252_v15  ;;  %v12372_v15 = vld [vmem:[%s14418_s19 + $0x194] ss:$24 sps:$4 sm:$0xff]  }
 0x206   : > { %2516 = vmatpush1.bf16.msra.mxu0 %v12247_v16  ;;  %v12301_v16 = vld [vmem:[%s14420_s22 + $0xf00] ss:$48 sps:$4 sm:$0xff]  }
 0x207   : > { %6323 = vmatpush1.bf16.msra.mxu1 %v12250_v18  ;;  %2517 = vmatprep.subr.bf16.mxu0 %v12255_v19  ;;  %v12306_v18 = vld [vmem:[%s14420_s22 + $0xf64] ss:$48 sps:$4 sm:$0xff]   ;;  %v12370_v19 = vld [vmem:[%s14418_s19 + $0x190] ss:$24 sps:$4 sm:$0xff]  }
 0x208   : > { %6324 = vmatprep.subr.bf16.mxu1 %v12258_v20  ;;  %v12378_v20 = vld [vmem:[%s14418_s19 + $0x1c4] ss:$24 sps:$4 sm:$0xff]  }
 0x20a   : > { %2518 = vmatpush1.bf16.msra.mxu0 %v12253_v21  ;;  %v12304_v21 = vld [vmem:[%s14420_s22 + $0xf60] ss:$48 sps:$4 sm:$0xff]  }
 0x20b   : > { %6325 = vmatpush1.bf16.msra.mxu1 %v12256_v22  ;;  %2519 = vmatprep.subr.bf16.mxu0 %v12261_v23  ;;  %v12309_v22 = vld [vmem:[%s14420_s22 + $0xfc4] ss:$48 sps:$4 sm:$0xff]   ;;  %v12376_v23 = vld [vmem:[%s14418_s19 + $0x1c0] ss:$24 sps:$4 sm:$0xff]  }
 0x20c   : > { %6326 = vmatprep.subr.bf16.mxu1 %v12264_v24  ;;  %v12384_v24 = vld [vmem:[%s14418_s19 + $0x1f4] ss:$24 sps:$4 sm:$0xff]  }
 0x20e   : > { %2520 = vmatpush1.bf16.msra.mxu0 %v12259_v25  ;;  %v12307_v25 = vld [vmem:[%s14420_s22 + $0xfc0] ss:$48 sps:$4 sm:$0xff]  }
 0x20f   : > { %6327 = vmatpush1.bf16.msra.mxu1 %v12262_v27  ;;  %2521 = vmatprep.subr.bf16.mxu0 %v12267_v29  ;;  %v12312_v27 = vld [vmem:[%s14420_s22 + $0x1024] ss:$48 sps:$4 sm:$0xff]   ;;  %v12382_v29 = vld [vmem:[%s14418_s19 + $0x1f0] ss:$24 sps:$4 sm:$0xff]  }
 0x210   : > { %6328 = vmatprep.subr.bf16.mxu1 %v12270_v30  ;;  %v12390_v30 = vld [vmem:[%s14418_s19 + $0x224] ss:$24 sps:$4 sm:$0xff]  }
 0x212   : > { %2522 = vmatpush1.bf16.msra.mxu0 %v12265_v31  ;;  %v12310_v31 = vld [vmem:[%s14420_s22 + $0x1020] ss:$48 sps:$4 sm:$0xff]  }
 0x213   : > { %6329 = vmatpush1.bf16.msra.mxu1 %v12268_v32  ;;  %2523 = vmatprep.subr.bf16.mxu0 %v12273_v33  ;;  %v12315_v32 = vld [vmem:[%s14420_s22 + $0x1084] ss:$48 sps:$4 sm:$0xff]   ;;  %v12388_v33 = vld [vmem:[%s14418_s19 + $0x220] ss:$24 sps:$4 sm:$0xff]  }
 0x214   : > { %6330 = vmatprep.subr.bf16.mxu1 %v12276_v36  ;;  %v12396_v36 = vld [vmem:[%s14418_s19 + $0x254] ss:$24 sps:$4 sm:$0xff]  }
 0x216   : > { %2524 = vmatpush1.bf16.msra.mxu0 %v12271_v37  ;;  %v12313_v37 = vld [vmem:[%s14420_s22 + $0x1080] ss:$48 sps:$4 sm:$0xff]  }
 0x217   : > { %6331 = vmatpush1.bf16.msra.mxu1 %v12274_v38  ;;  %2616 = vmatprep.subr.bf16.mxu0 %v12324_v41  ;;  %v12318_v38 = vld [vmem:[%s14420_s22 + $0x10e4] ss:$48 sps:$4 sm:$0xff]   ;;  %v12316_v41 = vld [vmem:[%s14420_s22 + $0x10e0] ss:$48 sps:$4 sm:$0xff]  }
 0x218   : > { %6341 = vmatprep.subr.bf16.mxu1 %v12279_v39  ;;  %v12394_v39 = vld [vmem:[%s14418_s19 + $0x250] ss:$24 sps:$4 sm:$0xff]  }
 0x219   : > { %2526 = vmatmul.mubr.bf16.vlgmr.msra.gmra.mrb[4].mxu0 %v14523_v10 }
 0x21a   : > { %6333 = vmatmul.mubr.bf16.vlgmr.msra.gmra.mrb[4].mxu1 %v14746_v43  ;;  %2617 = vmatpush1.bf16.msra.mxu0 %v12322_v46  ;;  %v12319_v46 = vld [vmem:[%s14420_s22 + $0x1140] ss:$48 sps:$4 sm:$0xff]  }
 0x21b   : > { %6342 = vmatpush1.bf16.msra.mxu1 %v12277_v42  ;;  %2618 = vmatprep.subr.bf16.mxu0 %v12330_v47  ;;  %v12321_v42 = vld [vmem:[%s14420_s22 + $0x1144] ss:$48 sps:$4 sm:$0xff]  }
 0x21c   : > { %6343 = vmatprep.subr.bf16.mxu1 %v12282_v45  ;;  %6373 = vmatprep.mubr.bf16.mxu1 %v14752_v49  ;;  %v12408_v45 = vld [vmem:[%s14418_s19 + $0x2b4] ss:$24 sps:$4 sm:$0xff]  }
 0x21d   : > { %2648 = vmatprep.mubr.bf16.mxu0 %v14493_v48  ;;  %v12348_v48 = vld [vmem:[%s14418_s19 + $0xd4] ss:$24 sps:$4 sm:$0xff]  }
 0x21e   : > { %2619 = vmatpush1.bf16.msra.mxu0 %v12328_v52  ;;  %v12327_v47 = vld [vmem:[%s14420_s22 + $0x11a4] ss:$48 sps:$4 sm:$0xff]   ;;  %v12325_v52 = vld [vmem:[%s14420_s22 + $0x11a0] ss:$48 sps:$4 sm:$0xff]  }
 0x21f   : > { %6344 = vmatpush1.bf16.msra.mxu1 %v12280_v50  ;;  %2620 = vmatprep.subr.bf16.mxu0 %v12336_v54  ;;  %v12406_v50 = vld [vmem:[%s14418_s19 + $0x2b0] ss:$24 sps:$4 sm:$0xff]  }
 0x220   : > { %6345 = vmatprep.subr.bf16.mxu1 %v12285_v51  ;;  %v12414_v51 = vld [vmem:[%s14418_s19 + $0x2e4] ss:$24 sps:$4 sm:$0xff]  }
 0x221   : > { %v602_v54 = vld [vmem:[%s14410_s11 + $0x20] sm:$0xff]  ;;  %s16077_s11 = scalar_lea.hbm %s16129_s8, %s11802_s20 }
 0x222   : > { %2621 = vmatpush1.bf16.msra.mxu0 %v12334_v57  ;;  %v12420_v57 = vld [vmem:[%s14418_s19 + $0x314] ss:$24 sps:$4 sm:$0xff]  }
 0x223   : > { %6346 = vmatpush1.bf16.msra.mxu1 %v12283_v55  ;;  %2622 = vmatprep.subr.bf16.mxu0 %v12342_v58  ;;  %v12333_v55 = vld [vmem:[%s14420_s22 + $0x14] ss:$48 sps:$4 sm:$0xff]   ;;  %v14819_v58 = vpack.c.bf16 %v602_v54, %v602_v54 }
 0x224   : > { %6347 = vmatprep.subr.bf16.mxu1 %v12288_v56  ;;  %v12412_v56 = vld [vmem:[%s14418_s19 + $0x2e0] ss:$24 sps:$4 sm:$0xff]   ;;  %v12492_v54 = vld [vmem:[%s14418_s19 + $0x554] ss:$24 sps:$4 sm:$0xff]  }
 0x226   : > { %2623 = vmatpush1.bf16.msra.mxu0 %v12340_v61  ;;  %v12418_v61 = vld [vmem:[%s14418_s19 + $0x310] ss:$24 sps:$4 sm:$0xff]  }
 0x227   : > { %6348 = vmatpush1.bf16.msra.mxu1 %v12286_v59  ;;  %2624 = vmatprep.subr.bf16.mxu0 %v12348_v48  ;;  %v12331_v59 = vld [vmem:[%s14420_s22 + $0x10] ss:$48 sps:$4 sm:$0xff]   ;;  %v12426_v48 = vld [vmem:[%s14418_s19 + $0x344] ss:$24 sps:$4 sm:$0xff]  }
 0x228   : > { %6349 = vmatprep.subr.bf16.mxu1 %v12291_v60  ;;  %v12339_v60 = vld [vmem:[%s14420_s22 + $0x74] ss:$48 sps:$4 sm:$0xff]  }
 0x22a   : > { %2625 = vmatpush1.bf16.msra.mxu0 %v12346_v0  ;;  %v12424_v0 = vld [vmem:[%s14418_s19 + $0x340] ss:$24 sps:$4 sm:$0xff]  }
 0x22b   : > { %6350 = vmatpush1.bf16.msra.mxu1 %v12289_v62  ;;  %2626 = vmatprep.subr.bf16.mxu0 %v12354_v1  ;;  %v12337_v62 = vld [vmem:[%s14420_s22 + $0x70] ss:$48 sps:$4 sm:$0xff]   ;;  %v12432_v1 = vld [vmem:[%s14418_s19 + $0x374] ss:$24 sps:$4 sm:$0xff]  }
 0x22c   : > { %6351 = vmatprep.subr.bf16.mxu1 %v12294_v63  ;;  %v12345_v63 = vld [vmem:[%s14420_s22 + $0xd4] ss:$48 sps:$4 sm:$0xff]  }
 0x22e   : > { %2627 = vmatpush1.bf16.msra.mxu0 %v12352_v4  ;;  %v12438_v4 = vld [vmem:[%s14418_s19 + $0x3a4] ss:$24 sps:$4 sm:$0xff]  }
 0x22f   : > { %6352 = vmatpush1.bf16.msra.mxu1 %v12292_v2  ;;  %2628 = vmatprep.subr.bf16.mxu0 %v12360_v5  ;;  %v12343_v2 = vld [vmem:[%s14420_s22 + $0xd0] ss:$48 sps:$4 sm:$0xff]  }
 0x230   : > { %6353 = vmatprep.subr.bf16.mxu1 %v12297_v3  ;;  %v12351_v3 = vld [vmem:[%s14420_s22 + $0x134] ss:$48 sps:$4 sm:$0xff]   ;;  %v12349_v5 = vld [vmem:[%s14420_s22 + $0x130] ss:$48 sps:$4 sm:$0xff]  }
 0x232   : > { %2629 = vmatpush1.bf16.msra.mxu0 %v12358_v8  ;;  %v12355_v8 = vld [vmem:[%s14420_s22 + $0x190] ss:$48 sps:$4 sm:$0xff]  }
 0x233   : > { %6354 = vmatpush1.bf16.msra.mxu1 %v12295_v6  ;;  %2630 = vmatprep.subr.bf16.mxu0 %v12366_v9  ;;  %v12357_v6 = vld [vmem:[%s14420_s22 + $0x194] ss:$48 sps:$4 sm:$0xff]  }
 0x234   : > { %6355 = vmatprep.subr.bf16.mxu1 %v12300_v7  ;;  %v12444_v7 = vld [vmem:[%s14418_s19 + $0x3d4] ss:$24 sps:$4 sm:$0xff]  }
 0x235   : > { %v12363_v9 = vld [vmem:[%s14420_s22 + $0x1f4] ss:$48 sps:$4 sm:$0xff]  }
 0x236   : > { %2631 = vmatpush1.bf16.msra.mxu0 %v12364_v14  ;;  %v12361_v14 = vld [vmem:[%s14420_s22 + $0x1f0] ss:$48 sps:$4 sm:$0xff]  }
 0x237   : > { %6356 = vmatpush1.bf16.msra.mxu1 %v12298_v12  ;;  %2632 = vmatprep.subr.bf16.mxu0 %v12372_v15  ;;  %v12442_v12 = vld [vmem:[%s14418_s19 + $0x3d0] ss:$24 sps:$4 sm:$0xff]   ;;  %v12369_v15 = vld [vmem:[%s14420_s22 + $0x254] ss:$48 sps:$4 sm:$0xff]  }
 0x238   : > { %6357 = vmatprep.subr.bf16.mxu1 %v12303_v13  ;;  %v12450_v13 = vld [vmem:[%s14418_s19 + $0x404] ss:$24 sps:$4 sm:$0xff]  }
 0x23a   : > { %2633 = vmatpush1.bf16.msra.mxu0 %v12370_v19 }
 0x23b   : > { %6358 = vmatpush1.bf16.msra.mxu1 %v12301_v16  ;;  %2634 = vmatprep.subr.bf16.mxu0 %v12378_v20  ;;  %v12448_v16 = vld [vmem:[%s14418_s19 + $0x400] ss:$24 sps:$4 sm:$0xff]  }
 0x23c   : > { %6359 = vmatprep.subr.bf16.mxu1 %v12306_v18  ;;  %v12456_v18 = vld [vmem:[%s14418_s19 + $0x434] ss:$24 sps:$4 sm:$0xff]   ;;  %v12367_v20 = vld [vmem:[%s14420_s22 + $0x250] ss:$48 sps:$4 sm:$0xff]  }
 0x23e   : > { %2635 = vmatpush1.bf16.msra.mxu0 %v12376_v23 }
 0x23f   : > { %6360 = vmatpush1.bf16.msra.mxu1 %v12304_v21  ;;  %2636 = vmatprep.subr.bf16.mxu0 %v12384_v24  ;;  %v12454_v24 = vld [vmem:[%s14418_s19 + $0x430] ss:$24 sps:$4 sm:$0xff]  }
 0x240   : > { %6361 = vmatprep.subr.bf16.mxu1 %v12309_v22  ;;  %v12375_v22 = vld [vmem:[%s14420_s22 + $0x2b4] ss:$48 sps:$4 sm:$0xff]  }
 0x242   : > { %2637 = vmatpush1.bf16.msra.mxu0 %v12382_v29  ;;  %v12373_v29 = vld [vmem:[%s14420_s22 + $0x2b0] ss:$48 sps:$4 sm:$0xff]  }
 0x243   : > { %6362 = vmatpush1.bf16.msra.mxu1 %v12307_v25  ;;  %2638 = vmatprep.subr.bf16.mxu0 %v12390_v30  ;;  %v12381_v30 = vld [vmem:[%s14420_s22 + $0x314] ss:$48 sps:$4 sm:$0xff]  }
 0x244   : > { %6363 = vmatprep.subr.bf16.mxu1 %v12312_v27  ;;  %v12462_v27 = vld [vmem:[%s14418_s19 + $0x464] ss:$24 sps:$4 sm:$0xff]  }
 0x246   : > { %2639 = vmatpush1.bf16.msra.mxu0 %v12388_v33  ;;  %v12379_v33 = vld [vmem:[%s14420_s22 + $0x310] ss:$48 sps:$4 sm:$0xff]  }
 0x247   : > { %6364 = vmatpush1.bf16.msra.mxu1 %v12310_v31  ;;  %2640 = vmatprep.subr.bf16.mxu0 %v12396_v36  ;;  %v12460_v31 = vld [vmem:[%s14418_s19 + $0x460] ss:$24 sps:$4 sm:$0xff]   ;;  %v12387_v36 = vld [vmem:[%s14420_s22 + $0x374] ss:$48 sps:$4 sm:$0xff]  }
 0x248   : > { %6365 = vmatprep.subr.bf16.mxu1 %v12315_v32  ;;  %v12468_v32 = vld [vmem:[%s14418_s19 + $0x494] ss:$24 sps:$4 sm:$0xff]  }
 0x24a   : > { %2641 = vmatpush1.bf16.msra.mxu0 %v12394_v39  ;;  %v12385_v39 = vld [vmem:[%s14420_s22 + $0x370] ss:$48 sps:$4 sm:$0xff]  }
 0x24b   : > { %6366 = vmatpush1.bf16.msra.mxu1 %v12313_v37  ;;  %2642 = vmatprep.subr.bf16.mxu0 %v12402_v40  ;;  %v12466_v37 = vld [vmem:[%s14418_s19 + $0x490] ss:$24 sps:$4 sm:$0xff]   ;;  %v12393_v40 = vld [vmem:[%s14420_s22 + $0x3d4] ss:$48 sps:$4 sm:$0xff]  }
 0x24c   : > { %6367 = vmatprep.subr.bf16.mxu1 %v12318_v38  ;;  %v12474_v38 = vld [vmem:[%s14418_s19 + $0x4c4] ss:$24 sps:$4 sm:$0xff]  }
 0x24e   : > { %2643 = vmatpush1.bf16.msra.mxu0 %v12400_v44  ;;  %v12391_v44 = vld [vmem:[%s14420_s22 + $0x3d0] ss:$48 sps:$4 sm:$0xff]  }
 0x24f   : > { %6368 = vmatpush1.bf16.msra.mxu1 %v12316_v41  ;;  %2644 = vmatprep.subr.bf16.mxu0 %v12408_v45  ;;  %v12472_v41 = vld [vmem:[%s14418_s19 + $0x4c0] ss:$24 sps:$4 sm:$0xff]   ;;  %v12399_v45 = vld [vmem:[%s14420_s22 + $0x434] ss:$48 sps:$4 sm:$0xff]  }
 0x250   : > { %6369 = vmatprep.subr.bf16.mxu1 %v12321_v42  ;;  %v12480_v42 = vld [vmem:[%s14418_s19 + $0x4f4] ss:$24 sps:$4 sm:$0xff]  }
 0x252   : > { %2645 = vmatpush1.bf16.msra.mxu0 %v12406_v50  ;;  %v12397_v50 = vld [vmem:[%s14420_s22 + $0x430] ss:$48 sps:$4 sm:$0xff]  }
 0x253   : > { %6370 = vmatpush1.bf16.msra.mxu1 %v12319_v46  ;;  %2646 = vmatprep.subr.bf16.mxu0 %v12414_v51  ;;  %v12478_v46 = vld [vmem:[%s14418_s19 + $0x4f0] ss:$24 sps:$4 sm:$0xff]   ;;  %v12405_v51 = vld [vmem:[%s14420_s22 + $0x494] ss:$48 sps:$4 sm:$0xff]  }
 0x254   : > { %6371 = vmatprep.subr.bf16.mxu1 %v12327_v47  ;;  %v12486_v47 = vld [vmem:[%s14418_s19 + $0x524] ss:$24 sps:$4 sm:$0xff]  }
 0x256   : > { %2647 = vmatpush1.bf16.msra.mxu0 %v12412_v56  ;;  %v12411_v56 = vld [vmem:[%s14420_s22 + $0x4f4] ss:$48 sps:$4 sm:$0xff]  }
 0x257   : > { %6372 = vmatpush1.bf16.msra.mxu1 %v12325_v52  ;;  %2657 = vmatprep.subr.bf16.mxu0 %v12420_v57  ;;  %v12484_v52 = vld [vmem:[%s14418_s19 + $0x520] ss:$24 sps:$4 sm:$0xff]   ;;  %v12490_v57 = vld [vmem:[%s14418_s19 + $0x550] ss:$24 sps:$4 sm:$0xff]  }
 0x258   : > { %6505 = vmatprep.subr.bf16.mxu1 %v12333_v55  ;;  %v12403_v55 = vld [vmem:[%s14420_s22 + $0x490] ss:$48 sps:$4 sm:$0xff]  }
 0x259   : > { %2649 = vmatmul.mubr.bf16.vlgmr.msra.gmra.mrb[8].mxu0 %v14523_v10  ;;  %v12430_v10 = vld [vmem:[%s14418_s19 + $0x370] ss:$24 sps:$4 sm:$0xff]  }
 0x25a   : > { %6374 = vmatmul.mubr.bf16.vlgmr.msra.gmra.mrb[4].mxu1 %v14819_v58  ;;  %2658 = vmatpush1.bf16.msra.mxu0 %v12418_v61  ;;  %v12417_v61 = vld [vmem:[%s14420_s22 + $0x554] ss:$48 sps:$4 sm:$0xff]  }
 0x25b   : > { %6506 = vmatpush1.bf16.msra.mxu1 %v12331_v59  ;;  %2659 = vmatprep.subr.bf16.mxu0 %v12426_v48  ;;  %v12498_v59 = vld [vmem:[%s14418_s19 + $0x584] ss:$24 sps:$4 sm:$0xff]   ;;  %v12496_v48 = vld [vmem:[%s14418_s19 + $0x580] ss:$24 sps:$4 sm:$0xff]  }
 0x25c   : > { %6507 = vmatprep.subr.bf16.mxu1 %v12339_v60  ;;  %6537 = vmatprep.mubr.bf16.mxu1 %v14609_v26  ;;  %v12409_v60 = vld [vmem:[%s14420_s22 + $0x4f0] ss:$48 sps:$4 sm:$0xff]  }
 0x25d   : > { %2689 = vmatprep.mubr.bf16.mxu0 %v14499_v53  ;;  %v12436_v53 = vld [vmem:[%s14418_s19 + $0x3a0] ss:$24 sps:$4 sm:$0xff]  }
 0x25e   : > { %2660 = vmatpush1.bf16.msra.mxu0 %v12424_v0  ;;  %v12423_v0 = vld [vmem:[%s14420_s22 + $0x5b4] ss:$48 sps:$4 sm:$0xff]  }
 0x25f   : > { %6508 = vmatpush1.bf16.msra.mxu1 %v12337_v62  ;;  %2661 = vmatprep.subr.bf16.mxu0 %v12432_v1  ;;  %v12504_v62 = vld [vmem:[%s14418_s19 + $0x5b4] ss:$24 sps:$4 sm:$0xff]   ;;  %v12502_v1 = vld [vmem:[%s14418_s19 + $0x5b0] ss:$24 sps:$4 sm:$0xff]  }
 0x260   : > { %6509 = vmatprep.subr.bf16.mxu1 %v12345_v63  ;;  %v12415_v63 = vld [vmem:[%s14420_s22 + $0x550] ss:$48 sps:$4 sm:$0xff]  }
 0x262   : > { %2662 = vmatpush1.bf16.msra.mxu0 %v12430_v10  ;;  %v12429_v10 = vld [vmem:[%s14420_s22 + $0x614] ss:$48 sps:$4 sm:$0xff]  }
 0x263   : > { %6510 = vmatpush1.bf16.msra.mxu1 %v12343_v2  ;;  %2663 = vmatprep.subr.bf16.mxu0 %v12438_v4  ;;  %v12510_v2 = vld [vmem:[%s14418_s19 + $0x5e4] ss:$24 sps:$4 sm:$0xff]   ;;  %v12508_v4 = vld [vmem:[%s14418_s19 + $0x5e0] ss:$24 sps:$4 sm:$0xff]  }
 0x264   : > { %6511 = vmatprep.subr.bf16.mxu1 %v12351_v3  ;;  %v12421_v3 = vld [vmem:[%s14420_s22 + $0x5b0] ss:$48 sps:$4 sm:$0xff]  }
 0x266   : > { %2664 = vmatpush1.bf16.msra.mxu0 %v12436_v53  ;;  %v12435_v53 = vld [vmem:[%s14420_s22 + $0x674] ss:$48 sps:$4 sm:$0xff]  }
 0x267   : > { %6512 = vmatpush1.bf16.msra.mxu1 %v12349_v5  ;;  %2665 = vmatprep.subr.bf16.mxu0 %v12444_v7  ;;  %v12516_v5 = vld [vmem:[%s14418_s19 + $0x614] ss:$24 sps:$4 sm:$0xff]   ;;  %v12514_v7 = vld [vmem:[%s14418_s19 + $0x610] ss:$24 sps:$4 sm:$0xff]  }
 0x268   : > { %6513 = vmatprep.subr.bf16.mxu1 %v12357_v6  ;;  %v12427_v6 = vld [vmem:[%s14420_s22 + $0x610] ss:$48 sps:$4 sm:$0xff]  }
 0x26a   : > { %2666 = vmatpush1.bf16.msra.mxu0 %v12442_v12  ;;  %v12441_v12 = vld [vmem:[%s14420_s22 + $0x6d4] ss:$48 sps:$4 sm:$0xff]  }
 0x26b   : > { %6514 = vmatpush1.bf16.msra.mxu1 %v12355_v8  ;;  %2667 = vmatprep.subr.bf16.mxu0 %v12450_v13  ;;  %v12522_v8 = vld [vmem:[%s14418_s19 + $0x644] ss:$24 sps:$4 sm:$0xff]   ;;  %v12520_v13 = vld [vmem:[%s14418_s19 + $0x640] ss:$24 sps:$4 sm:$0xff]  }
 0x26c   : > { %6515 = vmatprep.subr.bf16.mxu1 %v12363_v9  ;;  %v12433_v9 = vld [vmem:[%s14420_s22 + $0x670] ss:$48 sps:$4 sm:$0xff]  }
 0x26d   : > { %v14849_v19 = vpop.f32.mrb[0].mxu1 }
 0x26e   : > { %v14852_v21 = vpop.f32.mrb[1].mxu1  ;;  %2668 = vmatpush1.bf16.msra.mxu0 %v12448_v16  ;;  %v12447_v16 = vld [vmem:[%s14420_s22 + $0x734] ss:$48 sps:$4 sm:$0xff]  }
 0x26f   : > { %v2613_v23 = vpop.f32.mrb[2].mxu1  ;;  %6516 = vmatpush1.bf16.msra.mxu1 %v12361_v14  ;;  %2669 = vmatprep.subr.bf16.mxu0 %v12456_v18  ;;  %v12528_v14 = vld [vmem:[%s14418_s19 + $0x674] ss:$24 sps:$4 sm:$0xff]   ;;  %v12534_v18 = vld [vmem:[%s14418_s19 + $0x6a4] ss:$24 sps:$4 sm:$0xff]  }
 0x270   : > { %v2614_v25 = vpop.f32.mrb[3].mxu1  ;;  %6517 = vmatprep.subr.bf16.mxu1 %v12369_v15  ;;  %v12439_v15 = vld [vmem:[%s14420_s22 + $0x6d0] ss:$48 sps:$4 sm:$0xff]  }
 0x271   : > { %v12532_v23 = vld [vmem:[%s14418_s19 + $0x6a0] ss:$24 sps:$4 sm:$0xff]   ;;  %v12459_v25 = vld [vmem:[%s14420_s22 + $0x7f4] ss:$48 sps:$4 sm:$0xff]  }
 0x272   : > { %2670 = vmatpush1.bf16.msra.mxu0 %v12454_v24  ;;  %v12451_v24 = vld [vmem:[%s14420_s22 + $0x790] ss:$48 sps:$4 sm:$0xff]  }
 0x273   : > { %6518 = vmatpush1.bf16.msra.mxu1 %v12367_v20  ;;  %2671 = vmatprep.subr.bf16.mxu0 %v12462_v27  ;;  %v12445_v20 = vld [vmem:[%s14420_s22 + $0x730] ss:$48 sps:$4 sm:$0xff]  }
 0x274   : > { %6519 = vmatprep.subr.bf16.mxu1 %v12375_v22  ;;  %v12453_v22 = vld [vmem:[%s14420_s22 + $0x794] ss:$48 sps:$4 sm:$0xff]   ;;  %v12538_v27 = vld [vmem:[%s14418_s19 + $0x6d0] ss:$24 sps:$4 sm:$0xff]  }
 0x276   : > { %2672 = vmatpush1.bf16.msra.mxu0 %v12460_v31  ;;  %v12465_v31 = vld [vmem:[%s14420_s22 + $0x854] ss:$48 sps:$4 sm:$0xff]  }
 0x277   : > { %6520 = vmatpush1.bf16.msra.mxu1 %v12373_v29  ;;  %2673 = vmatprep.subr.bf16.mxu0 %v12468_v32  ;;  %v12546_v29 = vld [vmem:[%s14418_s19 + $0x704] ss:$24 sps:$4 sm:$0xff]   ;;  %v12544_v32 = vld [vmem:[%s14418_s19 + $0x700] ss:$24 sps:$4 sm:$0xff]  }
 0x278   : > { %6521 = vmatprep.subr.bf16.mxu1 %v12381_v30  ;;  %v12457_v30 = vld [vmem:[%s14420_s22 + $0x7f0] ss:$48 sps:$4 sm:$0xff]  }
 0x27a   : > { %2674 = vmatpush1.bf16.msra.mxu0 %v12466_v37 }
 0x27b   : > { %6522 = vmatpush1.bf16.msra.mxu1 %v12379_v33  ;;  %2675 = vmatprep.subr.bf16.mxu0 %v12474_v38  ;;  %v12552_v33 = vld [vmem:[%s14418_s19 + $0x734] ss:$24 sps:$4 sm:$0xff]  }
 0x27c   : > { %6523 = vmatprep.subr.bf16.mxu1 %v12387_v36  ;;  %v12463_v36 = vld [vmem:[%s14420_s22 + $0x850] ss:$48 sps:$4 sm:$0xff]   ;;  %v12471_v38 = vld [vmem:[%s14420_s22 + $0x8b4] ss:$48 sps:$4 sm:$0xff]  }
 0x27e   : > { %2676 = vmatpush1.bf16.msra.mxu0 %v12472_v41  ;;  %v12550_v41 = vld [vmem:[%s14418_s19 + $0x730] ss:$24 sps:$4 sm:$0xff]  }
 0x27f   : > { %6524 = vmatpush1.bf16.msra.mxu1 %v12385_v39  ;;  %2677 = vmatprep.subr.bf16.mxu0 %v12480_v42 }
 0x280   : > { %6525 = vmatprep.subr.bf16.mxu1 %v12393_v40 }
 0x282   : > { %2678 = vmatpush1.bf16.msra.mxu0 %v12478_v46  ;;  %v12477_v46 = vld [vmem:[%s14420_s22 + $0x914] ss:$48 sps:$4 sm:$0xff]  }
 0x283   : > { %6526 = vmatpush1.bf16.msra.mxu1 %v12391_v44  ;;  %2679 = vmatprep.subr.bf16.mxu0 %v12486_v47  ;;  %v12558_v44 = vld [vmem:[%s14418_s19 + $0x764] ss:$24 sps:$4 sm:$0xff]   ;;  %v12556_v47 = vld [vmem:[%s14418_s19 + $0x760] ss:$24 sps:$4 sm:$0xff]  }
 0x284   : > { %6527 = vmatprep.subr.bf16.mxu1 %v12399_v45  ;;  %v12469_v45 = vld [vmem:[%s14420_s22 + $0x8b0] ss:$48 sps:$4 sm:$0xff]  }
 0x286   : > { %2680 = vmatpush1.bf16.msra.mxu0 %v12484_v52  ;;  %v12483_v52 = vld [vmem:[%s14420_s22 + $0x974] ss:$48 sps:$4 sm:$0xff]  }
 0x287   : > { %6528 = vmatpush1.bf16.msra.mxu1 %v12397_v50  ;;  %2681 = vmatprep.subr.bf16.mxu0 %v12492_v54  ;;  %v12564_v50 = vld [vmem:[%s14418_s19 + $0x794] ss:$24 sps:$4 sm:$0xff]   ;;  %v12562_v54 = vld [vmem:[%s14418_s19 + $0x790] ss:$24 sps:$4 sm:$0xff]  }
 0x288   : > { %6529 = vmatprep.subr.bf16.mxu1 %v12405_v51  ;;  %v12475_v51 = vld [vmem:[%s14420_s22 + $0x910] ss:$48 sps:$4 sm:$0xff]  }
 0x28a   : > { %2682 = vmatpush1.bf16.msra.mxu0 %v12490_v57  ;;  %v12489_v57 = vld [vmem:[%s14420_s22 + $0x9d4] ss:$48 sps:$4 sm:$0xff]  }
 0x28b   : > { %6530 = vmatpush1.bf16.msra.mxu1 %v12403_v55  ;;  %2683 = vmatprep.subr.bf16.mxu0 %v12498_v59  ;;  %v12570_v55 = vld [vmem:[%s14418_s19 + $0x7c4] ss:$24 sps:$4 sm:$0xff]   ;;  %v12568_v59 = vld [vmem:[%s14418_s19 + $0x7c0] ss:$24 sps:$4 sm:$0xff]  }
 0x28c   : > { %6531 = vmatprep.subr.bf16.mxu1 %v12411_v56  ;;  %v12481_v56 = vld [vmem:[%s14420_s22 + $0x970] ss:$48 sps:$4 sm:$0xff]  }
 0x28e   : > { %2684 = vmatpush1.bf16.msra.mxu0 %v12496_v48  ;;  %v12495_v48 = vld [vmem:[%s14420_s22 + $0xa34] ss:$48 sps:$4 sm:$0xff]  }
 0x28f   : > { %6532 = vmatpush1.bf16.msra.mxu1 %v12409_v60  ;;  %2685 = vmatprep.subr.bf16.mxu0 %v12504_v62  ;;  %v12576_v60 = vld [vmem:[%s14418_s19 + $0x7f4] ss:$24 sps:$4 sm:$0xff]   ;;  %v12574_v62 = vld [vmem:[%s14418_s19 + $0x7f0] ss:$24 sps:$4 sm:$0xff]  }
 0x290   : > { %6533 = vmatprep.subr.bf16.mxu1 %v12417_v61  ;;  %v12487_v61 = vld [vmem:[%s14420_s22 + $0x9d0] ss:$48 sps:$4 sm:$0xff]  }
 0x292   : > { %2686 = vmatpush1.bf16.msra.mxu0 %v12502_v1  ;;  %v12501_v1 = vld [vmem:[%s14420_s22 + $0xa94] ss:$48 sps:$4 sm:$0xff]  }
 0x293   : > { %6534 = vmatpush1.bf16.msra.mxu1 %v12415_v63  ;;  %2687 = vmatprep.subr.bf16.mxu0 %v12510_v2  ;;  %v12582_v63 = vld [vmem:[%s14418_s19 + $0x824] ss:$24 sps:$4 sm:$0xff]   ;;  %v12580_v2 = vld [vmem:[%s14418_s19 + $0x820] ss:$24 sps:$4 sm:$0xff]  }
 0x294   : > { %6535 = vmatprep.subr.bf16.mxu1 %v12423_v0  ;;  %v12493_v0 = vld [vmem:[%s14420_s22 + $0xa30] ss:$48 sps:$4 sm:$0xff]  }
 0x296   : > { %2688 = vmatpush1.bf16.msra.mxu0 %v12508_v4  ;;  %v12507_v4 = vld [vmem:[%s14420_s22 + $0xaf4] ss:$48 sps:$4 sm:$0xff]  }
 0x297   : > { %6536 = vmatpush1.bf16.msra.mxu1 %v12421_v3  ;;  %2698 = vmatprep.subr.bf16.mxu0 %v12516_v5  ;;  %v12588_v3 = vld [vmem:[%s14418_s19 + $0x854] ss:$24 sps:$4 sm:$0xff]   ;;  %v12586_v5 = vld [vmem:[%s14418_s19 + $0x850] ss:$24 sps:$4 sm:$0xff]  }
 0x298   : > { %6546 = vmatprep.subr.bf16.mxu1 %v12429_v10  ;;  %v12499_v10 = vld [vmem:[%s14420_s22 + $0xa90] ss:$48 sps:$4 sm:$0xff]  }
 0x299   : > { %2690 = vmatmul.mubr.bf16.vlgmr.msra.gmra.mrb[8].mxu0 %v14525_v11  ;;  %v12526_v11 = vld [vmem:[%s14418_s19 + $0x670] ss:$24 sps:$4 sm:$0xff]  }
 0x29a   : > { %6538 = vmatmul.mubr.bf16.vlgmr.msra.gmra.mrb[8].mxu1 %v14671_v28  ;;  %2699 = vmatpush1.bf16.msra.mxu0 %v12514_v7  ;;  %v12513_v7 = vld [vmem:[%s14420_s22 + $0xb54] ss:$48 sps:$4 sm:$0xff]  }
 0x29b   : > { %6547 = vmatpush1.bf16.msra.mxu1 %v12427_v6  ;;  %2700 = vmatprep.subr.bf16.mxu0 %v12522_v8  ;;  %v12594_v6 = vld [vmem:[%s14418_s19 + $0x884] ss:$24 sps:$4 sm:$0xff]   ;;  %v12592_v8 = vld [vmem:[%s14418_s19 + $0x880] ss:$24 sps:$4 sm:$0xff]  }
 0x29c   : > { %6548 = vmatprep.subr.bf16.mxu1 %v12435_v53  ;;  %6578 = vmatprep.mubr.bf16.mxu1 %v14678_v34  ;;  %v12505_v53 = vld [vmem:[%s14420_s22 + $0xaf0] ss:$48 sps:$4 sm:$0xff]  }
 0x29d   : > { %2730 = vmatprep.mubr.bf16.mxu0 %v14553_v35  ;;  %v12540_v35 = vld [vmem:[%s14418_s19 + $0x6d4] ss:$24 sps:$4 sm:$0xff]  }
 0x29e   : > { %2701 = vmatpush1.bf16.msra.mxu0 %v12520_v13  ;;  %v12519_v13 = vld [vmem:[%s14420_s22 + $0xbb4] ss:$48 sps:$4 sm:$0xff]  }
 0x29f   : > { %6549 = vmatpush1.bf16.msra.mxu1 %v12433_v9  ;;  %2702 = vmatprep.subr.bf16.mxu0 %v12528_v14  ;;  %v12600_v9 = vld [vmem:[%s14418_s19 + $0x8b4] ss:$24 sps:$4 sm:$0xff]   ;;  %v12598_v14 = vld [vmem:[%s14418_s19 + $0x8b0] ss:$24 sps:$4 sm:$0xff]  }
 0x2a0   : > { %6550 = vmatprep.subr.bf16.mxu1 %v12441_v12  ;;  %v12511_v12 = vld [vmem:[%s14420_s22 + $0xb50] ss:$48 sps:$4 sm:$0xff]  }
 0x2a2   : > { %2703 = vmatpush1.bf16.msra.mxu0 %v12526_v11  ;;  %v12525_v11 = vld [vmem:[%s14420_s22 + $0xc14] ss:$48 sps:$4 sm:$0xff]  }
 0x2a3   : > { %6551 = vmatpush1.bf16.msra.mxu1 %v12439_v15  ;;  %2704 = vmatprep.subr.bf16.mxu0 %v12534_v18  ;;  %v12606_v15 = vld [vmem:[%s14418_s19 + $0x8e4] ss:$24 sps:$4 sm:$0xff]   ;;  %v12604_v18 = vld [vmem:[%s14418_s19 + $0x8e0] ss:$24 sps:$4 sm:$0xff]   ;;  %s13900_s19 = sshll.u32 %s13997_s13, 4  ;;  %s13901_s19 = int_to_ptr.vmem [resolvable:$false] %s13900_s19 }
 0x2a4   : > { %6552 = vmatprep.subr.bf16.mxu1 %v12447_v16  ;;  %v12517_v16 = vld [vmem:[%s14420_s22 + $0xbb0] ss:$48 sps:$4 sm:$0xff]   ;;  %s13902_s26 = scalar_lea.vmem %s13901_s19, 1536  ;;  %p13903_p2 = scmp.lt.s32.totalorder %s16079_s21, %s13901_s19 }
 0x2a5   : > { %p13904_p4 = scmp.lt.s32.totalorder %s13902_s26, %s13896_s27 }
 0x2a6   : > { %2705 = vmatpush1.bf16.msra.mxu0 %v12532_v23  ;;  %v12531_v23 = vld [vmem:[%s14420_s22 + $0xc74] ss:$48 sps:$4 sm:$0xff]  }
 0x2a7   : > { %6553 = vmatpush1.bf16.msra.mxu1 %v12445_v20  ;;  %2706 = vmatprep.subr.bf16.mxu0 %v12540_v35  ;;  %v12612_v20 = vld [vmem:[%s14420_s22 + $0xc] ss:$48 sps:$4 sm:$0xff]   ;;  %v12610_v35 = vld [vmem:[%s14420_s22 + $0x8] ss:$48 sps:$4 sm:$0xff]   ;;  %p13905_p8 = por %p13904_p4, %p13903_p2 }
 0x2a8   : > { %6554 = vmatprep.subr.bf16.mxu1 %v12453_v22  ;;  %v12523_v22 = vld [vmem:[%s14420_s22 + $0xc10] ss:$48 sps:$4 sm:$0xff]  }
 0x2a9   : > { %p13906_p6 = pnand %p13905_p8, %p13899_p7 }
 0x2aa   : > { %2707 = vmatpush1.bf16.msra.mxu0 %v12538_v27  ;;  %v12537_v27 = vld [vmem:[%s14420_s22 + $0xcd4] ss:$48 sps:$4 sm:$0xff]  }
 0x2ab   : > { %6555 = vmatpush1.bf16.msra.mxu1 %v12451_v24  ;;  %2708 = vmatprep.subr.bf16.mxu0 %v12546_v29  ;;  %v12618_v24 = vld [vmem:[%s14420_s22 + $0x6c] ss:$48 sps:$4 sm:$0xff]   ;;  %v12616_v29 = vld [vmem:[%s14420_s22 + $0x68] ss:$48 sps:$4 sm:$0xff]  }
 0x2ac   : > { %6556 = vmatprep.subr.bf16.mxu1 %v12459_v25  ;;  %v14922_v37 = vpop.f32.mrb[0].mxu0  ;;  %v12529_v25 = vld [vmem:[%s14420_s22 + $0xc70] ss:$48 sps:$4 sm:$0xff]  }
 0x2ad   : > { %v14925_v39 = vpop.f32.mrb[1].mxu0 }
 0x2ae   : > { %v2490_v40 = vpop.f32.mrb[2].mxu0  ;;  %2709 = vmatpush1.bf16.msra.mxu0 %v12544_v32  ;;  %v12543_v32 = vld [vmem:[%s14420_s22 + $0xd34] ss:$48 sps:$4 sm:$0xff]  }
 0x2af   : > { %6557 = vmatpush1.bf16.msra.mxu1 %v12457_v30  ;;  %v2491_v42 = vpop.f32.mrb[3].mxu0  ;;  %2710 = vmatprep.subr.bf16.mxu0 %v12552_v33  ;;  %v12624_v30 = vld [vmem:[%s14420_s22 + $0xcc] ss:$48 sps:$4 sm:$0xff]   ;;  %v12549_v40 = vld [vmem:[%s14420_s22 + $0xd94] ss:$48 sps:$4 sm:$0xff]  }
 0x2b0   : > { %6558 = vmatprep.subr.bf16.mxu1 %v12465_v31  ;;  %v12535_v31 = vld [vmem:[%s14420_s22 + $0xcd0] ss:$48 sps:$4 sm:$0xff]   ;;  %v12630_v33 = vld [vmem:[%s14420_s22 + $0x12c] ss:$48 sps:$4 sm:$0xff]  }
 0x2b1   : > { %v12636_v42 = vld [vmem:[%s14420_s22 + $0x18c] ss:$48 sps:$4 sm:$0xff]  }
 0x2b2   : > { %2711 = vmatpush1.bf16.msra.mxu0 %v12550_v41  ;;  %v12628_v41 = vld [vmem:[%s14420_s22 + $0x128] ss:$48 sps:$4 sm:$0xff]  }
 0x2b3   : > { %6559 = vmatpush1.bf16.msra.mxu1 %v12463_v36  ;;  %2712 = vmatprep.subr.bf16.mxu0 %v12558_v44  ;;  %v900_v36 = vlaneseq }
 0x2b4   : > { %6560 = vmatprep.subr.bf16.mxu1 %v12471_v38  ;;  %v12541_v38 = vld [vmem:[%s14420_s22 + $0xd30] ss:$48 sps:$4 sm:$0xff]  }
 0x2b5   : > { %v14985_v44 = vshrl.u32 %v900_v36, 7  ;;  %v12609_v36 = vld [vmem:[%s14420_s22 + $0x1154] ss:$48 sps:$4 sm:$0xff]  }
 0x2b6   : > { %2713 = vmatpush1.bf16.msra.mxu0 %v12556_v47 }
 0x2b7   : > { %6561 = vmatpush1.bf16.msra.mxu1 %v12469_v45  ;;  %2714 = vmatprep.subr.bf16.mxu0 %v12564_v50  ;;  %v12547_v45 = vld [vmem:[%s14420_s22 + $0xd90] ss:$48 sps:$4 sm:$0xff]   ;;  %v14992_v47 = vsub.s32 3, %v14985_v44 }
 0x2b8   : > { %6562 = vmatprep.subr.bf16.mxu1 %v12477_v46  ;;  %v14989_v46 = vsub.s32 2, %v14985_v44  ;;  %v14995_v50 = vld [vmem:[%s14429_s10] sm:$0x3f] }
 0x2ba   : > { %2715 = vmatpush1.bf16.msra.mxu0 %v12562_v54  ;;  %v12642_v54 = vld [vmem:[%s14420_s22 + $0x1ec] ss:$48 sps:$4 sm:$0xff]  }
 0x2bb   : > { %6563 = vmatpush1.bf16.msra.mxu1 %v12475_v51  ;;  %2716 = vmatprep.subr.bf16.mxu0 %v12570_v55  ;;  %v12555_v51 = vld [vmem:[%s14420_s22 + $0xdf4] ss:$48 sps:$4 sm:$0xff]   ;;  %v911_v55 = vrot.slane %v14995_v50, %v14989_v46 }
 0x2bc   : > { %6564 = vmatprep.subr.bf16.mxu1 %v12483_v52  ;;  %v12634_v52 = vld [vmem:[%s14420_s22 + $0x188] ss:$48 sps:$4 sm:$0xff]  }
 0x2be   : > { %2717 = vmatpush1.bf16.msra.mxu0 %v12568_v59  ;;  %v12561_v59 = vld [vmem:[%s14420_s22 + $0xe54] ss:$48 sps:$4 sm:$0xff]  }
 0x2bf   : > { %6565 = vmatpush1.bf16.msra.mxu1 %v12481_v56  ;;  %2718 = vmatprep.subr.bf16.mxu0 %v12576_v60  ;;  %v12553_v56 = vld [vmem:[%s14420_s22 + $0xdf0] ss:$48 sps:$4 sm:$0xff]   ;;  %v12640_v60 = vld [vmem:[%s14420_s22 + $0x1e8] ss:$48 sps:$4 sm:$0xff]  }
 0x2c0   : > { %6566 = vmatprep.subr.bf16.mxu1 %v12489_v57  ;;  %v915_v57 = vrot.slane %v14995_v50, %v14992_v47 }
 0x2c2   : > { %2719 = vmatpush1.bf16.msra.mxu0 %v12574_v62 }
 0x2c3   : > { %6567 = vmatpush1.bf16.msra.mxu1 %v12487_v61  ;;  %2720 = vmatprep.subr.bf16.mxu0 %v12582_v63  ;;  %v12648_v61 = vld [vmem:[%s14420_s22 + $0x24c] ss:$48 sps:$4 sm:$0xff]  }
 0x2c4   : > { %6568 = vmatprep.subr.bf16.mxu1 %v12495_v48 }
 0x2c6   : > { %2721 = vmatpush1.bf16.msra.mxu0 %v12580_v2  ;;  %v12567_v2 = vld [vmem:[%s14420_s22 + $0xeb4] ss:$48 sps:$4 sm:$0xff]  }
 0x2c7   : > { %6569 = vmatpush1.bf16.msra.mxu1 %v12493_v0  ;;  %2722 = vmatprep.subr.bf16.mxu0 %v12588_v3  ;;  %v12559_v0 = vld [vmem:[%s14420_s22 + $0xe50] ss:$48 sps:$4 sm:$0xff]   ;;  %v12646_v3 = vld [vmem:[%s14420_s22 + $0x248] ss:$48 sps:$4 sm:$0xff]  }
 0x2c8   : > { %6570 = vmatprep.subr.bf16.mxu1 %v12501_v1 }
 0x2ca   : > { %2723 = vmatpush1.bf16.msra.mxu0 %v12586_v5 }
 0x2cb   : > { %6571 = vmatpush1.bf16.msra.mxu1 %v12499_v10  ;;  %2724 = vmatprep.subr.bf16.mxu0 %v12594_v6  ;;  %v12654_v10 = vld [vmem:[%s14420_s22 + $0x2ac] ss:$48 sps:$4 sm:$0xff]  }
 0x2cc   : > { %6572 = vmatprep.subr.bf16.mxu1 %v12507_v4 }
 0x2ce   : > { %2725 = vmatpush1.bf16.msra.mxu0 %v12592_v8  ;;  %v12573_v8 = vld [vmem:[%s14420_s22 + $0xf14] ss:$48 sps:$4 sm:$0xff]  }
 0x2cf   : > { %6573 = vmatpush1.bf16.msra.mxu1 %v12505_v53  ;;  %2726 = vmatprep.subr.bf16.mxu0 %v12600_v9  ;;  %v12652_v9 = vld [vmem:[%s14420_s22 + $0x2a8] ss:$48 sps:$4 sm:$0xff]  }
 0x2d0   : > { %6574 = vmatprep.subr.bf16.mxu1 %v12513_v7  ;;  %v12565_v7 = vld [vmem:[%s14420_s22 + $0xeb0] ss:$48 sps:$4 sm:$0xff]  }
 0x2d2   : > { %2727 = vmatpush1.bf16.msra.mxu0 %v12598_v14  ;;  %v12666_v14 = vld [vmem:[%s14420_s22 + $0x36c] ss:$48 sps:$4 sm:$0xff]  }
 0x2d3   : > { %6575 = vmatpush1.bf16.msra.mxu1 %v12511_v12  ;;  %2728 = vmatprep.subr.bf16.mxu0 %v12606_v15  ;;  %v12571_v12 = vld [vmem:[%s14420_s22 + $0xf10] ss:$48 sps:$4 sm:$0xff]  }
 0x2d4   : > { %6576 = vmatprep.subr.bf16.mxu1 %v12519_v13  ;;  %v12579_v13 = vld [vmem:[%s14420_s22 + $0xf74] ss:$48 sps:$4 sm:$0xff]   ;;  %v12577_v15 = vld [vmem:[%s14420_s22 + $0xf70] ss:$48 sps:$4 sm:$0xff]  }
 0x2d6   : > { %2729 = vmatpush1.bf16.msra.mxu0 %v12604_v18  ;;  %v12672_v18 = vld [vmem:[%s14420_s22 + $0x3cc] ss:$48 sps:$4 sm:$0xff]  }
 0x2d7   : > { %6577 = vmatpush1.bf16.msra.mxu1 %v12517_v16  ;;  %6382 = vmatprep.subr.bf16.mxu0 %v12612_v20  ;;  %v12585_v16 = vld [vmem:[%s14420_s22 + $0xfd4] ss:$48 sps:$4 sm:$0xff]   ;;  %v12583_v20 = vld [vmem:[%s14420_s22 + $0xfd0] ss:$48 sps:$4 sm:$0xff]  }
 0x2d8   : > { %6587 = vmatprep.subr.bf16.mxu1 %v12525_v11  ;;  %v12664_v11 = vld [vmem:[%s14420_s22 + $0x368] ss:$48 sps:$4 sm:$0xff]  }
 0x2d9   : > { %2731 = vmatmul.mubr.bf16.vlgmr.msra.gmra.mrb[8].mxu0 %v14597_v17  ;;  %v12622_v17 = vld [vmem:[%s14420_s22 + $0xc8] ss:$48 sps:$4 sm:$0xff]  }
 0x2da   : > { %6579 = vmatmul.mubr.bf16.vlgmr.msra.gmra.mrb[8].mxu1 %v14746_v43  ;;  %6383 = vmatpush1.bf16.msra.mxu0 %v12610_v35  ;;  %v12678_v35 = vld [vmem:[%s14420_s22 + $0x42c] ss:$48 sps:$4 sm:$0xff]  }
 0x2db   : > { %6588 = vmatpush1.bf16.msra.mxu1 %v12523_v22  ;;  %6384 = vmatprep.subr.bf16.mxu0 %v12618_v24  ;;  %v12591_v22 = vld [vmem:[%s14420_s22 + $0x1034] ss:$48 sps:$4 sm:$0xff]   ;;  %v12589_v24 = vld [vmem:[%s14420_s22 + $0x1030] ss:$48 sps:$4 sm:$0xff]  }
 0x2dc   : > { %6589 = vmatprep.subr.bf16.mxu1 %v12531_v23  ;;  %6619 = vmatprep.mubr.bf16.mxu1 %v14752_v49  ;;  %v12670_v23 = vld [vmem:[%s14420_s22 + $0x3c8] ss:$48 sps:$4 sm:$0xff]  }
 0x2dd   : > { %6414 = vmatprep.mubr.bf16.mxu0 %v14609_v26 }
 0x2de   : > { %6385 = vmatpush1.bf16.msra.mxu0 %v12616_v29  ;;  %v12684_v29 = vld [vmem:[%s14420_s22 + $0x48c] ss:$48 sps:$4 sm:$0xff]  }
 0x2df   : > { %6590 = vmatpush1.bf16.msra.mxu1 %v12529_v25  ;;  %6386 = vmatprep.subr.bf16.mxu0 %v12624_v30  ;;  %v12597_v25 = vld [vmem:[%s14420_s22 + $0x1094] ss:$48 sps:$4 sm:$0xff]   ;;  %v12595_v30 = vld [vmem:[%s14420_s22 + $0x1090] ss:$48 sps:$4 sm:$0xff]  }
 0x2e0   : > { %6591 = vmatprep.subr.bf16.mxu1 %v12537_v27  ;;  %v12676_v27 = vld [vmem:[%s14420_s22 + $0x428] ss:$48 sps:$4 sm:$0xff]  }
 0x2e2   : > { %6387 = vmatpush1.bf16.msra.mxu0 %v12622_v17  ;;  %v12690_v17 = vld [vmem:[%s14420_s22 + $0x4ec] ss:$48 sps:$4 sm:$0xff]  }
 0x2e3   : > { %6592 = vmatpush1.bf16.msra.mxu1 %v12535_v31  ;;  %6388 = vmatprep.subr.bf16.mxu0 %v12630_v33  ;;  %v12603_v31 = vld [vmem:[%s14420_s22 + $0x10f4] ss:$48 sps:$4 sm:$0xff]   ;;  %v12601_v33 = vld [vmem:[%s14420_s22 + $0x10f0] ss:$48 sps:$4 sm:$0xff]  }
 0x2e4   : > { %6593 = vmatprep.subr.bf16.mxu1 %v12543_v32  ;;  %v12682_v32 = vld [vmem:[%s14420_s22 + $0x488] ss:$48 sps:$4 sm:$0xff]  }
 0x2e6   : > { %6389 = vmatpush1.bf16.msra.mxu0 %v12628_v41  ;;  %v12607_v41 = vld [vmem:[%s14420_s22 + $0x1150] ss:$48 sps:$4 sm:$0xff]  }
 0x2e7   : > { %6594 = vmatpush1.bf16.msra.mxu1 %v12541_v38  ;;  %6390 = vmatprep.subr.bf16.mxu0 %v12636_v42  ;;  %v12688_v38 = vld [vmem:[%s14420_s22 + $0x4e8] ss:$48 sps:$4 sm:$0xff]   ;;  %v12615_v42 = vld [vmem:[%s14420_s22 + $0x11b4] ss:$48 sps:$4 sm:$0xff]  }
 0x2e8   : > { %6595 = vmatprep.subr.bf16.mxu1 %v12549_v40  ;;  %v12696_v40 = vld [vmem:[%s14420_s22 + $0x54c] ss:$48 sps:$4 sm:$0xff]  }
 0x2ea   : > { %6391 = vmatpush1.bf16.msra.mxu0 %v12634_v52  ;;  %v12613_v52 = vld [vmem:[%s14420_s22 + $0x11b0] ss:$48 sps:$4 sm:$0xff]  }
 0x2eb   : > { %6596 = vmatpush1.bf16.msra.mxu1 %v12547_v45  ;;  %6392 = vmatprep.subr.bf16.mxu0 %v12642_v54  ;;  %v12694_v45 = vld [vmem:[%s14420_s22 + $0x548] ss:$48 sps:$4 sm:$0xff]   ;;  %v12621_v54 = vld [vmem:[%s14420_s22 + $0x24] ss:$48 sps:$4 sm:$0xff]  }
 0x2ec   : > { %6597 = vmatprep.subr.bf16.mxu1 %v12555_v51  ;;  %v2527_v48 = vpop.f32.mrb[4].mxu0  ;;  %v12702_v51 = vld [vmem:[%s14420_s22 + $0x5ac] ss:$48 sps:$4 sm:$0xff]  }
 0x2ed   : > { %v2528_v62 = vadd.f32 %v2527_v48, %v911_v55  ;;  %v2529_v63 = vpop.f32.mrb[5].mxu0  ;;  %v12700_v55 = vld [vmem:[%s14420_s22 + $0x5a8] ss:$48 sps:$4 sm:$0xff]   ;;  %v12625_v48 = vld [vmem:[%s14420_s22 + $0x80] ss:$48 sps:$4 sm:$0xff]  }
 0x2ee   : > { %v2530_v1 = vadd.f32 %v2529_v63, %v915_v57  ;;  %6393 = vmatpush1.bf16.msra.mxu0 %v12640_v60  ;;  %v2531_v5 = vpop.f32.mrb[6].mxu0  ;;  %v12619_v57 = vld [vmem:[%s14420_s22 + $0x20] ss:$48 sps:$4 sm:$0xff]   ;;  %v12706_v60 = vld [vmem:[%s14420_s22 + $0x608] ss:$48 sps:$4 sm:$0xff]  }
 0x2ef   : > { %6598 = vmatpush1.bf16.msra.mxu1 %v12553_v56  ;;  %v15013_v4 = vadd.f32 %v14849_v19, %v2528_v62  ;;  %6394 = vmatprep.subr.bf16.mxu0 %v12648_v61  ;;  %v2532_v53 = vpop.f32.mrb[7].mxu0  ;;  %v12660_v19 = vld [vmem:[%s14420_s22 + $0x30c] ss:$48 sps:$4 sm:$0xff]   ;;  %v12633_v62 = vld [vmem:[%s14420_s22 + $0xe4] ss:$48 sps:$4 sm:$0xff]  }
 0x2f0   : > { %6599 = vmatprep.subr.bf16.mxu1 %v12561_v59  ;;  %v15016_v6 = vadd.f32 %v14852_v21, %v2530_v1  ;;  %v12658_v21 = vld [vmem:[%s14420_s22 + $0x308] ss:$48 sps:$4 sm:$0xff]   ;;  %v12708_v56 = vld [vmem:[%s14420_s22 + $0x60c] ss:$48 sps:$4 sm:$0xff]   ;;  %v12627_v59 = vld [vmem:[%s14420_s22 + $0x84] ss:$48 sps:$4 sm:$0xff]  }
 0x2f1   : > { %v12714_v61 = vld [vmem:[%s14420_s22 + $0x66c] ss:$48 sps:$4 sm:$0xff]   ;;  %v12712_v63 = vld [vmem:[%s14420_s22 + $0x668] ss:$48 sps:$4 sm:$0xff]   ;;  %v12631_v1 = vld [vmem:[%s14420_s22 + $0xe0] ss:$48 sps:$4 sm:$0xff]  }
 0x2f2   : > { %6395 = vmatpush1.bf16.msra.mxu0 %v12646_v3  ;;  %v12718_v3 = vld [vmem:[%s14420_s22 + $0x6c8] ss:$48 sps:$4 sm:$0xff]   ;;  %v12637_v5 = vld [vmem:[%s14420_s22 + $0x140] ss:$48 sps:$4 sm:$0xff]  }
 0x2f3   : > { %6600 = vmatpush1.bf16.msra.mxu1 %v12559_v0  ;;  %6396 = vmatprep.subr.bf16.mxu0 %v12654_v10  ;;  %v12720_v0 = vld [vmem:[%s14420_s22 + $0x6cc] ss:$48 sps:$4 sm:$0xff]   ;;  %v12724_v53 = vld [vmem:[%s14420_s22 + $0x728] ss:$48 sps:$4 sm:$0xff]  }
 0x2f4   : > { %6601 = vmatprep.subr.bf16.mxu1 %v12567_v2  ;;  %v12639_v2 = vld [vmem:[%s14420_s22 + $0x144] ss:$48 sps:$4 sm:$0xff]   ;;  %v12726_v10 = vld [vmem:[%s14420_s22 + $0x72c] ss:$48 sps:$4 sm:$0xff]  }
 0x2f6   : > { %6397 = vmatpush1.bf16.msra.mxu0 %v12652_v9  ;;  %v12643_v9 = vld [vmem:[%s14420_s22 + $0x1a0] ss:$48 sps:$4 sm:$0xff]  }
 0x2f7   : > { %6602 = vmatpush1.bf16.msra.mxu1 %v12565_v7  ;;  %6398 = vmatprep.subr.bf16.mxu0 %v12660_v19  ;;  %v12645_v7 = vld [vmem:[%s14420_s22 + $0x1a4] ss:$48 sps:$4 sm:$0xff]   ;;  %v3315_v19 = vld [vmem:[%s14436_s1] sm:$0xff] }
 0x2f8   : > { %6603 = vmatprep.subr.bf16.mxu1 %v12573_v8  ;;  %v12732_v8 = vld [vmem:[%s14420_s22 + $0x78c] ss:$48 sps:$4 sm:$0xff]  }
 0x2fa   : > { %6399 = vmatpush1.bf16.msra.mxu0 %v12658_v21  ;;  %v15079_v21 = vsub.s32 0, %v14985_v44 }
 0x2fb   : > { %6604 = vmatpush1.bf16.msra.mxu1 %v12571_v12  ;;  %6400 = vmatprep.subr.bf16.mxu0 %v12666_v14  ;;  %v12651_v12 = vld [vmem:[%s14420_s22 + $0x204] ss:$48 sps:$4 sm:$0xff]   ;;  %v12738_v14 = vld [vmem:[%s14420_s22 + $0x7ec] ss:$48 sps:$4 sm:$0xff]  }
 0x2fc   : > { %6605 = vmatprep.subr.bf16.mxu1 %v12579_v13  ;;  %v12730_v13 = vld [vmem:[%s14420_s22 + $0x788] ss:$48 sps:$4 sm:$0xff]  }
 0x2fe   : > { %6401 = vmatpush1.bf16.msra.mxu0 %v12664_v11  ;;  %v12649_v11 = vld [vmem:[%s14420_s22 + $0x200] ss:$48 sps:$4 sm:$0xff]  }
 0x2ff   : > { %6606 = vmatpush1.bf16.msra.mxu1 %v12577_v15  ;;  %6402 = vmatprep.subr.bf16.mxu0 %v12672_v18  ;;  %v15083_v15 = vsub.s32 1, %v14985_v44  ;;  %v12736_v18 = vld [vmem:[%s14420_s22 + $0x7e8] ss:$48 sps:$4 sm:$0xff]  }
 0x300   : > { %6607 = vmatprep.subr.bf16.mxu1 %v12585_v16  ;;  %v3322_v16 = vrot.slane %v3315_v19, %v15079_v21 }
 0x302   : > { %6403 = vmatpush1.bf16.msra.mxu0 %v12670_v23  ;;  %v12744_v23 = vld [vmem:[%s14420_s22 + $0x84c] ss:$48 sps:$4 sm:$0xff]  }
 0x303   : > { %6608 = vmatpush1.bf16.msra.mxu1 %v12583_v20  ;;  %6404 = vmatprep.subr.bf16.mxu0 %v12678_v35  ;;  %v3326_v20 = vrot.slane %v3315_v19, %v15083_v15  ;;  %v12705_v19 = vld [vmem:[%s14420_s22 + $0x564] ss:$48 sps:$4 sm:$0xff]  }
 0x304   : > { %6609 = vmatprep.subr.bf16.mxu1 %v12591_v22  ;;  %v12657_v22 = vld [vmem:[%s14420_s22 + $0x264] ss:$48 sps:$4 sm:$0xff]  }
 0x306   : > { %6405 = vmatpush1.bf16.msra.mxu0 %v12676_v27  ;;  %v12655_v27 = vld [vmem:[%s14420_s22 + $0x260] ss:$48 sps:$4 sm:$0xff]  }
 0x307   : > { %6610 = vmatpush1.bf16.msra.mxu1 %v12589_v24  ;;  %6406 = vmatprep.subr.bf16.mxu0 %v12684_v29 }
 0x308   : > { %6611 = vmatprep.subr.bf16.mxu1 %v12597_v25 }
 0x30a   : > { %6407 = vmatpush1.bf16.msra.mxu0 %v12682_v32  ;;  %v907_v32 = vrot.slane %v14995_v50, %v15083_v15  ;;  %v12748_v50 = vld [vmem:[%s14420_s22 + $0x8a8] ss:$48 sps:$4 sm:$0xff]  }
 0x30b   : > { %6612 = vmatpush1.bf16.msra.mxu1 %v12595_v30  ;;  %6408 = vmatprep.subr.bf16.mxu0 %v12690_v17  ;;  %v12663_v30 = vld [vmem:[%s14420_s22 + $0x2c4] ss:$48 sps:$4 sm:$0xff]  }
 0x30c   : > { %6613 = vmatprep.subr.bf16.mxu1 %v12603_v31  ;;  %v12742_v31 = vld [vmem:[%s14420_s22 + $0x848] ss:$48 sps:$4 sm:$0xff]  }
 0x30e   : > { %6409 = vmatpush1.bf16.msra.mxu0 %v12688_v38  ;;  %v12750_v38 = vld [vmem:[%s14420_s22 + $0x8ac] ss:$48 sps:$4 sm:$0xff]  }
 0x30f   : > { %6614 = vmatpush1.bf16.msra.mxu1 %v12601_v33  ;;  %6410 = vmatprep.subr.bf16.mxu0 %v12696_v40  ;;  %v12661_v40 = vld [vmem:[%s14420_s22 + $0x2c0] ss:$48 sps:$4 sm:$0xff]  }
 0x310   : > { %6615 = vmatprep.subr.bf16.mxu1 %v12609_v36 }
 0x312   : > { %6411 = vmatpush1.bf16.msra.mxu0 %v12694_v45  ;;  %v11664_v45 = vadd.f32 %v14925_v39, %v907_v32  ;;  %v12673_v39 = vld [vmem:[%s14420_s22 + $0x380] ss:$48 sps:$4 sm:$0xff]   ;;  %v12808_v32 = vld [vmem:[%s14420_s22 + $0xc68] ss:$48 sps:$4 sm:$0xff]  }
 0x313   : > { %6616 = vmatpush1.bf16.msra.mxu1 %v12607_v41  ;;  %6412 = vmatprep.subr.bf16.mxu0 %v12702_v51  ;;  %v12669_v41 = vld [vmem:[%s14420_s22 + $0x324] ss:$48 sps:$4 sm:$0xff]  }
 0x314   : > { %6617 = vmatprep.subr.bf16.mxu1 %v12615_v42  ;;  %v12756_v42 = vld [vmem:[%s14420_s22 + $0x90c] ss:$48 sps:$4 sm:$0xff]  }
 0x316   : > { %6413 = vmatpush1.bf16.msra.mxu0 %v12700_v55  ;;  %v12754_v55 = vld [vmem:[%s14420_s22 + $0x908] ss:$48 sps:$4 sm:$0xff]  }
 0x317   : > { %6618 = vmatpush1.bf16.msra.mxu1 %v12613_v52  ;;  %6423 = vmatprep.subr.bf16.mxu0 %v12708_v56  ;;  %v12667_v52 = vld [vmem:[%s14420_s22 + $0x320] ss:$48 sps:$4 sm:$0xff]   ;;  %v12762_v56 = vld [vmem:[%s14420_s22 + $0x96c] ss:$48 sps:$4 sm:$0xff]  }
 0x318   : > { %6751 = vmatprep.subr.bf16.mxu1 %v12621_v54  ;;  %v12675_v54 = vld [vmem:[%s14420_s22 + $0x384] ss:$48 sps:$4 sm:$0xff]  }
 0x319   : > { %6415 = vmatmul.mubr.bf16.vlgmr.msra.gmra.mrb[12].mxu0 %v14671_v28 }
 0x31a   : > { %6620 = vmatmul.mubr.bf16.vlgmr.msra.gmra.mrb[8].mxu1 %v14819_v58  ;;  %6424 = vmatpush1.bf16.msra.mxu0 %v12706_v60  ;;  %v12760_v60 = vld [vmem:[%s14420_s22 + $0x968] ss:$48 sps:$4 sm:$0xff]  }
 0x31b   : > { %6752 = vmatpush1.bf16.msra.mxu1 %v12619_v57  ;;  %6425 = vmatprep.subr.bf16.mxu0 %v12714_v61  ;;  %v15114_v57 = vpack.c.bf16 %v11664_v45, %v11664_v45  ;;  %v12768_v61 = vld [vmem:[%s14420_s22 + $0x9cc] ss:$48 sps:$4 sm:$0xff]   ;;  %v12741_v45 = vld [vmem:[%s14420_s22 + $0x7a4] ss:$48 sps:$4 sm:$0xff]  }
 0x31c   : > { %6753 = vmatprep.subr.bf16.mxu1 %v12627_v59  ;;  %6783 = vmatprep.mubr.bf16.mxu1 %v14609_v26  ;;  %v12681_v59 = vld [vmem:[%s14420_s22 + $0x3e4] ss:$48 sps:$4 sm:$0xff]  }
 0x31d   : > { %6455 = vmatprep.mubr.bf16.mxu0 %v14678_v34 }
 0x31e   : > { %6426 = vmatpush1.bf16.msra.mxu0 %v12712_v63  ;;  %v12766_v63 = vld [vmem:[%s14420_s22 + $0x9c8] ss:$48 sps:$4 sm:$0xff]  }
 0x31f   : > { %6754 = vmatpush1.bf16.msra.mxu1 %v12625_v48  ;;  %6427 = vmatprep.subr.bf16.mxu0 %v12720_v0  ;;  %v12679_v48 = vld [vmem:[%s14420_s22 + $0x3e0] ss:$48 sps:$4 sm:$0xff]   ;;  %v12774_v0 = vld [vmem:[%s14420_s22 + $0xa2c] ss:$48 sps:$4 sm:$0xff]  }
 0x320   : > { %6755 = vmatprep.subr.bf16.mxu1 %v12633_v62  ;;  %v12687_v62 = vld [vmem:[%s14420_s22 + $0x444] ss:$48 sps:$4 sm:$0xff]  }
 0x322   : > { %6428 = vmatpush1.bf16.msra.mxu0 %v12718_v3  ;;  %v12772_v3 = vld [vmem:[%s14420_s22 + $0xa28] ss:$48 sps:$4 sm:$0xff]  }
 0x323   : > { %6756 = vmatpush1.bf16.msra.mxu1 %v12631_v1  ;;  %6429 = vmatprep.subr.bf16.mxu0 %v12726_v10  ;;  %v12685_v1 = vld [vmem:[%s14420_s22 + $0x440] ss:$48 sps:$4 sm:$0xff]   ;;  %v12780_v10 = vld [vmem:[%s14420_s22 + $0xa8c] ss:$48 sps:$4 sm:$0xff]  }
 0x324   : > { %6757 = vmatprep.subr.bf16.mxu1 %v12639_v2  ;;  %v12693_v2 = vld [vmem:[%s14420_s22 + $0x4a4] ss:$48 sps:$4 sm:$0xff]  }
 0x326   : > { %6430 = vmatpush1.bf16.msra.mxu0 %v12724_v53  ;;  %v12699_v53 = vld [vmem:[%s14420_s22 + $0x504] ss:$48 sps:$4 sm:$0xff]  }
 0x327   : > { %6758 = vmatpush1.bf16.msra.mxu1 %v12637_v5  ;;  %6431 = vmatprep.subr.bf16.mxu0 %v12732_v8  ;;  %v12691_v5 = vld [vmem:[%s14420_s22 + $0x4a0] ss:$48 sps:$4 sm:$0xff]   ;;  %v12786_v8 = vld [vmem:[%s14420_s22 + $0xaec] ss:$48 sps:$4 sm:$0xff]  }
 0x328   : > { %6759 = vmatprep.subr.bf16.mxu1 %v12645_v7  ;;  %v12778_v7 = vld [vmem:[%s14420_s22 + $0xa88] ss:$48 sps:$4 sm:$0xff]  }
 0x32a   : > { %6432 = vmatpush1.bf16.msra.mxu0 %v12730_v13  ;;  %v12792_v13 = vld [vmem:[%s14420_s22 + $0xb4c] ss:$48 sps:$4 sm:$0xff]  }
 0x32b   : > { %6760 = vmatpush1.bf16.msra.mxu1 %v12643_v9  ;;  %6433 = vmatprep.subr.bf16.mxu0 %v12738_v14  ;;  %v12697_v9 = vld [vmem:[%s14420_s22 + $0x500] ss:$48 sps:$4 sm:$0xff]  }
 0x32c   : > { %6761 = vmatprep.subr.bf16.mxu1 %v12651_v12  ;;  %v12784_v12 = vld [vmem:[%s14420_s22 + $0xae8] ss:$48 sps:$4 sm:$0xff]   ;;  %v12703_v14 = vld [vmem:[%s14420_s22 + $0x560] ss:$48 sps:$4 sm:$0xff]  }
 0x32d   : > { %v6375_v35 = vpop.f32.mrb[4].mxu1 }
 0x32e   : > { %v11671_v24 = vadd.f32 %v6375_v35, %v3322_v16  ;;  %v6377_v25 = vpop.f32.mrb[5].mxu1  ;;  %6434 = vmatpush1.bf16.msra.mxu0 %v12736_v18  ;;  %v12711_v16 = vld [vmem:[%s14420_s22 + $0x5c4] ss:$48 sps:$4 sm:$0xff]   ;;  %v12798_v18 = vld [vmem:[%s14420_s22 + $0xbac] ss:$48 sps:$4 sm:$0xff]  }
 0x32f   : > { %v6379_v29 = vpop.f32.mrb[6].mxu1  ;;  %6762 = vmatpush1.bf16.msra.mxu1 %v12649_v11  ;;  %v11672_v33 = vadd.f32 %v6377_v25, %v3326_v20  ;;  %6435 = vmatprep.subr.bf16.mxu0 %v12744_v23  ;;  %v12790_v11 = vld [vmem:[%s14420_s22 + $0xb48] ss:$48 sps:$4 sm:$0xff]   ;;  %v12709_v20 = vld [vmem:[%s14420_s22 + $0x5c0] ss:$48 sps:$4 sm:$0xff]  }
 0x330   : > { %v15096_v17 = vpack.c.bf16 %v11671_v24, %v11671_v24  ;;  %v6380_v36 = vpop.f32.mrb[7].mxu1  ;;  %6763 = vmatprep.subr.bf16.mxu1 %v12657_v22  ;;  %v12717_v22 = vld [vmem:[%s14420_s22 + $0x624] ss:$48 sps:$4 sm:$0xff]   ;;  %v12796_v23 = vld [vmem:[%s14420_s22 + $0xba8] ss:$48 sps:$4 sm:$0xff]  }
 0x331   : > { %v15106_v51 = vpack.c.bf16 %v11672_v33, %v11672_v33  ;;  %v12804_v35 = vld [vmem:[%s14420_s22 + $0xc0c] ss:$48 sps:$4 sm:$0xff]   ;;  %v12715_v24 = vld [vmem:[%s14420_s22 + $0x620] ss:$48 sps:$4 sm:$0xff]   ;;  %v12723_v25 = vld [vmem:[%s14420_s22 + $0x684] ss:$48 sps:$4 sm:$0xff]  }
 0x332   : > { %7132 = vrot.lane.b32.xlu1 %v15096_v17, %s13992_s15  ;;  %6436 = vmatpush1.bf16.msra.mxu0 %v12742_v31  ;;  %v12810_v29 = vld [vmem:[%s14420_s22 + $0xc6c] ss:$48 sps:$4 sm:$0xff]   ;;  %v12729_v31 = vld [vmem:[%s14420_s22 + $0x6e4] ss:$48 sps:$4 sm:$0xff]   ;;  %v12727_v36 = vld [vmem:[%s14420_s22 + $0x6e0] ss:$48 sps:$4 sm:$0xff]  }
 0x333   : > { %6764 = vmatpush1.bf16.msra.mxu1 %v12655_v27  ;;  %6437 = vmatprep.subr.bf16.mxu0 %v12750_v38  ;;  %v12802_v27 = vld [vmem:[%s14420_s22 + $0xc08] ss:$48 sps:$4 sm:$0xff]   ;;  %v12816_v33 = vld [vmem:[%s14420_s22 + $0xccc] ss:$48 sps:$4 sm:$0xff]  }
 0x334   : > { %6765 = vmatprep.subr.bf16.mxu1 %v12663_v30  ;;  %v12721_v30 = vld [vmem:[%s14420_s22 + $0x680] ss:$48 sps:$4 sm:$0xff]   ;;  %v12814_v38 = vld [vmem:[%s14420_s22 + $0xcc8] ss:$48 sps:$4 sm:$0xff]  }
 0x336   : > { %7134 = vrot.lane.b32.xlu1 %v15106_v51, %s13992_s15  ;;  %6438 = vmatpush1.bf16.msra.mxu0 %v12748_v50  ;;  %v12733_v50 = vld [vmem:[%s14420_s22 + $0x740] ss:$48 sps:$4 sm:$0xff]  }
 0x337   : > { %6766 = vmatpush1.bf16.msra.mxu1 %v12661_v40  ;;  %6439 = vmatprep.subr.bf16.mxu0 %v12756_v42  ;;  %v12735_v40 = vld [vmem:[%s14420_s22 + $0x744] ss:$48 sps:$4 sm:$0xff]   ;;  %v12820_v42 = vld [vmem:[%s14420_s22 + $0xd28] ss:$48 sps:$4 sm:$0xff]  }
 0x338   : > { %6767 = vmatprep.subr.bf16.mxu1 %v12669_v41  ;;  %v12822_v41 = vld [vmem:[%s14420_s22 + $0xd2c] ss:$48 sps:$4 sm:$0xff]  }
 0x33a   : > { %7126 = vrot.lane.b32.xlu1 %v15114_v57, %s13992_s15  ;;  %6440 = vmatpush1.bf16.msra.mxu0 %v12754_v55  ;;  %v12747_v55 = vld [vmem:[%s14420_s22 + $0x804] ss:$48 sps:$4 sm:$0xff]  }
 0x33b   : > { %6768 = vmatpush1.bf16.msra.mxu1 %v12667_v52  ;;  %6441 = vmatprep.subr.bf16.mxu0 %v12762_v56  ;;  %v12828_v52 = vld [vmem:[%s14420_s22 + $0xd8c] ss:$48 sps:$4 sm:$0xff]   ;;  %v12826_v56 = vld [vmem:[%s14420_s22 + $0xd88] ss:$48 sps:$4 sm:$0xff]  }
 0x33c   : > { %6769 = vmatprep.subr.bf16.mxu1 %v12675_v54  ;;  %v12739_v54 = vld [vmem:[%s14420_s22 + $0x7a0] ss:$48 sps:$4 sm:$0xff]  }
 0x33e   : > { %6442 = vmatpush1.bf16.msra.mxu0 %v12760_v60  ;;  %v12832_v60 = vld [vmem:[%s14420_s22 + $0xde8] ss:$48 sps:$4 sm:$0xff]  }
 0x33f   : > { %6770 = vmatpush1.bf16.msra.mxu1 %v12673_v39  ;;  %6443 = vmatprep.subr.bf16.mxu0 %v12768_v61  ;;  %v12834_v39 = vld [vmem:[%s14420_s22 + $0xdec] ss:$48 sps:$4 sm:$0xff]   ;;  %v12753_v61 = vld [vmem:[%s14420_s22 + $0x864] ss:$48 sps:$4 sm:$0xff]  }
 0x340   : > { %6771 = vmatprep.subr.bf16.mxu1 %v12681_v59  ;;  %v12745_v59 = vld [vmem:[%s14420_s22 + $0x800] ss:$48 sps:$4 sm:$0xff]  }
 0x342   : > { %6444 = vmatpush1.bf16.msra.mxu0 %v12766_v63  ;;  %v12759_v63 = vld [vmem:[%s14420_s22 + $0x8c4] ss:$48 sps:$4 sm:$0xff]  }
 0x343   : > { %6772 = vmatpush1.bf16.msra.mxu1 %v12679_v48  ;;  %6445 = vmatprep.subr.bf16.mxu0 %v12774_v0  ;;  %v12840_v48 = vld [vmem:[%s14420_s22 + $0xe4c] ss:$48 sps:$4 sm:$0xff]   ;;  %v12838_v0 = vld [vmem:[%s14420_s22 + $0xe48] ss:$48 sps:$4 sm:$0xff]  }
 0x344   : > { %6773 = vmatprep.subr.bf16.mxu1 %v12687_v62  ;;  %v12751_v62 = vld [vmem:[%s14420_s22 + $0x860] ss:$48 sps:$4 sm:$0xff]  }
 0x346   : > { %6446 = vmatpush1.bf16.msra.mxu0 %v12772_v3  ;;  %v12844_v3 = vld [vmem:[%s14420_s22 + $0xea8] ss:$48 sps:$4 sm:$0xff]  }
 0x347   : > { %6774 = vmatpush1.bf16.msra.mxu1 %v12685_v1  ;;  %6447 = vmatprep.subr.bf16.mxu0 %v12780_v10  ;;  %v12846_v1 = vld [vmem:[%s14420_s22 + $0xeac] ss:$48 sps:$4 sm:$0xff]   ;;  %v12765_v10 = vld [vmem:[%s14420_s22 + $0x924] ss:$48 sps:$4 sm:$0xff]  }
 0x348   : > { %6775 = vmatprep.subr.bf16.mxu1 %v12693_v2  ;;  %v12757_v2 = vld [vmem:[%s14420_s22 + $0x8c0] ss:$48 sps:$4 sm:$0xff]  }
 0x34a   : > { %6448 = vmatpush1.bf16.msra.mxu0 %v12778_v7  ;;  %v12850_v7 = vld [vmem:[%s14420_s22 + $0xf08] ss:$48 sps:$4 sm:$0xff]  }
 0x34b   : > { %6776 = vmatpush1.bf16.msra.mxu1 %v12691_v5  ;;  %6449 = vmatprep.subr.bf16.mxu0 %v12786_v8  ;;  %v12852_v5 = vld [vmem:[%s14420_s22 + $0xf0c] ss:$48 sps:$4 sm:$0xff]   ;;  %v12771_v8 = vld [vmem:[%s14420_s22 + $0x984] ss:$48 sps:$4 sm:$0xff]  }
 0x34c   : > { %6777 = vmatprep.subr.bf16.mxu1 %v12699_v53  ;;  %v12763_v53 = vld [vmem:[%s14420_s22 + $0x920] ss:$48 sps:$4 sm:$0xff]  }
 0x34e   : > { %6450 = vmatpush1.bf16.msra.mxu0 %v12784_v12  ;;  %v12856_v12 = vld [vmem:[%s14420_s22 + $0xf68] ss:$48 sps:$4 sm:$0xff]  }
 0x34f   : > { %6778 = vmatpush1.bf16.msra.mxu1 %v12697_v9  ;;  %6451 = vmatprep.subr.bf16.mxu0 %v12792_v13  ;;  %v12858_v9 = vld [vmem:[%s14420_s22 + $0xf6c] ss:$48 sps:$4 sm:$0xff]   ;;  %v12777_v13 = vld [vmem:[%s14420_s22 + $0x9e4] ss:$48 sps:$4 sm:$0xff]  }
 0x350   : > { %6779 = vmatprep.subr.bf16.mxu1 %v12705_v19  ;;  %v12769_v19 = vld [vmem:[%s14420_s22 + $0x980] ss:$48 sps:$4 sm:$0xff]  }
 0x352   : > { %6452 = vmatpush1.bf16.msra.mxu0 %v12790_v11  ;;  %v12783_v11 = vld [vmem:[%s14420_s22 + $0xa44] ss:$48 sps:$4 sm:$0xff]  }
 0x353   : > { %6780 = vmatpush1.bf16.msra.mxu1 %v12703_v14  ;;  %6453 = vmatprep.subr.bf16.mxu0 %v12798_v18  ;;  %v12864_v14 = vld [vmem:[%s14420_s22 + $0xfcc] ss:$48 sps:$4 sm:$0xff]   ;;  %v12862_v18 = vld [vmem:[%s14420_s22 + $0xfc8] ss:$48 sps:$4 sm:$0xff]  }
 0x354   : > { %6781 = vmatprep.subr.bf16.mxu1 %v12711_v16  ;;  %v12775_v16 = vld [vmem:[%s14420_s22 + $0x9e0] ss:$48 sps:$4 sm:$0xff]  }
 0x356   : > { %6454 = vmatpush1.bf16.msra.mxu0 %v12796_v23  ;;  %v12789_v23 = vld [vmem:[%s14420_s22 + $0xaa4] ss:$48 sps:$4 sm:$0xff]  }
 0x357   : > { %6782 = vmatpush1.bf16.msra.mxu1 %v12709_v20  ;;  %6464 = vmatprep.subr.bf16.mxu0 %v12804_v35  ;;  %v12870_v20 = vld [vmem:[%s14420_s22 + $0x102c] ss:$48 sps:$4 sm:$0xff]   ;;  %v12868_v35 = vld [vmem:[%s14420_s22 + $0x1028] ss:$48 sps:$4 sm:$0xff]  }
 0x358   : > { %6792 = vmatprep.subr.bf16.mxu1 %v12717_v22  ;;  %v12781_v22 = vld [vmem:[%s14420_s22 + $0xa40] ss:$48 sps:$4 sm:$0xff]  }
 0x359   : > { %6456 = vmatmul.mubr.bf16.vlgmr.msra.gmra.mrb[12].mxu0 %v14746_v43 }
 0x35a   : > { %6784 = vmatmul.mubr.bf16.vlgmr.msra.gmra.mrb[12].mxu1 %v14671_v28  ;;  %6465 = vmatpush1.bf16.msra.mxu0 %v12802_v27  ;;  %v12795_v27 = vld [vmem:[%s14420_s22 + $0xb04] ss:$48 sps:$4 sm:$0xff]  }
 0x35b   : > { %6793 = vmatpush1.bf16.msra.mxu1 %v12715_v24  ;;  %6466 = vmatprep.subr.bf16.mxu0 %v12810_v29  ;;  %v12876_v24 = vld [vmem:[%s14420_s22 + $0x108c] ss:$48 sps:$4 sm:$0xff]   ;;  %v12874_v29 = vld [vmem:[%s14420_s22 + $0x1088] ss:$48 sps:$4 sm:$0xff]  }
 0x35c   : > { %6794 = vmatprep.subr.bf16.mxu1 %v12723_v25  ;;  %6824 = vmatprep.mubr.bf16.mxu1 %v14678_v34  ;;  %v12787_v25 = vld [vmem:[%s14420_s22 + $0xaa0] ss:$48 sps:$4 sm:$0xff]  }
 0x35d   : > { %6496 = vmatprep.mubr.bf16.mxu0 %v14752_v49 }
 0x35e   : > { %6467 = vmatpush1.bf16.msra.mxu0 %v12808_v32  ;;  %v12801_v32 = vld [vmem:[%s14420_s22 + $0xb64] ss:$48 sps:$4 sm:$0xff]  }
 0x35f   : > { %6795 = vmatpush1.bf16.msra.mxu1 %v12721_v30  ;;  %6468 = vmatprep.subr.bf16.mxu0 %v12816_v33  ;;  %v12882_v30 = vld [vmem:[%s14420_s22 + $0x10ec] ss:$48 sps:$4 sm:$0xff]   ;;  %v12880_v33 = vld [vmem:[%s14420_s22 + $0x10e8] ss:$48 sps:$4 sm:$0xff]  }
 0x360   : > { %6796 = vmatprep.subr.bf16.mxu1 %v12729_v31  ;;  %v12793_v31 = vld [vmem:[%s14420_s22 + $0xb00] ss:$48 sps:$4 sm:$0xff]  }
 0x362   : > { %6469 = vmatpush1.bf16.msra.mxu0 %v12814_v38  ;;  %v12799_v38 = vld [vmem:[%s14420_s22 + $0xb60] ss:$48 sps:$4 sm:$0xff]  }
 0x363   : > { %6797 = vmatpush1.bf16.msra.mxu1 %v12727_v36  ;;  %6470 = vmatprep.subr.bf16.mxu0 %v12822_v41  ;;  %v12888_v36 = vld [vmem:[%s14420_s22 + $0x114c] ss:$48 sps:$4 sm:$0xff]   ;;  %v12886_v41 = vld [vmem:[%s14420_s22 + $0x1148] ss:$48 sps:$4 sm:$0xff]  }
 0x364   : > { %6798 = vmatprep.subr.bf16.mxu1 %v12735_v40  ;;  %v12807_v40 = vld [vmem:[%s14420_s22 + $0xbc4] ss:$48 sps:$4 sm:$0xff]  }
 0x366   : > { %6471 = vmatpush1.bf16.msra.mxu0 %v12820_v42  ;;  %v12805_v42 = vld [vmem:[%s14420_s22 + $0xbc0] ss:$48 sps:$4 sm:$0xff]  }
 0x367   : > { %6799 = vmatpush1.bf16.msra.mxu1 %v12733_v50  ;;  %6472 = vmatprep.subr.bf16.mxu0 %v12828_v52  ;;  %v12894_v50 = vld [vmem:[%s14420_s22 + $0x11ac] ss:$48 sps:$4 sm:$0xff]   ;;  %v12813_v52 = vld [vmem:[%s14420_s22 + $0xc24] ss:$48 sps:$4 sm:$0xff]  }
 0x368   : > { %6800 = vmatprep.subr.bf16.mxu1 %v12741_v45  ;;  %v12892_v45 = vld [vmem:[%s14420_s22 + $0x11a8] ss:$48 sps:$4 sm:$0xff]  }
 0x36a   : > { %6473 = vmatpush1.bf16.msra.mxu0 %v12826_v56  ;;  %v12898_v56 = vld [vmem:[%s14420_s22 + $0x18] ss:$48 sps:$4 sm:$0xff]  }
 0x36b   : > { %6801 = vmatpush1.bf16.msra.mxu1 %v12739_v54  ;;  %6474 = vmatprep.subr.bf16.mxu0 %v12834_v39  ;;  %v12900_v54 = vld [vmem:[%s14420_s22 + $0x1c] ss:$48 sps:$4 sm:$0xff]   ;;  %v12819_v39 = vld [vmem:[%s14420_s22 + $0xc84] ss:$48 sps:$4 sm:$0xff]  }
 0x36c   : > { %6802 = vmatprep.subr.bf16.mxu1 %v12747_v55  ;;  %v12811_v55 = vld [vmem:[%s14420_s22 + $0xc20] ss:$48 sps:$4 sm:$0xff]  }
 0x36e   : > { %6475 = vmatpush1.bf16.msra.mxu0 %v12832_v60  ;;  %v12817_v60 = vld [vmem:[%s14420_s22 + $0xc80] ss:$48 sps:$4 sm:$0xff]  }
 0x36f   : > { %6803 = vmatpush1.bf16.msra.mxu1 %v12745_v59  ;;  %6476 = vmatprep.subr.bf16.mxu0 %v12840_v48  ;;  %v12906_v59 = vld [vmem:[%s14420_s22 + $0x7c] ss:$48 sps:$4 sm:$0xff]   ;;  %v12825_v48 = vld [vmem:[%s14420_s22 + $0xce4] ss:$48 sps:$4 sm:$0xff]  }
 0x370   : > { %6804 = vmatprep.subr.bf16.mxu1 %v12753_v61  ;;  %v12904_v61 = vld [vmem:[%s14420_s22 + $0x78] ss:$48 sps:$4 sm:$0xff]  }
 0x372   : > { %6477 = vmatpush1.bf16.msra.mxu0 %v12838_v0  ;;  %v12907_v0 = vld [vmem:[%s14420_s22 + $0xd8] ss:$48 sps:$4 sm:$0xff]  }
 0x373   : > { %6805 = vmatpush1.bf16.msra.mxu1 %v12751_v62  ;;  %6478 = vmatprep.subr.bf16.mxu0 %v12846_v1  ;;  %v12909_v62 = vld [vmem:[%s14420_s22 + $0xdc] ss:$48 sps:$4 sm:$0xff]   ;;  %v12831_v1 = vld [vmem:[%s14420_s22 + $0xd44] ss:$48 sps:$4 sm:$0xff]  }
 0x374   : > { %6806 = vmatprep.subr.bf16.mxu1 %v12759_v63  ;;  %v12823_v63 = vld [vmem:[%s14420_s22 + $0xce0] ss:$48 sps:$4 sm:$0xff]  }
 0x376   : > { %6479 = vmatpush1.bf16.msra.mxu0 %v12844_v3  ;;  %v12829_v3 = vld [vmem:[%s14420_s22 + $0xd40] ss:$48 sps:$4 sm:$0xff]  }
 0x377   : > { %6807 = vmatpush1.bf16.msra.mxu1 %v12757_v2  ;;  %6480 = vmatprep.subr.bf16.mxu0 %v12852_v5  ;;  %v12912_v2 = vld [vmem:[%s14420_s22 + $0x13c] ss:$48 sps:$4 sm:$0xff]   ;;  %v12837_v5 = vld [vmem:[%s14420_s22 + $0xda4] ss:$48 sps:$4 sm:$0xff]  }
 0x378   : > { %6808 = vmatprep.subr.bf16.mxu1 %v12765_v10  ;;  %v12910_v10 = vld [vmem:[%s14420_s22 + $0x138] ss:$48 sps:$4 sm:$0xff]  }
 0x37a   : > { %6481 = vmatpush1.bf16.msra.mxu0 %v12850_v7  ;;  %v12835_v7 = vld [vmem:[%s14420_s22 + $0xda0] ss:$48 sps:$4 sm:$0xff]  }
 0x37b   : > { %6809 = vmatpush1.bf16.msra.mxu1 %v12763_v53  ;;  %6482 = vmatprep.subr.bf16.mxu0 %v12858_v9  ;;  %v12915_v53 = vld [vmem:[%s14420_s22 + $0x19c] ss:$48 sps:$4 sm:$0xff]   ;;  %v12843_v9 = vld [vmem:[%s14420_s22 + $0xe04] ss:$48 sps:$4 sm:$0xff]  }
 0x37c   : > { %6810 = vmatprep.subr.bf16.mxu1 %v12771_v8  ;;  %v12913_v8 = vld [vmem:[%s14420_s22 + $0x198] ss:$48 sps:$4 sm:$0xff]  }
 0x37e   : > { %6483 = vmatpush1.bf16.msra.mxu0 %v12856_v12  ;;  %v12841_v12 = vld [vmem:[%s14420_s22 + $0xe00] ss:$48 sps:$4 sm:$0xff]  }
 0x37f   : > { %6811 = vmatpush1.bf16.msra.mxu1 %v12769_v19  ;;  %6484 = vmatprep.subr.bf16.mxu0 %v12864_v14  ;;  %v12918_v19 = vld [vmem:[%s14420_s22 + $0x1fc] ss:$48 sps:$4 sm:$0xff]   ;;  %v12849_v14 = vld [vmem:[%s14420_s22 + $0xe64] ss:$48 sps:$4 sm:$0xff]  }
 0x380   : > { %6812 = vmatprep.subr.bf16.mxu1 %v12777_v13  ;;  %v12916_v13 = vld [vmem:[%s14420_s22 + $0x1f8] ss:$48 sps:$4 sm:$0xff]  }
 0x382   : > { %6485 = vmatpush1.bf16.msra.mxu0 %v12862_v18 }
 0x383   : > { %6813 = vmatpush1.bf16.msra.mxu1 %v12775_v16  ;;  %6486 = vmatprep.subr.bf16.mxu0 %v12870_v20  ;;  %v12921_v16 = vld [vmem:[%s14420_s22 + $0x25c] ss:$48 sps:$4 sm:$0xff]   ;;  %v12847_v20 = vld [vmem:[%s14420_s22 + $0xe60] ss:$48 sps:$4 sm:$0xff]  }
 0x384   : > { %6814 = vmatprep.subr.bf16.mxu1 %v12783_v11 }
 0x386   : > { %6487 = vmatpush1.bf16.msra.mxu0 %v12868_v35  ;;  %v12855_v35 = vld [vmem:[%s14420_s22 + $0xec4] ss:$48 sps:$4 sm:$0xff]  }
 0x387   : > { %6815 = vmatpush1.bf16.msra.mxu1 %v12781_v22  ;;  %6488 = vmatprep.subr.bf16.mxu0 %v12876_v24 }
 0x388   : > { %6816 = vmatprep.subr.bf16.mxu1 %v12789_v23  ;;  %v12919_v23 = vld [vmem:[%s14420_s22 + $0x258] ss:$48 sps:$4 sm:$0xff]  }
 0x38a   : > { %6489 = vmatpush1.bf16.msra.mxu0 %v12874_v29  ;;  %v12922_v29 = vld [vmem:[%s14420_s22 + $0x2b8] ss:$48 sps:$4 sm:$0xff]  }
 0x38b   : > { %6817 = vmatpush1.bf16.msra.mxu1 %v12787_v25  ;;  %6490 = vmatprep.subr.bf16.mxu0 %v12882_v30  ;;  %v12924_v25 = vld [vmem:[%s14420_s22 + $0x2bc] ss:$48 sps:$4 sm:$0xff]   ;;  %v12861_v30 = vld [vmem:[%s14420_s22 + $0xf24] ss:$48 sps:$4 sm:$0xff]  }
 0x38c   : > { %6818 = vmatprep.subr.bf16.mxu1 %v12795_v27  ;;  %v12853_v27 = vld [vmem:[%s14420_s22 + $0xec0] ss:$48 sps:$4 sm:$0xff]  }
 0x38e   : > { %6491 = vmatpush1.bf16.msra.mxu0 %v12880_v33  ;;  %v12925_v33 = vld [vmem:[%s14420_s22 + $0x318] ss:$48 sps:$4 sm:$0xff]  }
 0x38f   : > { %6819 = vmatpush1.bf16.msra.mxu1 %v12793_v31  ;;  %6492 = vmatprep.subr.bf16.mxu0 %v12888_v36  ;;  %v12927_v31 = vld [vmem:[%s14420_s22 + $0x31c] ss:$48 sps:$4 sm:$0xff]   ;;  %v12867_v36 = vld [vmem:[%s14420_s22 + $0xf84] ss:$48 sps:$4 sm:$0xff]  }
 0x390   : > { %6820 = vmatprep.subr.bf16.mxu1 %v12801_v32  ;;  %v12859_v32 = vld [vmem:[%s14420_s22 + $0xf20] ss:$48 sps:$4 sm:$0xff]  }
 0x392   : > { %6493 = vmatpush1.bf16.msra.mxu0 %v12886_v41  ;;  %v12928_v41 = vld [vmem:[%s14420_s22 + $0x378] ss:$48 sps:$4 sm:$0xff]  }
 0x393   : > { %6821 = vmatpush1.bf16.msra.mxu1 %v12799_v38  ;;  %6494 = vmatprep.subr.bf16.mxu0 %v12894_v50  ;;  %v12930_v38 = vld [vmem:[%s14420_s22 + $0x37c] ss:$48 sps:$4 sm:$0xff]   ;;  %v12873_v50 = vld [vmem:[%s14420_s22 + $0xfe4] ss:$48 sps:$4 sm:$0xff]  }
 0x394   : > { %6822 = vmatprep.subr.bf16.mxu1 %v12807_v40  ;;  %v12865_v40 = vld [vmem:[%s14420_s22 + $0xf80] ss:$48 sps:$4 sm:$0xff]  }
 0x396   : > { %6495 = vmatpush1.bf16.msra.mxu0 %v12892_v45  ;;  %v12871_v45 = vld [vmem:[%s14420_s22 + $0xfe0] ss:$48 sps:$4 sm:$0xff]  }
 0x397   : > { %6823 = vmatpush1.bf16.msra.mxu1 %v12805_v42  ;;  %6628 = vmatprep.subr.bf16.mxu0 %v12900_v54  ;;  %v12933_v42 = vld [vmem:[%s14420_s22 + $0x3dc] ss:$48 sps:$4 sm:$0xff]   ;;  %v12879_v54 = vld [vmem:[%s14420_s22 + $0x1044] ss:$48 sps:$4 sm:$0xff]  }
 0x398   : > { %6833 = vmatprep.subr.bf16.mxu1 %v12813_v52  ;;  %v12931_v52 = vld [vmem:[%s14420_s22 + $0x3d8] ss:$48 sps:$4 sm:$0xff]  }
 0x399   : > { %6497 = vmatmul.mubr.bf16.vlgmr.msra.gmra.mrb[12].mxu0 %v14819_v58 }
 0x39a   : > { %6825 = vmatmul.mubr.bf16.vlgmr.msra.gmra.mrb[12].mxu1 %v14746_v43  ;;  %6629 = vmatpush1.bf16.msra.mxu0 %v12898_v56  ;;  %v12877_v56 = vld [vmem:[%s14420_s22 + $0x1040] ss:$48 sps:$4 sm:$0xff]  }
 0x39b   : > { %6834 = vmatpush1.bf16.msra.mxu1 %v12811_v55  ;;  %6630 = vmatprep.subr.bf16.mxu0 %v12906_v59  ;;  %v12936_v55 = vld [vmem:[%s14420_s22 + $0x43c] ss:$48 sps:$4 sm:$0xff]   ;;  %v12885_v59 = vld [vmem:[%s14420_s22 + $0x10a4] ss:$48 sps:$4 sm:$0xff]  }
 0x39c   : > { %6835 = vmatprep.subr.bf16.mxu1 %v12819_v39  ;;  %6865 = vmatprep.mubr.bf16.mxu1 %v14752_v49  ;;  %v12934_v39 = vld [vmem:[%s14420_s22 + $0x438] ss:$48 sps:$4 sm:$0xff]  }
 0x39d   : > { %6660 = vmatprep.mubr.bf16.mxu0 %v14609_v26 }
 0x39e   : > { %6631 = vmatpush1.bf16.msra.mxu0 %v12904_v61  ;;  %v12883_v61 = vld [vmem:[%s14420_s22 + $0x10a0] ss:$48 sps:$4 sm:$0xff]  }
 0x39f   : > { %6836 = vmatpush1.bf16.msra.mxu1 %v12817_v60  ;;  %6632 = vmatprep.subr.bf16.mxu0 %v12909_v62  ;;  %v12939_v60 = vld [vmem:[%s14420_s22 + $0x49c] ss:$48 sps:$4 sm:$0xff]   ;;  %v12891_v62 = vld [vmem:[%s14420_s22 + $0x1104] ss:$48 sps:$4 sm:$0xff]  }
 0x3a0   : > { %6837 = vmatprep.subr.bf16.mxu1 %v12825_v48  ;;  %v12937_v48 = vld [vmem:[%s14420_s22 + $0x498] ss:$48 sps:$4 sm:$0xff]  }
 0x3a2   : > { %6633 = vmatpush1.bf16.msra.mxu0 %v12907_v0  ;;  %v12889_v0 = vld [vmem:[%s14420_s22 + $0x1100] ss:$48 sps:$4 sm:$0xff]  }
 0x3a3   : > { %6838 = vmatpush1.bf16.msra.mxu1 %v12823_v63  ;;  %6634 = vmatprep.subr.bf16.mxu0 %v12912_v2  ;;  %v12942_v63 = vld [vmem:[%s14420_s22 + $0x4fc] ss:$48 sps:$4 sm:$0xff]   ;;  %v12897_v2 = vld [vmem:[%s14420_s22 + $0x1164] ss:$48 sps:$4 sm:$0xff]  }
 0x3a4   : > { %6839 = vmatprep.subr.bf16.mxu1 %v12831_v1  ;;  %v12940_v1 = vld [vmem:[%s14420_s22 + $0x4f8] ss:$48 sps:$4 sm:$0xff]  }
 0x3a6   : > { %6635 = vmatpush1.bf16.msra.mxu0 %v12910_v10  ;;  %v12895_v10 = vld [vmem:[%s14420_s22 + $0x1160] ss:$48 sps:$4 sm:$0xff]  }
 0x3a7   : > { %6840 = vmatpush1.bf16.msra.mxu1 %v12829_v3  ;;  %6636 = vmatprep.subr.bf16.mxu0 %v12915_v53  ;;  %v12945_v3 = vld [vmem:[%s14420_s22 + $0x55c] ss:$48 sps:$4 sm:$0xff]   ;;  %v12903_v53 = vld [vmem:[%s14420_s22 + $0x11c4] ss:$48 sps:$4 sm:$0xff]  }
 0x3a8   : > { %6841 = vmatprep.subr.bf16.mxu1 %v12837_v5  ;;  %v12943_v5 = vld [vmem:[%s14420_s22 + $0x558] ss:$48 sps:$4 sm:$0xff]  }
 0x3aa   : > { %6637 = vmatpush1.bf16.msra.mxu0 %v12913_v8  ;;  %v12901_v8 = vld [vmem:[%s14420_s22 + $0x11c0] ss:$48 sps:$4 sm:$0xff]  }
 0x3ab   : > { %6842 = vmatpush1.bf16.msra.mxu1 %v12835_v7  ;;  %6638 = vmatprep.subr.bf16.mxu0 %v12918_v19  ;;  %v12948_v7 = vld [vmem:[%s14420_s22 + $0x5bc] ss:$48 sps:$4 sm:$0xff]  }
 0x3ac   : > { %6843 = vmatprep.subr.bf16.mxu1 %v12843_v9  ;;  %v15242_v11 = vpop.f32.mrb[8].mxu0  ;;  %v12946_v9 = vld [vmem:[%s14420_s22 + $0x5b8] ss:$48 sps:$4 sm:$0xff]   ;;  %v12951_v19 = vld [vmem:[%s14420_s22 + $0x61c] ss:$48 sps:$4 sm:$0xff]  }
 0x3ad   : > { %v15244_v18 = vpop.f32.mrb[9].mxu0 }
 0x3ae   : > { %v2736_v22 = vpop.f32.mrb[10].mxu0  ;;  %6639 = vmatpush1.bf16.msra.mxu0 %v12916_v13  ;;  %v13993_v13 = vmov 0.0  }
 0x3af   : > { %6844 = vmatpush1.bf16.msra.mxu1 %v12841_v12  ;;  %v2737_v24 = vpop.f32.mrb[11].mxu0  ;;  %6640 = vmatprep.subr.bf16.mxu0 %v12921_v16  ;;  %v12949_v12 = vld [vmem:[%s14420_s22 + $0x618] ss:$48 sps:$4 sm:$0xff]  }
 0x3b0   : > { %6845 = vmatprep.subr.bf16.mxu1 %v12849_v14  ;;  %v12954_v14 = vld [vmem:[%s14420_s22 + $0x67c] ss:$48 sps:$4 sm:$0xff]   ;;  %v12952_v16 = vld [vmem:[%s14420_s22 + $0x678] ss:$48 sps:$4 sm:$0xff]  }
 0x3b1   : > { %v13653_v22 = vld [vmem:[%s14429_s10] sm:$0x3f] }
 0x3b2   : > { %6641 = vmatpush1.bf16.msra.mxu0 %v12919_v23  ;;  %v903_v23 = vrot.slane %v13653_v22, %v15079_v21  ;;  %v12955_v24 = vld [vmem:[%s14420_s22 + $0x6d8] ss:$48 sps:$4 sm:$0xff]   ;;  %v13014_v22 = vld [vmem:[%s14420_s22 + $0xdfc] ss:$48 sps:$4 sm:$0xff]  }
 0x3b3   : > { %6846 = vmatpush1.bf16.msra.mxu1 %v12847_v20  ;;  %6642 = vmatprep.subr.bf16.mxu0 %v12924_v25  ;;  %v12957_v20 = vld [vmem:[%s14420_s22 + $0x6dc] ss:$48 sps:$4 sm:$0xff]  }
 0x3b4   : > { %6847 = vmatprep.subr.bf16.mxu1 %v12855_v35  ;;  %v7020_v35 = vsel %vm7015_vm1, %v15096_v17, 0  ;;  %v12960_v25 = vld [vmem:[%s14420_s22 + $0x73c] ss:$48 sps:$4 sm:$0xff]   ;;  %v12961_v17 = vld [vmem:[%s14420_s22 + $0x798] ss:$48 sps:$4 sm:$0xff]  }
 0x3b6   : > { %6643 = vmatpush1.bf16.msra.mxu0 %v12922_v29  ;;  %v12958_v29 = vld [vmem:[%s14420_s22 + $0x738] ss:$48 sps:$4 sm:$0xff]  }
 0x3b7   : > { %6848 = vmatpush1.bf16.msra.mxu1 %v12853_v27  ;;  %6644 = vmatprep.subr.bf16.mxu0 %v12927_v31  ;;  %v11663_v27 = vadd.f32 %v14922_v37, %v903_v23  ;;  %v12964_v37 = vld [vmem:[%s14420_s22 + $0x7f8] ss:$48 sps:$4 sm:$0xff]  }
 0x3b8   : > { %6849 = vmatprep.subr.bf16.mxu1 %v12861_v30  ;;  %v12963_v30 = vld [vmem:[%s14420_s22 + $0x79c] ss:$48 sps:$4 sm:$0xff]   ;;  %v13012_v23 = vld [vmem:[%s14420_s22 + $0xdf8] ss:$48 sps:$4 sm:$0xff]  }
 0x3b9   : > { %v15305_v31 = vpack.c.bf16 %v11663_v27, %v11663_v27  ;;  %v13018_v27 = vld [vmem:[%s14420_s22 + $0xeb8] ss:$48 sps:$4 sm:$0xff]  }
 0x3ba   : > { %6645 = vmatpush1.bf16.msra.mxu0 %v12925_v33  ;;  %v12969_v33 = vld [vmem:[%s14420_s22 + $0x85c] ss:$48 sps:$4 sm:$0xff]  }
 0x3bb   : > { %6850 = vmatpush1.bf16.msra.mxu1 %v12859_v32  ;;  %6646 = vmatprep.subr.bf16.mxu0 %v12930_v38  ;;  %v12966_v32 = vld [vmem:[%s14420_s22 + $0x7fc] ss:$48 sps:$4 sm:$0xff]  }
 0x3bc   : > { %6851 = vmatprep.subr.bf16.mxu1 %v12867_v36 }
 0x3be   : > { %6647 = vmatpush1.bf16.msra.mxu0 %v12928_v41  ;;  %v12967_v41 = vld [vmem:[%s14420_s22 + $0x858] ss:$48 sps:$4 sm:$0xff]  }
 0x3bf   : > { %6852 = vmatpush1.bf16.msra.mxu1 %v12865_v40  ;;  %6648 = vmatprep.subr.bf16.mxu0 %v12933_v42  ;;  %v12972_v42 = vld [vmem:[%s14420_s22 + $0x8bc] ss:$48 sps:$4 sm:$0xff]  }
 0x3c0   : > { %6853 = vmatprep.subr.bf16.mxu1 %v12873_v50 }
 0x3c2   : > { %6649 = vmatpush1.bf16.msra.mxu0 %v12931_v52  ;;  %v12975_v52 = vld [vmem:[%s14420_s22 + $0x91c] ss:$48 sps:$4 sm:$0xff]  }
 0x3c3   : > { %6854 = vmatpush1.bf16.msra.mxu1 %v12871_v45  ;;  %6650 = vmatprep.subr.bf16.mxu0 %v12936_v55  ;;  %v12970_v45 = vld [vmem:[%s14420_s22 + $0x8b8] ss:$48 sps:$4 sm:$0xff]   ;;  %v12978_v55 = vld [vmem:[%s14420_s22 + $0x97c] ss:$48 sps:$4 sm:$0xff]  }
 0x3c4   : > { %6855 = vmatprep.subr.bf16.mxu1 %v12879_v54  ;;  %v12973_v54 = vld [vmem:[%s14420_s22 + $0x918] ss:$48 sps:$4 sm:$0xff]  }
 0x3c6   : > { %6651 = vmatpush1.bf16.msra.mxu0 %v12934_v39  ;;  %v12981_v39 = vld [vmem:[%s14420_s22 + $0x9dc] ss:$48 sps:$4 sm:$0xff]  }
 0x3c7   : > { %6856 = vmatpush1.bf16.msra.mxu1 %v12877_v56  ;;  %6652 = vmatprep.subr.bf16.mxu0 %v12939_v60  ;;  %v12976_v56 = vld [vmem:[%s14420_s22 + $0x978] ss:$48 sps:$4 sm:$0xff]   ;;  %v12984_v60 = vld [vmem:[%s14420_s22 + $0xa3c] ss:$48 sps:$4 sm:$0xff]  }
 0x3c8   : > { %6857 = vmatprep.subr.bf16.mxu1 %v12885_v59  ;;  %v12979_v59 = vld [vmem:[%s14420_s22 + $0x9d8] ss:$48 sps:$4 sm:$0xff]  }
 0x3ca   : > { %6653 = vmatpush1.bf16.msra.mxu0 %v12937_v48  ;;  %v12987_v48 = vld [vmem:[%s14420_s22 + $0xa9c] ss:$48 sps:$4 sm:$0xff]  }
 0x3cb   : > { %6858 = vmatpush1.bf16.msra.mxu1 %v12883_v61  ;;  %6654 = vmatprep.subr.bf16.mxu0 %v12942_v63  ;;  %v12982_v61 = vld [vmem:[%s14420_s22 + $0xa38] ss:$48 sps:$4 sm:$0xff]   ;;  %v12990_v63 = vld [vmem:[%s14420_s22 + $0xafc] ss:$48 sps:$4 sm:$0xff]  }
 0x3cc   : > { %6859 = vmatprep.subr.bf16.mxu1 %v12891_v62  ;;  %v12985_v62 = vld [vmem:[%s14420_s22 + $0xa98] ss:$48 sps:$4 sm:$0xff]  }
 0x3ce   : > { %6655 = vmatpush1.bf16.msra.mxu0 %v12940_v1  ;;  %v12993_v1 = vld [vmem:[%s14420_s22 + $0xb5c] ss:$48 sps:$4 sm:$0xff]  }
 0x3cf   : > { %6860 = vmatpush1.bf16.msra.mxu1 %v12889_v0  ;;  %6656 = vmatprep.subr.bf16.mxu0 %v12945_v3  ;;  %v12988_v0 = vld [vmem:[%s14420_s22 + $0xaf8] ss:$48 sps:$4 sm:$0xff]   ;;  %v12996_v3 = vld [vmem:[%s14420_s22 + $0xbbc] ss:$48 sps:$4 sm:$0xff]  }
 0x3d0   : > { %6861 = vmatprep.subr.bf16.mxu1 %v12897_v2  ;;  %v12991_v2 = vld [vmem:[%s14420_s22 + $0xb58] ss:$48 sps:$4 sm:$0xff]  }
 0x3d2   : > { %6657 = vmatpush1.bf16.msra.mxu0 %v12943_v5  ;;  %v12999_v5 = vld [vmem:[%s14420_s22 + $0xc1c] ss:$48 sps:$4 sm:$0xff]  }
 0x3d3   : > { %6862 = vmatpush1.bf16.msra.mxu1 %v12895_v10  ;;  %6658 = vmatprep.subr.bf16.mxu0 %v12948_v7  ;;  %v12994_v10 = vld [vmem:[%s14420_s22 + $0xbb8] ss:$48 sps:$4 sm:$0xff]   ;;  %v13002_v7 = vld [vmem:[%s14420_s22 + $0xc7c] ss:$48 sps:$4 sm:$0xff]  }
 0x3d4   : > { %6863 = vmatprep.subr.bf16.mxu1 %v12903_v53  ;;  %v12997_v53 = vld [vmem:[%s14420_s22 + $0xc18] ss:$48 sps:$4 sm:$0xff]  }
 0x3d6   : > { %6659 = vmatpush1.bf16.msra.mxu0 %v12946_v9  ;;  %v13005_v9 = vld [vmem:[%s14420_s22 + $0xcdc] ss:$48 sps:$4 sm:$0xff]  }
 0x3d7   : > { %6864 = vmatpush1.bf16.msra.mxu1 %v12901_v8  ;;  %6669 = vmatprep.subr.bf16.mxu0 %v12951_v19  ;;  %v13000_v8 = vld [vmem:[%s14420_s22 + $0xc78] ss:$48 sps:$4 sm:$0xff]  }
 0x3d8   : > { %11567 = vmatprep.subr.bf16.mxu1 %v13993_v13  ;;  %v13003_v19 = vld [vmem:[%s14420_s22 + $0xcd8] ss:$48 sps:$4 sm:$0xff]  }
 0x3d9   : > { %6661 = vmatmul.mubr.bf16.vlgmr.msra.gmra.mrb[16].mxu0 %v14671_v28 }
 0x3da   : > { %6866 = vmatmul.mubr.bf16.vlgmr.msra.gmra.mrb[12].mxu1 %v14819_v58  ;;  %6670 = vmatpush1.bf16.msra.mxu0 %v12949_v12  ;;  %v13008_v12 = vld [vmem:[%s14420_s22 + $0xd3c] ss:$48 sps:$4 sm:$0xff]  }
 0x3db   : > { %11569 = vmatprep.mubr.msk.bf16.mxu1 %vm13994_vm0, %v13993_v13  ;;  %6671 = vmatprep.subr.bf16.mxu0 %v12954_v14  ;;  %v13006_v14 = vld [vmem:[%s14420_s22 + $0xd38] ss:$48 sps:$4 sm:$0xff]  }
 0x3dc   : > { %6701 = vmatprep.mubr.bf16.mxu0 %v14678_v34 }
 0x3de   : > { %6672 = vmatpush1.bf16.msra.mxu0 %v12952_v16  ;;  %v13011_v16 = vld [vmem:[%s14420_s22 + $0xd9c] ss:$48 sps:$4 sm:$0xff]  }
 0x3df   : > { %6673 = vmatprep.subr.bf16.mxu0 %v12957_v20  ;;  %v13009_v20 = vld [vmem:[%s14420_s22 + $0xd98] ss:$48 sps:$4 sm:$0xff]  }
 0x3e0   : > { %11568 = vmatpush3.bf16.xpose.msra.mxu1 %v7020_v35  ;;  %v13017_v35 = vld [vmem:[%s14420_s22 + $0xe5c] ss:$48 sps:$4 sm:$0xff]  }
 0x3e1   : > { %11573 = vmatprep.subr.bf16.mxu1 %v13993_v13 }
 0x3e2   : > { %6674 = vmatpush1.bf16.msra.mxu0 %v12955_v24  ;;  %v13015_v24 = vld [vmem:[%s14420_s22 + $0xe58] ss:$48 sps:$4 sm:$0xff]  }
 0x3e3   : > { %6675 = vmatprep.subr.bf16.mxu0 %v12960_v25  ;;  %v13020_v25 = vld [vmem:[%s14420_s22 + $0xebc] ss:$48 sps:$4 sm:$0xff]  }
 0x3e6   : > { %6676 = vmatpush1.bf16.msra.mxu0 %v12958_v29  ;;  %v13023_v29 = vld [vmem:[%s14420_s22 + $0xf1c] ss:$48 sps:$4 sm:$0xff]  }
 0x3e7   : > { %11570 = vmatmul.mubr.msk.bf16.vlgmr.msra.gmra.mrb[16].mxu1 %vm7015_vm1, %v15305_v31  ;;  %6677 = vmatprep.subr.bf16.mxu0 %v12963_v30  ;;  %v13021_v30 = vld [vmem:[%s14420_s22 + $0xf18] ss:$48 sps:$4 sm:$0xff]  }
 0x3e8   : > { %11575 = vmatprep.mubr.msk.bf16.mxu1 %vm13994_vm0, %v13993_v13 }
 0x3ea   : > { %6678 = vmatpush1.bf16.msra.mxu0 %v12961_v17  ;;  %v13026_v17 = vld [vmem:[%s14420_s22 + $0xf7c] ss:$48 sps:$4 sm:$0xff]  }
 0x3eb   : > { %6679 = vmatprep.subr.bf16.mxu0 %v12966_v32  ;;  %v13024_v32 = vld [vmem:[%s14420_s22 + $0xf78] ss:$48 sps:$4 sm:$0xff]  }
 0x3ed   : > { %v15315_v36 = vpop.f32.mrb[8].mxu1 }
 0x3ee   : > { %v15317_v38 = vpop.f32.mrb[9].mxu1  ;;  %6680 = vmatpush1.bf16.msra.mxu0 %v12964_v37  ;;  %v13029_v37 = vld [vmem:[%s14420_s22 + $0xfdc] ss:$48 sps:$4 sm:$0xff]  }
 0x3ef   : > { %v6625_v40 = vpop.f32.mrb[10].mxu1  ;;  %6681 = vmatprep.subr.bf16.mxu0 %v12969_v33  ;;  %v13027_v33 = vld [vmem:[%s14420_s22 + $0xfd8] ss:$48 sps:$4 sm:$0xff]  }
 0x3f0   : > { %v6626_v50 = vpop.f32.mrb[11].mxu1  ;;  %v13032_v40 = vld [vmem:[%s14420_s22 + $0x103c] ss:$48 sps:$4 sm:$0xff]  }
 0x3f1   : > { %v13035_v50 = vld [vmem:[%s14420_s22 + $0x109c] ss:$48 sps:$4 sm:$0xff]  }
 0x3f2   : > { %6682 = vmatpush1.bf16.msra.mxu0 %v12967_v41  ;;  %v13030_v41 = vld [vmem:[%s14420_s22 + $0x1038] ss:$48 sps:$4 sm:$0xff]  }
 0x3f3   : > { %6683 = vmatprep.subr.bf16.mxu0 %v12972_v42  ;;  %v13033_v42 = vld [vmem:[%s14420_s22 + $0x1098] ss:$48 sps:$4 sm:$0xff]  }
 0x3f6   : > { %6684 = vmatpush1.bf16.msra.mxu0 %v12970_v45  ;;  %v13038_v45 = vld [vmem:[%s14420_s22 + $0x10fc] ss:$48 sps:$4 sm:$0xff]  }
 0x3f7   : > { %6685 = vmatprep.subr.bf16.mxu0 %v12975_v52  ;;  %v13036_v52 = vld [vmem:[%s14420_s22 + $0x10f8] ss:$48 sps:$4 sm:$0xff]  }
 0x3fa   : > { %6686 = vmatpush1.bf16.msra.mxu0 %v12973_v54  ;;  %v13041_v54 = vld [vmem:[%s14420_s22 + $0x115c] ss:$48 sps:$4 sm:$0xff]  }
 0x3fb   : > { %6687 = vmatprep.subr.bf16.mxu0 %v12978_v55  ;;  %v13039_v55 = vld [vmem:[%s14420_s22 + $0x1158] ss:$48 sps:$4 sm:$0xff]  }
 0x3fe   : > { %6688 = vmatpush1.bf16.msra.mxu0 %v12976_v56  ;;  %v13044_v56 = vld [vmem:[%s14420_s22 + $0x11bc] ss:$48 sps:$4 sm:$0xff]  }
 0x3ff   : > { %6689 = vmatprep.subr.bf16.mxu0 %v12981_v39  ;;  %v13042_v39 = vld [vmem:[%s14420_s22 + $0x11b8] ss:$48 sps:$4 sm:$0xff]  }
 0x402   : > { %6690 = vmatpush1.bf16.msra.mxu0 %v12979_v59 }
 0x403   : > { %6691 = vmatprep.subr.bf16.mxu0 %v12984_v60 }
 0x406   : > { %6692 = vmatpush1.bf16.msra.mxu0 %v12982_v61 }
 0x407   : > { %6693 = vmatprep.subr.bf16.mxu0 %v12987_v48 }
 0x40a   : > { %6694 = vmatpush1.bf16.msra.mxu0 %v12985_v62 }
 0x40b   : > { %6695 = vmatprep.subr.bf16.mxu0 %v12990_v63 }
 0x40e   : > { %6696 = vmatpush1.bf16.msra.mxu0 %v12988_v0 }
 0x40f   : > { %6697 = vmatprep.subr.bf16.mxu0 %v12993_v1 }
 0x412   : > { %6698 = vmatpush1.bf16.msra.mxu0 %v12991_v2 }
 0x413   : > { %6699 = vmatprep.subr.bf16.mxu0 %v12996_v3 }
 0x416   : > { %6700 = vmatpush1.bf16.msra.mxu0 %v12994_v10 }
 0x417   : > { %6710 = vmatprep.subr.bf16.mxu0 %v12999_v5 }
 0x419   : > { %6702 = vmatmul.mubr.bf16.vlgmr.msra.gmra.mrb[16].mxu0 %v14746_v43 }
 0x41a   : > { %6711 = vmatpush1.bf16.msra.mxu0 %v12997_v53  ;;  %6742 = vmatprep.mubr.bf16.mxu0 %v14752_v49  ;;  %v3345_v53 = vsub.s32 6, %v14985_v44 }
 0x41b   : > { %6712 = vmatprep.subr.bf16.mxu0 %v13002_v7  ;;  %v15385_v7 = vld [vmem:[%s14436_s1] sm:$0xff] }
 0x41e   : > { %6713 = vmatpush1.bf16.msra.mxu0 %v13000_v8  ;;  %v3346_v8 = vrot.slane %v15385_v7, %v3345_v53 }
 0x41f   : > { %6714 = vmatprep.subr.bf16.mxu0 %v13005_v9 }
 0x422   : > { %6715 = vmatpush1.bf16.msra.mxu0 %v13003_v19 }
 0x423   : > { %6716 = vmatprep.subr.bf16.mxu0 %v13008_v12 }
 0x426   : > { %6717 = vmatpush1.bf16.msra.mxu0 %v13006_v14 }
 0x427   : > { %6718 = vmatprep.subr.bf16.mxu0 %v13011_v16 }
 0x42a   : > { %6719 = vmatpush1.bf16.msra.mxu0 %v13009_v20 }
 0x42b   : > { %6720 = vmatprep.subr.bf16.mxu0 %v13014_v22 }
 0x42e   : > { %6721 = vmatpush1.bf16.msra.mxu0 %v13012_v23 }
 0x42f   : > { %6722 = vmatprep.subr.bf16.mxu0 %v13017_v35 }
 0x432   : > { %6723 = vmatpush1.bf16.msra.mxu0 %v13015_v24 }
 0x433   : > { %6724 = vmatprep.subr.bf16.mxu0 %v13020_v25 }
 0x436   : > { %6725 = vmatpush1.bf16.msra.mxu0 %v13018_v27 }
 0x437   : > { %6726 = vmatprep.subr.bf16.mxu0 %v13023_v29 }
 0x43a   : > { %6727 = vmatpush1.bf16.msra.mxu0 %v13021_v30  ;;  %v7133_v30 = vpop.permute.xlu1 %7132 }
 0x43b   : > { %6728 = vmatprep.subr.bf16.mxu0 %v13026_v17 }
 0x43e   : > { %6729 = vmatpush1.bf16.msra.mxu0 %v13024_v32  ;;  %v7135_v17 = vpop.permute.xlu1 %7134 }
 0x43f   : > { %6730 = vmatprep.subr.bf16.mxu0 %v13029_v37 }
 0x442   : > { %6731 = vmatpush1.bf16.msra.mxu0 %v13027_v33  ;;  %v7136_v33 = vsel %vm7128_vm4, %v7133_v30, %v7135_v17 }
 0x443   : > { %6732 = vmatprep.subr.bf16.mxu0 %v13032_v40 }
 0x446   : > { %6733 = vmatpush1.bf16.msra.mxu0 %v13030_v41  ;;  %v7141_v41 = vsel %vm7015_vm1, %v7136_v33, 0 }
 0x447   : > { %6734 = vmatprep.subr.bf16.mxu0 %v13035_v50  ;;  %v7127_v50 = vpop.permute.xlu1 %7126 }
 0x44a   : > { %6735 = vmatpush1.bf16.msra.mxu0 %v13033_v42 }
 0x44b   : > { %6736 = vmatprep.subr.bf16.mxu0 %v13038_v45 }
 0x44e   : > { %6737 = vmatpush1.bf16.msra.mxu0 %v13036_v52 }
 0x44f   : > { %6738 = vmatprep.subr.bf16.mxu0 %v13041_v54 }
 0x452   : > { %6739 = vmatpush1.bf16.msra.mxu0 %v13039_v55 }
 0x453   : > { %6740 = vmatprep.subr.bf16.mxu0 %v13044_v56 }
 0x456   : > { %6741 = vmatpush1.bf16.msra.mxu0 %v13042_v39 }
 0x459   : > { %6743 = vmatmul.mubr.bf16.vlgmr.msra.gmra.mrb[16].mxu0 %v14819_v58 }
 0x45a   : > { %6906 = vmatprep.mubr.bf16.mxu0 %v14609_v26 }
 0x46c   : > { %v15374_v59 = vpop.f32.mrb[12].mxu0 }
 0x46d   : > { %v15376_v60 = vpop.f32.mrb[13].mxu0 }
 0x46e   : > { %v6502_v61 = vpop.f32.mrb[14].mxu0 }
 0x46f   : > { %v6503_v48 = vpop.f32.mrb[15].mxu0 }
 0x4ad   : > { %v15378_v62 = vpop.f32.mrb[12].mxu1 }
 0x4ae   : > { %v15380_v63 = vpop.f32.mrb[13].mxu1 }
 0x4af   : > { %v6871_v0 = vpop.f32.mrb[14].mxu1 }
 0x4b0   : > { %v6872_v1 = vpop.f32.mrb[15].mxu1 }
 0x4b1   : > { %v3330_v1 = vrot.slane %v15385_v7, %v14989_v46 }
 0x4ba   : > { %v7056_v2 = vpop.f32.mrb[16].mxu1 }
 0x4bb   : > { %v11571_v3 = vpop.f32.mrb[17].mxu1  ;;  %v7063_v10 = vsel %vm7062_vm2, %v7056_v2, -inf }
 0x4bc   : > { %7064 = vmax.xlane.f32.xlu0 %v7063_v10  ;;  %v7059_v26 = vpop.f32.mrb[18].mxu1  ;;  %v15419_v10 = vpack.c.bf16 %v15013_v4, %v15013_v4 }
 0x4bd   : > { %v11572_v5 = vpop.f32.mrb[19].mxu1 }
 0x52c   : > { %v6744_v9 = vpop.f32.mrb[16].mxu0 }
 0x52d   : > { %v11677_v19 = vadd.f32 %v6744_v9, %v3346_v8  ;;  %v15388_v12 = vpop.f32.mrb[17].mxu0  ;;  %v3349_v8 = vsub.s32 7, %v14985_v44 }
 0x52e   : > { %v6748_v14 = vpop.f32.mrb[18].mxu0 }
 0x52f   : > { %v7009_v16 = vpack.c.bf16 %v11677_v19, %v11677_v19  ;;  %v6749_v20 = vpop.f32.mrb[19].mxu0  ;;  %v3350_v9 = vrot.slane %v15385_v7, %v3349_v8 }
 0x531   : > { %v7080_v22 = vsel %vm7078_vm3, %v7009_v16, 0 }
 0x532   : > { %11574 = vmatpush3.bf16.msra.mxu1 %v7080_v22 }
 0x533   : > { %11579 = vmatprep.subr.bf16.mxu1 %v13993_v13 }
 0x549   : > { %v7065_v23 = vpop.xlane.xlu0 %7064 }
 0x54a   : > { %v7066_v35 = vsub.f32 %v7056_v2, %v7065_v23  ;;  %v11673_v2 = vadd.f32 %v15374_v59, %v3330_v1 }
 0x54c   : > { %v7067_v24 = vmul.f32 1.442695, %v7066_v35  ;;  %v7005_v3 = vpack.c.bf16 %v11673_v2, %v11673_v2 }
 0x54e   : > { %13621 = vpow2.f32 %v7067_v24 }
 0x558   : > { %v13622_v25 = vpop.eup %13621 }
 0x559   : > { %v7069_v27 = vsel %vm7062_vm2, %v13622_v25, 0.0 }
 0x55a   : > { %7070 = vadd.xlane.f32.xlu0 %v7069_v27 }
 0x570   : > { %7124 = vrot.lane.b32.xlu0 %v15305_v31, %s13992_s15 }
 0x5e7   : > { %v7071_v29 = vpop.xlane.xlu0 %7070 }
 0x5e8   : > { %13623 = vrcp.f32 %v7071_v29 }
 0x5eb   : > { %v7125_v31 = vpop.permute.xlu0 %7124 }
 0x5ec   : > { %v7129_v42 = vsel %vm7128_vm4, %v7125_v31, %v7127_v50 }
 0x5f2   : > { %v13624_v32 = vpop.eup %13623 }
 0x5f3   : > { %v7073_v37 = vmul.f32 %v13624_v32, %v13622_v25 }
 0x5f5   : > { %v7074_v40 = vpack.c.bf16 %v7073_v37, %v7073_v37 }
 0x5f7   : > { %11576 = vmatmul.mubr.msk.bf16.vlgmr.msra.gmra.mrb[20].mxu1 %vm7062_vm2, %v7074_v40 }
 0x5f8   : > { %11580 = vmatpush3.bf16.xpose.msra.mxu1 %v7141_v41  ;;  %11581 = vmatprep.mubr.msk.bf16.mxu1 %vm13994_vm0, %v13993_v13 }
 0x5f9   : > { %11585 = vmatprep.subr.bf16.mxu1 %v13993_v13 }
 0x5ff   : > { %11582 = vmatmul.mubr.msk.bf16.vlgmr.msra.gmra.mrb[24].mxu1 %vm7015_vm1, %v7129_v42 }
 0x600   : > { %11587 = vmatprep.mubr.msk.bf16.mxu1 %vm13994_vm0, %v13993_v13 }
 0x6ca   : > { %v15405_v45 = vpop.f32.mrb[20].mxu1 }
 0x6cb   : > { %v11577_v52 = vpop.f32.mrb[21].mxu1 }
 0x6cc   : > { %v7119_v54 = vpop.f32.mrb[22].mxu1 }
 0x6cd   : > { %v11578_v55 = vpop.f32.mrb[23].mxu1 }
 0x6ce   : > { %v15445_v55 = vld [vmem:[%s14436_s1 + $0x8] sm:$0xf] }
 0x6d2   : > { %v7177_v56 = vpop.f32.mrb[24].mxu1 }
 0x6d3   : > { %v11583_v39 = vpop.f32.mrb[25].mxu1  ;;  %v7183_v61 = vsel %vm7062_vm2, %v7177_v56, -inf }
 0x6d4   : > { %7184 = vmax.xlane.f32.xlu1 %v7183_v61  ;;  %v7180_v48 = vpop.f32.mrb[26].mxu1 }
 0x6d5   : > { %v11584_v0 = vpop.f32.mrb[27].mxu1 }
 0x6e5   : > { %7197 = vrot.lane.b32.xlu1 %v7009_v16, %s13992_s15 }
 0x6e9   : > { %7256 = vrot.lane.b32.xlu1 %v15106_v51, %s13995_s25 }
 0x6ed   : > { %7258 = vrot.lane.b32.xlu1 %v7005_v3, %s13995_s25 }
 0x6f1   : > { %7249 = vrot.lane.b32.xlu1 %v15114_v57, %s13995_s25  ;;  %v11678_v57 = vadd.f32 %v15388_v12, %v3350_v9 }
 0x6f3   : > { %v7010_v19 = vpack.c.bf16 %v11678_v57, %v11678_v57 }
 0x6f5   : > { %7251 = vrot.lane.b32.xlu1 %v15419_v10, %s13995_s25 }
 0x761   : > { %v7185_v26 = vpop.xlane.xlu1 %7184 }
 0x762   : > { %v7186_v5 = vsub.f32 %v7177_v56, %v7185_v26  ;;  %v3354_v56 = vrot.slane %v15445_v55, %v15079_v21 }
 0x764   : > { %v7187_v59 = vmul.f32 1.442695, %v7186_v5  ;;  %v11679_v39 = vadd.f32 %v15378_v62, %v3354_v56  ;;  %v15493_v56 = vpack.c.bf16 %v15016_v6, %v15016_v6  ;;  %v13060_v6 = vld [vmem:[%s14420_s22 + $0x208] ss:$48 sps:$4 sm:$0xff]  }
 0x765   : > { %v7198_v4 = vpop.permute.xlu1 %7197 }
 0x766   : > { %13625 = vpow2.f32 %v7187_v59  ;;  %v7011_v61 = vpack.c.bf16 %v11679_v39, %v11679_v39  ;;  %v13056_v39 = vld [vmem:[%s14420_s22 + $0x14c] ss:$48 sps:$4 sm:$0xff]  }
 0x769   : > { %v7257_v16 = vpop.permute.xlu1 %7256 }
 0x76d   : > { %v7259_v35 = vpop.permute.xlu1 %7258 }
 0x76e   : > { %v7260_v12 = vsel %vm7253_vm5, %v7257_v16, %v7259_v35 }
 0x76f   : > { %v7265_v30 = vsel %vm7015_vm1, %v7260_v12, 0 }
 0x770   : > { %v13626_v53 = vpop.eup %13625 }
 0x771   : > { %v7189_v51 = vsel %vm7062_vm2, %v13626_v53, 0.0  ;;  %v7250_v27 = vpop.permute.xlu1 %7249 }
 0x772   : > { %7190 = vadd.xlane.f32.xlu0 %v7189_v51 }
 0x775   : > { %v7252_v17 = vpop.permute.xlu1 %7251 }
 0x776   : > { %v7254_v32 = vsel %vm7253_vm5, %v7250_v27, %v7252_v17 }
 0x788   : > { %7199 = vrot.lane.b32.xlu0 %v7010_v19, %s13992_s15 }
 0x7ff   : > { %v7191_v14 = vpop.xlane.xlu0 %7190 }
 0x800   : > { %13627 = vrcp.f32 %v7191_v14 }
 0x803   : > { %v7200_v20 = vpop.permute.xlu0 %7199 }
 0x804   : > { %v7201_v22 = vsel %vm7128_vm4, %v7198_v4, %v7200_v20 }
 0x805   : > { %v7206_v23 = vsel %vm7078_vm3, %v7201_v22, 0 }
 0x806   : > { %11586 = vmatpush3.bf16.msra.mxu1 %v7206_v23 }
 0x807   : > { %11591 = vmatprep.subr.bf16.mxu1 %v13993_v13 }
 0x80a   : > { %v13628_v24 = vpop.eup %13627 }
 0x80b   : > { %v7193_v25 = vmul.f32 %v13628_v24, %v13626_v53 }
 0x80d   : > { %v7194_v29 = vpack.c.bf16 %v7193_v25, %v7193_v25 }
 0x80f   : > { %11588 = vmatmul.mubr.msk.bf16.vlgmr.msra.gmra.mrb[28].mxu1 %vm7062_vm2, %v7194_v29 }
 0x810   : > { %11592 = vmatpush3.bf16.xpose.msra.mxu1 %v7265_v30  ;;  %11593 = vmatprep.mubr.msk.bf16.mxu1 %vm13994_vm0, %v13993_v13 }
 0x811   : > { %11597 = vmatprep.subr.bf16.mxu1 %v13993_v13 }
 0x817   : > { %11594 = vmatmul.mubr.msk.bf16.vlgmr.msra.gmra.mrb[32].mxu1 %vm7015_vm1, %v7254_v32  ;;  %v15475_v32 = vsub.s32 4, %v14985_v44 }
 0x818   : > { %11599 = vmatprep.mubr.msk.bf16.mxu1 %vm13994_vm0, %v13993_v13 }
 0x8e2   : > { %v15441_v37 = vpop.f32.mrb[28].mxu1 }
 0x8e3   : > { %v11589_v33 = vpop.f32.mrb[29].mxu1 }
 0x8e4   : > { %v7245_v40 = vpop.f32.mrb[30].mxu1  ;;  %v3338_v33 = vrot.slane %v15385_v7, %v15475_v32 }
 0x8e5   : > { %v11590_v41 = vpop.f32.mrb[31].mxu1 }
 0x8e6   : > { %v11675_v40 = vadd.f32 %v15315_v36, %v3338_v33  ;;  %v13047_v41 = vld [vmem:[%s14420_s22 + $0x2c] ss:$48 sps:$4 sm:$0xff]   ;;  %v13051_v36 = vld [vmem:[%s14420_s22 + $0xe8] ss:$48 sps:$4 sm:$0xff]  }
 0x8e7   : > { %6874 = vmatprep.subr.bf16.mxu0 %v13047_v41  ;;  %v13099_v33 = vld [vmem:[%s14420_s22 + $0x6e8] ss:$48 sps:$4 sm:$0xff]  }
 0x8e8   : > { %v13102_v41 = vld [vmem:[%s14420_s22 + $0x748] ss:$48 sps:$4 sm:$0xff]  }
 0x8ea   : > { %v7301_v31 = vpop.f32.mrb[32].mxu1 }
 0x8eb   : > { %v11595_v50 = vpop.f32.mrb[33].mxu1  ;;  %v7307_v42 = vsel %vm7062_vm2, %v7301_v31, -inf }
 0x8ec   : > { %7308 = vmax.xlane.f32.xlu1 %v7307_v42  ;;  %v7304_v52 = vpop.f32.mrb[34].mxu1  ;;  %v15483_v50 = vpack.c.bf16 %v11675_v40, %v11675_v40  ;;  %v13050_v42 = vld [vmem:[%s14420_s22 + $0x8c] ss:$48 sps:$4 sm:$0xff]  }
 0x8ed   : > { %v11596_v54 = vpop.f32.mrb[35].mxu1  ;;  %v13048_v52 = vld [vmem:[%s14420_s22 + $0x88] ss:$48 sps:$4 sm:$0xff]   ;;  %v13104_v40 = vld [vmem:[%s14420_s22 + $0x74c] ss:$48 sps:$4 sm:$0xff]  }
 0x8ee   : > { %v13053_v54 = vld [vmem:[%s14420_s22 + $0xec] ss:$48 sps:$4 sm:$0xff]  }
 0x8fd   : > { %7322 = vrot.lane.b32.xlu1 %v7011_v61, %s13995_s25 }
 0x901   : > { %7373 = vrot.lane.b32.xlu1 %v7005_v3, %s13996_s0 }
 0x979   : > { %v7309_v48 = vpop.xlane.xlu1 %7308 }
 0x97a   : > { %v7310_v0 = vsub.f32 %v7301_v31, %v7309_v48  ;;  %v13045_v31 = vld [vmem:[%s14420_s22 + $0x28] ss:$48 sps:$4 sm:$0xff]   ;;  %v13059_v48 = vld [vmem:[%s14420_s22 + $0x1ac] ss:$48 sps:$4 sm:$0xff]  }
 0x97b   : > { %6875 = vmatpush1.bf16.msra.mxu0 %v13045_v31  ;;  %v13105_v31 = vld [vmem:[%s14420_s22 + $0x7a8] ss:$48 sps:$4 sm:$0xff]  }
 0x97c   : > { %v7311_v1 = vmul.f32 1.442695, %v7310_v0  ;;  %6876 = vmatprep.subr.bf16.mxu0 %v13050_v42  ;;  %v13057_v0 = vld [vmem:[%s14420_s22 + $0x1a8] ss:$48 sps:$4 sm:$0xff]  }
 0x97d   : > { %v7323_v5 = vpop.permute.xlu1 %7322  ;;  %v13108_v42 = vld [vmem:[%s14420_s22 + $0x808] ss:$48 sps:$4 sm:$0xff]  }
 0x97e   : > { %13629 = vpow2.f32 %v7311_v1  ;;  %v13062_v1 = vld [vmem:[%s14420_s22 + $0x20c] ss:$48 sps:$4 sm:$0xff]  }
 0x97f   : > { %6877 = vmatpush1.bf16.msra.mxu0 %v13048_v52  ;;  %v13113_v52 = vld [vmem:[%s14420_s22 + $0x86c] ss:$48 sps:$4 sm:$0xff]  }
 0x980   : > { %6878 = vmatprep.subr.bf16.mxu0 %v13053_v54  ;;  %v13111_v54 = vld [vmem:[%s14420_s22 + $0x868] ss:$48 sps:$4 sm:$0xff]  }
 0x981   : > { %v7374_v9 = vpop.permute.xlu1 %7373 }
 0x983   : > { %6879 = vmatpush1.bf16.msra.mxu0 %v13051_v36  ;;  %v13116_v36 = vld [vmem:[%s14420_s22 + $0x8cc] ss:$48 sps:$4 sm:$0xff]  }
 0x984   : > { %6880 = vmatprep.subr.bf16.mxu0 %v13056_v39  ;;  %v13114_v39 = vld [vmem:[%s14420_s22 + $0x8c8] ss:$48 sps:$4 sm:$0xff]  }
 0x988   : > { %v13630_v2 = vpop.eup %13629 }
 0x989   : > { %v7313_v26 = vsel %vm7062_vm2, %v13630_v2, 0.0 }
 0x98a   : > { %7314 = vadd.xlane.f32.xlu0 %v7313_v26  ;;  %v13063_v26 = vld [vmem:[%s14420_s22 + $0x268] ss:$48 sps:$4 sm:$0xff]  }
 0x9a0   : > { %7320 = vrot.lane.b32.xlu0 %v7010_v19, %s13995_s25  ;;  %v7379_v19 = vsel %vm7015_vm1, %v7374_v9, 0  ;;  %v13075_v9 = vld [vmem:[%s14420_s22 + $0x3e8] ss:$48 sps:$4 sm:$0xff]  }
 0x9a4   : > { %7371 = vrot.lane.b32.xlu0 %v15419_v10, %s13996_s0 }
 0xa17   : > { %v7315_v62 = vpop.xlane.xlu0 %7314 }
 0xa18   : > { %13631 = vrcp.f32 %v7315_v62  ;;  %v13068_v62 = vld [vmem:[%s14420_s22 + $0x2cc] ss:$48 sps:$4 sm:$0xff]  }
 0xa1b   : > { %v7321_v59 = vpop.permute.xlu0 %7320 }
 0xa1c   : > { %v7324_v53 = vsel %vm7253_vm5, %v7321_v59, %v7323_v5  ;;  %v13066_v5 = vld [vmem:[%s14420_s22 + $0x2c8] ss:$48 sps:$4 sm:$0xff]   ;;  %v13071_v59 = vld [vmem:[%s14420_s22 + $0x32c] ss:$48 sps:$4 sm:$0xff]  }
 0xa1d   : > { %v7329_v3 = vsel %vm7078_vm3, %v7324_v53, 0  ;;  %v13069_v53 = vld [vmem:[%s14420_s22 + $0x328] ss:$48 sps:$4 sm:$0xff]  }
 0xa1e   : > { %11598 = vmatpush3.bf16.msra.mxu1 %v7329_v3  ;;  %v13074_v3 = vld [vmem:[%s14420_s22 + $0x38c] ss:$48 sps:$4 sm:$0xff]  }
 0xa1f   : > { %11603 = vmatprep.subr.bf16.mxu1 %v13993_v13  ;;  %v7372_v10 = vpop.permute.xlu0 %7371 }
 0xa22   : > { %v13632_v51 = vpop.eup %13631 }
 0xa23   : > { %v7317_v8 = vmul.f32 %v13632_v51, %v13630_v2  ;;  %v13065_v2 = vld [vmem:[%s14420_s22 + $0x26c] ss:$48 sps:$4 sm:$0xff]   ;;  %v13072_v51 = vld [vmem:[%s14420_s22 + $0x388] ss:$48 sps:$4 sm:$0xff]  }
 0xa25   : > { %v7318_v57 = vpack.c.bf16 %v7317_v8, %v7317_v8  ;;  %v13077_v8 = vld [vmem:[%s14420_s22 + $0x3ec] ss:$48 sps:$4 sm:$0xff]  }
 0xa27   : > { %11600 = vmatmul.mubr.msk.bf16.vlgmr.msra.gmra.mrb[36].mxu1 %vm7062_vm2, %v7318_v57  ;;  %v13080_v57 = vld [vmem:[%s14420_s22 + $0x44c] ss:$48 sps:$4 sm:$0xff]  }
 0xa28   : > { %11604 = vmatpush3.bf16.xpose.msra.mxu1 %v7379_v19  ;;  %11605 = vmatprep.mubr.msk.bf16.mxu1 %vm13994_vm0, %v13993_v13  ;;  %v13078_v19 = vld [vmem:[%s14420_s22 + $0x448] ss:$48 sps:$4 sm:$0xff]  }
 0xa29   : > { %11609 = vmatprep.subr.bf16.mxu1 %v13993_v13 }
 0xa2f   : > { %11606 = vmatmul.mubr.msk.bf16.vlgmr.msra.gmra.mrb[40].mxu1 %vm7015_vm1, %v7372_v10  ;;  %v13083_v10 = vld [vmem:[%s14420_s22 + $0x4ac] ss:$48 sps:$4 sm:$0xff]  }
 0xa30   : > { %11611 = vmatprep.mubr.msk.bf16.mxu1 %vm13994_vm0, %v13993_v13 }
 0xafa   : > { %v15467_v4 = vpop.f32.mrb[36].mxu1 }
 0xafb   : > { %v11601_v14 = vpop.f32.mrb[37].mxu1 }
 0xafc   : > { %v7368_v16 = vpop.f32.mrb[38].mxu1  ;;  %v13081_v14 = vld [vmem:[%s14420_s22 + $0x4a8] ss:$48 sps:$4 sm:$0xff]  }
 0xafd   : > { %v11602_v20 = vpop.f32.mrb[39].mxu1  ;;  %v13086_v16 = vld [vmem:[%s14420_s22 + $0x50c] ss:$48 sps:$4 sm:$0xff]  }
 0xafe   : > { %v13084_v20 = vld [vmem:[%s14420_s22 + $0x508] ss:$48 sps:$4 sm:$0xff]  }
 0xb02   : > { %v7415_v22 = vpop.f32.mrb[40].mxu1 }
 0xb03   : > { %v11607_v23 = vpop.f32.mrb[41].mxu1  ;;  %v7421_v35 = vsel %vm7062_vm2, %v7415_v22, -inf }
 0xb04   : > { %7422 = vmax.xlane.f32.xlu1 %v7421_v35  ;;  %v7418_v24 = vpop.f32.mrb[42].mxu1  ;;  %v13087_v23 = vld [vmem:[%s14420_s22 + $0x568] ss:$48 sps:$4 sm:$0xff]   ;;  %v13092_v35 = vld [vmem:[%s14420_s22 + $0x5cc] ss:$48 sps:$4 sm:$0xff]  }
 0xb05   : > { %v11608_v25 = vpop.f32.mrb[43].mxu1  ;;  %v13090_v24 = vld [vmem:[%s14420_s22 + $0x5c8] ss:$48 sps:$4 sm:$0xff]  }
 0xb06   : > { %v13095_v25 = vld [vmem:[%s14420_s22 + $0x62c] ss:$48 sps:$4 sm:$0xff]  }
 0xb91   : > { %v7423_v12 = vpop.xlane.xlu1 %7422 }
 0xb92   : > { %v7424_v27 = vsub.f32 %v7415_v22, %v7423_v12  ;;  %v13089_v22 = vld [vmem:[%s14420_s22 + $0x56c] ss:$48 sps:$4 sm:$0xff]   ;;  %v13093_v12 = vld [vmem:[%s14420_s22 + $0x628] ss:$48 sps:$4 sm:$0xff]  }
 0xb94   : > { %v7425_v29 = vmul.f32 1.442695, %v7424_v27  ;;  %v13098_v27 = vld [vmem:[%s14420_s22 + $0x68c] ss:$48 sps:$4 sm:$0xff]  }
 0xb96   : > { %13633 = vpow2.f32 %v7425_v29  ;;  %v13096_v29 = vld [vmem:[%s14420_s22 + $0x688] ss:$48 sps:$4 sm:$0xff]  }
 0xba0   : > { %v15470_v30 = vpop.eup %13633 }
 0xba1   : > { %v7427_v17 = vsel %vm7062_vm2, %v15470_v30, 0.0 }
 0xba2   : > { %7428 = vadd.xlane.f32.xlu0 %v7427_v17  ;;  %v13101_v17 = vld [vmem:[%s14420_s22 + $0x6ec] ss:$48 sps:$4 sm:$0xff]  }
 0xbb8   : > { %7433 = vrot.lane.b32.xlu0 %v7011_v61, %s13996_s0  ;;  %v13054_v61 = vld [vmem:[%s14420_s22 + $0x148] ss:$48 sps:$4 sm:$0xff]  }
 0xbb9   : > { %6881 = vmatpush1.bf16.msra.mxu0 %v13054_v61  ;;  %v13119_v61 = vld [vmem:[%s14420_s22 + $0x92c] ss:$48 sps:$4 sm:$0xff]  }
 0xbba   : > { %6882 = vmatprep.subr.bf16.mxu0 %v13059_v48  ;;  %v13117_v48 = vld [vmem:[%s14420_s22 + $0x928] ss:$48 sps:$4 sm:$0xff]  }
 0xbbc   : > { %7596 = vrot.lane.b32.xlu0 %v15483_v50, %s13992_s15 }
 0xbbd   : > { %6883 = vmatpush1.bf16.msra.mxu0 %v13057_v0  ;;  %v13122_v0 = vld [vmem:[%s14420_s22 + $0x98c] ss:$48 sps:$4 sm:$0xff]  }
 0xbbe   : > { %6884 = vmatprep.subr.bf16.mxu0 %v13062_v1  ;;  %v13120_v1 = vld [vmem:[%s14420_s22 + $0x988] ss:$48 sps:$4 sm:$0xff]  }
 0xbc0   : > { %7587 = vrot.lane.b32.xlu0 %v15493_v56, %s13992_s15 }
 0xbc1   : > { %6885 = vmatpush1.bf16.msra.mxu0 %v13060_v6  ;;  %v13125_v6 = vld [vmem:[%s14420_s22 + $0x9ec] ss:$48 sps:$4 sm:$0xff]  }
 0xbc2   : > { %6886 = vmatprep.subr.bf16.mxu0 %v13065_v2  ;;  %v13123_v2 = vld [vmem:[%s14420_s22 + $0x9e8] ss:$48 sps:$4 sm:$0xff]  }
 0xbc5   : > { %6887 = vmatpush1.bf16.msra.mxu0 %v13063_v26  ;;  %v13128_v26 = vld [vmem:[%s14420_s22 + $0xa4c] ss:$48 sps:$4 sm:$0xff]  }
 0xbc6   : > { %6888 = vmatprep.subr.bf16.mxu0 %v13068_v62  ;;  %v13126_v62 = vld [vmem:[%s14420_s22 + $0xa48] ss:$48 sps:$4 sm:$0xff]  }
 0xbc9   : > { %6889 = vmatpush1.bf16.msra.mxu0 %v13066_v5  ;;  %v13131_v5 = vld [vmem:[%s14420_s22 + $0xaac] ss:$48 sps:$4 sm:$0xff]  }
 0xbca   : > { %6890 = vmatprep.subr.bf16.mxu0 %v13071_v59  ;;  %v13129_v59 = vld [vmem:[%s14420_s22 + $0xaa8] ss:$48 sps:$4 sm:$0xff]  }
 0xbcd   : > { %6891 = vmatpush1.bf16.msra.mxu0 %v13069_v53  ;;  %v13134_v53 = vld [vmem:[%s14420_s22 + $0xb0c] ss:$48 sps:$4 sm:$0xff]  }
 0xbce   : > { %6892 = vmatprep.subr.bf16.mxu0 %v13074_v3  ;;  %v13132_v3 = vld [vmem:[%s14420_s22 + $0xb08] ss:$48 sps:$4 sm:$0xff]  }
 0xbd1   : > { %6893 = vmatpush1.bf16.msra.mxu0 %v13072_v51  ;;  %v13137_v51 = vld [vmem:[%s14420_s22 + $0xb6c] ss:$48 sps:$4 sm:$0xff]  }
 0xbd2   : > { %6894 = vmatprep.subr.bf16.mxu0 %v13077_v8  ;;  %v13135_v8 = vld [vmem:[%s14420_s22 + $0xb68] ss:$48 sps:$4 sm:$0xff]  }
 0xbd5   : > { %6895 = vmatpush1.bf16.msra.mxu0 %v13075_v9  ;;  %v13140_v9 = vld [vmem:[%s14420_s22 + $0xbcc] ss:$48 sps:$4 sm:$0xff]  }
 0xbd6   : > { %6896 = vmatprep.subr.bf16.mxu0 %v13080_v57 }
 0xbd9   : > { %6897 = vmatpush1.bf16.msra.mxu0 %v13078_v19  ;;  %v13138_v19 = vld [vmem:[%s14420_s22 + $0xbc8] ss:$48 sps:$4 sm:$0xff]  }
 0xbda   : > { %6898 = vmatprep.subr.bf16.mxu0 %v13083_v10  ;;  %v13143_v10 = vld [vmem:[%s14420_s22 + $0xc2c] ss:$48 sps:$4 sm:$0xff]  }
 0xbdd   : > { %6899 = vmatpush1.bf16.msra.mxu0 %v13081_v14  ;;  %v3334_v14 = vrot.slane %v15385_v7, %v14992_v47 }
 0xbde   : > { %6900 = vmatprep.subr.bf16.mxu0 %v13086_v16 }
 0xbe1   : > { %6901 = vmatpush1.bf16.msra.mxu0 %v13084_v20 }
 0xbe2   : > { %6902 = vmatprep.subr.bf16.mxu0 %v13089_v22  ;;  %v13141_v22 = vld [vmem:[%s14420_s22 + $0xc28] ss:$48 sps:$4 sm:$0xff]  }
 0xbe5   : > { %6903 = vmatpush1.bf16.msra.mxu0 %v13087_v23  ;;  %v13146_v23 = vld [vmem:[%s14420_s22 + $0xc8c] ss:$48 sps:$4 sm:$0xff]  }
 0xbe6   : > { %6904 = vmatprep.subr.bf16.mxu0 %v13092_v35  ;;  %v11674_v35 = vadd.f32 %v15376_v60, %v3334_v14  ;;  %v13152_v60 = vld [vmem:[%s14420_s22 + $0xd4c] ss:$48 sps:$4 sm:$0xff]  }
 0xbe9   : > { %6905 = vmatpush1.bf16.msra.mxu0 %v13090_v24  ;;  %v13144_v24 = vld [vmem:[%s14420_s22 + $0xc88] ss:$48 sps:$4 sm:$0xff]  }
 0xbea   : > { %6915 = vmatprep.subr.bf16.mxu0 %v13095_v25 }
 0xbec   : > { %6907 = vmatmul.mubr.bf16.vlgmr.msra.gmra.mrb[20].mxu0 %v14671_v28  ;;  %v13107_v28 = vld [vmem:[%s14420_s22 + $0x7ac] ss:$48 sps:$4 sm:$0xff]  }
 0xbed   : > { %6916 = vmatpush1.bf16.msra.mxu0 %v13093_v12  ;;  %6947 = vmatprep.mubr.bf16.mxu0 %v14678_v34  ;;  %v13110_v34 = vld [vmem:[%s14420_s22 + $0x80c] ss:$48 sps:$4 sm:$0xff]  }
 0xbee   : > { %6917 = vmatprep.subr.bf16.mxu0 %v13098_v27  ;;  %v13149_v12 = vld [vmem:[%s14420_s22 + $0xcec] ss:$48 sps:$4 sm:$0xff]   ;;  %v15569_v27 = vpack.c.bf16 %v11674_v35, %v11674_v35 }
 0xbf1   : > { %6918 = vmatpush1.bf16.msra.mxu0 %v13096_v29  ;;  %v3358_v29 = vrot.slane %v15445_v55, %v15083_v15 }
 0xbf2   : > { %6919 = vmatprep.subr.bf16.mxu0 %v13101_v17 }
 0xbf5   : > { %6920 = vmatpush1.bf16.msra.mxu0 %v13099_v33 }
 0xbf6   : > { %6921 = vmatprep.subr.bf16.mxu0 %v13104_v40  ;;  %v11680_v40 = vadd.f32 %v15380_v63, %v3358_v29  ;;  %v13153_v63 = vld [vmem:[%s14420_s22 + $0xda8] ss:$48 sps:$4 sm:$0xff]  }
 0xbf9   : > { %6922 = vmatpush1.bf16.msra.mxu0 %v13102_v41  ;;  %v13155_v41 = vld [vmem:[%s14420_s22 + $0xdac] ss:$48 sps:$4 sm:$0xff]  }
 0xbfa   : > { %6923 = vmatprep.subr.bf16.mxu0 %v13107_v28  ;;  %v15585_v28 = vpack.c.bf16 %v11680_v40, %v11680_v40 }
 0xbfd   : > { %6924 = vmatpush1.bf16.msra.mxu0 %v13105_v31  ;;  %v13158_v31 = vld [vmem:[%s14420_s22 + $0xe0c] ss:$48 sps:$4 sm:$0xff]  }
 0xbfe   : > { %6925 = vmatprep.subr.bf16.mxu0 %v13110_v34  ;;  %v7543_v34 = vsel %vm7078_vm3, %v15585_v28, 0 }
 0xc01   : > { %6926 = vmatpush1.bf16.msra.mxu0 %v13108_v42  ;;  %v13156_v42 = vld [vmem:[%s14420_s22 + $0xe08] ss:$48 sps:$4 sm:$0xff]  }
 0xc02   : > { %6927 = vmatprep.subr.bf16.mxu0 %v13113_v52  ;;  %v13161_v52 = vld [vmem:[%s14420_s22 + $0xe6c] ss:$48 sps:$4 sm:$0xff]  }
 0xc05   : > { %6928 = vmatpush1.bf16.msra.mxu0 %v13111_v54  ;;  %v13159_v54 = vld [vmem:[%s14420_s22 + $0xe68] ss:$48 sps:$4 sm:$0xff]  }
 0xc06   : > { %6929 = vmatprep.subr.bf16.mxu0 %v13116_v36  ;;  %v13164_v36 = vld [vmem:[%s14420_s22 + $0xecc] ss:$48 sps:$4 sm:$0xff]  }
 0xc09   : > { %6930 = vmatpush1.bf16.msra.mxu0 %v13114_v39  ;;  %v13167_v39 = vld [vmem:[%s14420_s22 + $0xf2c] ss:$48 sps:$4 sm:$0xff]  }
 0xc0a   : > { %6931 = vmatprep.subr.bf16.mxu0 %v13119_v61  ;;  %v13165_v61 = vld [vmem:[%s14420_s22 + $0xf28] ss:$48 sps:$4 sm:$0xff]  }
 0xc0d   : > { %6932 = vmatpush1.bf16.msra.mxu0 %v13117_v48  ;;  %v13170_v48 = vld [vmem:[%s14420_s22 + $0xf8c] ss:$48 sps:$4 sm:$0xff]  }
 0xc0e   : > { %6933 = vmatprep.subr.bf16.mxu0 %v13122_v0  ;;  %v13168_v0 = vld [vmem:[%s14420_s22 + $0xf88] ss:$48 sps:$4 sm:$0xff]  }
 0xc11   : > { %6934 = vmatpush1.bf16.msra.mxu0 %v13120_v1  ;;  %v13173_v1 = vld [vmem:[%s14420_s22 + $0xfec] ss:$48 sps:$4 sm:$0xff]  }
 0xc12   : > { %6935 = vmatprep.subr.bf16.mxu0 %v13125_v6  ;;  %v13171_v6 = vld [vmem:[%s14420_s22 + $0xfe8] ss:$48 sps:$4 sm:$0xff]  }
 0xc15   : > { %6936 = vmatpush1.bf16.msra.mxu0 %v13123_v2  ;;  %v13176_v2 = vld [vmem:[%s14420_s22 + $0x104c] ss:$48 sps:$4 sm:$0xff]  }
 0xc16   : > { %6937 = vmatprep.subr.bf16.mxu0 %v13128_v26  ;;  %v13174_v26 = vld [vmem:[%s14420_s22 + $0x1048] ss:$48 sps:$4 sm:$0xff]  }
 0xc19   : > { %6938 = vmatpush1.bf16.msra.mxu0 %v13126_v62  ;;  %v13179_v62 = vld [vmem:[%s14420_s22 + $0x10ac] ss:$48 sps:$4 sm:$0xff]  }
 0xc1a   : > { %6939 = vmatprep.subr.bf16.mxu0 %v13131_v5  ;;  %v13177_v5 = vld [vmem:[%s14420_s22 + $0x10a8] ss:$48 sps:$4 sm:$0xff]  }
 0xc1d   : > { %6940 = vmatpush1.bf16.msra.mxu0 %v13129_v59  ;;  %v13182_v59 = vld [vmem:[%s14420_s22 + $0x110c] ss:$48 sps:$4 sm:$0xff]  }
 0xc1e   : > { %6941 = vmatprep.subr.bf16.mxu0 %v13134_v53  ;;  %v13180_v53 = vld [vmem:[%s14420_s22 + $0x1108] ss:$48 sps:$4 sm:$0xff]  }
 0xc21   : > { %6942 = vmatpush1.bf16.msra.mxu0 %v13132_v3  ;;  %v13185_v3 = vld [vmem:[%s14420_s22 + $0x116c] ss:$48 sps:$4 sm:$0xff]  }
 0xc22   : > { %6943 = vmatprep.subr.bf16.mxu0 %v13137_v51  ;;  %v13183_v51 = vld [vmem:[%s14420_s22 + $0x1168] ss:$48 sps:$4 sm:$0xff]  }
 0xc25   : > { %6944 = vmatpush1.bf16.msra.mxu0 %v13135_v8  ;;  %v13188_v8 = vld [vmem:[%s14420_s22 + $0x11cc] ss:$48 sps:$4 sm:$0xff]  }
 0xc26   : > { %6945 = vmatprep.subr.bf16.mxu0 %v13140_v9  ;;  %v13186_v9 = vld [vmem:[%s14420_s22 + $0x11c8] ss:$48 sps:$4 sm:$0xff]  }
 0xc29   : > { %6946 = vmatpush1.bf16.msra.mxu0 %v13138_v19 }
 0xc2a   : > { %6956 = vmatprep.subr.bf16.mxu0 %v13143_v10 }
 0xc2c   : > { %6948 = vmatmul.mubr.bf16.vlgmr.msra.gmra.mrb[20].mxu0 %v14746_v43  ;;  %v13147_v43 = vld [vmem:[%s14420_s22 + $0xce8] ss:$48 sps:$4 sm:$0xff]  }
 0xc2d   : > { %6957 = vmatpush1.bf16.msra.mxu0 %v13141_v22  ;;  %6988 = vmatprep.mubr.bf16.mxu0 %v14752_v49  ;;  %v7485_v49 = vsel %vm7015_vm1, %v15569_v27, 0 }
 0xc2e   : > { %6958 = vmatprep.subr.bf16.mxu0 %v13146_v23 }
 0xc2f   : > { %v7429_v57 = vpop.xlane.xlu0 %7428 }
 0xc30   : > { %13635 = vrcp.f32 %v7429_v57 }
 0xc31   : > { %6959 = vmatpush1.bf16.msra.mxu0 %v13144_v24 }
 0xc32   : > { %6960 = vmatprep.subr.bf16.mxu0 %v13149_v12 }
 0xc33   : > { %v7434_v16 = vpop.permute.xlu0 %7433 }
 0xc34   : > { %v7439_v20 = vsel %vm7078_vm3, %v7434_v16, 0 }
 0xc35   : > { %11610 = vmatpush3.bf16.msra.mxu1 %v7439_v20  ;;  %6961 = vmatpush1.bf16.msra.mxu0 %v13147_v43 }
 0xc36   : > { %11615 = vmatprep.subr.bf16.mxu1 %v13993_v13  ;;  %6962 = vmatprep.subr.bf16.mxu0 %v13152_v60  ;;  %v3362_v60 = vrot.slane %v15445_v55, %v14989_v46 }
 0xc3a   : > { %v13636_v25 = vpop.eup %13635 }
 0xc3b   : > { %v7431_v17 = vmul.f32 %v13636_v25, %v15470_v30  ;;  %v13150_v30 = vld [vmem:[%s14420_s22 + $0xd48] ss:$48 sps:$4 sm:$0xff]  }
 0xc3c   : > { %6963 = vmatpush1.bf16.msra.mxu0 %v13150_v30 }
 0xc3d   : > { %v7432_v33 = vpack.c.bf16 %v7431_v17, %v7431_v17  ;;  %6964 = vmatprep.subr.bf16.mxu0 %v13155_v41 }
 0xc3f   : > { %11612 = vmatmul.mubr.msk.bf16.vlgmr.msra.gmra.mrb[44].mxu1 %vm7062_vm2, %v7432_v33  ;;  %v15625_v33 = vld [vmem:[%s14429_s10] sm:$0x3f] }
 0xc40   : > { %11616 = vmatpush3.bf16.xpose.msra.mxu1 %v7485_v49  ;;  %11617 = vmatprep.mubr.msk.bf16.mxu1 %vm13994_vm0, %v13993_v13  ;;  %v919_v43 = vrot.slane %v15625_v33, %v15475_v32 }
 0xc41   : > { %11621 = vmatprep.subr.bf16.mxu1 %v13993_v13  ;;  %6965 = vmatpush1.bf16.msra.mxu0 %v13153_v63 }
 0xc42   : > { %6966 = vmatprep.subr.bf16.mxu0 %v13158_v31  ;;  %v11669_v49 = vadd.f32 %v15242_v11, %v919_v43 }
 0xc44   : > { %v7001_v30 = vpack.c.bf16 %v11669_v49, %v11669_v49 }
 0xc45   : > { %6967 = vmatpush1.bf16.msra.mxu0 %v13156_v42 }
 0xc46   : > { %6968 = vmatprep.subr.bf16.mxu0 %v13161_v52 }
 0xc47   : > { %11618 = vmatmul.mubr.msk.bf16.vlgmr.msra.gmra.mrb[48].mxu1 %vm7015_vm1, %v15493_v56  ;;  %v13162_v56 = vld [vmem:[%s14420_s22 + $0xec8] ss:$48 sps:$4 sm:$0xff]  }
 0xc48   : > { %11622 = vmatpush3.bf16.msra.mxu1 %v7543_v34  ;;  %11623 = vmatprep.mubr.msk.bf16.mxu1 %vm13994_vm0, %v13993_v13 }
 0xc49   : > { %11627 = vmatprep.subr.bf16.mxu1 %v13993_v13  ;;  %6969 = vmatpush1.bf16.msra.mxu0 %v13159_v54 }
 0xc4a   : > { %6970 = vmatprep.subr.bf16.mxu0 %v13164_v36  ;;  %v7597_v36 = vpop.permute.xlu0 %7596 }
 0xc4d   : > { %6971 = vmatpush1.bf16.msra.mxu0 %v13162_v56 }
 0xc4e   : > { %6972 = vmatprep.subr.bf16.mxu0 %v13167_v39 }
 0xc51   : > { %6973 = vmatpush1.bf16.msra.mxu0 %v13165_v61 }
 0xc52   : > { %6974 = vmatprep.subr.bf16.mxu0 %v13170_v48 }
 0xc55   : > { %6975 = vmatpush1.bf16.msra.mxu0 %v13168_v0  ;;  %v7588_v0 = vpop.permute.xlu0 %7587 }
 0xc56   : > { %6976 = vmatprep.subr.bf16.mxu0 %v13173_v1 }
 0xc59   : > { %6977 = vmatpush1.bf16.msra.mxu0 %v13171_v6 }
 0xc5a   : > { %6978 = vmatprep.subr.bf16.mxu0 %v13176_v2 }
 0xc5d   : > { %6979 = vmatpush1.bf16.msra.mxu0 %v13174_v26 }
 0xc5e   : > { %6980 = vmatprep.subr.bf16.mxu0 %v13179_v62 }
 0xc61   : > { %6981 = vmatpush1.bf16.msra.mxu0 %v13177_v5 }
 0xc62   : > { %6982 = vmatprep.subr.bf16.mxu0 %v13182_v59 }
 0xc65   : > { %6983 = vmatpush1.bf16.msra.mxu0 %v13180_v53 }
 0xc66   : > { %6984 = vmatprep.subr.bf16.mxu0 %v13185_v3 }
 0xc69   : > { %6985 = vmatpush1.bf16.msra.mxu0 %v13183_v51 }
 0xc6a   : > { %6986 = vmatprep.subr.bf16.mxu0 %v13188_v8 }
 0xc6d   : > { %6987 = vmatpush1.bf16.msra.mxu0 %v13186_v9 }
 0xc70   : > { %6989 = vmatmul.mubr.bf16.vlgmr.msra.gmra.mrb[20].mxu0 %v14819_v58 }
 0xd12   : > { %v15618_v57 = vpop.f32.mrb[44].mxu1 }
 0xd13   : > { %v11613_v19 = vpop.f32.mrb[45].mxu1 }
 0xd14   : > { %v7478_v10 = vpop.f32.mrb[46].mxu1 }
 0xd15   : > { %v11614_v14 = vpop.f32.mrb[47].mxu1 }
 0xd1a   : > { %v7521_v16 = vpop.f32.mrb[48].mxu1 }
 0xd1b   : > { %v11619_v20 = vpop.f32.mrb[49].mxu1  ;;  %v7527_v22 = vsel %vm7062_vm2, %v7521_v16, -inf }
 0xd1c   : > { %7528 = vmax.xlane.f32.xlu1 %v7527_v22  ;;  %v7524_v23 = vpop.f32.mrb[50].mxu1 }
 0xd1d   : > { %v11620_v35 = vpop.f32.mrb[51].mxu1 }
 0xd2d   : > { %7594 = vrot.lane.b32.xlu1 %v15569_v27, %s13992_s15  ;;  %v15633_v27 = vsub.s32 5, %v14985_v44 }
 0xd2f   : > { %v3342_v41 = vrot.slane %v15385_v7, %v15633_v27 }
 0xd31   : > { %v11676_v31 = vadd.f32 %v15317_v38, %v3342_v41 }
 0xd33   : > { %v15643_v34 = vpack.c.bf16 %v11676_v31, %v11676_v31 }
 0xd43   : > { %v6990_v24 = vpop.f32.mrb[20].mxu0 }
 0xd44   : > { %v11681_v40 = vadd.f32 %v6990_v24, %v3362_v60  ;;  %v15647_v44 = vpop.f32.mrb[21].mxu0 }
 0xd45   : > { %v6994_v11 = vpop.f32.mrb[22].mxu0 }
 0xd46   : > { %v15637_v63 = vpack.c.bf16 %v11681_v40, %v11681_v40  ;;  %v6995_v42 = vpop.f32.mrb[23].mxu0 }
 0xda9   : > { %v7529_v25 = vpop.xlane.xlu1 %7528 }
 0xdaa   : > { %v7530_v12 = vsub.f32 %v7521_v16, %v7529_v25 }
 0xdac   : > { %v7531_v58 = vmul.f32 1.442695, %v7530_v12 }
 0xdad   : > { %v7595_v52 = vpop.permute.xlu1 %7594 }
 0xdae   : > { %13637 = vpow2.f32 %v7531_v58  ;;  %v7598_v38 = vsel %vm7128_vm4, %v7595_v52, %v7597_v36 }
 0xdaf   : > { %v7603_v61 = vsel %vm7015_vm1, %v7598_v38, 0 }
 0xdb8   : > { %v13638_v29 = vpop.eup %13637 }
 0xdb9   : > { %v7533_v17 = vsel %vm7062_vm2, %v13638_v29, 0.0 }
 0xdba   : > { %7534 = vadd.xlane.f32.xlu1 %v7533_v17 }
 0xdcb   : > { %7589 = vrot.lane.b32.xlu1 %v7001_v30, %s13992_s15 }
 0xdcf   : > { %7661 = vrot.lane.b32.xlu1 %v15637_v63, %s13992_s15 }
 0xdd3   : > { %7719 = vrot.lane.b32.xlu1 %v15643_v34, %s13995_s25 }
 0xe47   : > { %v7535_v7 = vpop.xlane.xlu1 %7534 }
 0xe48   : > { %13639 = vrcp.f32 %v7535_v7 }
 0xe4b   : > { %v7590_v48 = vpop.permute.xlu1 %7589 }
 0xe4c   : > { %v7591_v1 = vsel %vm7128_vm4, %v7588_v0, %v7590_v48  ;;  %v3366_v48 = vrot.slane %v15445_v55, %v14992_v47 }
 0xe4e   : > { %v11682_v0 = vadd.f32 %v15647_v44, %v3366_v48 }
 0xe4f   : > { %v7662_v10 = vpop.permute.xlu1 %7661 }
 0xe52   : > { %v13640_v54 = vpop.eup %13639 }
 0xe53   : > { %v7537_v56 = vmul.f32 %v13640_v54, %v13638_v29  ;;  %v7720_v24 = vpop.permute.xlu1 %7719 }
 0xe55   : > { %v7538_v39 = vpack.c.bf16 %v7537_v56, %v7537_v56 }
 0xe57   : > { %11624 = vmatmul.mubr.msk.bf16.vlgmr.msra.gmra.mrb[52].mxu1 %vm7062_vm2, %v7538_v39 }
 0xe58   : > { %11628 = vmatpush3.bf16.xpose.msra.mxu1 %v7603_v61  ;;  %11629 = vmatprep.mubr.msk.bf16.mxu1 %vm13994_vm0, %v13993_v13 }
 0xe59   : > { %11633 = vmatprep.subr.bf16.mxu1 %v13993_v13 }
 0xe5f   : > { %11630 = vmatmul.mubr.msk.bf16.vlgmr.msra.gmra.mrb[56].mxu1 %vm7015_vm1, %v7591_v1  ;;  %v7014_v1 = vpack.c.bf16 %v11682_v0, %v11682_v0 }
 0xe60   : > { %11635 = vmatprep.mubr.msk.bf16.mxu1 %vm13994_vm0, %v13993_v13 }
 0xf2a   : > { %v15659_v6 = vpop.f32.mrb[52].mxu1 }
 0xf2b   : > { %v11625_v2 = vpop.f32.mrb[53].mxu1 }
 0xf2c   : > { %v7582_v26 = vpop.f32.mrb[54].mxu1 }
 0xf2d   : > { %v11626_v62 = vpop.f32.mrb[55].mxu1 }
 0xf32   : > { %v7639_v5 = vpop.f32.mrb[56].mxu1 }
 0xf33   : > { %v11631_v59 = vpop.f32.mrb[57].mxu1  ;;  %v7645_v53 = vsel %vm7062_vm2, %v7639_v5, -inf }
 0xf34   : > { %7646 = vmax.xlane.f32.xlu0 %v7645_v53  ;;  %v7642_v3 = vpop.f32.mrb[58].mxu1 }
 0xf35   : > { %v11632_v51 = vpop.f32.mrb[59].mxu1 }
 0xf4a   : > { %7659 = vrot.lane.b32.xlu0 %v15585_v28, %s13992_s15 }
 0xf4e   : > { %7717 = vrot.lane.b32.xlu0 %v15483_v50, %s13995_s25  ;;  %v923_v50 = vrot.slane %v15625_v33, %v15633_v27 }
 0xf50   : > { %v11670_v23 = vadd.f32 %v15244_v18, %v923_v50  ;;  %v13194_v50 = vld [vmem:[%s14427_s24 + $0x3c] ss:$24 sps:$4 sm:$0xff]  }
 0xf52   : > { %7711 = vrot.lane.b32.xlu0 %v7001_v30, %s13995_s25  ;;  %v7002_v35 = vpack.c.bf16 %v11670_v23, %v11670_v23  ;;  %v13192_v23 = vld [vmem:[%s14427_s24 + $0x38] ss:$24 sps:$4 sm:$0xff]  }
 0xfc1   : > { %v7647_v8 = vpop.xlane.xlu0 %7646 }
 0xfc2   : > { %v7648_v9 = vsub.f32 %v7639_v5, %v7647_v8 }
 0xfc4   : > { %v7649_v19 = vmul.f32 1.442695, %v7648_v9 }
 0xfc5   : > { %v7660_v14 = vpop.permute.xlu0 %7659 }
 0xfc6   : > { %13641 = vpow2.f32 %v7649_v19  ;;  %v7663_v16 = vsel %vm7128_vm4, %v7660_v14, %v7662_v10 }
 0xfc7   : > { %v7668_v20 = vsel %vm7078_vm3, %v7663_v16, 0 }
 0xfc8   : > { %11634 = vmatpush3.bf16.msra.mxu1 %v7668_v20 }
 0xfc9   : > { %11639 = vmatprep.subr.bf16.mxu1 %v13993_v13  ;;  %v7718_v12 = vpop.permute.xlu0 %7717 }
 0xfca   : > { %v7721_v17 = vsel %vm7253_vm5, %v7718_v12, %v7720_v24  ;;  %v13195_v24 = vld [vmem:[%s14427_s24 + $0x68] ss:$24 sps:$4 sm:$0xff]  }
 0xfcb   : > { %v7726_v60 = vsel %vm7015_vm1, %v7721_v17, 0  ;;  %v13201_v12 = vld [vmem:[%s14427_s24 + $0xc8] ss:$24 sps:$4 sm:$0xff]   ;;  %v13209_v17 = vld [vmem:[%s14427_s24 + $0x12c] ss:$24 sps:$4 sm:$0xff]  }
 0xfcd   : > { %v7712_v33 = vpop.permute.xlu0 %7711 }
 0xfd0   : > { %v13642_v22 = vpop.eup %13641 }
 0xfd1   : > { %v7651_v28 = vsel %vm7062_vm2, %v13642_v22, 0.0 }
 0xfd2   : > { %7652 = vadd.xlane.f32.xlu1 %v7651_v28  ;;  %v13191_v28 = vld [vmem:[%s14427_s24 + $0xc] ss:$24 sps:$4 sm:$0xff]  }
 0xfd3   : > { %9863 = vmatprep.subr.bf16.mxu0 %v13191_v28  ;;  %v13246_v28 = vld [vmem:[%s14427_s24 + $0x368] ss:$24 sps:$4 sm:$0xff]  }
 0xfe3   : > { %7713 = vrot.lane.b32.xlu1 %v7002_v35, %s13995_s25 }
0x105f   : > { %v7653_v25 = vpop.xlane.xlu1 %7652 }
0x1060   : > { %13643 = vrcp.f32 %v7653_v25  ;;  %v13203_v25 = vld [vmem:[%s14427_s24 + $0xcc] ss:$24 sps:$4 sm:$0xff]  }
0x1063   : > { %v7714_v18 = vpop.permute.xlu1 %7713 }
0x1064   : > { %v7715_v49 = vsel %vm7253_vm5, %v7712_v33, %v7714_v18  ;;  %v13210_v18 = vld [vmem:[%s14427_s24 + $0x158] ss:$24 sps:$4 sm:$0xff]   ;;  %v13215_v33 = vld [vmem:[%s14427_s24 + $0x18c] ss:$24 sps:$4 sm:$0xff]  }
0x106a   : > { %v13644_v58 = vpop.eup %13643 }
0x106b   : > { %v7655_v29 = vmul.f32 %v13644_v58, %v13642_v22  ;;  %v13206_v58 = vld [vmem:[%s14427_s24 + $0xfc] ss:$24 sps:$4 sm:$0xff]  }
0x106d   : > { %v7656_v43 = vpack.c.bf16 %v7655_v29, %v7655_v29  ;;  %v13204_v29 = vld [vmem:[%s14427_s24 + $0xf8] ss:$24 sps:$4 sm:$0xff]  }
0x106f   : > { %11636 = vmatmul.mubr.msk.bf16.vlgmr.msra.gmra.mrb[60].mxu1 %vm7062_vm2, %v7656_v43  ;;  %v13207_v43 = vld [vmem:[%s14427_s24 + $0x128] ss:$24 sps:$4 sm:$0xff]  }
0x1070   : > { %11640 = vmatpush3.bf16.xpose.msra.mxu1 %v7726_v60  ;;  %11641 = vmatprep.mubr.msk.bf16.mxu1 %vm13994_vm0, %v13993_v13  ;;  %v13212_v60 = vld [vmem:[%s14427_s24 + $0x15c] ss:$24 sps:$4 sm:$0xff]  }
0x1071   : > { %11645 = vmatprep.subr.bf16.mxu1 %v13993_v13 }
0x1077   : > { %11642 = vmatmul.mubr.msk.bf16.vlgmr.msra.gmra.mrb[64].mxu1 %vm7015_vm1, %v7715_v49  ;;  %v13213_v49 = vld [vmem:[%s14427_s24 + $0x188] ss:$24 sps:$4 sm:$0xff]  }
0x1078   : > { %11647 = vmatprep.mubr.msk.bf16.mxu1 %vm13994_vm0, %v13993_v13 }
0x1142   : > { %v15685_v40 = vpop.f32.mrb[60].mxu1 }
0x1143   : > { %v11637_v30 = vpop.f32.mrb[61].mxu1 }
0x1144   : > { %v7707_v41 = vpop.f32.mrb[62].mxu1  ;;  %v13218_v30 = vld [vmem:[%s14427_s24 + $0x1bc] ss:$24 sps:$4 sm:$0xff]  }
0x1145   : > { %v11638_v31 = vpop.f32.mrb[63].mxu1  ;;  %v13216_v41 = vld [vmem:[%s14427_s24 + $0x1b8] ss:$24 sps:$4 sm:$0xff]  }
0x1146   : > { %v13221_v31 = vld [vmem:[%s14427_s24 + $0x1ec] ss:$24 sps:$4 sm:$0xff]  }
0x114a   : > { %v7762_v11 = vpop.f32.mrb[64].mxu1 }
0x114b   : > { %v11643_v42 = vpop.f32.mrb[65].mxu1  ;;  %v7768_v52 = vsel %vm7062_vm2, %v7762_v11, -inf }
0x114c   : > { %7769 = vmax.xlane.f32.xlu0 %v7768_v52  ;;  %v7765_v7 = vpop.f32.mrb[66].mxu1  ;;  %v13224_v42 = vld [vmem:[%s14427_s24 + $0x21c] ss:$24 sps:$4 sm:$0xff]   ;;  %v13222_v52 = vld [vmem:[%s14427_s24 + $0x218] ss:$24 sps:$4 sm:$0xff]  }
0x114d   : > { %v11644_v54 = vpop.f32.mrb[67].mxu1  ;;  %v13227_v7 = vld [vmem:[%s14427_s24 + $0x24c] ss:$24 sps:$4 sm:$0xff]  }
0x114e   : > { %v13225_v54 = vld [vmem:[%s14427_s24 + $0x248] ss:$24 sps:$4 sm:$0xff]  }
0x1162   : > { %7781 = vrot.lane.b32.xlu0 %v15637_v63, %s13995_s25 }
0x1166   : > { %7834 = vrot.lane.b32.xlu0 %v15643_v34, %s13996_s0 }
0x11d9   : > { %v7770_v36 = vpop.xlane.xlu0 %7769 }
0x11da   : > { %v7771_v56 = vsub.f32 %v7762_v11, %v7770_v36  ;;  %v13219_v11 = vld [vmem:[%s14427_s24 + $0x1e8] ss:$24 sps:$4 sm:$0xff]   ;;  %v13230_v36 = vld [vmem:[%s14427_s24 + $0x27c] ss:$24 sps:$4 sm:$0xff]  }
0x11dc   : > { %v7772_v38 = vmul.f32 1.442695, %v7771_v56  ;;  %v13228_v56 = vld [vmem:[%s14427_s24 + $0x278] ss:$24 sps:$4 sm:$0xff]  }
0x11dd   : > { %v7782_v34 = vpop.permute.xlu0 %7781 }
0x11de   : > { %13645 = vpow2.f32 %v7772_v38  ;;  %v13233_v38 = vld [vmem:[%s14427_s24 + $0x2ac] ss:$24 sps:$4 sm:$0xff]  }
0x11e1   : > { %v7835_v59 = vpop.permute.xlu0 %7834 }
0x11e2   : > { %v7840_v53 = vsel %vm7015_vm1, %v7835_v59, 0 }
0x11e8   : > { %v13646_v39 = vpop.eup %13645 }
0x11e9   : > { %v7774_v61 = vsel %vm7062_vm2, %v13646_v39, 0.0 }
0x11ea   : > { %7775 = vadd.xlane.f32.xlu1 %v7774_v61 }
0x11fb   : > { %7783 = vrot.lane.b32.xlu1 %v7014_v1, %s13995_s25 }
0x11ff   : > { %7832 = vrot.lane.b32.xlu1 %v7002_v35, %s13996_s0  ;;  %v13197_v35 = vld [vmem:[%s14427_s24 + $0x6c] ss:$24 sps:$4 sm:$0xff]  }
0x1277   : > { %v7776_v63 = vpop.xlane.xlu1 %7775 }
0x1278   : > { %13647 = vrcp.f32 %v7776_v63 }
0x127b   : > { %v7784_v2 = vpop.permute.xlu1 %7783 }
0x127c   : > { %v7785_v26 = vsel %vm7253_vm5, %v7782_v34, %v7784_v2 }
0x127d   : > { %v7790_v62 = vsel %vm7078_vm3, %v7785_v26, 0  ;;  %v13236_v26 = vld [vmem:[%s14427_s24 + $0x2dc] ss:$24 sps:$4 sm:$0xff]  }
0x127e   : > { %11646 = vmatpush3.bf16.msra.mxu1 %v7790_v62  ;;  %v13234_v62 = vld [vmem:[%s14427_s24 + $0x2d8] ss:$24 sps:$4 sm:$0xff]  }
0x127f   : > { %11651 = vmatprep.subr.bf16.mxu1 %v13993_v13  ;;  %v7833_v3 = vpop.permute.xlu1 %7832 }
0x1282   : > { %v13648_v5 = vpop.eup %13647 }
0x1283   : > { %v7778_v55 = vmul.f32 %v13648_v5, %v13646_v39  ;;  %v13231_v39 = vld [vmem:[%s14427_s24 + $0x2a8] ss:$24 sps:$4 sm:$0xff]   ;;  %v13239_v5 = vld [vmem:[%s14427_s24 + $0x30c] ss:$24 sps:$4 sm:$0xff]  }
0x1285   : > { %v7779_v44 = vpack.c.bf16 %v7778_v55, %v7778_v55  ;;  %v13245_v55 = vld [vmem:[%s14427_s24 + $0x4] ss:$24 sps:$4 sm:$0xff]  }
0x1287   : > { %11648 = vmatmul.mubr.msk.bf16.vlgmr.msra.gmra.mrb[68].mxu1 %vm7062_vm2, %v7779_v44 }
0x1288   : > { %11652 = vmatpush3.bf16.xpose.msra.mxu1 %v7840_v53  ;;  %11653 = vmatprep.mubr.msk.bf16.mxu1 %vm13994_vm0, %v13993_v13 }
0x1289   : > { %11657 = vmatprep.subr.bf16.mxu1 %v13993_v13 }
0x128f   : > { %11654 = vmatmul.mubr.msk.bf16.vlgmr.msra.gmra.mrb[72].mxu1 %vm7015_vm1, %v7833_v3 }
0x1290   : > { %11659 = vmatprep.mubr.msk.bf16.mxu1 %vm13994_vm0, %v13993_v13  ;;  %v13189_v13 = vld [vmem:[%s14427_s24 + $0x8] ss:$24 sps:$4 sm:$0xff]  }
0x1291   : > { %9864 = vmatpush1.bf16.msra.mxu0 %v13189_v13  ;;  %v13243_v13 = vld [vmem:[%s14427_s24] ss:$24 sps:$4 sm:$0xff]  }
0x1292   : > { %9865 = vmatprep.subr.bf16.mxu0 %v13194_v50  ;;  %v13251_v50 = vld [vmem:[%s14427_s24 + $0x34] ss:$24 sps:$4 sm:$0xff]  }
0x1295   : > { %9866 = vmatpush1.bf16.msra.mxu0 %v13192_v23  ;;  %v13254_v23 = vld [vmem:[%s14427_s24 + $0x39c] ss:$24 sps:$4 sm:$0xff]  }
0x1296   : > { %9867 = vmatprep.subr.bf16.mxu0 %v13197_v35  ;;  %v13249_v35 = vld [vmem:[%s14427_s24 + $0x30] ss:$24 sps:$4 sm:$0xff]  }
0x1299   : > { %9868 = vmatpush1.bf16.msra.mxu0 %v13195_v24  ;;  %v13252_v24 = vld [vmem:[%s14427_s24 + $0x398] ss:$24 sps:$4 sm:$0xff]  }
0x135a   : > { %v15709_v51 = vpop.f32.mrb[68].mxu1 }
0x135b   : > { %v11649_v8 = vpop.f32.mrb[69].mxu1 }
0x135c   : > { %v7829_v9 = vpop.f32.mrb[70].mxu1 }
0x135d   : > { %v11650_v19 = vpop.f32.mrb[71].mxu1  ;;  %v13242_v9 = vld [vmem:[%s14427_s24 + $0x33c] ss:$24 sps:$4 sm:$0xff]  }
0x1362   : > { %v15711_v10 = vpop.f32.mrb[72].mxu1 }
0x1363   : > { %v11655_v14 = vpop.f32.mrb[73].mxu1  ;;  %v7882_v16 = vsel %vm7062_vm2, %v15711_v10, -inf }
0x1364   : > { %7883 = vmax.xlane.f32.xlu0 %v7882_v16  ;;  %v7879_v20 = vpop.f32.mrb[74].mxu1  ;;  %v13240_v14 = vld [vmem:[%s14427_s24 + $0x338] ss:$24 sps:$4 sm:$0xff]  }
0x1365   : > { %v11656_v22 = vpop.f32.mrb[75].mxu1  ;;  %v13248_v20 = vld [vmem:[%s14427_s24 + $0x36c] ss:$24 sps:$4 sm:$0xff]  }
0x137a   : > { %7894 = vrot.lane.b32.xlu0 %v7014_v1, %s13996_s0 }
0x137e   : > { %7947 = vrot.lane.b32.xlu0 %v15467_v4, %s13995_s25  ;;  %v13200_v4 = vld [vmem:[%s14427_s24 + $0x9c] ss:$24 sps:$4 sm:$0xff]  }
0x137f   : > { %9869 = vmatprep.subr.bf16.mxu0 %v13200_v4  ;;  %v13257_v4 = vld [vmem:[%s14427_s24 + $0x64] ss:$24 sps:$4 sm:$0xff]  }
0x1382   : > { %7951 = vrot.lane.b32.xlu0 %v15618_v57, %s13992_s15  ;;  %v13198_v57 = vld [vmem:[%s14427_s24 + $0x98] ss:$24 sps:$4 sm:$0xff]  }
0x1383   : > { %9870 = vmatpush1.bf16.msra.mxu0 %v13198_v57  ;;  %v13260_v57 = vld [vmem:[%s14427_s24 + $0x3cc] ss:$24 sps:$4 sm:$0xff]  }
0x1384   : > { %9871 = vmatprep.subr.bf16.mxu0 %v13203_v25  ;;  %v13255_v25 = vld [vmem:[%s14427_s24 + $0x60] ss:$24 sps:$4 sm:$0xff]  }
0x1387   : > { %9872 = vmatpush1.bf16.msra.mxu0 %v13201_v12  ;;  %v13258_v12 = vld [vmem:[%s14427_s24 + $0x3c8] ss:$24 sps:$4 sm:$0xff]  }
0x1388   : > { %9873 = vmatprep.subr.bf16.mxu0 %v13206_v58  ;;  %v13263_v58 = vld [vmem:[%s14427_s24 + $0x94] ss:$24 sps:$4 sm:$0xff]  }
0x138b   : > { %9874 = vmatpush1.bf16.msra.mxu0 %v13204_v29  ;;  %v13266_v29 = vld [vmem:[%s14427_s24 + $0x3fc] ss:$24 sps:$4 sm:$0xff]  }
0x138c   : > { %9875 = vmatprep.subr.bf16.mxu0 %v13209_v17  ;;  %v13261_v17 = vld [vmem:[%s14427_s24 + $0x90] ss:$24 sps:$4 sm:$0xff]  }
0x138f   : > { %9876 = vmatpush1.bf16.msra.mxu0 %v13207_v43  ;;  %v13264_v43 = vld [vmem:[%s14427_s24 + $0x3f8] ss:$24 sps:$4 sm:$0xff]  }
0x1390   : > { %9877 = vmatprep.subr.bf16.mxu0 %v13212_v60  ;;  %v13269_v60 = vld [vmem:[%s14427_s24 + $0xc4] ss:$24 sps:$4 sm:$0xff]  }
0x1393   : > { %9878 = vmatpush1.bf16.msra.mxu0 %v13210_v18  ;;  %v13272_v18 = vld [vmem:[%s14427_s24 + $0x42c] ss:$24 sps:$4 sm:$0xff]  }
0x1394   : > { %9879 = vmatprep.subr.bf16.mxu0 %v13215_v33  ;;  %v13267_v33 = vld [vmem:[%s14427_s24 + $0xc0] ss:$24 sps:$4 sm:$0xff]  }
0x1397   : > { %9880 = vmatpush1.bf16.msra.mxu0 %v13213_v49  ;;  %v13270_v49 = vld [vmem:[%s14427_s24 + $0x428] ss:$24 sps:$4 sm:$0xff]  }
0x1398   : > { %9881 = vmatprep.subr.bf16.mxu0 %v13218_v30  ;;  %v13275_v30 = vld [vmem:[%s14427_s24 + $0xf4] ss:$24 sps:$4 sm:$0xff]  }
0x139b   : > { %9882 = vmatpush1.bf16.msra.mxu0 %v13216_v41  ;;  %v13278_v41 = vld [vmem:[%s14427_s24 + $0x45c] ss:$24 sps:$4 sm:$0xff]  }
0x139c   : > { %9883 = vmatprep.subr.bf16.mxu0 %v13221_v31  ;;  %v13273_v31 = vld [vmem:[%s14427_s24 + $0xf0] ss:$24 sps:$4 sm:$0xff]  }
0x139f   : > { %9884 = vmatpush1.bf16.msra.mxu0 %v13219_v11  ;;  %v13276_v11 = vld [vmem:[%s14427_s24 + $0x458] ss:$24 sps:$4 sm:$0xff]  }
0x13a0   : > { %9885 = vmatprep.subr.bf16.mxu0 %v13224_v42  ;;  %v13281_v42 = vld [vmem:[%s14427_s24 + $0x124] ss:$24 sps:$4 sm:$0xff]  }
0x13a3   : > { %9886 = vmatpush1.bf16.msra.mxu0 %v13222_v52  ;;  %v13284_v52 = vld [vmem:[%s14427_s24 + $0x48c] ss:$24 sps:$4 sm:$0xff]  }
0x13a4   : > { %9887 = vmatprep.subr.bf16.mxu0 %v13227_v7  ;;  %v13279_v7 = vld [vmem:[%s14427_s24 + $0x120] ss:$24 sps:$4 sm:$0xff]  }
0x13a7   : > { %9888 = vmatpush1.bf16.msra.mxu0 %v13225_v54  ;;  %v13282_v54 = vld [vmem:[%s14427_s24 + $0x488] ss:$24 sps:$4 sm:$0xff]  }
0x13a8   : > { %9889 = vmatprep.subr.bf16.mxu0 %v13230_v36  ;;  %v13287_v36 = vld [vmem:[%s14427_s24 + $0x154] ss:$24 sps:$4 sm:$0xff]  }
0x13ab   : > { %9890 = vmatpush1.bf16.msra.mxu0 %v13228_v56  ;;  %v13290_v56 = vld [vmem:[%s14427_s24 + $0x4bc] ss:$24 sps:$4 sm:$0xff]  }
0x13ac   : > { %9891 = vmatprep.subr.bf16.mxu0 %v13233_v38  ;;  %v13285_v38 = vld [vmem:[%s14427_s24 + $0x150] ss:$24 sps:$4 sm:$0xff]  }
0x13af   : > { %9892 = vmatpush1.bf16.msra.mxu0 %v13231_v39  ;;  %v13288_v39 = vld [vmem:[%s14427_s24 + $0x4b8] ss:$24 sps:$4 sm:$0xff]  }
0x13b0   : > { %9893 = vmatprep.subr.bf16.mxu0 %v13236_v26  ;;  %v13300_v26 = vld [vmem:[%s14427_s24 + $0x518] ss:$24 sps:$4 sm:$0xff]  }
0x13b3   : > { %9894 = vmatpush1.bf16.msra.mxu0 %v13234_v62  ;;  %v13305_v62 = vld [vmem:[%s14427_s24 + $0x1e4] ss:$24 sps:$4 sm:$0xff]  }
0x13b4   : > { %9904 = vmatprep.subr.bf16.mxu0 %v13239_v5  ;;  %v13308_v5 = vld [vmem:[%s14427_s24 + $0x54c] ss:$24 sps:$4 sm:$0xff]  }
0x13f1   : > { %v7884_v61 = vpop.xlane.xlu0 %7883 }
0x13f2   : > { %v7885_v48 = vsub.f32 %v15711_v10, %v7884_v61  ;;  %v13293_v61 = vld [vmem:[%s14427_s24 + $0x184] ss:$24 sps:$4 sm:$0xff]  }
0x13f4   : > { %v7886_v0 = vmul.f32 1.442695, %v7885_v48  ;;  %v13296_v48 = vld [vmem:[%s14427_s24 + $0x4ec] ss:$24 sps:$4 sm:$0xff]  }
0x13f5   : > { %v7895_v1 = vpop.permute.xlu0 %7894 }
0x13f6   : > { %13649 = vpow2.f32 %v7886_v0  ;;  %v7900_v63 = vsel %vm7078_vm3, %v7895_v1, 0  ;;  %v13291_v0 = vld [vmem:[%s14427_s24 + $0x180] ss:$24 sps:$4 sm:$0xff]  }
0x13f7   : > { %11658 = vmatpush3.bf16.msra.mxu1 %v7900_v63  ;;  %v13294_v1 = vld [vmem:[%s14427_s24 + $0x4e8] ss:$24 sps:$4 sm:$0xff]   ;;  %v13299_v63 = vld [vmem:[%s14427_s24 + $0x1b4] ss:$24 sps:$4 sm:$0xff]  }
0x13f8   : > { %9740 = vmatprep.subr.bf16.mxu1 %v13245_v55  ;;  %v13303_v55 = vld [vmem:[%s14427_s24 + $0x1e0] ss:$24 sps:$4 sm:$0xff]  }
0x13f9   : > { %v15763_v44 = vpop.permute.xlu0 %7947 }
0x1400   : > { %v13650_v34 = vpop.eup %13649 }
0x1401   : > { %v7888_v2 = vsel %vm7062_vm2, %v13650_v34, 0.0 }
0x1402   : > { %7889 = vadd.xlane.f32.xlu1 %v7888_v2  ;;  %v13297_v2 = vld [vmem:[%s14427_s24 + $0x1b0] ss:$24 sps:$4 sm:$0xff]  }
0x1413   : > { %7943 = vrot.lane.b32.xlu1 %v15441_v37, %s13996_s0 }
0x1417   : > { %7955 = vrot.lane.b32.xlu1 %v15685_v40, %s13996_s0 }
0x141b   : > { %7959 = vrot.lane.b32.xlu1 %v15709_v51, %s13995_s25  ;;  %v13237_v51 = vld [vmem:[%s14427_s24 + $0x308] ss:$24 sps:$4 sm:$0xff]  }
0x148f   : > { %v7890_v59 = vpop.xlane.xlu1 %7889 }
0x1490   : > { %13651 = vrcp.f32 %v7890_v59  ;;  %v13306_v59 = vld [vmem:[%s14427_s24 + $0x548] ss:$24 sps:$4 sm:$0xff]  }
0x1493   : > { %v7944_v37 = vpop.permute.xlu1 %7943 }
0x1494   : > { %v7966_v53 = vsel %vm7015_vm1, %v15405_v45, %v7944_v37  ;;  %v7968_v3 = vsel %vm7253_vm5, %v7944_v37, %v15763_v44  ;;  %v13311_v37 = vld [vmem:[%s14427_s24 + $0x214] ss:$24 sps:$4 sm:$0xff]  }
0x1495   : > { %v15769_v40 = vpack.c.bf16 %v7966_v53, %v7966_v53  ;;  %v15771_v8 = vpack.c.bf16 %v7968_v3, %v7968_v3  ;;  %v13314_v53 = vld [vmem:[%s14427_s24 + $0x57c] ss:$24 sps:$4 sm:$0xff]   ;;  %v13309_v3 = vld [vmem:[%s14427_s24 + $0x210] ss:$24 sps:$4 sm:$0xff]  }
0x1497   : > { %v15775_v19 = vpop.permute.xlu1 %7955  ;;  %9895 = vmatprep.mubr.bf16.mxu0 %v15771_v8 }
0x1498   : > { %v7971_v45 = vsel %vm7015_vm1, %v15659_v6, %v15775_v19  ;;  %9896 = vmatmul.mubr.bf16.vlgmr.msra.gmra.mrb[24].mxu0 %v15769_v40 }
0x1499   : > { %v15782_v10 = vpack.c.bf16 %v7971_v45, %v7971_v45  ;;  %9905 = vmatpush1.bf16.msra.mxu0 %v13237_v51  ;;  %v13312_v51 = vld [vmem:[%s14427_s24 + $0x578] ss:$24 sps:$4 sm:$0xff]   ;;  %v13320_v45 = vld [vmem:[%s14427_s24 + $0x5ac] ss:$24 sps:$4 sm:$0xff]  }
0x149a   : > { %v13652_v16 = vpop.eup %13651  ;;  %9906 = vmatprep.subr.bf16.mxu0 %v13242_v9  ;;  %v13317_v9 = vld [vmem:[%s14427_s24 + $0x244] ss:$24 sps:$4 sm:$0xff]  }
0x149b   : > { %v7892_v22 = vmul.f32 %v13652_v16, %v13650_v34  ;;  %9936 = vmatprep.mubr.bf16.mxu0 %v15782_v10  ;;  %v13302_v34 = vld [vmem:[%s14427_s24 + $0x51c] ss:$24 sps:$4 sm:$0xff]   ;;  %v13318_v16 = vld [vmem:[%s14427_s24 + $0x5a8] ss:$24 sps:$4 sm:$0xff]  }
0x149d   : > { %9907 = vmatpush1.bf16.msra.mxu0 %v13240_v14  ;;  %v7893_v6 = vpack.c.bf16 %v7892_v22, %v7892_v22  ;;  %v13315_v14 = vld [vmem:[%s14427_s24 + $0x240] ss:$24 sps:$4 sm:$0xff]   ;;  %v13326_v22 = vld [vmem:[%s14427_s24 + $0x5dc] ss:$24 sps:$4 sm:$0xff]  }
0x149e   : > { %9908 = vmatprep.subr.bf16.mxu0 %v13248_v20  ;;  %v13323_v20 = vld [vmem:[%s14427_s24 + $0x274] ss:$24 sps:$4 sm:$0xff]  }
0x149f   : > { %11660 = vmatmul.mubr.msk.bf16.vlgmr.msra.gmra.mrb[76].mxu1 %vm7062_vm2, %v7893_v6  ;;  %v13321_v6 = vld [vmem:[%s14427_s24 + $0x270] ss:$24 sps:$4 sm:$0xff]  }
0x14a0   : > { %9741 = vmatpush1.bf16.msra.mxu1 %v13243_v13  ;;  %9772 = vmatprep.mubr.bf16.mxu1 %v15771_v8  ;;  %v7952_v13 = vpop.permute.xlu0 %7951 }
0x14a1   : > { %9909 = vmatpush1.bf16.msra.mxu0 %v13246_v28  ;;  %9742 = vmatprep.subr.bf16.mxu1 %v13251_v50  ;;  %v13324_v28 = vld [vmem:[%s14427_s24 + $0x5d8] ss:$24 sps:$4 sm:$0xff]   ;;  %v13329_v50 = vld [vmem:[%s14427_s24 + $0x2a4] ss:$24 sps:$4 sm:$0xff]  }
0x14a2   : > { %9910 = vmatprep.subr.bf16.mxu0 %v13254_v23  ;;  %v7970_v23 = vsel %vm7128_vm4, %v15763_v44, %v7952_v13  ;;  %v13333_v44 = vld [vmem:[%s14427_s24 + $0x300] ss:$24 sps:$4 sm:$0xff]   ;;  %v13434_v13 = vld [vmem:[%s14427_s24 + $0x78c] ss:$24 sps:$4 sm:$0xff]  }
0x14a4   : > { %9743 = vmatpush1.bf16.msra.mxu1 %v13249_v35  ;;  %v13327_v35 = vld [vmem:[%s14427_s24 + $0x2a0] ss:$24 sps:$4 sm:$0xff]  }
0x14a5   : > { %9911 = vmatpush1.bf16.msra.mxu0 %v13252_v24  ;;  %9744 = vmatprep.subr.bf16.mxu1 %v13257_v4  ;;  %v13332_v24 = vld [vmem:[%s14427_s24 + $0x2d4] ss:$24 sps:$4 sm:$0xff]   ;;  %v15848_v4 = vpack.c.bf16 %v7970_v23, %v7970_v23 }
0x14a6   : > { %9912 = vmatprep.subr.bf16.mxu0 %v13260_v57  ;;  %v13330_v57 = vld [vmem:[%s14427_s24 + $0x2d0] ss:$24 sps:$4 sm:$0xff]   ;;  %v13440_v23 = vld [vmem:[%s14427_s24 + $0x7bc] ss:$24 sps:$4 sm:$0xff]  }
0x14a8   : > { %9745 = vmatpush1.bf16.msra.mxu1 %v13255_v25  ;;  %v13335_v25 = vld [vmem:[%s14427_s24 + $0x304] ss:$24 sps:$4 sm:$0xff]  }
0x14a9   : > { %9913 = vmatpush1.bf16.msra.mxu0 %v13258_v12  ;;  %9746 = vmatprep.subr.bf16.mxu1 %v13263_v58  ;;  %v13338_v12 = vld [vmem:[%s14427_s24 + $0x334] ss:$24 sps:$4 sm:$0xff]   ;;  %v13336_v58 = vld [vmem:[%s14427_s24 + $0x330] ss:$24 sps:$4 sm:$0xff]  }
0x14aa   : > { %9914 = vmatprep.subr.bf16.mxu0 %v13266_v29  ;;  %v13341_v29 = vld [vmem:[%s14427_s24 + $0x364] ss:$24 sps:$4 sm:$0xff]  }
0x14ac   : > { %9747 = vmatpush1.bf16.msra.mxu1 %v13261_v17  ;;  %v13339_v17 = vld [vmem:[%s14427_s24 + $0x360] ss:$24 sps:$4 sm:$0xff]  }
0x14ad   : > { %9915 = vmatpush1.bf16.msra.mxu0 %v13264_v43  ;;  %9748 = vmatprep.subr.bf16.mxu1 %v13269_v60  ;;  %v13344_v43 = vld [vmem:[%s14427_s24 + $0x394] ss:$24 sps:$4 sm:$0xff]   ;;  %v13342_v60 = vld [vmem:[%s14427_s24 + $0x390] ss:$24 sps:$4 sm:$0xff]  }
0x14ae   : > { %9916 = vmatprep.subr.bf16.mxu0 %v13272_v18  ;;  %v13347_v18 = vld [vmem:[%s14427_s24 + $0x3c4] ss:$24 sps:$4 sm:$0xff]  }
0x14b0   : > { %9749 = vmatpush1.bf16.msra.mxu1 %v13267_v33  ;;  %v13345_v33 = vld [vmem:[%s14427_s24 + $0x3c0] ss:$24 sps:$4 sm:$0xff]  }
0x14b1   : > { %9917 = vmatpush1.bf16.msra.mxu0 %v13270_v49  ;;  %9750 = vmatprep.subr.bf16.mxu1 %v13275_v30  ;;  %v13350_v49 = vld [vmem:[%s14427_s24 + $0x3f4] ss:$24 sps:$4 sm:$0xff]   ;;  %v13348_v30 = vld [vmem:[%s14427_s24 + $0x3f0] ss:$24 sps:$4 sm:$0xff]  }
0x14b2   : > { %9918 = vmatprep.subr.bf16.mxu0 %v13278_v41  ;;  %v13353_v41 = vld [vmem:[%s14427_s24 + $0x424] ss:$24 sps:$4 sm:$0xff]  }
0x14b4   : > { %9751 = vmatpush1.bf16.msra.mxu1 %v13273_v31  ;;  %v13351_v31 = vld [vmem:[%s14427_s24 + $0x420] ss:$24 sps:$4 sm:$0xff]  }
0x14b5   : > { %9919 = vmatpush1.bf16.msra.mxu0 %v13276_v11  ;;  %9752 = vmatprep.subr.bf16.mxu1 %v13281_v42  ;;  %v13356_v11 = vld [vmem:[%s14427_s24 + $0x454] ss:$24 sps:$4 sm:$0xff]   ;;  %v13384_v42 = vld [vmem:[%s14427_s24 + $0x608] ss:$24 sps:$4 sm:$0xff]  }
0x14b6   : > { %9920 = vmatprep.subr.bf16.mxu0 %v13284_v52  ;;  %v13386_v52 = vld [vmem:[%s14427_s24 + $0x60c] ss:$24 sps:$4 sm:$0xff]  }
0x14b8   : > { %9753 = vmatpush1.bf16.msra.mxu1 %v13279_v7  ;;  %v13392_v7 = vld [vmem:[%s14427_s24 + $0x63c] ss:$24 sps:$4 sm:$0xff]  }
0x14b9   : > { %9921 = vmatpush1.bf16.msra.mxu0 %v13282_v54  ;;  %9754 = vmatprep.subr.bf16.mxu1 %v13287_v36  ;;  %v13354_v54 = vld [vmem:[%s14427_s24 + $0x450] ss:$24 sps:$4 sm:$0xff]   ;;  %v13359_v36 = vld [vmem:[%s14427_s24 + $0x484] ss:$24 sps:$4 sm:$0xff]  }
0x14ba   : > { %9922 = vmatprep.subr.bf16.mxu0 %v13290_v56  ;;  %v13390_v56 = vld [vmem:[%s14427_s24 + $0x638] ss:$24 sps:$4 sm:$0xff]  }
0x14bc   : > { %9755 = vmatpush1.bf16.msra.mxu1 %v13285_v38  ;;  %v13398_v38 = vld [vmem:[%s14427_s24 + $0x66c] ss:$24 sps:$4 sm:$0xff]  }
0x14bd   : > { %9923 = vmatpush1.bf16.msra.mxu0 %v13288_v39  ;;  %9756 = vmatprep.subr.bf16.mxu1 %v13293_v61  ;;  %v13357_v39 = vld [vmem:[%s14427_s24 + $0x480] ss:$24 sps:$4 sm:$0xff]   ;;  %v13362_v61 = vld [vmem:[%s14427_s24 + $0x4b4] ss:$24 sps:$4 sm:$0xff]  }
0x14be   : > { %9924 = vmatprep.subr.bf16.mxu0 %v13296_v48  ;;  %v13396_v48 = vld [vmem:[%s14427_s24 + $0x668] ss:$24 sps:$4 sm:$0xff]  }
0x14c0   : > { %9757 = vmatpush1.bf16.msra.mxu1 %v13291_v0  ;;  %v13404_v0 = vld [vmem:[%s14427_s24 + $0x69c] ss:$24 sps:$4 sm:$0xff]  }
0x14c1   : > { %9925 = vmatpush1.bf16.msra.mxu0 %v13294_v1  ;;  %9758 = vmatprep.subr.bf16.mxu1 %v13299_v63  ;;  %v13360_v1 = vld [vmem:[%s14427_s24 + $0x4b0] ss:$24 sps:$4 sm:$0xff]   ;;  %v13365_v63 = vld [vmem:[%s14427_s24 + $0x4e4] ss:$24 sps:$4 sm:$0xff]  }
0x14c2   : > { %9926 = vmatprep.subr.bf16.mxu0 %v13302_v34  ;;  %v13402_v34 = vld [vmem:[%s14427_s24 + $0x698] ss:$24 sps:$4 sm:$0xff]  }
0x14c4   : > { %9759 = vmatpush1.bf16.msra.mxu1 %v13297_v2  ;;  %v13410_v2 = vld [vmem:[%s14427_s24 + $0x6cc] ss:$24 sps:$4 sm:$0xff]  }
0x14c5   : > { %9927 = vmatpush1.bf16.msra.mxu0 %v13300_v26  ;;  %9760 = vmatprep.subr.bf16.mxu1 %v13305_v62  ;;  %v13363_v26 = vld [vmem:[%s14427_s24 + $0x4e0] ss:$24 sps:$4 sm:$0xff]   ;;  %v13368_v62 = vld [vmem:[%s14427_s24 + $0x514] ss:$24 sps:$4 sm:$0xff]  }
0x14c6   : > { %9928 = vmatprep.subr.bf16.mxu0 %v13308_v5  ;;  %v13408_v5 = vld [vmem:[%s14427_s24 + $0x6c8] ss:$24 sps:$4 sm:$0xff]  }
0x14c8   : > { %9761 = vmatpush1.bf16.msra.mxu1 %v13303_v55  ;;  %v13416_v55 = vld [vmem:[%s14427_s24 + $0x6fc] ss:$24 sps:$4 sm:$0xff]  }
0x14c9   : > { %9929 = vmatpush1.bf16.msra.mxu0 %v13306_v59  ;;  %9762 = vmatprep.subr.bf16.mxu1 %v13311_v37  ;;  %v13366_v59 = vld [vmem:[%s14427_s24 + $0x510] ss:$24 sps:$4 sm:$0xff]   ;;  %v13371_v37 = vld [vmem:[%s14427_s24 + $0x544] ss:$24 sps:$4 sm:$0xff]  }
0x14ca   : > { %9930 = vmatprep.subr.bf16.mxu0 %v13314_v53  ;;  %v13414_v53 = vld [vmem:[%s14427_s24 + $0x6f8] ss:$24 sps:$4 sm:$0xff]  }
0x14cc   : > { %9763 = vmatpush1.bf16.msra.mxu1 %v13309_v3  ;;  %v13422_v3 = vld [vmem:[%s14427_s24 + $0x72c] ss:$24 sps:$4 sm:$0xff]  }
0x14cd   : > { %9931 = vmatpush1.bf16.msra.mxu0 %v13312_v51  ;;  %9764 = vmatprep.subr.bf16.mxu1 %v13317_v9  ;;  %v13369_v51 = vld [vmem:[%s14427_s24 + $0x540] ss:$24 sps:$4 sm:$0xff]   ;;  %v13374_v9 = vld [vmem:[%s14427_s24 + $0x574] ss:$24 sps:$4 sm:$0xff]  }
0x14ce   : > { %9932 = vmatprep.subr.bf16.mxu0 %v13320_v45  ;;  %v13420_v45 = vld [vmem:[%s14427_s24 + $0x728] ss:$24 sps:$4 sm:$0xff]  }
0x14d0   : > { %9765 = vmatpush1.bf16.msra.mxu1 %v13315_v14  ;;  %v13428_v14 = vld [vmem:[%s14427_s24 + $0x75c] ss:$24 sps:$4 sm:$0xff]  }
0x14d1   : > { %9933 = vmatpush1.bf16.msra.mxu0 %v13318_v16  ;;  %9766 = vmatprep.subr.bf16.mxu1 %v13323_v20  ;;  %v13372_v16 = vld [vmem:[%s14427_s24 + $0x570] ss:$24 sps:$4 sm:$0xff]   ;;  %v13377_v20 = vld [vmem:[%s14427_s24 + $0x5a4] ss:$24 sps:$4 sm:$0xff]  }
0x14d2   : > { %9934 = vmatprep.subr.bf16.mxu0 %v13326_v22  ;;  %v13426_v22 = vld [vmem:[%s14427_s24 + $0x758] ss:$24 sps:$4 sm:$0xff]  }
0x14d4   : > { %9767 = vmatpush1.bf16.msra.mxu1 %v13321_v6  ;;  %v13375_v6 = vld [vmem:[%s14427_s24 + $0x5a0] ss:$24 sps:$4 sm:$0xff]  }
0x14d5   : > { %9935 = vmatpush1.bf16.msra.mxu0 %v13324_v28  ;;  %9768 = vmatprep.subr.bf16.mxu1 %v13329_v50  ;;  %v13380_v28 = vld [vmem:[%s14427_s24 + $0x5d4] ss:$24 sps:$4 sm:$0xff]   ;;  %v13432_v50 = vld [vmem:[%s14427_s24 + $0x788] ss:$24 sps:$4 sm:$0xff]  }
0x14d6   : > { %9945 = vmatprep.subr.bf16.mxu0 %v13386_v52  ;;  %v13470_v52 = vld [vmem:[%s14427_s24 + $0x8ac] ss:$24 sps:$4 sm:$0xff]  }
0x14d8   : > { %9769 = vmatpush1.bf16.msra.mxu1 %v13327_v35  ;;  %9937 = vmatmul.mubr.bf16.vlgmr.msra.gmra.mrb[24].mxu0 %v15848_v4  ;;  %v13378_v35 = vld [vmem:[%s14427_s24 + $0x5d0] ss:$24 sps:$4 sm:$0xff]  }
0x14d9   : > { %9770 = vmatprep.subr.bf16.mxu1 %v13332_v24  ;;  %9946 = vmatpush1.bf16.msra.mxu0 %v13384_v42  ;;  %v13383_v24 = vld [vmem:[%s14427_s24 + $0x604] ss:$24 sps:$4 sm:$0xff]   ;;  %v13462_v42 = vld [vmem:[%s14427_s24 + $0x878] ss:$24 sps:$4 sm:$0xff]  }
0x14da   : > { %9947 = vmatprep.subr.bf16.mxu0 %v13392_v7  ;;  %v13405_v7 = vld [vmem:[%s14427_s24 + $0x6c0] ss:$24 sps:$4 sm:$0xff]  }
0x14dc   : > { %9771 = vmatpush1.bf16.msra.mxu1 %v13330_v57  ;;  %v13438_v57 = vld [vmem:[%s14427_s24 + $0x7b8] ss:$24 sps:$4 sm:$0xff]  }
0x14dd   : > { %9781 = vmatprep.subr.bf16.mxu1 %v13335_v25  ;;  %9948 = vmatpush1.bf16.msra.mxu0 %v13390_v56  ;;  %v13446_v25 = vld [vmem:[%s14427_s24 + $0x7ec] ss:$24 sps:$4 sm:$0xff]   ;;  %v13411_v56 = vld [vmem:[%s14427_s24 + $0x6f0] ss:$24 sps:$4 sm:$0xff]  }
0x14de   : > { %9949 = vmatprep.subr.bf16.mxu0 %v13398_v38  ;;  %v13419_v38 = vld [vmem:[%s14427_s24 + $0x724] ss:$24 sps:$4 sm:$0xff]  }
0x14df   : > { %9773 = vmatmul.mubr.bf16.vlgmr.msra.gmra.mrb[80].mxu1 %v15769_v40 }
0x14e0   : > { %9782 = vmatpush1.bf16.msra.mxu1 %v13333_v44  ;;  %9813 = vmatprep.mubr.bf16.mxu1 %v15782_v10  ;;  %v13381_v44 = vld [vmem:[%s14427_s24 + $0x600] ss:$24 sps:$4 sm:$0xff]  }
0x14e1   : > { %9783 = vmatprep.subr.bf16.mxu1 %v13338_v12  ;;  %9950 = vmatpush1.bf16.msra.mxu0 %v13396_v48  ;;  %v13389_v12 = vld [vmem:[%s14427_s24 + $0x634] ss:$24 sps:$4 sm:$0xff]   ;;  %v13423_v48 = vld [vmem:[%s14427_s24 + $0x750] ss:$24 sps:$4 sm:$0xff]  }
0x14e2   : > { %9951 = vmatprep.subr.bf16.mxu0 %v13404_v0  ;;  %v13431_v0 = vld [vmem:[%s14427_s24 + $0x784] ss:$24 sps:$4 sm:$0xff]  }
0x14e4   : > { %9784 = vmatpush1.bf16.msra.mxu1 %v13336_v58  ;;  %v13444_v58 = vld [vmem:[%s14427_s24 + $0x7e8] ss:$24 sps:$4 sm:$0xff]  }
0x14e5   : > { %9785 = vmatprep.subr.bf16.mxu1 %v13341_v29  ;;  %9952 = vmatpush1.bf16.msra.mxu0 %v13402_v34  ;;  %v13452_v29 = vld [vmem:[%s14427_s24 + $0x81c] ss:$24 sps:$4 sm:$0xff]   ;;  %v13435_v34 = vld [vmem:[%s14427_s24 + $0x7b0] ss:$24 sps:$4 sm:$0xff]  }
0x14e6   : > { %9953 = vmatprep.subr.bf16.mxu0 %v13410_v2  ;;  %v13443_v2 = vld [vmem:[%s14427_s24 + $0x7e4] ss:$24 sps:$4 sm:$0xff]  }
0x14e8   : > { %9786 = vmatpush1.bf16.msra.mxu1 %v13339_v17  ;;  %v13387_v17 = vld [vmem:[%s14427_s24 + $0x630] ss:$24 sps:$4 sm:$0xff]  }
0x14e9   : > { %9787 = vmatprep.subr.bf16.mxu1 %v13344_v43  ;;  %9954 = vmatpush1.bf16.msra.mxu0 %v13408_v5  ;;  %v13395_v43 = vld [vmem:[%s14427_s24 + $0x664] ss:$24 sps:$4 sm:$0xff]   ;;  %v13447_v5 = vld [vmem:[%s14427_s24 + $0x810] ss:$24 sps:$4 sm:$0xff]  }
0x14ea   : > { %9955 = vmatprep.subr.bf16.mxu0 %v13416_v55  ;;  %v13455_v55 = vld [vmem:[%s14427_s24 + $0x844] ss:$24 sps:$4 sm:$0xff]  }
0x14ec   : > { %9788 = vmatpush1.bf16.msra.mxu1 %v13342_v60  ;;  %v13450_v60 = vld [vmem:[%s14427_s24 + $0x818] ss:$24 sps:$4 sm:$0xff]  }
0x14ed   : > { %9789 = vmatprep.subr.bf16.mxu1 %v13347_v18  ;;  %9956 = vmatpush1.bf16.msra.mxu0 %v13414_v53  ;;  %v13458_v18 = vld [vmem:[%s14427_s24 + $0x84c] ss:$24 sps:$4 sm:$0xff]   ;;  %v13459_v53 = vld [vmem:[%s14427_s24 + $0x870] ss:$24 sps:$4 sm:$0xff]  }
0x14ee   : > { %9957 = vmatprep.subr.bf16.mxu0 %v13422_v3  ;;  %v13467_v3 = vld [vmem:[%s14427_s24 + $0x8a4] ss:$24 sps:$4 sm:$0xff]  }
0x14f0   : > { %9790 = vmatpush1.bf16.msra.mxu1 %v13345_v33  ;;  %v13393_v33 = vld [vmem:[%s14427_s24 + $0x660] ss:$24 sps:$4 sm:$0xff]  }
0x14f1   : > { %9791 = vmatprep.subr.bf16.mxu1 %v13350_v49  ;;  %9958 = vmatpush1.bf16.msra.mxu0 %v13420_v45  ;;  %v13401_v49 = vld [vmem:[%s14427_s24 + $0x694] ss:$24 sps:$4 sm:$0xff]   ;;  %v13471_v45 = vld [vmem:[%s14427_s24 + $0x8d0] ss:$24 sps:$4 sm:$0xff]  }
0x14f2   : > { %9959 = vmatprep.subr.bf16.mxu0 %v13428_v14  ;;  %v13476_v14 = vld [vmem:[%s14427_s24 + $0x8dc] ss:$24 sps:$4 sm:$0xff]  }
0x14f4   : > { %9792 = vmatpush1.bf16.msra.mxu1 %v13348_v30  ;;  %v13456_v30 = vld [vmem:[%s14427_s24 + $0x848] ss:$24 sps:$4 sm:$0xff]  }
0x14f5   : > { %9793 = vmatprep.subr.bf16.mxu1 %v13353_v41  ;;  %9960 = vmatpush1.bf16.msra.mxu0 %v13426_v22  ;;  %v13464_v41 = vld [vmem:[%s14427_s24 + $0x87c] ss:$24 sps:$4 sm:$0xff]  }
0x14f6   : > { %9961 = vmatprep.subr.bf16.mxu0 %v13434_v13 }
0x14f8   : > { %9794 = vmatpush1.bf16.msra.mxu1 %v13351_v31  ;;  %v13399_v31 = vld [vmem:[%s14427_s24 + $0x690] ss:$24 sps:$4 sm:$0xff]  }
0x14f9   : > { %9795 = vmatprep.subr.bf16.mxu1 %v13356_v11  ;;  %9962 = vmatpush1.bf16.msra.mxu0 %v13432_v50  ;;  %v13407_v11 = vld [vmem:[%s14427_s24 + $0x6c4] ss:$24 sps:$4 sm:$0xff]   ;;  %v7960_v50 = vpop.permute.xlu1 %7959 }
0x14fa   : > { %9963 = vmatprep.subr.bf16.mxu0 %v13440_v23  ;;  %v7972_v23 = vsel %vm7253_vm5, %v15775_v19, %v7960_v50  ;;  %v13480_v19 = vld [vmem:[%s14427_s24 + $0x40] ss:$24 sps:$4 sm:$0xff]  }
0x14fc   : > { %9796 = vmatpush1.bf16.msra.mxu1 %v13354_v54  ;;  %v13413_v54 = vld [vmem:[%s14427_s24 + $0x6f4] ss:$24 sps:$4 sm:$0xff]  }
0x14fd   : > { %9797 = vmatprep.subr.bf16.mxu1 %v13359_v36  ;;  %9964 = vmatpush1.bf16.msra.mxu0 %v13438_v57  ;;  %v13468_v36 = vld [vmem:[%s14427_s24 + $0x8a8] ss:$24 sps:$4 sm:$0xff]  }
0x14fe   : > { %9965 = vmatprep.subr.bf16.mxu0 %v13446_v25  ;;  %v13477_v25 = vld [vmem:[%s14427_s24 + $0x10] ss:$24 sps:$4 sm:$0xff]  }
0x1500   : > { %9798 = vmatpush1.bf16.msra.mxu1 %v13357_v39  ;;  %v13417_v39 = vld [vmem:[%s14427_s24 + $0x720] ss:$24 sps:$4 sm:$0xff]  }
0x1501   : > { %9799 = vmatprep.subr.bf16.mxu1 %v13362_v61  ;;  %9966 = vmatpush1.bf16.msra.mxu0 %v13444_v58  ;;  %v13425_v61 = vld [vmem:[%s14427_s24 + $0x754] ss:$24 sps:$4 sm:$0xff]  }
0x1502   : > { %9967 = vmatprep.subr.bf16.mxu0 %v13452_v29  ;;  %v13485_v58 = vld [vmem:[%s14427_s24 + $0x74] ss:$24 sps:$4 sm:$0xff]   ;;  %v13483_v29 = vld [vmem:[%s14427_s24 + $0x70] ss:$24 sps:$4 sm:$0xff]  }
0x1504   : > { %9800 = vmatpush1.bf16.msra.mxu1 %v13360_v1  ;;  %v13429_v1 = vld [vmem:[%s14427_s24 + $0x780] ss:$24 sps:$4 sm:$0xff]  }
0x1505   : > { %9801 = vmatprep.subr.bf16.mxu1 %v13365_v63  ;;  %9968 = vmatpush1.bf16.msra.mxu0 %v13450_v60  ;;  %v13437_v63 = vld [vmem:[%s14427_s24 + $0x7b4] ss:$24 sps:$4 sm:$0xff]  }
0x1506   : > { %9969 = vmatprep.subr.bf16.mxu0 %v13458_v18  ;;  %v13491_v60 = vld [vmem:[%s14427_s24 + $0xd4] ss:$24 sps:$4 sm:$0xff]   ;;  %v13489_v18 = vld [vmem:[%s14427_s24 + $0xd0] ss:$24 sps:$4 sm:$0xff]  }
0x1508   : > { %9802 = vmatpush1.bf16.msra.mxu1 %v13363_v26  ;;  %v13441_v26 = vld [vmem:[%s14427_s24 + $0x7e0] ss:$24 sps:$4 sm:$0xff]  }
0x1509   : > { %9803 = vmatprep.subr.bf16.mxu1 %v13368_v62  ;;  %9970 = vmatpush1.bf16.msra.mxu0 %v13456_v30  ;;  %v13449_v62 = vld [vmem:[%s14427_s24 + $0x814] ss:$24 sps:$4 sm:$0xff]   ;;  %v13495_v30 = vld [vmem:[%s14427_s24 + $0x130] ss:$24 sps:$4 sm:$0xff]  }
0x150a   : > { %9971 = vmatprep.subr.bf16.mxu0 %v13464_v41  ;;  %v13500_v41 = vld [vmem:[%s14427_s24 + $0x164] ss:$24 sps:$4 sm:$0xff]  }
0x150c   : > { %9804 = vmatpush1.bf16.msra.mxu1 %v13366_v59  ;;  %v13453_v59 = vld [vmem:[%s14427_s24 + $0x840] ss:$24 sps:$4 sm:$0xff]  }
0x150d   : > { %9805 = vmatprep.subr.bf16.mxu1 %v13371_v37  ;;  %9972 = vmatpush1.bf16.msra.mxu0 %v13462_v42  ;;  %v13461_v37 = vld [vmem:[%s14427_s24 + $0x874] ss:$24 sps:$4 sm:$0xff]   ;;  %v13501_v42 = vld [vmem:[%s14427_s24 + $0x190] ss:$24 sps:$4 sm:$0xff]  }
0x150e   : > { %9973 = vmatprep.subr.bf16.mxu0 %v13470_v52  ;;  %v13506_v52 = vld [vmem:[%s14427_s24 + $0x1c4] ss:$24 sps:$4 sm:$0xff]  }
0x1510   : > { %9806 = vmatpush1.bf16.msra.mxu1 %v13369_v51  ;;  %v13465_v51 = vld [vmem:[%s14427_s24 + $0x8a0] ss:$24 sps:$4 sm:$0xff]  }
0x1511   : > { %9807 = vmatprep.subr.bf16.mxu1 %v13374_v9  ;;  %9974 = vmatpush1.bf16.msra.mxu0 %v13468_v36  ;;  %v13473_v9 = vld [vmem:[%s14427_s24 + $0x8d4] ss:$24 sps:$4 sm:$0xff]   ;;  %v13507_v36 = vld [vmem:[%s14427_s24 + $0x1f0] ss:$24 sps:$4 sm:$0xff]  }
0x1512   : > { %9975 = vmatprep.subr.bf16.mxu0 %v13476_v14  ;;  %v13543_v14 = vld [vmem:[%s14427_s24 + $0x430] ss:$24 sps:$4 sm:$0xff]  }
0x1514   : > { %9808 = vmatpush1.bf16.msra.mxu1 %v13372_v16  ;;  %v13474_v16 = vld [vmem:[%s14427_s24 + $0x8d8] ss:$24 sps:$4 sm:$0xff]  }
0x1515   : > { %9809 = vmatprep.subr.bf16.mxu1 %v13377_v20  ;;  %9976 = vmatpush1.bf16.msra.mxu0 %v13474_v16  ;;  %v13479_v20 = vld [vmem:[%s14427_s24 + $0x14] ss:$24 sps:$4 sm:$0xff]   ;;  %v13548_v16 = vld [vmem:[%s14427_s24 + $0x464] ss:$24 sps:$4 sm:$0xff]  }
0x1518   : > { %9810 = vmatpush1.bf16.msra.mxu1 %v13375_v6 }
0x1519   : > { %9811 = vmatprep.subr.bf16.mxu1 %v13380_v28 }
0x151c   : > { %9812 = vmatpush1.bf16.msra.mxu1 %v13378_v35 }
0x151d   : > { %9822 = vmatprep.subr.bf16.mxu1 %v13383_v24 }
0x151f   : > { %9814 = vmatmul.mubr.bf16.vlgmr.msra.gmra.mrb[80].mxu1 %v15848_v4 }
0x1520   : > { %9823 = vmatpush1.bf16.msra.mxu1 %v13381_v44  ;;  %v15959_v44 = vpack.c.bf16 %v7972_v23, %v7972_v23  ;;  %v13555_v23 = vld [vmem:[%s14427_s24 + $0x4f0] ss:$24 sps:$4 sm:$0xff]  }
0x1521   : > { %9824 = vmatprep.subr.bf16.mxu1 %v13389_v12  ;;  %v13482_v12 = vld [vmem:[%s14427_s24 + $0x44] ss:$24 sps:$4 sm:$0xff]  }
0x1524   : > { %9825 = vmatpush1.bf16.msra.mxu1 %v13387_v17  ;;  %v13488_v17 = vld [vmem:[%s14427_s24 + $0xa4] ss:$24 sps:$4 sm:$0xff]  }
0x1525   : > { %9826 = vmatprep.subr.bf16.mxu1 %v13395_v43  ;;  %v13486_v43 = vld [vmem:[%s14427_s24 + $0xa0] ss:$24 sps:$4 sm:$0xff]  }
0x1528   : > { %9827 = vmatpush1.bf16.msra.mxu1 %v13393_v33  ;;  %v13492_v33 = vld [vmem:[%s14427_s24 + $0x100] ss:$24 sps:$4 sm:$0xff]  }
0x1529   : > { %9828 = vmatprep.subr.bf16.mxu1 %v13401_v49  ;;  %v13497_v49 = vld [vmem:[%s14427_s24 + $0x134] ss:$24 sps:$4 sm:$0xff]  }
0x152c   : > { %9829 = vmatpush1.bf16.msra.mxu1 %v13399_v31  ;;  %v13498_v31 = vld [vmem:[%s14427_s24 + $0x160] ss:$24 sps:$4 sm:$0xff]  }
0x152d   : > { %9830 = vmatprep.subr.bf16.mxu1 %v13407_v11  ;;  %v13503_v11 = vld [vmem:[%s14427_s24 + $0x194] ss:$24 sps:$4 sm:$0xff]  }
0x1530   : > { %9831 = vmatpush1.bf16.msra.mxu1 %v13405_v7  ;;  %v13504_v7 = vld [vmem:[%s14427_s24 + $0x1c0] ss:$24 sps:$4 sm:$0xff]  }
0x1531   : > { %9832 = vmatprep.subr.bf16.mxu1 %v13413_v54  ;;  %v13509_v54 = vld [vmem:[%s14427_s24 + $0x1f4] ss:$24 sps:$4 sm:$0xff]  }
0x1534   : > { %9833 = vmatpush1.bf16.msra.mxu1 %v13411_v56  ;;  %v13512_v56 = vld [vmem:[%s14427_s24 + $0x224] ss:$24 sps:$4 sm:$0xff]  }
0x1535   : > { %9834 = vmatprep.subr.bf16.mxu1 %v13419_v38  ;;  %v13510_v38 = vld [vmem:[%s14427_s24 + $0x220] ss:$24 sps:$4 sm:$0xff]  }
0x1538   : > { %9835 = vmatpush1.bf16.msra.mxu1 %v13417_v39  ;;  %v13515_v39 = vld [vmem:[%s14427_s24 + $0x254] ss:$24 sps:$4 sm:$0xff]  }
0x1539   : > { %9836 = vmatprep.subr.bf16.mxu1 %v13425_v61  ;;  %v13513_v61 = vld [vmem:[%s14427_s24 + $0x250] ss:$24 sps:$4 sm:$0xff]  }
0x153c   : > { %9837 = vmatpush1.bf16.msra.mxu1 %v13423_v48  ;;  %v13518_v48 = vld [vmem:[%s14427_s24 + $0x284] ss:$24 sps:$4 sm:$0xff]  }
0x153d   : > { %9838 = vmatprep.subr.bf16.mxu1 %v13431_v0  ;;  %v13516_v0 = vld [vmem:[%s14427_s24 + $0x280] ss:$24 sps:$4 sm:$0xff]  }
0x1540   : > { %9839 = vmatpush1.bf16.msra.mxu1 %v13429_v1  ;;  %v13521_v1 = vld [vmem:[%s14427_s24 + $0x2b4] ss:$24 sps:$4 sm:$0xff]  }
0x1541   : > { %9840 = vmatprep.subr.bf16.mxu1 %v13437_v63  ;;  %v13519_v63 = vld [vmem:[%s14427_s24 + $0x2b0] ss:$24 sps:$4 sm:$0xff]  }
0x1544   : > { %9841 = vmatpush1.bf16.msra.mxu1 %v13435_v34  ;;  %v13524_v34 = vld [vmem:[%s14427_s24 + $0x2e4] ss:$24 sps:$4 sm:$0xff]  }
0x1545   : > { %9842 = vmatprep.subr.bf16.mxu1 %v13443_v2  ;;  %v13522_v2 = vld [vmem:[%s14427_s24 + $0x2e0] ss:$24 sps:$4 sm:$0xff]  }
0x1548   : > { %9843 = vmatpush1.bf16.msra.mxu1 %v13441_v26  ;;  %v13527_v26 = vld [vmem:[%s14427_s24 + $0x314] ss:$24 sps:$4 sm:$0xff]  }
0x1549   : > { %9844 = vmatprep.subr.bf16.mxu1 %v13449_v62  ;;  %v13525_v62 = vld [vmem:[%s14427_s24 + $0x310] ss:$24 sps:$4 sm:$0xff]  }
0x154c   : > { %9845 = vmatpush1.bf16.msra.mxu1 %v13447_v5  ;;  %v13530_v5 = vld [vmem:[%s14427_s24 + $0x344] ss:$24 sps:$4 sm:$0xff]  }
0x154d   : > { %9846 = vmatprep.subr.bf16.mxu1 %v13455_v55  ;;  %v13528_v55 = vld [vmem:[%s14427_s24 + $0x340] ss:$24 sps:$4 sm:$0xff]  }
0x1550   : > { %9847 = vmatpush1.bf16.msra.mxu1 %v13453_v59  ;;  %v13533_v59 = vld [vmem:[%s14427_s24 + $0x374] ss:$24 sps:$4 sm:$0xff]  }
0x1551   : > { %9848 = vmatprep.subr.bf16.mxu1 %v13461_v37  ;;  %v13531_v37 = vld [vmem:[%s14427_s24 + $0x370] ss:$24 sps:$4 sm:$0xff]  }
0x1554   : > { %9849 = vmatpush1.bf16.msra.mxu1 %v13459_v53  ;;  %v13536_v53 = vld [vmem:[%s14427_s24 + $0x3a4] ss:$24 sps:$4 sm:$0xff]  }
0x1555   : > { %9850 = vmatprep.subr.bf16.mxu1 %v13467_v3  ;;  %v13534_v3 = vld [vmem:[%s14427_s24 + $0x3a0] ss:$24 sps:$4 sm:$0xff]  }
0x1558   : > { %9851 = vmatpush1.bf16.msra.mxu1 %v13465_v51  ;;  %v13537_v51 = vld [vmem:[%s14427_s24 + $0x3d0] ss:$24 sps:$4 sm:$0xff]  }
0x1559   : > { %9852 = vmatprep.subr.bf16.mxu1 %v13473_v9  ;;  %v13540_v9 = vld [vmem:[%s14427_s24 + $0x400] ss:$24 sps:$4 sm:$0xff]  }
0x155c   : > { %9853 = vmatpush1.bf16.msra.mxu1 %v13471_v45  ;;  %v13545_v45 = vld [vmem:[%s14427_s24 + $0x434] ss:$24 sps:$4 sm:$0xff]  }
0x155d   : > { %9986 = vmatprep.subr.bf16.mxu1 %v13479_v20  ;;  %v13546_v20 = vld [vmem:[%s14427_s24 + $0x460] ss:$24 sps:$4 sm:$0xff]  }
0x1572   : > { %v7936_v22 = vpop.f32.mrb[76].mxu1 }
0x1573   : > { %7963 = vrot.lane.b32.xlu0 %v7936_v22, %s13992_s15  ;;  %v11661_v13 = vpop.f32.mrb[77].mxu1  ;;  %v13551_v22 = vld [vmem:[%s14427_s24 + $0x494] ss:$24 sps:$4 sm:$0xff]  }
0x1574   : > { %v7939_v6 = vpop.f32.mrb[78].mxu1  ;;  %v13549_v13 = vld [vmem:[%s14427_s24 + $0x490] ss:$24 sps:$4 sm:$0xff]  }
0x1575   : > { %v11662_v28 = vpop.f32.mrb[79].mxu1  ;;  %v13554_v6 = vld [vmem:[%s14427_s24 + $0x4c4] ss:$24 sps:$4 sm:$0xff]  }
0x1576   : > { %v13552_v28 = vld [vmem:[%s14427_s24 + $0x4c0] ss:$24 sps:$4 sm:$0xff]  }
0x15e5   : > { %v7964_v35 = vpop.permute.xlu0 %7963 }
0x15e6   : > { %v7973_v24 = vsel %vm7128_vm4, %v7960_v50, %v7964_v35  ;;  %v13557_v50 = vld [vmem:[%s14427_s24 + $0x4f4] ss:$24 sps:$4 sm:$0xff]   ;;  %v13560_v35 = vld [vmem:[%s14427_s24 + $0x524] ss:$24 sps:$4 sm:$0xff]  }
0x15e7   : > { %v15956_v57 = vpack.c.bf16 %v7973_v24, %v7973_v24  ;;  %v13558_v24 = vld [vmem:[%s14427_s24 + $0x520] ss:$24 sps:$4 sm:$0xff]  }
0x15e9   : > { %9854 = vmatprep.mubr.bf16.mxu1 %v15956_v57  ;;  %9977 = vmatprep.mubr.bf16.mxu0 %v15956_v57 }
0x15ea   : > { %9855 = vmatmul.mubr.bf16.vlgmr.msra.gmra.mrb[80].mxu1 %v15959_v44  ;;  %9978 = vmatmul.mubr.bf16.vlgmr.msra.gmra.mrb[24].mxu0 %v15959_v44 }
0x15eb   : > { %9987 = vmatpush1.bf16.msra.mxu1 %v13477_v25  ;;  %10018 = vmatprep.mubr.bf16.mxu1 %v15771_v8  ;;  %v13494_v8 = vld [vmem:[%s14427_s24 + $0x104] ss:$24 sps:$4 sm:$0xff]   ;;  %v13563_v25 = vld [vmem:[%s14427_s24 + $0x554] ss:$24 sps:$4 sm:$0xff]  }
0x15ec   : > { %9988 = vmatprep.subr.bf16.mxu1 %v13482_v12  ;;  %v13561_v12 = vld [vmem:[%s14427_s24 + $0x550] ss:$24 sps:$4 sm:$0xff]  }
0x15ef   : > { %9989 = vmatpush1.bf16.msra.mxu1 %v13480_v19  ;;  %v13566_v19 = vld [vmem:[%s14427_s24 + $0x584] ss:$24 sps:$4 sm:$0xff]  }
0x15f0   : > { %9990 = vmatprep.subr.bf16.mxu1 %v13485_v58  ;;  %v13564_v58 = vld [vmem:[%s14427_s24 + $0x580] ss:$24 sps:$4 sm:$0xff]  }
0x15f3   : > { %9991 = vmatpush1.bf16.msra.mxu1 %v13483_v29  ;;  %v13569_v29 = vld [vmem:[%s14427_s24 + $0x5b4] ss:$24 sps:$4 sm:$0xff]  }
0x15f4   : > { %9992 = vmatprep.subr.bf16.mxu1 %v13488_v17  ;;  %v13567_v17 = vld [vmem:[%s14427_s24 + $0x5b0] ss:$24 sps:$4 sm:$0xff]  }
0x15f7   : > { %9993 = vmatpush1.bf16.msra.mxu1 %v13486_v43  ;;  %v13572_v43 = vld [vmem:[%s14427_s24 + $0x5e4] ss:$24 sps:$4 sm:$0xff]  }
0x15f8   : > { %9994 = vmatprep.subr.bf16.mxu1 %v13491_v60  ;;  %v13570_v60 = vld [vmem:[%s14427_s24 + $0x5e0] ss:$24 sps:$4 sm:$0xff]  }
0x15fb   : > { %9995 = vmatpush1.bf16.msra.mxu1 %v13489_v18  ;;  %v13575_v18 = vld [vmem:[%s14427_s24 + $0x614] ss:$24 sps:$4 sm:$0xff]  }
0x15fc   : > { %9996 = vmatprep.subr.bf16.mxu1 %v13494_v8  ;;  %v13573_v8 = vld [vmem:[%s14427_s24 + $0x610] ss:$24 sps:$4 sm:$0xff]  }
0x15ff   : > { %9997 = vmatpush1.bf16.msra.mxu1 %v13492_v33  ;;  %v13578_v33 = vld [vmem:[%s14427_s24 + $0x644] ss:$24 sps:$4 sm:$0xff]  }
0x1600   : > { %9998 = vmatprep.subr.bf16.mxu1 %v13497_v49  ;;  %v13576_v49 = vld [vmem:[%s14427_s24 + $0x640] ss:$24 sps:$4 sm:$0xff]  }
0x1603   : > { %9999 = vmatpush1.bf16.msra.mxu1 %v13495_v30  ;;  %v13581_v30 = vld [vmem:[%s14427_s24 + $0x674] ss:$24 sps:$4 sm:$0xff]  }
0x1604   : > { %10000 = vmatprep.subr.bf16.mxu1 %v13500_v41  ;;  %v13579_v41 = vld [vmem:[%s14427_s24 + $0x670] ss:$24 sps:$4 sm:$0xff]  }
0x1607   : > { %10001 = vmatpush1.bf16.msra.mxu1 %v13498_v31  ;;  %v13584_v31 = vld [vmem:[%s14427_s24 + $0x6a4] ss:$24 sps:$4 sm:$0xff]  }
0x1608   : > { %10002 = vmatprep.subr.bf16.mxu1 %v13503_v11  ;;  %v13582_v11 = vld [vmem:[%s14427_s24 + $0x6a0] ss:$24 sps:$4 sm:$0xff]  }
0x160b   : > { %10003 = vmatpush1.bf16.msra.mxu1 %v13501_v42  ;;  %v13585_v42 = vld [vmem:[%s14427_s24 + $0x6d0] ss:$24 sps:$4 sm:$0xff]  }
0x160c   : > { %10004 = vmatprep.subr.bf16.mxu1 %v13506_v52  ;;  %v13588_v52 = vld [vmem:[%s14427_s24 + $0x700] ss:$24 sps:$4 sm:$0xff]  }
0x160f   : > { %10005 = vmatpush1.bf16.msra.mxu1 %v13504_v7  ;;  %v13593_v7 = vld [vmem:[%s14427_s24 + $0x734] ss:$24 sps:$4 sm:$0xff]  }
0x1610   : > { %10006 = vmatprep.subr.bf16.mxu1 %v13509_v54  ;;  %v13591_v54 = vld [vmem:[%s14427_s24 + $0x730] ss:$24 sps:$4 sm:$0xff]  }
0x1613   : > { %10007 = vmatpush1.bf16.msra.mxu1 %v13507_v36  ;;  %v13596_v36 = vld [vmem:[%s14427_s24 + $0x764] ss:$24 sps:$4 sm:$0xff]  }
0x1614   : > { %10008 = vmatprep.subr.bf16.mxu1 %v13512_v56  ;;  %v13594_v56 = vld [vmem:[%s14427_s24 + $0x760] ss:$24 sps:$4 sm:$0xff]  }
0x1617   : > { %10009 = vmatpush1.bf16.msra.mxu1 %v13510_v38  ;;  %v13599_v38 = vld [vmem:[%s14427_s24 + $0x794] ss:$24 sps:$4 sm:$0xff]  }
0x1618   : > { %10010 = vmatprep.subr.bf16.mxu1 %v13515_v39  ;;  %v13597_v39 = vld [vmem:[%s14427_s24 + $0x790] ss:$24 sps:$4 sm:$0xff]  }
0x161b   : > { %10011 = vmatpush1.bf16.msra.mxu1 %v13513_v61  ;;  %v13602_v61 = vld [vmem:[%s14427_s24 + $0x7c4] ss:$24 sps:$4 sm:$0xff]  }
0x161c   : > { %10012 = vmatprep.subr.bf16.mxu1 %v13518_v48  ;;  %v13600_v48 = vld [vmem:[%s14427_s24 + $0x7c0] ss:$24 sps:$4 sm:$0xff]  }
0x161f   : > { %10013 = vmatpush1.bf16.msra.mxu1 %v13516_v0  ;;  %v13605_v0 = vld [vmem:[%s14427_s24 + $0x7f4] ss:$24 sps:$4 sm:$0xff]  }
0x1620   : > { %10014 = vmatprep.subr.bf16.mxu1 %v13521_v1  ;;  %v13603_v1 = vld [vmem:[%s14427_s24 + $0x7f0] ss:$24 sps:$4 sm:$0xff]  }
0x1623   : > { %10015 = vmatpush1.bf16.msra.mxu1 %v13519_v63  ;;  %v13608_v63 = vld [vmem:[%s14427_s24 + $0x824] ss:$24 sps:$4 sm:$0xff]  }
0x1624   : > { %10016 = vmatprep.subr.bf16.mxu1 %v13524_v34  ;;  %v13606_v34 = vld [vmem:[%s14427_s24 + $0x820] ss:$24 sps:$4 sm:$0xff]  }
0x1627   : > { %10017 = vmatpush1.bf16.msra.mxu1 %v13522_v2  ;;  %v13611_v2 = vld [vmem:[%s14427_s24 + $0x854] ss:$24 sps:$4 sm:$0xff]  }
0x1628   : > { %10027 = vmatprep.subr.bf16.mxu1 %v13527_v26  ;;  %v13609_v26 = vld [vmem:[%s14427_s24 + $0x850] ss:$24 sps:$4 sm:$0xff]  }
0x162a   : > { %10019 = vmatmul.mubr.bf16.vlgmr.msra.gmra.mrb[84].mxu1 %v15769_v40  ;;  %v13539_v40 = vld [vmem:[%s14427_s24 + $0x3d4] ss:$24 sps:$4 sm:$0xff]  }
0x162b   : > { %10028 = vmatpush1.bf16.msra.mxu1 %v13525_v62  ;;  %10059 = vmatprep.mubr.bf16.mxu1 %v15782_v10  ;;  %v13542_v10 = vld [vmem:[%s14427_s24 + $0x404] ss:$24 sps:$4 sm:$0xff]  }
0x162c   : > { %10029 = vmatprep.subr.bf16.mxu1 %v13530_v5  ;;  %v13614_v62 = vld [vmem:[%s14427_s24 + $0x884] ss:$24 sps:$4 sm:$0xff]   ;;  %v13612_v5 = vld [vmem:[%s14427_s24 + $0x880] ss:$24 sps:$4 sm:$0xff]  }
0x162f   : > { %10030 = vmatpush1.bf16.msra.mxu1 %v13528_v55  ;;  %v13617_v55 = vld [vmem:[%s14427_s24 + $0x8b4] ss:$24 sps:$4 sm:$0xff]  }
0x1630   : > { %10031 = vmatprep.subr.bf16.mxu1 %v13533_v59  ;;  %v13615_v59 = vld [vmem:[%s14427_s24 + $0x8b0] ss:$24 sps:$4 sm:$0xff]  }
0x1633   : > { %10032 = vmatpush1.bf16.msra.mxu1 %v13531_v37  ;;  %v13620_v37 = vld [vmem:[%s14427_s24 + $0x8e4] ss:$24 sps:$4 sm:$0xff]  }
0x1634   : > { %10033 = vmatprep.subr.bf16.mxu1 %v13536_v53  ;;  %v13618_v53 = vld [vmem:[%s14427_s24 + $0x8e0] ss:$24 sps:$4 sm:$0xff]  }
0x1637   : > { %10034 = vmatpush1.bf16.msra.mxu1 %v13534_v3  ;;  %v8268_v3 = vld [vmem:[%s14439_s29] sm:$0x3f] }
0x1638   : > { %10035 = vmatprep.subr.bf16.mxu1 %v13539_v40  ;;  %v8273_v40 = vrot.slane %v8268_v3, %v15079_v21 }
0x163b   : > { %10036 = vmatpush1.bf16.msra.mxu1 %v13537_v51  ;;  %v8281_v51 = vrot.slane %v8268_v3, %v14989_v46 }
0x163c   : > { %10037 = vmatprep.subr.bf16.mxu1 %v13542_v10  ;;  %v8277_v10 = vrot.slane %v8268_v3, %v15083_v15  ;;  %v8293_v15 = vrot.slane %v8268_v3, %v15633_v27 }
0x163f   : > { %10038 = vmatpush1.bf16.msra.mxu1 %v13540_v9  ;;  %v8285_v9 = vrot.slane %v8268_v3, %v14992_v47  ;;  %v8289_v47 = vrot.slane %v8268_v3, %v15475_v32 }
0x1640   : > { %10039 = vmatprep.subr.bf16.mxu1 %v13545_v45 }
0x1643   : > { %10040 = vmatpush1.bf16.msra.mxu1 %v13543_v14 }
0x1644   : > { %10041 = vmatprep.subr.bf16.mxu1 %v13548_v16 }
0x1647   : > { %10042 = vmatpush1.bf16.msra.mxu1 %v13546_v20 }
0x1648   : > { %10043 = vmatprep.subr.bf16.mxu1 %v13551_v22 }
0x164b   : > { %10044 = vmatpush1.bf16.msra.mxu1 %v13549_v13 }
0x164c   : > { %10045 = vmatprep.subr.bf16.mxu1 %v13554_v6 }
0x164f   : > { %10046 = vmatpush1.bf16.msra.mxu1 %v13552_v28 }
0x1650   : > { %10047 = vmatprep.subr.bf16.mxu1 %v13557_v50 }
0x1653   : > { %10048 = vmatpush1.bf16.msra.mxu1 %v13555_v23 }
0x1654   : > { %10049 = vmatprep.subr.bf16.mxu1 %v13560_v35 }
0x1657   : > { %10050 = vmatpush1.bf16.msra.mxu1 %v13558_v24 }
0x1658   : > { %10051 = vmatprep.subr.bf16.mxu1 %v13563_v25 }
0x165b   : > { %10052 = vmatpush1.bf16.msra.mxu1 %v13561_v12 }
0x165c   : > { %10053 = vmatprep.subr.bf16.mxu1 %v13566_v19 }
0x165f   : > { %10054 = vmatpush1.bf16.msra.mxu1 %v13564_v58 }
0x1660   : > { %10055 = vmatprep.subr.bf16.mxu1 %v13569_v29 }
0x1663   : > { %10056 = vmatpush1.bf16.msra.mxu1 %v13567_v17 }
0x1664   : > { %10057 = vmatprep.subr.bf16.mxu1 %v13572_v43 }
0x1667   : > { %10058 = vmatpush1.bf16.msra.mxu1 %v13570_v60 }
0x1668   : > { %10068 = vmatprep.subr.bf16.mxu1 %v13575_v18 }
0x166a   : > { %10060 = vmatmul.mubr.bf16.vlgmr.msra.gmra.mrb[84].mxu1 %v15848_v4  ;;  %v13587_v4 = vld [vmem:[%s14427_s24 + $0x6d4] ss:$24 sps:$4 sm:$0xff]  }
0x166b   : > { %10069 = vmatpush1.bf16.msra.mxu1 %v13573_v8  ;;  %10100 = vmatprep.mubr.bf16.mxu1 %v15956_v57  ;;  %v13590_v57 = vld [vmem:[%s14427_s24 + $0x704] ss:$24 sps:$4 sm:$0xff]  }
0x166c   : > { %10070 = vmatprep.subr.bf16.mxu1 %v13578_v33 }
0x166f   : > { %10071 = vmatpush1.bf16.msra.mxu1 %v13576_v49 }
0x1670   : > { %10072 = vmatprep.subr.bf16.mxu1 %v13581_v30 }
0x1673   : > { %10073 = vmatpush1.bf16.msra.mxu1 %v13579_v41 }
0x1674   : > { %10074 = vmatprep.subr.bf16.mxu1 %v13584_v31 }
0x1677   : > { %10075 = vmatpush1.bf16.msra.mxu1 %v13582_v11 }
0x1678   : > { %10076 = vmatprep.subr.bf16.mxu1 %v13587_v4 }
0x167b   : > { %10077 = vmatpush1.bf16.msra.mxu1 %v13585_v42 }
0x167c   : > { %10078 = vmatprep.subr.bf16.mxu1 %v13590_v57 }
0x167f   : > { %10079 = vmatpush1.bf16.msra.mxu1 %v13588_v52 }
0x1680   : > { %10080 = vmatprep.subr.bf16.mxu1 %v13593_v7 }
0x1683   : > { %10081 = vmatpush1.bf16.msra.mxu1 %v13591_v54 }
0x1684   : > { %10082 = vmatprep.subr.bf16.mxu1 %v13596_v36 }
0x1687   : > { %10083 = vmatpush1.bf16.msra.mxu1 %v13594_v56 }
0x1688   : > { %10084 = vmatprep.subr.bf16.mxu1 %v13599_v38 }
0x168b   : > { %10085 = vmatpush1.bf16.msra.mxu1 %v13597_v39 }
0x168c   : > { %10086 = vmatprep.subr.bf16.mxu1 %v13602_v61 }
0x168f   : > { %10087 = vmatpush1.bf16.msra.mxu1 %v13600_v48 }
0x1690   : > { %10088 = vmatprep.subr.bf16.mxu1 %v13605_v0 }
0x1693   : > { %10089 = vmatpush1.bf16.msra.mxu1 %v13603_v1 }
0x1694   : > { %10090 = vmatprep.subr.bf16.mxu1 %v13608_v63 }
0x1697   : > { %10091 = vmatpush1.bf16.msra.mxu1 %v13606_v34 }
0x1698   : > { %10092 = vmatprep.subr.bf16.mxu1 %v13611_v2 }
0x169b   : > { %10093 = vmatpush1.bf16.msra.mxu1 %v13609_v26 }
0x169c   : > { %10094 = vmatprep.subr.bf16.mxu1 %v13614_v62 }
0x169f   : > { %10095 = vmatpush1.bf16.msra.mxu1 %v13612_v5 }
0x16a0   : > { %10096 = vmatprep.subr.bf16.mxu1 %v13617_v55 }
0x16a3   : > { %10097 = vmatpush1.bf16.msra.mxu1 %v13615_v59 }
0x16a4   : > { %10098 = vmatprep.subr.bf16.mxu1 %v13620_v37 }
0x16a7   : > { %10099 = vmatpush1.bf16.msra.mxu1 %v13618_v53 }
0x16aa   : > { %10101 = vmatmul.mubr.bf16.vlgmr.msra.gmra.mrb[84].mxu1 %v15959_v44 }
0x16bd   : > { %v9856_v45 = vpop.f32.mrb[80].mxu1  ;;  %v9979_v14 = vpop.f32.mrb[24].mxu0 }
0x16be   : > { %v11683_v16 = vadd.f32 %v9856_v45, %v8273_v40  ;;  %v11685_v20 = vadd.f32 %v9979_v14, %v8281_v51  ;;  %v9858_v22 = vpop.f32.mrb[81].mxu1  ;;  %v9981_v13 = vpop.f32.mrb[25].mxu0 }
0x16bf   : > { %v11684_v6 = vadd.f32 %v9858_v22, %v8277_v10  ;;  %v11686_v28 = vadd.f32 %v9981_v13, %v8285_v9  ;;  %v9860_v44 = vpop.f32.mrb[82].mxu1  ;;  %v9983_v50 = vpop.f32.mrb[26].mxu0 }
0x16c0   : > { %10109 = vst [vmem:[%s584_s4] sm:$0xff] %v11683_v16  ;;  %10111 = vst [vmem:[%s584_s4 + $0x10] sm:$0xff] %v11685_v20  ;;  %v9861_v21 = vpop.f32.mrb[83].mxu1  ;;  %v9984_v46 = vpop.f32.mrb[27].mxu0 }
0x16c1   : > { %10110 = vst [vmem:[%s584_s4 + $0x8] sm:$0xff] %v11684_v6  ;;  %10112 = vst [vmem:[%s584_s4 + $0x18] sm:$0xff] %v11686_v28 }
0x177d   : > { %v10102_v23 = vpop.f32.mrb[84].mxu1 }
0x177e   : > { %v11687_v35 = vadd.f32 %v10102_v23, %v8289_v47  ;;  %v10104_v24 = vpop.f32.mrb[85].mxu1 }
0x177f   : > { %v11688_v25 = vadd.f32 %v10104_v24, %v8293_v15  ;;  %v10106_v12 = vpop.f32.mrb[86].mxu1 }
0x1780   : > { %10113 = vst [vmem:[%s584_s4 + $0x20] sm:$0xff] %v11687_v35  ;;  %v10107_v32 = vpop.f32.mrb[87].mxu1 }
0x1781   : > { %10114 = vst [vmem:[%s584_s4 + $0x28] sm:$0xff] %v11688_v25 }
0x1782   : > { %13909 = shalt.err (!%p13906_p6)
}
0x1783   : > { %s13910_s23 = scalar_lea.hbm %s16077_s11, 768  ;;  %s13914_s24 = scalar_lea.hbm %s16129_s8, 1536 }
0x1784   : > { %p13911_p13 = scmp.ne.s32.totalorder %s16077_s11, %s13910_s23  ;;  %p13915_p10 = scmp.lt.u32.totalorder %s16077_s11, %s16129_s8 }
0x1785   : > { %p13916_p11 = scmp.lt.u32.totalorder %s13914_s24, %s13910_s23  ;;  %p13918_p9 = scmp.lt.u32.totalorder %s13910_s23, %s16077_s11 }
0x1786   : > { %p13912_p0 = pnand %p13911_p13, %p16180_p5 }
0x1787   : > { %p13917_p3 = por %p13916_p11, %p13915_p10 }
0x1788   : > { %p13913_p1 = pneg %p13912_p0 }
0x1789   : > { %p13919_p12 = por %p13918_p9, %p13917_p3 }
0x178b   : > { %p13920_p7 = pnand %p13919_p12, %p13913_p1 }
0x178d   : > { %13923 = shalt.err (!%p13920_p7)
}
0x178e   : > { %11819 = dma.vmem_to_hbm [thread:$0]  (%p16180_p5), %s16079_s21, 768, %s16077_s11, %s10116_s9  }
0x178f PF: > { %s16181_s14 = sld [smem:[#allocation23_spill]]  ;;  %s16182_s1 = sld [smem:[#allocation27_spill]] }
0x1790   : > { %p16184_p4 = scmp.ge.s32.totalorder %s13978_s30, 2 }
0x1795   : > { %s10142_s18 = sand.u32 1, %s16181_s14   ;;  %p16183_p2 = scmp.ne.s32.totalorder %s16182_s1, 0 }
0x1796   : > { %s10143_s29 = scalar_lea.sflag [#allocation4], %s10142_s18 }
0x1797   : > { %p11847_p8 = pnand %p16184_p4, %p16183_p2 }
0x1799   : > { %13961 = dma.done.wait (!%p11847_p8), %s10143_s29, 768  }
0x179a   : > { %13963 = vsyncadd (!%p11847_p8), %s10143_s29, 4294966528  ;;  %s16185_s30 = sld [smem:[#allocation25_spill]]  ;;  %s16186_s15 = sld [smem:[#allocation24_spill]] }
0x179b   : > { %s16187_s29 = sld [smem:[#allocation26_spill]]  ;;  %s16188_s27 = smov %s13970_s28 }
0x17a0   : > { %p33_p6 = scmp.ge.s32.totalorder %s16185_s30, 4   ;;  %s16189_s28 = smov %s16186_s15 }
0x17a2   :  { %35 = sbr.rel (!%p33_p6) target bundleno = 19 (0x13), region = 182 }
0x17a9   :  { %10148 = vsyncpa [#allocation3], 1 }
0x17aa   :  { %10150 = vsyncpa [#allocation3 + $0x1], 1 }
0x17ab   :  { %10151 = vsyncpa [#allocation6], 1 }
0x17ac   :  { %10153 = vsyncpa [#allocation6 + $0x1], 1 }
0x17ad   :  { %10154 = vsyncpa [#allocation9], 1 }
0x17ae   :  { %10156 = vsyncpa [#allocation9 + $0x1], 1 }
0x17af   :  { %10157 = vsyncpa [#allocation12], 1 }
0x17b0   :  { %10159 = vsyncpa [#allocation12 + $0x1], 1 }
0x17b1   :  { %10160 = vsyncpa [#allocation15], 1 }
0x17b2   :  { %10162 = vsyncpa [#allocation15 + $0x1], 1 }
0x17b3   :  { %10163 = vsyncpa [#allocation4], 1 }
0x17b4   :  { %10165 = vsyncpa [#allocation4 + $0x1], 1 }

</bundles_post_ra>
